<compile_context>
chip_gen: v7x
topology: tpu7x:2x2x1
jax: 0.10.0
libtpu: 0.0.40
codegen_flags: <defaults>
</compile_context>

<pallas_src>
import math

import jax
import jax.numpy as jnp
from jax import lax
from jax.experimental import pallas as pl
from jax.experimental.pallas import tpu as pltpu

_EPS = 1e-5

# Geometry fixed by the module: Linear(256*8*2, 128) => input spatial 64x16.
_H0, _W0 = 64, 16
_CONV_CFG = [(1, 16), (16, 64), (64, 256)]    # (Cin, Cout) per conv stage
_H_SIZES = [64, 32, 16]                       # Hin per stage
_W_SIZES = [16, 8, 4]                         # Win per stage


# ----------------------------------------------------------------------------
# In-kernel building block: conv3x3(pad=1) + BN + ReLU + maxpool2x2.
# Activation layout: (H, W*C) -- H on sublanes, (w, c) flattened on lanes.
# ----------------------------------------------------------------------------
def _conv_bn_relu_pool(a, apad_ref, wb_ref, sc_ref, sh_ref):
    hin, nin = a.shape
    nw = wb_ref.shape[2]          # Win * Cout
    half = nw // 2                # Wout * Cout
    hout = hin // 2

    # H zero-padding (one row above / below) into a small VMEM scratch.
    apad_ref[0:1, :] = jnp.zeros((1, nin), jnp.float32)
    apad_ref[hin + 1:hin + 2, :] = jnp.zeros((1, nin), jnp.float32)
    apad_ref[1:hin + 1, :] = a

    # 3x3 conv: W taps + channels folded into K = Win*Cin; one matmul per H tap.
    # Output lanes are ordered (pool-phase dx, pooled wp, cout) -> lane dense.
    y = jnp.dot(apad_ref[0:hin, :], wb_ref[0], preferred_element_type=jnp.float32)
    y = y + jnp.dot(apad_ref[1:hin + 1, :], wb_ref[1],
                    preferred_element_type=jnp.float32)
    y = y + jnp.dot(apad_ref[2:hin + 2, :], wb_ref[2],
                    preferred_element_type=jnp.float32)

    # conv bias + BatchNorm (folded) + ReLU   (scale/shift read once)
    y = jnp.maximum(y * sc_ref[...] + sh_ref[...], 0.0)

    # MaxPool over W: the two pool phases are the two lane halves.
    m = jnp.maximum(y[:, :half], y[:, half:])

    # MaxPool over H: even/odd row selection via 0/1 matmuls on the MXU
    # (cheaper/safer than a sublane-splitting reshape; MXU has slack here).
    ii = lax.broadcasted_iota(jnp.int32, (hout, hin), 0)
    jj = lax.broadcasted_iota(jnp.int32, (hout, hin), 1)
    s_even = (jj == 2 * ii).astype(jnp.float32)
    s_odd = (jj == 2 * ii + 1).astype(jnp.float32)
    return jnp.maximum(
        jnp.dot(s_even, m, preferred_element_type=jnp.float32),
        jnp.dot(s_odd, m, preferred_element_type=jnp.float32))


# ----------------------------------------------------------------------------
# Fused whole-network kernel (one grid step = one batch element).
# ----------------------------------------------------------------------------
def _fused_net_kernel(x_ref,
                      wb1_ref, sc1_ref, sh1_ref,
                      wb2_ref, sc2_ref, sh2_ref,
                      wb3_ref, sc3_ref, sh3_ref,
                      w1_ref, scl_ref, shl_ref, w2_ref, b2_ref,
                      o_ref,
                      apad1, apad2, apad3):
    a = _conv_bn_relu_pool(x_ref[0], apad1, wb1_ref, sc1_ref, sh1_ref)  # (32, 128)
    a = _conv_bn_relu_pool(a, apad2, wb2_ref, sc2_ref, sh2_ref)         # (16, 256)
    a = _conv_bn_relu_pool(a, apad3, wb3_ref, sc3_ref, sh3_ref)         # (8, 512)

    # Linear(4096,128): single lane-dense (8,512)@(512,1024) matmul; the true
    # contraction over all 4096 features is the sum of the 8 "diagonal" blocks
    # (row r, lanes r*128:(r+1)*128).
    m1 = jnp.dot(a, w1_ref[...], preferred_element_type=jnp.float32)    # (8, 1024)
    h = m1[0:1, 0:128]
    for r in range(1, 8):
        h = h + m1[r:r + 1, 128 * r:128 * (r + 1)]

    # Dropout(eval) = identity, BatchNorm1d folded into scale/shift, ReLU.
    h = jnp.maximum(h * scl_ref[...] + shl_ref[...], 0.0)

    # Linear(128, 38)
    o_ref[0] = (jnp.dot(h, w2_ref[...], preferred_element_type=jnp.float32)
                + b2_ref[...])


# ----------------------------------------------------------------------------
# One-time parameter preparation (host/XLA side, outside the hot path).
# ----------------------------------------------------------------------------
def _fold_bn(gamma, beta, mean, var, bias):
    s = gamma / jnp.sqrt(var + _EPS)
    return s, (bias - mean) * s + beta


def _build_conv_wb(wt, win):
    """wt: (Cout, Cin, 3, 3) (PyTorch OIHW) -> (3, Win*Cin, Win*Cout).

    Folds the W-direction 3-tap convolution (with zero padding) into a
    block-banded matrix, one per H tap ky.  Output columns are permuted to
    (pool-phase dx, pooled wp, cout) so the 2x2 W-pool is a max of lane halves.
    """
    cout, cin = wt.shape[0], wt.shape[1]
    wi = jnp.arange(win)
    # e[kw, w_in, w_out] = 1 iff w_in == w_out + kw - 1   (zero pad outside)
    e = (wi[None, :, None] ==
         wi[None, None, :] + jnp.arange(3)[:, None, None] - 1).astype(jnp.float32)
    # t[ky, w_in, cin, w_out, cout]
    t = jnp.einsum('kiw,ocyk->yicwo', e, wt)
    perm = jnp.concatenate([jnp.arange(0, win, 2), jnp.arange(1, win, 2)])
    t = t[:, :, :, perm, :]
    return t.reshape(3, win * cin, win * cout)


def prepare_params(conv_params, lin1, lin2):
    prep = []
    for p, win in zip(conv_params, _W_SIZES):
        wb = _build_conv_wb(p['w'], win)
        s, t = _fold_bn(p['gamma'], p['beta'], p['mean'], p['var'], p['b'])
        prep += [wb,
                 jnp.tile(s, (win,)).reshape(1, -1),
                 jnp.tile(t, (win,)).reshape(1, -1)]
    (w1, b1, bn1), (w2, b2) = lin1, lin2
    # Permute w1's 4096 input rows from torch (c, h, w) flatten order into the
    # kernel's (h, w, c) activation layout and pre-arrange as (512, 8*128).
    h3, w3, c3 = 8, 2, 256
    w1r = w1.reshape(128, c3, h3, w3)                 # (j, c, h, w)
    w1p = jnp.transpose(w1r, (2, 3, 1, 0))            # (h, w, c, j)
    w1p = w1p.reshape(h3, w3 * c3, 128)               # lane = w*256 + c
    w1w = jnp.transpose(w1p, (1, 0, 2)).reshape(w3 * c3, h3 * 128)
    s1, t1 = _fold_bn(bn1['gamma'], bn1['beta'], bn1['mean'], bn1['var'], b1)
    prep += [w1w, s1.reshape(1, -1), t1.reshape(1, -1), w2.T, b2.reshape(1, -1)]
    return tuple(prep)


# ----------------------------------------------------------------------------
# Pallas forward
# ----------------------------------------------------------------------------
def pallas_forward(x_nchw, prep):
    B = x_nchw.shape[0]
    x = x_nchw.reshape(B, _H0, _W0)                   # Cin = 1

    def const_spec(arr):
        nd = arr.ndim
        return pl.BlockSpec(arr.shape, lambda b, nd=nd: (0,) * nd)

    in_specs = [pl.BlockSpec((1, _H0, _W0), lambda b: (b, 0, 0))]
    in_specs += [const_spec(a) for a in prep]

    out = pl.pallas_call(
        _fused_net_kernel,
        out_shape=jax.ShapeDtypeStruct((B, 1, 38), jnp.float32),
        grid_spec=pltpu.PrefetchScalarGridSpec(
            num_scalar_prefetch=0,
            grid=(B,),
            in_specs=in_specs,
            out_specs=pl.BlockSpec((1, 1, 38), lambda b: (b, 0, 0)),
            scratch_shapes=[
                pltpu.VMEM((_H_SIZES[0] + 2, _W_SIZES[0] * _CONV_CFG[0][0]),
                           jnp.float32),
                pltpu.VMEM((_H_SIZES[1] + 2, _W_SIZES[1] * _CONV_CFG[1][0]),
                           jnp.float32),
                pltpu.VMEM((_H_SIZES[2] + 2, _W_SIZES[2] * _CONV_CFG[2][0]),
                           jnp.float32),
            ],
        ),
        compiler_params=pltpu.CompilerParams(
            dimension_semantics=("parallel",),
            # ~6 MiB of weights (x2 buffers) + scratch; 32 MiB is ample and
            # within scoped-VMEM on v5e/v6e/v7x.
            vmem_limit_bytes=32 * 1024 * 1024,
        ),
    )(x, *prep)
    return out.reshape(B, 38)


# ----------------------------------------------------------------------------
# Deterministic parameters matching the module's shapes / init style.
# ----------------------------------------------------------------------------
def _kaiming_normal(key, shape, fan_in, a):
    gain = math.sqrt(2.0 / (1.0 + a * a))
    return (gain / math.sqrt(fan_in)) * jax.random.normal(key, shape, jnp.float32)


def init_params(key):
    keys = jax.random.split(key, 5)
    conv_params = []
    for i, (cin, cout) in enumerate(_CONV_CFG):
        conv_params.append(dict(
            w=_kaiming_normal(keys[i], (cout, cin, 3, 3), fan_in=cin * 9, a=0.1),
            b=jnp.zeros((cout,), jnp.float32),
            gamma=jnp.ones((cout,), jnp.float32),
            beta=jnp.zeros((cout,), jnp.float32),
            mean=jnp.zeros((cout,), jnp.float32),
            var=jnp.ones((cout,), jnp.float32),
        ))
    w1 = _kaiming_normal(keys[3], (128, 4096), fan_in=4096, a=math.sqrt(5.0))
    b1 = jnp.zeros((128,), jnp.float32)
    bn1 = dict(gamma=jnp.ones((128,), jnp.float32), beta=jnp.zeros((128,), jnp.float32),
               mean=jnp.zeros((128,), jnp.float32), var=jnp.ones((128,), jnp.float32))
    w2 = _kaiming_normal(keys[4], (38, 128), fan_in=128, a=0.1)
    b2 = jnp.full((38,), 0.01, jnp.float32)
    return conv_params, (w1, b1, bn1), (w2, b2)


# ----------------------------------------------------------------------------
# Pure-JAX reference (NCHW, identical math) for validation.
# ----------------------------------------------------------------------------
def ref_forward(x_nchw, conv_params, lin1, lin2):
    x = x_nchw
    for p in conv_params:
        y = lax.conv_general_dilated(x, p['w'], (1, 1), ((1, 1), (1, 1)),
                                     dimension_numbers=('NCHW', 'OIHW', 'NCHW'))
        y = y + p['b'][None, :, None, None]
        y = ((y - p['mean'][None, :, None, None])
             / jnp.sqrt(p['var'][None, :, None, None] + _EPS)
             * p['gamma'][None, :, None, None] + p['beta'][None, :, None, None])
        y = jnp.maximum(y, 0.0)
        B, C, H, W = y.shape
        x = y.reshape(B, C, H // 2, 2, W // 2, 2).max(axis=(3, 5))
    B = x.shape[0]
    feat = x.reshape(B, -1)
    (w1, b1, bn1), (w2, b2) = lin1, lin2
    h = feat @ w1.T + b1
    h = (h - bn1['mean']) / jnp.sqrt(bn1['var'] + _EPS) * bn1['gamma'] + bn1['beta']
    h = jnp.maximum(h, 0.0)
    return h @ w2.T + b2


if __name__ == "__main__":
    key = jax.random.PRNGKey(0)
    kx, kp = jax.random.split(key)
    # Input: NCHW (B=2, C=1, H=64, W=16) -> after 3x pool/2: (2, 256, 8, 2) -> 4096 features
    x = jax.random.normal(kx, (2, 1, 64, 16), dtype=jnp.float32)
    conv_params, lin1, lin2 = init_params(kp)

    prep = prepare_params(conv_params, lin1, lin2)      # one-time weight repack
    fwd = jax.jit(pallas_forward)
    out = jax.block_until_ready(fwd(x, prep))
    assert out.shape == (2, 38)

    ref = ref_forward(x, conv_params, lin1, lin2)
    err = float(jnp.max(jnp.abs(out - ref)))
    assert err < 5e-2, f"max abs err {err}"
    print("KERNEL_OK")
</pallas_src>

<mosaic_0001>
module attributes {stable_mosaic.version = 11 : i64} {
  func.func @_fused_net_kernel(%arg0: i32, %arg1: memref<1x64x16xf32, #tpu.memory_space<vmem>>, %arg2: memref<3x16x256xf32, #tpu.memory_space<vmem>>, %arg3: memref<1x256xf32, #tpu.memory_space<vmem>>, %arg4: memref<1x256xf32, #tpu.memory_space<vmem>>, %arg5: memref<3x128x512xf32, #tpu.memory_space<vmem>>, %arg6: memref<1x512xf32, #tpu.memory_space<vmem>>, %arg7: memref<1x512xf32, #tpu.memory_space<vmem>>, %arg8: memref<3x256x1024xf32, #tpu.memory_space<vmem>>, %arg9: memref<1x1024xf32, #tpu.memory_space<vmem>>, %arg10: memref<1x1024xf32, #tpu.memory_space<vmem>>, %arg11: memref<512x1024xf32, #tpu.memory_space<vmem>>, %arg12: memref<1x128xf32, #tpu.memory_space<vmem>>, %arg13: memref<1x128xf32, #tpu.memory_space<vmem>>, %arg14: memref<128x38xf32, #tpu.memory_space<vmem>>, %arg15: memref<1x38xf32, #tpu.memory_space<vmem>>, %arg16: memref<1x1x38xf32, #tpu.memory_space<vmem>>, %arg17: memref<66x16xf32, #tpu.memory_space<vmem>>, %arg18: memref<34x128xf32, #tpu.memory_space<vmem>>, %arg19: memref<18x256xf32, #tpu.memory_space<vmem>>) attributes {dimension_semantics = [#tpu.dimension_semantics<parallel>], iteration_bounds = array<i64: 2>, scalar_prefetch = 0 : i64, scratch_operands = 3 : i64, tpu.core_type = #tpu.core_type<tc>, window_params = [{transform_indices = @transform_0, window_bounds = array<i64: 1, 64, 16>}, {pipeline_mode = #tpu.pipeline_mode<synchronous>, transform_indices = @transform_1, window_bounds = array<i64: 3, 16, 256>}, {pipeline_mode = #tpu.pipeline_mode<synchronous>, transform_indices = @transform_2, window_bounds = array<i64: 1, 256>}, {pipeline_mode = #tpu.pipeline_mode<synchronous>, transform_indices = @transform_3, window_bounds = array<i64: 1, 256>}, {pipeline_mode = #tpu.pipeline_mode<synchronous>, transform_indices = @transform_4, window_bounds = array<i64: 3, 128, 512>}, {pipeline_mode = #tpu.pipeline_mode<synchronous>, transform_indices = @transform_5, window_bounds = array<i64: 1, 512>}, {pipeline_mode = #tpu.pipeline_mode<synchronous>, transform_indices = @transform_6, window_bounds = array<i64: 1, 512>}, {pipeline_mode = #tpu.pipeline_mode<synchronous>, transform_indices = @transform_7, window_bounds = array<i64: 3, 256, 1024>}, {pipeline_mode = #tpu.pipeline_mode<synchronous>, transform_indices = @transform_8, window_bounds = array<i64: 1, 1024>}, {pipeline_mode = #tpu.pipeline_mode<synchronous>, transform_indices = @transform_9, window_bounds = array<i64: 1, 1024>}, {pipeline_mode = #tpu.pipeline_mode<synchronous>, transform_indices = @transform_10, window_bounds = array<i64: 512, 1024>}, {pipeline_mode = #tpu.pipeline_mode<synchronous>, transform_indices = @transform_11, window_bounds = array<i64: 1, 128>}, {pipeline_mode = #tpu.pipeline_mode<synchronous>, transform_indices = @transform_12, window_bounds = array<i64: 1, 128>}, {pipeline_mode = #tpu.pipeline_mode<synchronous>, transform_indices = @transform_13, window_bounds = array<i64: 128, 38>}, {pipeline_mode = #tpu.pipeline_mode<synchronous>, transform_indices = @transform_14, window_bounds = array<i64: 1, 38>}, {transform_indices = @transform_15, window_bounds = array<i64: 1, 1, 38>}]} {
    %c0 = arith.constant 0 : index
    %c0_0 = arith.constant 0 : index
    %c0_1 = arith.constant 0 : index
    %0 = vector.load %arg1[%c0, %c0_0, %c0_1] : memref<1x64x16xf32, #tpu.memory_space<vmem>>, vector<1x64x16xf32>
    %1 = vector.shape_cast %0 : vector<1x64x16xf32> to vector<64x16xf32>
    %cst = arith.constant 0.000000e+00 : f32
    %2 = vector.broadcast %cst : f32 to vector<1x16xf32>
    %c0_2 = arith.constant 0 : index
    %c0_3 = arith.constant 0 : index
    %3 = vector.load %arg17[%c0_2, %c0_3] : memref<66x16xf32, #tpu.memory_space<vmem>>, vector<1x16xf32>
    tpu.vector_store %arg17[%c0_2, %c0_3], %2 {strides = array<i32>} : memref<66x16xf32, #tpu.memory_space<vmem>>, vector<1x16xf32>,
    %cst_4 = arith.constant 0.000000e+00 : f32
    %4 = vector.broadcast %cst_4 : f32 to vector<1x16xf32>
    %c65 = arith.constant 65 : index
    %c0_5 = arith.constant 0 : index
    %5 = vector.load %arg17[%c65, %c0_5] : memref<66x16xf32, #tpu.memory_space<vmem>>, vector<1x16xf32>
    tpu.vector_store %arg17[%c65, %c0_5], %4 {strides = array<i32>} : memref<66x16xf32, #tpu.memory_space<vmem>>, vector<1x16xf32>,
    %c1 = arith.constant 1 : index
    %c0_6 = arith.constant 0 : index
    %6 = vector.load %arg17[%c1, %c0_6] : memref<66x16xf32, #tpu.memory_space<vmem>>, vector<64x16xf32>
    tpu.vector_store %arg17[%c1, %c0_6], %1 {strides = array<i32>} : memref<66x16xf32, #tpu.memory_space<vmem>>, vector<64x16xf32>,
    %c0_7 = arith.constant 0 : index
    %c0_8 = arith.constant 0 : index
    %7 = vector.load %arg17[%c0_7, %c0_8] : memref<66x16xf32, #tpu.memory_space<vmem>>, vector<64x16xf32>
    %c0_9 = arith.constant 0 : index
    %c0_10 = arith.constant 0 : index
    %c0_11 = arith.constant 0 : index
    %8 = vector.load %arg2[%c0_9, %c0_10, %c0_11] : memref<3x16x256xf32, #tpu.memory_space<vmem>>, vector<1x16x256xf32>
    %9 = vector.shape_cast %8 : vector<1x16x256xf32> to vector<16x256xf32>
    %cst_12 = arith.constant dense<0.000000e+00> : vector<64x256xf32>
    %10 = tpu.matmul %7, %9, %cst_12 {dimension_numbers = #tpu.dot_dimension_numbers<[1], [0], [0], [1], [0, 0, 1, 1], [], []>} : vector<64x16xf32>, vector<16x256xf32>, vector<64x256xf32> -> vector<64x256xf32>
    %c1_13 = arith.constant 1 : index
    %c0_14 = arith.constant 0 : index
    %11 = vector.load %arg17[%c1_13, %c0_14] : memref<66x16xf32, #tpu.memory_space<vmem>>, vector<64x16xf32>
    %c1_15 = arith.constant 1 : index
    %c0_16 = arith.constant 0 : index
    %c0_17 = arith.constant 0 : index
    %12 = vector.load %arg2[%c1_15, %c0_16, %c0_17] : memref<3x16x256xf32, #tpu.memory_space<vmem>>, vector<1x16x256xf32>
    %13 = vector.shape_cast %12 : vector<1x16x256xf32> to vector<16x256xf32>
    %cst_18 = arith.constant dense<0.000000e+00> : vector<64x256xf32>
    %14 = tpu.matmul %11, %13, %cst_18 {dimension_numbers = #tpu.dot_dimension_numbers<[1], [0], [0], [1], [0, 0, 1, 1], [], []>} : vector<64x16xf32>, vector<16x256xf32>, vector<64x256xf32> -> vector<64x256xf32>
    %15 = arith.addf %10, %14 : vector<64x256xf32>
    %c2 = arith.constant 2 : index
    %c0_19 = arith.constant 0 : index
    %16 = vector.load %arg17[%c2, %c0_19] : memref<66x16xf32, #tpu.memory_space<vmem>>, vector<64x16xf32>
    %c2_20 = arith.constant 2 : index
    %c0_21 = arith.constant 0 : index
    %c0_22 = arith.constant 0 : index
    %17 = vector.load %arg2[%c2_20, %c0_21, %c0_22] : memref<3x16x256xf32, #tpu.memory_space<vmem>>, vector<1x16x256xf32>
    %18 = vector.shape_cast %17 : vector<1x16x256xf32> to vector<16x256xf32>
    %cst_23 = arith.constant dense<0.000000e+00> : vector<64x256xf32>
    %19 = tpu.matmul %16, %18, %cst_23 {dimension_numbers = #tpu.dot_dimension_numbers<[1], [0], [0], [1], [0, 0, 1, 1], [], []>} : vector<64x16xf32>, vector<16x256xf32>, vector<64x256xf32> -> vector<64x256xf32>
    %20 = arith.addf %15, %19 : vector<64x256xf32>
    %c0_24 = arith.constant 0 : index
    %c0_25 = arith.constant 0 : index
    %21 = vector.load %arg3[%c0_24, %c0_25] : memref<1x256xf32, #tpu.memory_space<vmem>>, vector<1x256xf32>
    %22 = vector.broadcast %21 : vector<1x256xf32> to vector<64x256xf32>
    %23 = arith.mulf %20, %22 : vector<64x256xf32>
    %c0_26 = arith.constant 0 : index
    %c0_27 = arith.constant 0 : index
    %24 = vector.load %arg4[%c0_26, %c0_27] : memref<1x256xf32, #tpu.memory_space<vmem>>, vector<1x256xf32>
    %25 = vector.broadcast %24 : vector<1x256xf32> to vector<64x256xf32>
    %26 = arith.addf %23, %25 : vector<64x256xf32>
    %cst_28 = arith.constant 0.000000e+00 : f32
    %27 = vector.broadcast %cst_28 : f32 to vector<64x256xf32>
    %28 = arith.maximumf %26, %27 : vector<64x256xf32>
    %29 = vector.extract_strided_slice %28 {offsets = [0, 0], sizes = [64, 128], strides = [1, 1]} : vector<64x256xf32> to vector<64x128xf32>
    %30 = vector.extract_strided_slice %28 {offsets = [0, 128], sizes = [64, 128], strides = [1, 1]} : vector<64x256xf32> to vector<64x128xf32>
    %31 = arith.maximumf %29, %30 : vector<64x128xf32>
    %32 = tpu.iota {dimensions = array<i32: 0>} : vector<32x64xi32>
    %33 = tpu.iota {dimensions = array<i32: 1>} : vector<32x64xi32>
    %c2_i32 = arith.constant 2 : i32
    %34 = vector.broadcast %c2_i32 : i32 to vector<32x64xi32>
    %35 = arith.muli %34, %32 : vector<32x64xi32>
    %36 = arith.cmpi eq, %33, %35 : vector<32x64xi32>
    %37 = arith.extui %36 : vector<32x64xi1> to vector<32x64xi32>
    %38 = arith.sitofp %37 : vector<32x64xi32> to vector<32x64xf32>
    %c2_i32_29 = arith.constant 2 : i32
    %39 = vector.broadcast %c2_i32_29 : i32 to vector<32x64xi32>
    %40 = arith.muli %39, %32 : vector<32x64xi32>
    %c1_i32 = arith.constant 1 : i32
    %41 = vector.broadcast %c1_i32 : i32 to vector<32x64xi32>
    %42 = arith.addi %40, %41 : vector<32x64xi32>
    %43 = arith.cmpi eq, %33, %42 : vector<32x64xi32>
    %44 = arith.extui %43 : vector<32x64xi1> to vector<32x64xi32>
    %45 = arith.sitofp %44 : vector<32x64xi32> to vector<32x64xf32>
    %cst_30 = arith.constant dense<0.000000e+00> : vector<32x128xf32>
    %46 = tpu.matmul %38, %31, %cst_30 {dimension_numbers = #tpu.dot_dimension_numbers<[1], [0], [0], [1], [0, 0, 1, 1], [], []>} : vector<32x64xf32>, vector<64x128xf32>, vector<32x128xf32> -> vector<32x128xf32>
    %cst_31 = arith.constant dense<0.000000e+00> : vector<32x128xf32>
    %47 = tpu.matmul %45, %31, %cst_31 {dimension_numbers = #tpu.dot_dimension_numbers<[1], [0], [0], [1], [0, 0, 1, 1], [], []>} : vector<32x64xf32>, vector<64x128xf32>, vector<32x128xf32> -> vector<32x128xf32>
    %48 = arith.maximumf %46, %47 : vector<32x128xf32>
    %cst_32 = arith.constant 0.000000e+00 : f32
    %49 = vector.broadcast %cst_32 : f32 to vector<1x128xf32>
    %c0_33 = arith.constant 0 : index
    %c0_34 = arith.constant 0 : index
    %50 = vector.load %arg18[%c0_33, %c0_34] : memref<34x128xf32, #tpu.memory_space<vmem>>, vector<1x128xf32>
    tpu.vector_store %arg18[%c0_33, %c0_34], %49 {strides = array<i32>} : memref<34x128xf32, #tpu.memory_space<vmem>>, vector<1x128xf32>,
    %cst_35 = arith.constant 0.000000e+00 : f32
    %51 = vector.broadcast %cst_35 : f32 to vector<1x128xf32>
    %c33 = arith.constant 33 : index
    %c0_36 = arith.constant 0 : index
    %52 = vector.load %arg18[%c33, %c0_36] : memref<34x128xf32, #tpu.memory_space<vmem>>, vector<1x128xf32>
    tpu.vector_store %arg18[%c33, %c0_36], %51 {strides = array<i32>} : memref<34x128xf32, #tpu.memory_space<vmem>>, vector<1x128xf32>,
    %c1_37 = arith.constant 1 : index
    %c0_38 = arith.constant 0 : index
    %53 = vector.load %arg18[%c1_37, %c0_38] : memref<34x128xf32, #tpu.memory_space<vmem>>, vector<32x128xf32>
    tpu.vector_store %arg18[%c1_37, %c0_38], %48 {strides = array<i32>} : memref<34x128xf32, #tpu.memory_space<vmem>>, vector<32x128xf32>,
    %c0_39 = arith.constant 0 : index
    %c0_40 = arith.constant 0 : index
    %54 = vector.load %arg18[%c0_39, %c0_40] : memref<34x128xf32, #tpu.memory_space<vmem>>, vector<32x128xf32>
    %c0_41 = arith.constant 0 : index
    %c0_42 = arith.constant 0 : index
    %c0_43 = arith.constant 0 : index
    %55 = vector.load %arg5[%c0_41, %c0_42, %c0_43] : memref<3x128x512xf32, #tpu.memory_space<vmem>>, vector<1x128x512xf32>
    %56 = vector.shape_cast %55 : vector<1x128x512xf32> to vector<128x512xf32>
    %cst_44 = arith.constant dense<0.000000e+00> : vector<32x512xf32>
    %57 = tpu.matmul %54, %56, %cst_44 {dimension_numbers = #tpu.dot_dimension_numbers<[1], [0], [0], [1], [0, 0, 1, 1], [], []>} : vector<32x128xf32>, vector<128x512xf32>, vector<32x512xf32> -> vector<32x512xf32>
    %c1_45 = arith.constant 1 : index
    %c0_46 = arith.constant 0 : index
    %58 = vector.load %arg18[%c1_45, %c0_46] : memref<34x128xf32, #tpu.memory_space<vmem>>, vector<32x128xf32>
    %c1_47 = arith.constant 1 : index
    %c0_48 = arith.constant 0 : index
    %c0_49 = arith.constant 0 : index
    %59 = vector.load %arg5[%c1_47, %c0_48, %c0_49] : memref<3x128x512xf32, #tpu.memory_space<vmem>>, vector<1x128x512xf32>
    %60 = vector.shape_cast %59 : vector<1x128x512xf32> to vector<128x512xf32>
    %cst_50 = arith.constant dense<0.000000e+00> : vector<32x512xf32>
    %61 = tpu.matmul %58, %60, %cst_50 {dimension_numbers = #tpu.dot_dimension_numbers<[1], [0], [0], [1], [0, 0, 1, 1], [], []>} : vector<32x128xf32>, vector<128x512xf32>, vector<32x512xf32> -> vector<32x512xf32>
    %62 = arith.addf %57, %61 : vector<32x512xf32>
    %c2_51 = arith.constant 2 : index
    %c0_52 = arith.constant 0 : index
    %63 = vector.load %arg18[%c2_51, %c0_52] : memref<34x128xf32, #tpu.memory_space<vmem>>, vector<32x128xf32>
    %c2_53 = arith.constant 2 : index
    %c0_54 = arith.constant 0 : index
    %c0_55 = arith.constant 0 : index
    %64 = vector.load %arg5[%c2_53, %c0_54, %c0_55] : memref<3x128x512xf32, #tpu.memory_space<vmem>>, vector<1x128x512xf32>
    %65 = vector.shape_cast %64 : vector<1x128x512xf32> to vector<128x512xf32>
    %cst_56 = arith.constant dense<0.000000e+00> : vector<32x512xf32>
    %66 = tpu.matmul %63, %65, %cst_56 {dimension_numbers = #tpu.dot_dimension_numbers<[1], [0], [0], [1], [0, 0, 1, 1], [], []>} : vector<32x128xf32>, vector<128x512xf32>, vector<32x512xf32> -> vector<32x512xf32>
    %67 = arith.addf %62, %66 : vector<32x512xf32>
    %c0_57 = arith.constant 0 : index
    %c0_58 = arith.constant 0 : index
    %68 = vector.load %arg6[%c0_57, %c0_58] : memref<1x512xf32, #tpu.memory_space<vmem>>, vector<1x512xf32>
    %69 = vector.broadcast %68 : vector<1x512xf32> to vector<32x512xf32>
    %70 = arith.mulf %67, %69 : vector<32x512xf32>
    %c0_59 = arith.constant 0 : index
    %c0_60 = arith.constant 0 : index
    %71 = vector.load %arg7[%c0_59, %c0_60] : memref<1x512xf32, #tpu.memory_space<vmem>>, vector<1x512xf32>
    %72 = vector.broadcast %71 : vector<1x512xf32> to vector<32x512xf32>
    %73 = arith.addf %70, %72 : vector<32x512xf32>
    %cst_61 = arith.constant 0.000000e+00 : f32
    %74 = vector.broadcast %cst_61 : f32 to vector<32x512xf32>
    %75 = arith.maximumf %73, %74 : vector<32x512xf32>
    %76 = vector.extract_strided_slice %75 {offsets = [0, 0], sizes = [32, 256], strides = [1, 1]} : vector<32x512xf32> to vector<32x256xf32>
    %77 = vector.extract_strided_slice %75 {offsets = [0, 256], sizes = [32, 256], strides = [1, 1]} : vector<32x512xf32> to vector<32x256xf32>
    %78 = arith.maximumf %76, %77 : vector<32x256xf32>
    %79 = tpu.iota {dimensions = array<i32: 0>} : vector<16x32xi32>
    %80 = tpu.iota {dimensions = array<i32: 1>} : vector<16x32xi32>
    %c2_i32_62 = arith.constant 2 : i32
    %81 = vector.broadcast %c2_i32_62 : i32 to vector<16x32xi32>
    %82 = arith.muli %81, %79 : vector<16x32xi32>
    %83 = arith.cmpi eq, %80, %82 : vector<16x32xi32>
    %84 = arith.extui %83 : vector<16x32xi1> to vector<16x32xi32>
    %85 = arith.sitofp %84 : vector<16x32xi32> to vector<16x32xf32>
    %c2_i32_63 = arith.constant 2 : i32
    %86 = vector.broadcast %c2_i32_63 : i32 to vector<16x32xi32>
    %87 = arith.muli %86, %79 : vector<16x32xi32>
    %c1_i32_64 = arith.constant 1 : i32
    %88 = vector.broadcast %c1_i32_64 : i32 to vector<16x32xi32>
    %89 = arith.addi %87, %88 : vector<16x32xi32>
    %90 = arith.cmpi eq, %80, %89 : vector<16x32xi32>
    %91 = arith.extui %90 : vector<16x32xi1> to vector<16x32xi32>
    %92 = arith.sitofp %91 : vector<16x32xi32> to vector<16x32xf32>
    %cst_65 = arith.constant dense<0.000000e+00> : vector<16x256xf32>
    %93 = tpu.matmul %85, %78, %cst_65 {dimension_numbers = #tpu.dot_dimension_numbers<[1], [0], [0], [1], [0, 0, 1, 1], [], []>} : vector<16x32xf32>, vector<32x256xf32>, vector<16x256xf32> -> vector<16x256xf32>
    %cst_66 = arith.constant dense<0.000000e+00> : vector<16x256xf32>
    %94 = tpu.matmul %92, %78, %cst_66 {dimension_numbers = #tpu.dot_dimension_numbers<[1], [0], [0], [1], [0, 0, 1, 1], [], []>} : vector<16x32xf32>, vector<32x256xf32>, vector<16x256xf32> -> vector<16x256xf32>
    %95 = arith.maximumf %93, %94 : vector<16x256xf32>
    %cst_67 = arith.constant 0.000000e+00 : f32
    %96 = vector.broadcast %cst_67 : f32 to vector<1x256xf32>
    %c0_68 = arith.constant 0 : index
    %c0_69 = arith.constant 0 : index
    %97 = vector.load %arg19[%c0_68, %c0_69] : memref<18x256xf32, #tpu.memory_space<vmem>>, vector<1x256xf32>
    tpu.vector_store %arg19[%c0_68, %c0_69], %96 {strides = array<i32>} : memref<18x256xf32, #tpu.memory_space<vmem>>, vector<1x256xf32>,
    %cst_70 = arith.constant 0.000000e+00 : f32
    %98 = vector.broadcast %cst_70 : f32 to vector<1x256xf32>
    %c17 = arith.constant 17 : index
    %c0_71 = arith.constant 0 : index
    %99 = vector.load %arg19[%c17, %c0_71] : memref<18x256xf32, #tpu.memory_space<vmem>>, vector<1x256xf32>
    tpu.vector_store %arg19[%c17, %c0_71], %98 {strides = array<i32>} : memref<18x256xf32, #tpu.memory_space<vmem>>, vector<1x256xf32>,
    %c1_72 = arith.constant 1 : index
    %c0_73 = arith.constant 0 : index
    %100 = vector.load %arg19[%c1_72, %c0_73] : memref<18x256xf32, #tpu.memory_space<vmem>>, vector<16x256xf32>
    tpu.vector_store %arg19[%c1_72, %c0_73], %95 {strides = array<i32>} : memref<18x256xf32, #tpu.memory_space<vmem>>, vector<16x256xf32>,
    %c0_74 = arith.constant 0 : index
    %c0_75 = arith.constant 0 : index
    %101 = vector.load %arg19[%c0_74, %c0_75] : memref<18x256xf32, #tpu.memory_space<vmem>>, vector<16x256xf32>
    %c0_76 = arith.constant 0 : index
    %c0_77 = arith.constant 0 : index
    %c0_78 = arith.constant 0 : index
    %102 = vector.load %arg8[%c0_76, %c0_77, %c0_78] : memref<3x256x1024xf32, #tpu.memory_space<vmem>>, vector<1x256x1024xf32>
    %103 = vector.shape_cast %102 : vector<1x256x1024xf32> to vector<256x1024xf32>
    %cst_79 = arith.constant dense<0.000000e+00> : vector<16x1024xf32>
    %104 = tpu.matmul %101, %103, %cst_79 {dimension_numbers = #tpu.dot_dimension_numbers<[1], [0], [0], [1], [0, 0, 1, 1], [], []>} : vector<16x256xf32>, vector<256x1024xf32>, vector<16x1024xf32> -> vector<16x1024xf32>
    %c1_80 = arith.constant 1 : index
    %c0_81 = arith.constant 0 : index
    %105 = vector.load %arg19[%c1_80, %c0_81] : memref<18x256xf32, #tpu.memory_space<vmem>>, vector<16x256xf32>
    %c1_82 = arith.constant 1 : index
    %c0_83 = arith.constant 0 : index
    %c0_84 = arith.constant 0 : index
    %106 = vector.load %arg8[%c1_82, %c0_83, %c0_84] : memref<3x256x1024xf32, #tpu.memory_space<vmem>>, vector<1x256x1024xf32>
    %107 = vector.shape_cast %106 : vector<1x256x1024xf32> to vector<256x1024xf32>
    %cst_85 = arith.constant dense<0.000000e+00> : vector<16x1024xf32>
    %108 = tpu.matmul %105, %107, %cst_85 {dimension_numbers = #tpu.dot_dimension_numbers<[1], [0], [0], [1], [0, 0, 1, 1], [], []>} : vector<16x256xf32>, vector<256x1024xf32>, vector<16x1024xf32> -> vector<16x1024xf32>
    %109 = arith.addf %104, %108 : vector<16x1024xf32>
    %c2_86 = arith.constant 2 : index
    %c0_87 = arith.constant 0 : index
    %110 = vector.load %arg19[%c2_86, %c0_87] : memref<18x256xf32, #tpu.memory_space<vmem>>, vector<16x256xf32>
    %c2_88 = arith.constant 2 : index
    %c0_89 = arith.constant 0 : index
    %c0_90 = arith.constant 0 : index
    %111 = vector.load %arg8[%c2_88, %c0_89, %c0_90] : memref<3x256x1024xf32, #tpu.memory_space<vmem>>, vector<1x256x1024xf32>
    %112 = vector.shape_cast %111 : vector<1x256x1024xf32> to vector<256x1024xf32>
    %cst_91 = arith.constant dense<0.000000e+00> : vector<16x1024xf32>
    %113 = tpu.matmul %110, %112, %cst_91 {dimension_numbers = #tpu.dot_dimension_numbers<[1], [0], [0], [1], [0, 0, 1, 1], [], []>} : vector<16x256xf32>, vector<256x1024xf32>, vector<16x1024xf32> -> vector<16x1024xf32>
    %114 = arith.addf %109, %113 : vector<16x1024xf32>
    %c0_92 = arith.constant 0 : index
    %c0_93 = arith.constant 0 : index
    %115 = vector.load %arg9[%c0_92, %c0_93] : memref<1x1024xf32, #tpu.memory_space<vmem>>, vector<1x1024xf32>
    %116 = vector.broadcast %115 : vector<1x1024xf32> to vector<16x1024xf32>
    %117 = arith.mulf %114, %116 : vector<16x1024xf32>
    %c0_94 = arith.constant 0 : index
    %c0_95 = arith.constant 0 : index
    %118 = vector.load %arg10[%c0_94, %c0_95] : memref<1x1024xf32, #tpu.memory_space<vmem>>, vector<1x1024xf32>
    %119 = vector.broadcast %118 : vector<1x1024xf32> to vector<16x1024xf32>
    %120 = arith.addf %117, %119 : vector<16x1024xf32>
    %cst_96 = arith.constant 0.000000e+00 : f32
    %121 = vector.broadcast %cst_96 : f32 to vector<16x1024xf32>
    %122 = arith.maximumf %120, %121 : vector<16x1024xf32>
    %123 = vector.extract_strided_slice %122 {offsets = [0, 0], sizes = [16, 512], strides = [1, 1]} : vector<16x1024xf32> to vector<16x512xf32>
    %124 = vector.extract_strided_slice %122 {offsets = [0, 512], sizes = [16, 512], strides = [1, 1]} : vector<16x1024xf32> to vector<16x512xf32>
    %125 = arith.maximumf %123, %124 : vector<16x512xf32>
    %126 = tpu.iota {dimensions = array<i32: 0>} : vector<8x16xi32>
    %127 = tpu.iota {dimensions = array<i32: 1>} : vector<8x16xi32>
    %c2_i32_97 = arith.constant 2 : i32
    %128 = vector.broadcast %c2_i32_97 : i32 to vector<8x16xi32>
    %129 = arith.muli %128, %126 : vector<8x16xi32>
    %130 = arith.cmpi eq, %127, %129 : vector<8x16xi32>
    %131 = arith.extui %130 : vector<8x16xi1> to vector<8x16xi32>
    %132 = arith.sitofp %131 : vector<8x16xi32> to vector<8x16xf32>
    %c2_i32_98 = arith.constant 2 : i32
    %133 = vector.broadcast %c2_i32_98 : i32 to vector<8x16xi32>
    %134 = arith.muli %133, %126 : vector<8x16xi32>
    %c1_i32_99 = arith.constant 1 : i32
    %135 = vector.broadcast %c1_i32_99 : i32 to vector<8x16xi32>
    %136 = arith.addi %134, %135 : vector<8x16xi32>
    %137 = arith.cmpi eq, %127, %136 : vector<8x16xi32>
    %138 = arith.extui %137 : vector<8x16xi1> to vector<8x16xi32>
    %139 = arith.sitofp %138 : vector<8x16xi32> to vector<8x16xf32>
    %cst_100 = arith.constant dense<0.000000e+00> : vector<8x512xf32>
    %140 = tpu.matmul %132, %125, %cst_100 {dimension_numbers = #tpu.dot_dimension_numbers<[1], [0], [0], [1], [0, 0, 1, 1], [], []>} : vector<8x16xf32>, vector<16x512xf32>, vector<8x512xf32> -> vector<8x512xf32>
    %cst_101 = arith.constant dense<0.000000e+00> : vector<8x512xf32>
    %141 = tpu.matmul %139, %125, %cst_101 {dimension_numbers = #tpu.dot_dimension_numbers<[1], [0], [0], [1], [0, 0, 1, 1], [], []>} : vector<8x16xf32>, vector<16x512xf32>, vector<8x512xf32> -> vector<8x512xf32>
    %142 = arith.maximumf %140, %141 : vector<8x512xf32>
    %c0_102 = arith.constant 0 : index
    %c0_103 = arith.constant 0 : index
    %143 = vector.load %arg11[%c0_102, %c0_103] : memref<512x1024xf32, #tpu.memory_space<vmem>>, vector<512x1024xf32>
    %cst_104 = arith.constant dense<0.000000e+00> : vector<8x1024xf32>
    %144 = tpu.matmul %142, %143, %cst_104 {dimension_numbers = #tpu.dot_dimension_numbers<[1], [0], [0], [1], [0, 0, 1, 1], [], []>} : vector<8x512xf32>, vector<512x1024xf32>, vector<8x1024xf32> -> vector<8x1024xf32>
    %145 = vector.extract_strided_slice %144 {offsets = [0, 0], sizes = [1, 128], strides = [1, 1]} : vector<8x1024xf32> to vector<1x128xf32>
    %146 = vector.extract_strided_slice %144 {offsets = [1, 128], sizes = [1, 128], strides = [1, 1]} : vector<8x1024xf32> to vector<1x128xf32>
    %147 = arith.addf %145, %146 : vector<1x128xf32>
    %148 = vector.extract_strided_slice %144 {offsets = [2, 256], sizes = [1, 128], strides = [1, 1]} : vector<8x1024xf32> to vector<1x128xf32>
    %149 = arith.addf %147, %148 : vector<1x128xf32>
    %150 = vector.extract_strided_slice %144 {offsets = [3, 384], sizes = [1, 128], strides = [1, 1]} : vector<8x1024xf32> to vector<1x128xf32>
    %151 = arith.addf %149, %150 : vector<1x128xf32>
    %152 = vector.extract_strided_slice %144 {offsets = [4, 512], sizes = [1, 128], strides = [1, 1]} : vector<8x1024xf32> to vector<1x128xf32>
    %153 = arith.addf %151, %152 : vector<1x128xf32>
    %154 = vector.extract_strided_slice %144 {offsets = [5, 640], sizes = [1, 128], strides = [1, 1]} : vector<8x1024xf32> to vector<1x128xf32>
    %155 = arith.addf %153, %154 : vector<1x128xf32>
    %156 = vector.extract_strided_slice %144 {offsets = [6, 768], sizes = [1, 128], strides = [1, 1]} : vector<8x1024xf32> to vector<1x128xf32>
    %157 = arith.addf %155, %156 : vector<1x128xf32>
    %158 = vector.extract_strided_slice %144 {offsets = [7, 896], sizes = [1, 128], strides = [1, 1]} : vector<8x1024xf32> to vector<1x128xf32>
    %159 = arith.addf %157, %158 : vector<1x128xf32>
    %c0_105 = arith.constant 0 : index
    %c0_106 = arith.constant 0 : index
    %160 = vector.load %arg12[%c0_105, %c0_106] : memref<1x128xf32, #tpu.memory_space<vmem>>, vector<1x128xf32>
    %161 = arith.mulf %159, %160 : vector<1x128xf32>
    %c0_107 = arith.constant 0 : index
    %c0_108 = arith.constant 0 : index
    %162 = vector.load %arg13[%c0_107, %c0_108] : memref<1x128xf32, #tpu.memory_space<vmem>>, vector<1x128xf32>
    %163 = arith.addf %161, %162 : vector<1x128xf32>
    %cst_109 = arith.constant 0.000000e+00 : f32
    %164 = vector.broadcast %cst_109 : f32 to vector<1x128xf32>
    %165 = arith.maximumf %163, %164 : vector<1x128xf32>
    %c0_110 = arith.constant 0 : index
    %c0_111 = arith.constant 0 : index
    %166 = vector.load %arg14[%c0_110, %c0_111] : memref<128x38xf32, #tpu.memory_space<vmem>>, vector<128x38xf32>
    %cst_112 = arith.constant dense<0.000000e+00> : vector<1x38xf32>
    %167 = tpu.matmul %165, %166, %cst_112 {dimension_numbers = #tpu.dot_dimension_numbers<[1], [0], [0], [1], [0, 0, 1, 1], [], []>} : vector<1x128xf32>, vector<128x38xf32>, vector<1x38xf32> -> vector<1x38xf32>
    %c0_113 = arith.constant 0 : index
    %c0_114 = arith.constant 0 : index
    %168 = vector.load %arg15[%c0_113, %c0_114] : memref<1x38xf32, #tpu.memory_space<vmem>>, vector<1x38xf32>
    %169 = arith.addf %167, %168 : vector<1x38xf32>
    %c0_115 = arith.constant 0 : index
    %c0_116 = arith.constant 0 : index
    %c0_117 = arith.constant 0 : index
    %170 = vector.load %arg16[%c0_115, %c0_116, %c0_117] : memref<1x1x38xf32, #tpu.memory_space<vmem>>, vector<1x1x38xf32>
    %171 = vector.shape_cast %170 : vector<1x1x38xf32> to vector<1x38xf32>
    %172 = vector.shape_cast %169 : vector<1x38xf32> to vector<1x1x38xf32>
    tpu.vector_store %arg16[%c0_115, %c0_116, %c0_117], %172 {strides = array<i32>} : memref<1x1x38xf32, #tpu.memory_space<vmem>>, vector<1x1x38xf32>,
    return
  }
  func.func @transform_0(%arg0: i32) -> (i32, i32, i32) {
    %c0_i32 = arith.constant 0 : i32
    %c0_i32_0 = arith.constant 0 : i32
    %c0_i32_1 = arith.constant 0 : i32
    return %arg0, %c0_i32, %c0_i32_0 : i32, i32, i32
  }
  func.func @transform_1(%arg0: i32) -> (i32, i32, i32) {
    %c0_i32 = arith.constant 0 : i32
    %c0_i32_0 = arith.constant 0 : i32
    %c0_i32_1 = arith.constant 0 : i32
    %c0_i32_2 = arith.constant 0 : i32
    return %c0_i32, %c0_i32_0, %c0_i32_1 : i32, i32, i32
  }
  func.func @transform_2(%arg0: i32) -> (i32, i32) {
    %c0_i32 = arith.constant 0 : i32
    %c0_i32_0 = arith.constant 0 : i32
    %c0_i32_1 = arith.constant 0 : i32
    return %c0_i32, %c0_i32_0 : i32, i32
  }
  func.func @transform_3(%arg0: i32) -> (i32, i32) {
    %c0_i32 = arith.constant 0 : i32
    %c0_i32_0 = arith.constant 0 : i32
    %c0_i32_1 = arith.constant 0 : i32
    return %c0_i32, %c0_i32_0 : i32, i32
  }
  func.func @transform_4(%arg0: i32) -> (i32, i32, i32) {
    %c0_i32 = arith.constant 0 : i32
    %c0_i32_0 = arith.constant 0 : i32
    %c0_i32_1 = arith.constant 0 : i32
    %c0_i32_2 = arith.constant 0 : i32
    return %c0_i32, %c0_i32_0, %c0_i32_1 : i32, i32, i32
  }
  func.func @transform_5(%arg0: i32) -> (i32, i32) {
    %c0_i32 = arith.constant 0 : i32
    %c0_i32_0 = arith.constant 0 : i32
    %c0_i32_1 = arith.constant 0 : i32
    return %c0_i32, %c0_i32_0 : i32, i32
  }
  func.func @transform_6(%arg0: i32) -> (i32, i32) {
    %c0_i32 = arith.constant 0 : i32
    %c0_i32_0 = arith.constant 0 : i32
    %c0_i32_1 = arith.constant 0 : i32
    return %c0_i32, %c0_i32_0 : i32, i32
  }
  func.func @transform_7(%arg0: i32) -> (i32, i32, i32) {
    %c0_i32 = arith.constant 0 : i32
    %c0_i32_0 = arith.constant 0 : i32
    %c0_i32_1 = arith.constant 0 : i32
    %c0_i32_2 = arith.constant 0 : i32
    return %c0_i32, %c0_i32_0, %c0_i32_1 : i32, i32, i32
  }
  func.func @transform_8(%arg0: i32) -> (i32, i32) {
    %c0_i32 = arith.constant 0 : i32
    %c0_i32_0 = arith.constant 0 : i32
    %c0_i32_1 = arith.constant 0 : i32
    return %c0_i32, %c0_i32_0 : i32, i32
  }
  func.func @transform_9(%arg0: i32) -> (i32, i32) {
    %c0_i32 = arith.constant 0 : i32
    %c0_i32_0 = arith.constant 0 : i32
    %c0_i32_1 = arith.constant 0 : i32
    return %c0_i32, %c0_i32_0 : i32, i32
  }
  func.func @transform_10(%arg0: i32) -> (i32, i32) {
    %c0_i32 = arith.constant 0 : i32
    %c0_i32_0 = arith.constant 0 : i32
    %c0_i32_1 = arith.constant 0 : i32
    return %c0_i32, %c0_i32_0 : i32, i32
  }
  func.func @transform_11(%arg0: i32) -> (i32, i32) {
    %c0_i32 = arith.constant 0 : i32
    %c0_i32_0 = arith.constant 0 : i32
    %c0_i32_1 = arith.constant 0 : i32
    return %c0_i32, %c0_i32_0 : i32, i32
  }
  func.func @transform_12(%arg0: i32) -> (i32, i32) {
    %c0_i32 = arith.constant 0 : i32
    %c0_i32_0 = arith.constant 0 : i32
    %c0_i32_1 = arith.constant 0 : i32
    return %c0_i32, %c0_i32_0 : i32, i32
  }
  func.func @transform_13(%arg0: i32) -> (i32, i32) {
    %c0_i32 = arith.constant 0 : i32
    %c0_i32_0 = arith.constant 0 : i32
    %c0_i32_1 = arith.constant 0 : i32
    return %c0_i32, %c0_i32_0 : i32, i32
  }
  func.func @transform_14(%arg0: i32) -> (i32, i32) {
    %c0_i32 = arith.constant 0 : i32
    %c0_i32_0 = arith.constant 0 : i32
    %c0_i32_1 = arith.constant 0 : i32
    return %c0_i32, %c0_i32_0 : i32, i32
  }
  func.func @transform_15(%arg0: i32) -> (i32, i32, i32) {
    %c0_i32 = arith.constant 0 : i32
    %c0_i32_0 = arith.constant 0 : i32
    %c0_i32_1 = arith.constant 0 : i32
    return %arg0, %c0_i32, %c0_i32_0 : i32, i32, i32
  }
}

</mosaic_0001>

<bundles_post_ra>
// kernel: pallas_forward.1
= control target key start
LH: loop header
LB: loop body
LE: loop exit
PB: predicated region body
PF: predicated region fallthrough
CT: control target
= control target key end

     0   :  { %s9683_s0 = inlined_call_operand.vmem [shape: f32[2,64,16], index: 0, kind: input, shape index: {}]   ;;  %s9684_s1 = inlined_call_operand.hbm [shape: f32[3,16,256], index: 1, kind: input, shape index: {}]   ;;  %s9685_s2 = inlined_call_operand.hbm [shape: f32[1,256], index: 2, kind: input, shape index: {}]   ;;  %s9686_s3 = inlined_call_operand.hbm [shape: f32[1,256], index: 3, kind: input, shape index: {}]   ;;  %s9687_s4 = inlined_call_operand.hbm [shape: f32[3,128,512], index: 4, kind: input, shape index: {}]   ;;  %s9688_s5 = inlined_call_operand.hbm [shape: f32[1,512], index: 5, kind: input, shape index: {}]   ;;  %s9689_s6 = inlined_call_operand.hbm [shape: f32[1,512], index: 6, kind: input, shape index: {}]   ;;  %s9690_s7 = inlined_call_operand.hbm [shape: f32[3,256,1024], index: 7, kind: input, shape index: {}]   ;;  %s9691_s8 = inlined_call_operand.hbm [shape: f32[1,1024], index: 8, kind: input, shape index: {}]   ;;  %s9692_s9 = inlined_call_operand.hbm [shape: f32[1,1024], index: 9, kind: input, shape index: {}]   ;;  %s9693_s10 = inlined_call_operand.hbm [shape: f32[512,1024], index: 10, kind: input, shape index: {}]   ;;  %s9694_s11 = inlined_call_operand.hbm [shape: f32[1,128], index: 11, kind: input, shape index: {}]   ;;  %s9695_s12 = inlined_call_operand.hbm [shape: f32[1,128], index: 12, kind: input, shape index: {}]   ;;  %s9696_s13 = inlined_call_operand.vmem [shape: f32[128,38], index: 13, kind: input, shape index: {}]   ;;  %s9697_s14 = inlined_call_operand.hbm [shape: f32[1,38], index: 14, kind: input, shape index: {}]   ;;  %s9698_s15 = inlined_call_operand.hbm [shape: f32[2,1,38], index: 15, kind: output, shape index: {}]  }
   0x1   :  { %9714 = sst [smem:[#allocation43_spill]] %s9685_s2 }
   0x2   :  { %9715 = sst [smem:[#allocation44_spill]] %s9687_s4 }
   0x3   :  { %9716 = sst [smem:[#allocation45_spill]] %s9689_s6 }
   0x4   :  { %9717 = sst [smem:[#allocation46_spill]] %s9691_s8 }
   0x5   :  { %9718 = sst [smem:[#allocation47_spill]] %s9698_s15 }
   0x6   :  { %20 = vsyncpa [#allocation6], 0 }
   0x7   :  { %21 = vsyncpa [#allocation9], 0 }
   0x8   :  { %22 = vsyncpa [#allocation12], 0 }
   0x9   :  { %23 = vsyncpa [#allocation15], 0 }
   0xa   :  { %24 = vsyncpa [#allocation18], 0 }
   0xb   :  { %25 = vsyncpa [#allocation21], 0 }
   0xc   :  { %26 = vsyncpa [#allocation24], 0 }
   0xd   :  { %27 = vsyncpa [#allocation7], 0 }
   0xe   :  { %29 = vsyncpa [#allocation7 + $0x1], 0  ;;  %s8741_s18 = smov 0   ;;  %s8743_s19 = smov 0  }
   0xf   :  { %s8745_s20 = smov 0   ;;  %s8747_s21 = smov 0  }
  0x10 LB: > { %9719 = sst [smem:[#allocation35_spill]] %s8624_s18  ;;  %s8762_s22 = sadd.s32 4294967295, %s8636_s21   ;;  %s8636_s21 = sphi %s8747_s21, %s9761_s21   ;;  %s8632_s20 = sphi %s8745_s20, %s9764_s20   ;;  %s8628_s19 = sphi %s8743_s19, %s9763_s19   ;;  %s8624_s18 = sphi %s8741_s18, %s9762_s18  }
  0x11   : > { %9720 = sst [smem:[#allocation36_spill]] %s8628_s19  ;;  %s6117_s23 = sadd.s32 4294967294, %s8636_s21  }
  0x12   : > { %9721 = sst [smem:[#allocation37_spill]] %s8632_s20  ;;  %s8766_s24 = sadd.s32 1, %s8636_s21  }
  0x13   : > { %9722 = sst [smem:[#allocation38_spill]] %s8636_s21  ;;  %s362_s25 = sadd.s32 1, %s8632_s20 }
  0x14   : > { %9723 = sst [smem:[#allocation39_spill]] %s8766_s24  ;;  %s359_s26 = ssub.s32 %s8636_s21, %s8766_s24 }
  0x15   : > { %p372_p0 = scmp.ne.s32.totalorder %s8632_s20, %s8628_s19  ;;  %p360_p1 = scmp.eq.s32.totalorder %s359_s26, 0 }
  0x16   : > { %p373_p2 = scmp.eq.s32.totalorder %s8762_s22, 1  ;;  %p378_p3 = scmp.ne.s32.totalorder %s8628_s19, %s8624_s18 }
  0x17   : > { %p379_p4 = scmp.eq.s32.totalorder %s6117_s23, 1  ;;  %p6118_p7 = scmp.ge.s32.totalorder %s8636_s21, 1 }
  0x18   : > { %s8777_s27 = scalar_select %p360_p1, %s8632_s20, %s362_s25  }
  0x19   : > { %p8779_p5 = por %p373_p2, %p372_p0  ;;  %p8783_p6 = por %p379_p4, %p378_p3 }
  0x1a   : > { %9724 = sst [smem:[#allocation40_spill]] %s8777_s27  ;;  %p386_p8 = scmp.lt.s32.totalorder %s8636_s21, 3 }
  0x1b   : > { %s9725_s28 = scalar_select %p8779_p5, 1, 0 }
  0x1c   : > { %s9727_s29 = scalar_select %p8783_p6, 1, 0 }
  0x1d   : > { %9726 = sst [smem:[#allocation41_spill]] %s9725_s28  ;;  %p9706_p9 = scmp.eq.s32.totalorder %s8762_s22, 0 }
  0x1e   : > { %9728 = sst [smem:[#allocation42_spill]] %s9727_s29  ;;  %p8790_p10 = pnand %p6118_p7, %p386_p8 }
  0x1f   : > { %s8638_s16 = smov [#allocation8]   ;;  %s8639_s23 = smov [#allocation11]  }
  0x20   : > { %s9729_s30 = scalar_select %p8790_p10, 1, 0 }
  0x21   : > { %s412_s17 = sshll.u32 %s8638_s16, 4  ;;  %p8053_p11 = pneg %p8790_p10  ;;  %s413_s17 = int_to_ptr.vmem [resolvable:$true] %s412_s17 }
  0x22   : > { %s433_s25 = sshll.u32 %s8639_s23, 4  ;;  %s8640_s27 = smov [#allocation14]   ;;  %s8802_s25 = int_to_ptr.vmem [resolvable:$true] %s433_s25 }
  0x23   : > { %p8798_p12 = pnand %p9706_p9, %p8053_p11  ;;  %s8804_s20 = sshll.u32 %s8640_s27, 4  ;;  %s459_s20 = int_to_ptr.vmem [resolvable:$true] %s8804_s20 }
  0x24   : > { %s9731_s2 = sld [smem:[#allocation43_spill]] }
  0x25   : > { %p8814_p0 = pneg %p8798_p12 }
  0x2a   : > { %s8182_s16 = scalar_lea.hbm %s9731_s2, 32 }
  0x2b   : > { %p8183_p13 = scmp.ne.s32.totalorder %s9731_s2, %s8182_s16  ;;  %p8189_p3 = scmp.lt.u32.totalorder %s8182_s16, %s9731_s2 }
  0x2d   : > { %p8185_p1 = pnand %p8814_p0, %p8183_p13 }
  0x2f   : > { %p8186_p2 = pneg %p8185_p1 }
  0x31   : > { %p8191_p4 = pnand %p8189_p3, %p8186_p2 }
  0x33   : > { %8194 = shalt.err (!%p8191_p4)
}
  0x34   : > { %s8195_s24 = scalar_lea.vmem %s413_s17, 32  ;;  %p8203_p9 = scmp.lt.s32.totalorder %s413_s17, %s413_s17 }
  0x35   : > { %p8196_p7 = scmp.ne.s32.totalorder %s413_s17, %s8195_s24  ;;  %p8204_p6 = scmp.lt.s32.totalorder %s8195_s24, %s8195_s24 }
  0x37   : > { %p8198_p8 = pnand %p8196_p7, %p8814_p0  ;;  %p8205_p5 = por %p8204_p6, %p8203_p9 }
  0x39   : > { %p8199_p11 = pneg %p8198_p8 }
  0x3b   : > { %p8206_p10 = pnand %p8205_p5, %p8199_p11 }
  0x3d   : > { %8209 = shalt.err (!%p8206_p10)
}
  0x3e   : > { %8059 = dma.hbm_to_vmem [thread:$0]  (!%p8798_p12), %s9731_s2, 32, %s413_s17, [#allocation9]  }
  0x3f   : > { %s9733_s4 = sld [smem:[#allocation44_spill]] }
  0x45   : > { %s8210_s16 = scalar_lea.hbm %s9733_s4, 24576 }
  0x46   : > { %p8211_p13 = scmp.ne.s32.totalorder %s9733_s4, %s8210_s16  ;;  %p8217_p5 = scmp.lt.u32.totalorder %s8210_s16, %s9733_s4 }
  0x48   : > { %p8213_p1 = pnand %p8211_p13, %p8814_p0 }
  0x4a   : > { %p8214_p6 = pneg %p8213_p1 }
  0x4c   : > { %p8219_p9 = pnand %p8217_p5, %p8214_p6 }
  0x4e   : > { %8222 = shalt.err (!%p8219_p9)
}
  0x4f   : > { %s8223_s17 = scalar_lea.vmem %s8802_s25, 24576  ;;  %p8231_p4 = scmp.lt.s32.totalorder %s8802_s25, %s8802_s25 }
  0x50   : > { %p8224_p10 = scmp.ne.s32.totalorder %s8802_s25, %s8223_s17  ;;  %p8232_p7 = scmp.lt.s32.totalorder %s8223_s17, %s8223_s17 }
  0x52   : > { %p8226_p2 = pnand %p8224_p10, %p8814_p0  ;;  %p8233_p8 = por %p8232_p7, %p8231_p4 }
  0x54   : > { %p8227_p3 = pneg %p8226_p2 }
  0x56   : > { %p8234_p11 = pnand %p8233_p8, %p8227_p3 }
  0x58   : > { %8237 = shalt.err (!%p8234_p11)
}
  0x59   : > { %s8641_s28 = smov 512   ;;  %s8642_s19 = smov 32  }
  0x5a   : > { %8065 = dma.hbm_to_vmem [thread:$0]  (!%p8798_p12), %s9733_s4, 24576, %s8802_s25, [#allocation12], %s8641_s28, %s8641_s28, %s8642_s19  }
  0x5b   : > { %s9734_s6 = sld [smem:[#allocation45_spill]] }
  0x61   : > { %s8238_s16 = scalar_lea.hbm %s9734_s6, 64 }
  0x62   : > { %p8239_p13 = scmp.ne.s32.totalorder %s9734_s6, %s8238_s16  ;;  %p8245_p5 = scmp.lt.u32.totalorder %s8238_s16, %s9734_s6 }
  0x64   : > { %p8241_p1 = pnand %p8239_p13, %p8814_p0 }
  0x66   : > { %p8242_p6 = pneg %p8241_p1 }
  0x68   : > { %p8247_p9 = pnand %p8245_p5, %p8242_p6 }
  0x6a   : > { %8250 = shalt.err (!%p8247_p9)
}
  0x6b   : > { %s8251_s18 = scalar_lea.vmem %s459_s20, 64  ;;  %p8259_p4 = scmp.lt.s32.totalorder %s459_s20, %s459_s20 }
  0x6c   : > { %p8252_p10 = scmp.ne.s32.totalorder %s459_s20, %s8251_s18  ;;  %p8260_p7 = scmp.lt.s32.totalorder %s8251_s18, %s8251_s18 }
  0x6e   : > { %p8254_p2 = pnand %p8252_p10, %p8814_p0  ;;  %p8261_p8 = por %p8260_p7, %p8259_p4 }
  0x70   : > { %p8255_p3 = pneg %p8254_p2 }
  0x72   : > { %p8262_p11 = pnand %p8261_p8, %p8255_p3 }
  0x74   : > { %8265 = shalt.err (!%p8262_p11)
}
  0x75   : > { %8071 = dma.hbm_to_vmem [thread:$0]  (!%p8798_p12), %s9734_s6, 64, %s459_s20, [#allocation15]  }
  0x76   : > { %s8643_s2 = smov [#allocation17]   ;;  %s9735_s8 = sld [smem:[#allocation46_spill]] }
  0x77   : > { %s482_s19 = sshll.u32 %s8643_s2, 4  ;;  %s483_s19 = int_to_ptr.vmem [resolvable:$true] %s482_s19 }
  0x7c   : > { %s8266_s29 = scalar_lea.hbm %s9735_s8, 128 }
  0x7d   : > { %p8267_p13 = scmp.ne.s32.totalorder %s9735_s8, %s8266_s29  ;;  %p8273_p5 = scmp.lt.u32.totalorder %s8266_s29, %s9735_s8 }
  0x7f   : > { %p8269_p1 = pnand %p8267_p13, %p8814_p0 }
  0x81   : > { %p8270_p6 = pneg %p8269_p1 }
  0x83   : > { %p8275_p9 = pnand %p8273_p5, %p8270_p6 }
  0x85   : > { %8278 = shalt.err (!%p8275_p9)
}
  0x86   : > { %s8279_s20 = scalar_lea.vmem %s483_s19, 128  ;;  %p8287_p4 = scmp.lt.s32.totalorder %s483_s19, %s483_s19 }
  0x87   : > { %p8280_p10 = scmp.ne.s32.totalorder %s483_s19, %s8279_s20  ;;  %p8288_p7 = scmp.lt.s32.totalorder %s8279_s20, %s8279_s20 }
  0x89   : > { %p8282_p2 = pnand %p8280_p10, %p8814_p0  ;;  %p8289_p8 = por %p8288_p7, %p8287_p4 }
  0x8b   : > { %p8283_p3 = pneg %p8282_p2 }
  0x8d   : > { %p8290_p11 = pnand %p8289_p8, %p8283_p3 }
  0x8f   : > { %8293 = shalt.err (!%p8290_p11)
}
  0x90   : > { %8077 = dma.hbm_to_vmem [thread:$0]  (!%p8798_p12), %s9735_s8, 128, %s483_s19, [#allocation18]  }
  0x91   : > { %s8644_s28 = smov [#allocation20]   ;;  %s8645_s21 = smov [#allocation23]  }
  0x92   : > { %s503_s2 = sshll.u32 %s8644_s28, 4  ;;  %s528_s15 = sshll.u32 %s8645_s21, 4  ;;  %s504_s2 = int_to_ptr.vmem [resolvable:$true] %s503_s2  ;;  %s8890_s15 = int_to_ptr.vmem [resolvable:$true] %s528_s15 }
  0x93   : > { %s8294_s27 = scalar_lea.hbm %s9693_s10, 65536 }
  0x94   : > { %p8295_p13 = scmp.ne.s32.totalorder %s9693_s10, %s8294_s27  ;;  %p8301_p5 = scmp.lt.u32.totalorder %s8294_s27, %s9693_s10 }
  0x96   : > { %p8297_p1 = pnand %p8295_p13, %p8814_p0 }
  0x98   : > { %p8298_p6 = pneg %p8297_p1 }
  0x9a   : > { %p8303_p9 = pnand %p8301_p5, %p8298_p6 }
  0x9c   : > { %8306 = shalt.err (!%p8303_p9)
}
  0x9d   : > { %s8307_s18 = scalar_lea.vmem %s504_s2, 65536  ;;  %p8315_p4 = scmp.lt.s32.totalorder %s504_s2, %s504_s2 }
  0x9e   : > { %p8308_p10 = scmp.ne.s32.totalorder %s504_s2, %s8307_s18  ;;  %p8316_p7 = scmp.lt.s32.totalorder %s8307_s18, %s8307_s18 }
  0xa0   : > { %p8310_p2 = pnand %p8308_p10, %p8814_p0  ;;  %p8317_p8 = por %p8316_p7, %p8315_p4 }
  0xa2   : > { %p8311_p3 = pneg %p8310_p2 }
  0xa4   : > { %p8318_p11 = pnand %p8317_p8, %p8311_p3 }
  0xa6   : > { %8321 = shalt.err (!%p8318_p11)
}
  0xa7   : > { %s9712_s25 = smov 1024   ;;  %s9713_s28 = smov 64  }
  0xa8   : > { %8083 = dma.hbm_to_vmem [thread:$0]  (!%p8798_p12), %s9693_s10, 65536, %s504_s2, [#allocation21], %s9712_s25, %s9712_s25, %s9713_s28  }
  0xa9   : > { %s8322_s24 = scalar_lea.hbm %s9695_s12, 16 }
  0xaa   : > { %p8323_p13 = scmp.ne.s32.totalorder %s9695_s12, %s8322_s24  ;;  %p8329_p5 = scmp.lt.u32.totalorder %s8322_s24, %s9695_s12 }
  0xac   : > { %p8325_p1 = pnand %p8323_p13, %p8814_p0 }
  0xae   : > { %p8326_p6 = pneg %p8325_p1 }
  0xb0   : > { %p8331_p9 = pnand %p8329_p5, %p8326_p6 }
  0xb2   : > { %8334 = shalt.err (!%p8331_p9)
}
  0xb3   : > { %s8335_s2 = scalar_lea.vmem %s8890_s15, 16  ;;  %s8342_s21 = scalar_lea.vmem %s8890_s15, 32 }
  0xb4   : > { %p8336_p10 = scmp.ne.s32.totalorder %s8890_s15, %s8335_s2  ;;  %p8343_p4 = scmp.lt.s32.totalorder %s8890_s15, %s8890_s15 }
  0xb5   : > { %p8344_p7 = scmp.lt.s32.totalorder %s8342_s21, %s8335_s2 }
  0xb6   : > { %p8338_p2 = pnand %p8336_p10, %p8814_p0 }
  0xb7   : > { %p8345_p8 = por %p8344_p7, %p8343_p4 }
  0xb8   : > { %p8339_p3 = pneg %p8338_p2 }
  0xba   : > { %p8346_p11 = pnand %p8345_p8, %p8339_p3 }
  0xbc   : > { %8349 = shalt.err (!%p8346_p11)
}
  0xbd   : > { %8089 = dma.hbm_to_vmem [thread:$0]  (!%p8798_p12), %s9695_s12, 16, %s8890_s15, [#allocation24]  }
  0xbe   : > { %s8648_s27 = smov [#allocation5]   ;;  %s8350_s19 = scalar_lea.hbm %s9684_s1, 1536 }
  0xbf   : > { %s398_s24 = sshll.u32 %s8648_s27, 4  ;;  %p8351_p13 = scmp.ne.s32.totalorder %s9684_s1, %s8350_s19  ;;  %s399_s24 = int_to_ptr.vmem [resolvable:$true] %s398_s24 }
  0xc0   : > { %p8357_p5 = scmp.lt.u32.totalorder %s8350_s19, %s9684_s1 }
  0xc1   : > { %p8353_p1 = pnand %p8351_p13, %p8814_p0 }
  0xc3   : > { %p8354_p6 = pneg %p8353_p1 }
  0xc5   : > { %p8359_p9 = pnand %p8357_p5, %p8354_p6 }
  0xc7   : > { %8362 = shalt.err (!%p8359_p9)
}
  0xc8   : > { %s8363_s15 = scalar_lea.vmem %s399_s24, 1536  ;;  %p8371_p4 = scmp.lt.s32.totalorder %s399_s24, %s399_s24 }
  0xc9   : > { %p8364_p10 = scmp.ne.s32.totalorder %s399_s24, %s8363_s15  ;;  %p8372_p7 = scmp.lt.s32.totalorder %s8363_s15, %s8363_s15 }
  0xcb   : > { %p8366_p2 = pnand %p8364_p10, %p8814_p0  ;;  %p8373_p8 = por %p8372_p7, %p8371_p4 }
  0xcd   : > { %p8367_p3 = pneg %p8366_p2 }
  0xcf   : > { %p8374_p11 = pnand %p8373_p8, %p8367_p3 }
  0xd1   : > { %8377 = shalt.err (!%p8374_p11)
}
  0xd2   : > { %s8649_s29 = smov 256   ;;  %s8650_s16 = smov 16  }
  0xd3   : > { %8056 = dma.hbm_to_vmem [thread:$0]  (!%p8798_p12), %s9684_s1, 1536, %s399_s24, [#allocation6], %s8649_s29, %s8649_s29, %s8650_s16  }
  0xd4   : > { %s8651_s17 = smov [#allocation10]   ;;  %s8652_s19 = smov [#allocation13]  }
  0xd5   : > { %s423_s20 = sshll.u32 %s8651_s17, 4  ;;  %s447_s18 = sshll.u32 %s8652_s19, 4  ;;  %s424_s20 = int_to_ptr.vmem [resolvable:$true] %s423_s20  ;;  %s448_s18 = int_to_ptr.vmem [resolvable:$true] %s447_s18 }
  0xd6   : > { %s8378_s15 = scalar_lea.hbm %s9686_s3, 32 }
  0xd7   : > { %p8379_p13 = scmp.ne.s32.totalorder %s9686_s3, %s8378_s15  ;;  %p8385_p5 = scmp.lt.u32.totalorder %s8378_s15, %s9686_s3 }
  0xd9   : > { %p8381_p1 = pnand %p8379_p13, %p8814_p0 }
  0xdb   : > { %p8382_p6 = pneg %p8381_p1 }
  0xdd   : > { %p8387_p9 = pnand %p8385_p5, %p8382_p6 }
  0xdf   : > { %8390 = shalt.err (!%p8387_p9)
}
  0xe0   : > { %s8391_s24 = scalar_lea.vmem %s424_s20, 32  ;;  %p8399_p4 = scmp.lt.s32.totalorder %s424_s20, %s424_s20 }
  0xe1   : > { %p8392_p10 = scmp.ne.s32.totalorder %s424_s20, %s8391_s24  ;;  %p8400_p7 = scmp.lt.s32.totalorder %s8391_s24, %s8391_s24 }
  0xe3   : > { %p8394_p2 = pnand %p8392_p10, %p8814_p0  ;;  %p8401_p8 = por %p8400_p7, %p8399_p4 }
  0xe5   : > { %p8395_p3 = pneg %p8394_p2 }
  0xe7   : > { %p8402_p11 = pnand %p8401_p8, %p8395_p3 }
  0xe9   : > { %8405 = shalt.err (!%p8402_p11)
}
  0xea   : > { %8062 = dma.hbm_to_vmem [thread:$0]  (!%p8798_p12), %s9686_s3, 32, %s424_s20, [#allocation9]  }
  0xeb   : > { %s8406_s29 = scalar_lea.hbm %s9688_s5, 64 }
  0xec   : > { %p8407_p13 = scmp.ne.s32.totalorder %s9688_s5, %s8406_s29  ;;  %p8413_p5 = scmp.lt.u32.totalorder %s8406_s29, %s9688_s5 }
  0xee   : > { %p8409_p1 = pnand %p8407_p13, %p8814_p0 }
  0xf0   : > { %p8410_p6 = pneg %p8409_p1 }
  0xf2   : > { %p8415_p9 = pnand %p8413_p5, %p8410_p6 }
  0xf4   : > { %8418 = shalt.err (!%p8415_p9)
}
  0xf5   : > { %s8419_s19 = scalar_lea.vmem %s448_s18, 64  ;;  %p8427_p4 = scmp.lt.s32.totalorder %s448_s18, %s448_s18 }
  0xf6   : > { %p8420_p10 = scmp.ne.s32.totalorder %s448_s18, %s8419_s19  ;;  %p8428_p7 = scmp.lt.s32.totalorder %s8419_s19, %s8419_s19 }
  0xf8   : > { %p8422_p2 = pnand %p8420_p10, %p8814_p0  ;;  %p8429_p8 = por %p8428_p7, %p8427_p4 }
  0xfa   : > { %p8423_p3 = pneg %p8422_p2 }
  0xfc   : > { %p8430_p11 = pnand %p8429_p8, %p8423_p3 }
  0xfe   : > { %8433 = shalt.err (!%p8430_p11)
}
  0xff   : > { %8068 = dma.hbm_to_vmem [thread:$0]  (!%p8798_p12), %s9688_s5, 64, %s448_s18, [#allocation12]  }
 0x100   : > { %s8653_s21 = smov [#allocation16]   ;;  %s8654_s24 = smov [#allocation19]  }
 0x101   : > { %s468_s15 = sshll.u32 %s8653_s21, 4  ;;  %s493_s4 = sshll.u32 %s8654_s24, 4  ;;  %s469_s15 = int_to_ptr.vmem [resolvable:$true] %s468_s15  ;;  %s494_s4 = int_to_ptr.vmem [resolvable:$true] %s493_s4 }
 0x102   : > { %s8434_s8 = scalar_lea.hbm %s9690_s7, 98304 }
 0x103   : > { %p8435_p13 = scmp.ne.s32.totalorder %s9690_s7, %s8434_s8  ;;  %p8441_p5 = scmp.lt.u32.totalorder %s8434_s8, %s9690_s7 }
 0x105   : > { %p8437_p1 = pnand %p8435_p13, %p8814_p0 }
 0x107   : > { %p8438_p6 = pneg %p8437_p1 }
 0x109   : > { %p8443_p9 = pnand %p8441_p5, %p8438_p6 }
 0x10b   : > { %8446 = shalt.err (!%p8443_p9)
}
 0x10c   : > { %s8447_s18 = scalar_lea.vmem %s469_s15, 98304  ;;  %p8455_p4 = scmp.lt.s32.totalorder %s469_s15, %s469_s15 }
 0x10d   : > { %p8448_p10 = scmp.ne.s32.totalorder %s469_s15, %s8447_s18  ;;  %p8456_p7 = scmp.lt.s32.totalorder %s8447_s18, %s8447_s18 }
 0x10f   : > { %p8450_p2 = pnand %p8448_p10, %p8814_p0  ;;  %p8457_p8 = por %p8456_p7, %p8455_p4 }
 0x111   : > { %p8451_p3 = pneg %p8450_p2 }
 0x113   : > { %p8458_p11 = pnand %p8457_p8, %p8451_p3 }
 0x115   : > { %8461 = shalt.err (!%p8458_p11)
}
 0x116   : > { %s9736_s17 = smov 64   ;;  %s9737_s19 = smov 1024  }
 0x117   : > { %8074 = dma.hbm_to_vmem [thread:$0]  (!%p8798_p12), %s9690_s7, 98304, %s469_s15, [#allocation15], %s9737_s19, %s9737_s19, %s9736_s17  }
 0x118   : > { %s8462_s28 = scalar_lea.hbm %s9692_s9, 128 }
 0x119   : > { %p8463_p13 = scmp.ne.s32.totalorder %s9692_s9, %s8462_s28  ;;  %p8469_p5 = scmp.lt.u32.totalorder %s8462_s28, %s9692_s9 }
 0x11b   : > { %p8465_p1 = pnand %p8463_p13, %p8814_p0 }
 0x11d   : > { %p8466_p6 = pneg %p8465_p1 }
 0x11f   : > { %p8471_p9 = pnand %p8469_p5, %p8466_p6 }
 0x121   : > { %8474 = shalt.err (!%p8471_p9)
}
 0x122   : > { %s8475_s25 = scalar_lea.vmem %s494_s4, 128  ;;  %p8483_p4 = scmp.lt.s32.totalorder %s494_s4, %s494_s4 }
 0x123   : > { %p8476_p10 = scmp.ne.s32.totalorder %s494_s4, %s8475_s25  ;;  %p8484_p7 = scmp.lt.s32.totalorder %s8475_s25, %s8475_s25 }
 0x125   : > { %p8478_p2 = pnand %p8476_p10, %p8814_p0  ;;  %p8485_p8 = por %p8484_p7, %p8483_p4 }
 0x127   : > { %p8479_p3 = pneg %p8478_p2 }
 0x129   : > { %p8486_p11 = pnand %p8485_p8, %p8479_p3 }
 0x12b   : > { %8489 = shalt.err (!%p8486_p11)
}
 0x12c   : > { %8080 = dma.hbm_to_vmem [thread:$0]  (!%p8798_p12), %s9692_s9, 128, %s494_s4, [#allocation18]  }
 0x12d   : > { %s8655_s18 = smov [#allocation22]   ;;  %s8656_s19 = smov [#allocation25]  }
 0x12e   : > { %s517_s17 = sshll.u32 %s8655_s18, 4  ;;  %s542_s20 = sshll.u32 %s8656_s19, 4  ;;  %s518_s17 = int_to_ptr.vmem [resolvable:$true] %s517_s17  ;;  %s543_s20 = int_to_ptr.vmem [resolvable:$true] %s542_s20 }
 0x12f   : > { %s8490_s24 = scalar_lea.hbm %s9694_s11, 16 }
 0x130   : > { %p8491_p13 = scmp.ne.s32.totalorder %s9694_s11, %s8490_s24  ;;  %p8497_p5 = scmp.lt.u32.totalorder %s8490_s24, %s9694_s11 }
 0x132   : > { %p8493_p1 = pnand %p8491_p13, %p8814_p0 }
 0x134   : > { %p8494_p6 = pneg %p8493_p1 }
 0x136   : > { %p8499_p9 = pnand %p8497_p5, %p8494_p6 }
 0x138   : > { %8502 = shalt.err (!%p8499_p9)
}
 0x139   : > { %s8503_s4 = scalar_lea.vmem %s518_s17, 16  ;;  %s8510_s16 = scalar_lea.vmem %s518_s17, 32 }
 0x13a   : > { %p8504_p10 = scmp.ne.s32.totalorder %s518_s17, %s8503_s4  ;;  %p8511_p4 = scmp.lt.s32.totalorder %s518_s17, %s518_s17 }
 0x13b   : > { %p8512_p7 = scmp.lt.s32.totalorder %s8510_s16, %s8503_s4 }
 0x13c   : > { %p8506_p2 = pnand %p8504_p10, %p8814_p0 }
 0x13d   : > { %p8513_p8 = por %p8512_p7, %p8511_p4 }
 0x13e   : > { %p8507_p3 = pneg %p8506_p2 }
 0x140   : > { %p8514_p11 = pnand %p8513_p8, %p8507_p3 }
 0x142   : > { %8517 = shalt.err (!%p8514_p11)
}
 0x143   : > { %8086 = dma.hbm_to_vmem [thread:$0]  (!%p8798_p12), %s9694_s11, 16, %s518_s17, [#allocation21]  }
 0x144   : > { %s8518_s19 = scalar_lea.hbm %s9697_s14, 16 }
 0x145   : > { %p8519_p13 = scmp.ne.s32.totalorder %s9697_s14, %s8518_s19  ;;  %p8525_p5 = scmp.lt.u32.totalorder %s8518_s19, %s9697_s14 }
 0x147   : > { %p8521_p1 = pnand %p8519_p13, %p8814_p0 }
 0x149   : > { %p8522_p6 = pneg %p8521_p1 }
 0x14b   : > { %p8527_p9 = pnand %p8525_p5, %p8522_p6 }
 0x14d   : > { %8530 = shalt.err (!%p8527_p9)
}
 0x14e   : > { %s8531_s6 = scalar_lea.vmem %s543_s20, 16  ;;  %s8538_s17 = scalar_lea.vmem %s543_s20, 32 }
 0x14f   : > { %p8532_p10 = scmp.ne.s32.totalorder %s543_s20, %s8531_s6  ;;  %p8539_p4 = scmp.lt.s32.totalorder %s543_s20, %s543_s20 }
 0x150   : > { %p8540_p7 = scmp.lt.s32.totalorder %s8538_s17, %s8531_s6 }
 0x151   : > { %p8534_p2 = pnand %p8532_p10, %p8814_p0 }
 0x152   : > { %p8541_p8 = por %p8540_p7, %p8539_p4 }
 0x153   : > { %p8535_p3 = pneg %p8534_p2 }
 0x155   : > { %p8542_p11 = pnand %p8541_p8, %p8535_p3 }
 0x157   : > { %8545 = shalt.err (!%p8542_p11)
}
 0x158   : > { %8092 = dma.hbm_to_vmem [thread:$0]  (!%p8798_p12), %s9697_s14, 16, %s543_s20, [#allocation24]  }
 0x159   : > { %p9738_p13 = scmp.ne.s32.totalorder %s9729_s30, 0 }
 0x15a   : > { %p9739_p1 = scmp.eq.s32.totalorder (!%p9738_p13), %s8762_s22, 0 }
 0x15b   : > { %563 = sbr.rel (%p9738_p13) target bundleno = 3297 (0xce1), region = 80 }
 0x162   : > { %8591 = dma.done.wait (%p9739_p1), [#allocation6], 1536   ;;  %p9740_p0 = pmov %p9739_p1 }
 0x164   : > { %8593 = vsyncadd (%p9740_p0), [#allocation6], 4294965760  ;;  %p9741_p6 = pmov %p9740_p0 }
 0x165   : > { %p9742_p5 = pmov %p9740_p0 }
 0x166   : > { %8595 = dma.done.wait (%p9741_p6), [#allocation9], 64  }
 0x167   : > { %8597 = vsyncadd (%p9742_p5), [#allocation9], 4294967232  ;;  %p9743_p9 = pmov %p9740_p0 }
 0x168   : > { %p9744_p12 = pmov %p9740_p0 }
 0x169   : > { %8599 = dma.done.wait (%p9743_p9), [#allocation12], 24640  }
 0x16a   : > { %8601 = vsyncadd (%p9744_p12), [#allocation12], 4294942656  ;;  %p9745_p10 = pmov %p9740_p0 }
 0x16b   : > { %p9746_p2 = pmov %p9740_p0 }
 0x16c   : > { %8603 = dma.done.wait (%p9745_p10), [#allocation15], 98368  }
 0x16d   : > { %8605 = vsyncadd (%p9746_p2), [#allocation15], 4294868928  ;;  %p9747_p3 = pmov %p9740_p0 }
 0x16e   : > { %p9748_p4 = pmov %p9740_p0 }
 0x16f   : > { %8607 = dma.done.wait (%p9747_p3), [#allocation18], 256  }
 0x170   : > { %8609 = vsyncadd (%p9748_p4), [#allocation18], 4294967040  ;;  %p9749_p7 = pmov %p9740_p0 }
 0x171   : > { %p9750_p8 = pmov %p9740_p0 }
 0x172   : > { %8611 = dma.done.wait (%p9749_p7), [#allocation21], 65552  }
 0x173   : > { %8613 = vsyncadd (%p9750_p8), [#allocation21], 4294901744  ;;  %p9751_p11 = pmov %p9740_p0 }
 0x174   : > { %p9752_p13 = pmov %p9740_p0 }
 0x175   : > { %8615 = dma.done.wait (%p9751_p11), [#allocation24], 32  }
 0x176   : > { %8617 = vsyncadd (%p9752_p13), [#allocation24], 4294967264  ;;  %p658_p1 = scmp.lt.s32.totalorder %s8762_s22, 1  ;;  %vm671_vm0 = vcmask 122880   ;;  %v8657_v0 = vmov 0.0   ;;  %vm674_vm1 = vcmask 130048   ;;  %v1150_v51 = vlaneseq }
 0x177   : > { %796 = vmatprep.mubr.f32.mxu0 %v8657_v0  ;;  %1466 = vst [vmem:[#allocation3] sm:$0x1] %v8657_v0  ;;  %1467 = vst [vmem:[#allocation3 + $0x21] sm:$0x1] %v8657_v0  ;;  %820 = vmatprep.mubr.f32.mxu1 %v8657_v0  ;;  %v705_v1 = vld [vmem:[#allocation5 + $0x28] sm:$0xff]  ;;  %v707_v2 = vld [vmem:[#allocation5 + $0x38] sm:$0xff] }
 0x178   : > { %672 = vst.msk [vmem:[#allocation2] sm:$0x1] %vm671_vm0, %v8657_v0  ;;  %673 = vst.msk [vmem:[#allocation2 + $0x41] sm:$0x1] %vm671_vm0, %v8657_v0  ;;  %s659_s30 = scalar_select %p658_p1, %s8762_s22, 1  ;;  %v704_v3 = vld [vmem:[#allocation5 + $0x20] sm:$0xff]  ;;  %v6321_v4 = vpack.c.bf16 %v707_v2, %v705_v1 }
 0x179   : > { %v706_v5 = vld [vmem:[#allocation5 + $0x30] sm:$0xff]  ;;  %v692_v11 = vld [vmem:[#allocation5 + $0x8] sm:$0xff]  ;;  %v694_v12 = vld [vmem:[#allocation5 + $0x18] sm:$0xff]  ;;  %v9173_v52 = vshrl.u32 %v1150_v51, 7  ;;  %v9176_v53 = vand.u32 127, %v1150_v51  ;;  %vm1267_vm3 = vcmask 523264  }
 0x17a   : > { %s6200_s26 = sshll.u32 %s659_s30, 6  ;;  %v6323_v8 = vpack.c.bf16 %v706_v5, %v704_v3  ;;  %6322 = vmatprep.subr.bf16.mxu0 %v6321_v4  ;;  %v691_v13 = vld [vmem:[#allocation5] sm:$0xff]  ;;  %7893 = vmatprep.subr.bf16.mxu1 %v6321_v4  ;;  %v6325_v14 = vpack.c.bf16 %v694_v12, %v692_v11  ;;  %v693_v15 = vld [vmem:[#allocation5 + $0x10] sm:$0xff]  ;;  %v992_v18 = vld [vmem:[#allocation5 + $0x48] sm:$0xff]  ;;  %vm2328_vm11 = vcmask 261120   ;;  %vm2497_vm12 = vcmp.lt.s32.totalorder %v1150_v51, 256 }
 0x17b   : > { %s9107_s4 = scalar_lea.vmem %s9683_s0, %s6200_s26  ;;  %v994_v19 = vld [vmem:[#allocation5 + $0x58] sm:$0xff]  ;;  %v6327_v22 = vpack.c.bf16 %v693_v15, %v691_v13  ;;  %v991_v31 = vld [vmem:[#allocation5 + $0x40] sm:$0xff]  ;;  %v993_v32 = vld [vmem:[#allocation5 + $0x50] sm:$0xff]  ;;  %v1235_v54 = vmul.u32 2, %v9173_v52  ;;  %v9200_v2 = vsub.s32 0, %v9173_v52  ;;  %v9203_v4 = vsub.s32 1, %v9173_v52 }
 0x17c   : > { %v663_v6 = vld [vmem:[%s9107_s4] sm:$0xff]  ;;  %v664_v7 = vld [vmem:[%s9107_s4 + $0x8] sm:$0xff]  ;;  %v665_v9 = vld [vmem:[%s9107_s4 + $0x10] sm:$0xff]  ;;  %6324 = vmatpush1.bf16.msra.mxu0 %v6323_v8  ;;  %7894 = vmatpush1.bf16.msra.mxu1 %v6323_v8  ;;  %v6329_v23 = vpack.c.bf16 %v994_v19, %v992_v18  ;;  %v6331_v34 = vpack.c.bf16 %v993_v32, %v991_v31  ;;  %2499 = vst.msk [vmem:[#allocation4] ss:$8 sm:$0x3] %vm2497_vm12, %v8657_v0 }
 0x17d   : > { %675 = vst.msk [vmem:[#allocation2 + $0x1] sm:$0xff] %vm674_vm1, %v663_v6  ;;  %676 = vst.msk [vmem:[#allocation2 + $0x9] sm:$0xff] %vm674_vm1, %v664_v7  ;;  %v666_v10 = vld [vmem:[%s9107_s4 + $0x18] sm:$0xff]  ;;  %v667_v16 = vld [vmem:[%s9107_s4 + $0x20] sm:$0xff]  ;;  %6326 = vmatprep.subr.bf16.mxu0 %v6325_v14  ;;  %vm1239_vm2 = vcmp.eq.s32.totalorder %v9176_v53, %v1235_v54  ;;  %v9185_v56 = vadd.s32 1, %v1235_v54  ;;  %vm2508_vm13 = vcmask 1040384  }
 0x17e   : > { %677 = vst.msk [vmem:[#allocation2 + $0x11] sm:$0xff] %vm674_vm1, %v665_v9  ;;  %678 = vst.msk [vmem:[#allocation2 + $0x19] sm:$0xff] %vm674_vm1, %v666_v10  ;;  %v668_v17 = vld [vmem:[%s9107_s4 + $0x28] sm:$0xff]  ;;  %v669_v20 = vld [vmem:[%s9107_s4 + $0x30] sm:$0xff]  ;;  %v9181_v55 = vsel %vm1239_vm2, 1.0, %v8657_v0  ;;  %vm3054_vm14 = vcmask 1046528  }
 0x17f   : > { %679 = vst.msk [vmem:[#allocation2 + $0x21] sm:$0xff] %vm674_vm1, %v667_v16  ;;  %680 = vst.msk [vmem:[#allocation2 + $0x29] sm:$0xff] %vm674_vm1, %v668_v17  ;;  %v670_v21 = vld [vmem:[%s9107_s4 + $0x38] sm:$0xff]  ;;  %vm1255_vm4 = vcmp.eq.s32.totalorder %v9176_v53, %v9185_v56  ;;  %v1148_v3 = vld [vmem:[#allocation8] sm:$0x3]  ;;  %vm3950_vm15 = vcmask 1045504  }
 0x180   : > { %681 = vst.msk [vmem:[#allocation2 + $0x31] sm:$0xff] %vm674_vm1, %v669_v20  ;;  %682 = vst.msk [vmem:[#allocation2 + $0x39] sm:$0xff] %vm674_vm1, %v670_v21  ;;  %v1176_v5 = vld [vmem:[#allocation10] sm:$0x3]  ;;  %v9206_v6 = vrot.slane %v1148_v3, %v9200_v2  ;;  %v9209_v7 = vrot.slane %v1148_v3, %v9203_v4  ;;  %v1545_v56 = vld [vmem:[#allocation11 + $0x200] sm:$0xff]  ;;  %s9753_s29 = sld [smem:[#allocation36_spill]] }
 0x181   : > { %v9212_v8 = vrot.slane %v1176_v5, %v9200_v2  ;;  %v9215_v10 = vrot.slane %v1176_v5, %v9203_v4  ;;  %2502 = vst.msk [vmem:[#allocation4 + $0x21] ss:$8 sm:$0x3] %vm2497_vm12, %v8657_v0  ;;  %vm8659_vm0 = vmmov 0   ;;  %s9754_s30 = sld [smem:[#allocation41_spill]]  ;;  %s6197_s23 = sshll.u32 %s8762_s22, 4 }
 0x182   : > { %s9755_s15 = sld [smem:[#allocation47_spill]]  ;;  %s8660_s22 = smov [#allocation26]  }
 0x183   : > { %s8550_s2 = sshll.u32 %s8660_s22, 4  ;;  %s8551_s2 = int_to_ptr.vmem [resolvable:$false] %s8550_s2 }
 0x184   : > { %v695_v24 = vld [vmem:[#allocation2 + $0x1] sm:$0xff]  ;;  %v696_v25 = vld [vmem:[#allocation2 + $0x9] sm:$0xff]  ;;  %s8552_s21 = scalar_lea.vmem %s8551_s2, 32 }
 0x185   : > { %6149 = vmatmul.mubr.msk.f32.vlgmr.msra.gmra.mrb[0].mxu0 %vm674_vm1, %v695_v24  ;;  %v697_v27 = vld [vmem:[#allocation2 + $0x11] sm:$0xff]  ;;  %v698_v29 = vld [vmem:[#allocation2 + $0x19] sm:$0xff]  ;;  %v684_v36 = vld [vmem:[#allocation2 + $0x8] sm:$0xff] }
 0x186   : > { %802 = vmatprep.mubr.f32.mxu0 %v8657_v0  ;;  %6328 = vmatpush1.bf16.msra.mxu0 %v6327_v22  ;;  %v699_v26 = vld [vmem:[#allocation2 + $0x21] sm:$0xff]  ;;  %v700_v28 = vld [vmem:[#allocation2 + $0x29] sm:$0xff]  ;;  %v686_v38 = vld [vmem:[#allocation2 + $0x18] sm:$0xff]  ;;  %s656_s26 = sand.u32 1, %s9753_s29  }
 0x187   : > { %6330 = vmatprep.subr.bf16.mxu0 %v6329_v23  ;;  %6153 = vmatmul.mubr.msk.f32.vlgmr.msra.gmra.mrb[0].mxu1 %vm674_vm1, %v699_v26  ;;  %v701_v30 = vld [vmem:[#allocation2 + $0x31] sm:$0xff]  ;;  %v683_v33 = vld [vmem:[#allocation2] sm:$0xff]  ;;  %v688_v40 = vld [vmem:[#allocation2 + $0x28] sm:$0xff]  ;;  %s657_s20 = scalar_lea.vmem [#allocation26], %s656_s26  ;;  %s5924_s18 = scalar_lea.sflag [#allocation7], %s656_s26 }
 0x188   : > { %826 = vmatprep.mubr.f32.mxu1 %v8657_v0  ;;  %v702_v35 = vld [vmem:[#allocation2 + $0x39] sm:$0xff]  ;;  %v685_v37 = vld [vmem:[#allocation2 + $0x10] sm:$0xff]  ;;  %v982_v43 = vld [vmem:[#allocation2 + $0x2] sm:$0xff]  ;;  %s5936_s4 = sshll.u32 %s657_s20, 4  ;;  %s9641_s27 = scalar_lea.hbm %s9755_s15, %s6197_s23  ;;  %s9643_s4 = int_to_ptr.vmem [resolvable:$true] %s5936_s4 }
 0x189   : > { %6150 = vmatmul.mubr.msk.f32.gmra.mrb[2].mxu0 %vm674_vm1, %v696_v25  ;;  %v687_v39 = vld [vmem:[#allocation2 + $0x20] sm:$0xff]  ;;  %v689_v41 = vld [vmem:[#allocation2 + $0x30] sm:$0xff]  ;;  %v690_v42 = vld [vmem:[#allocation2 + $0x38] sm:$0xff]  ;;  %s8546_s19 = scalar_lea.vmem %s9643_s4, 16  ;;  %p9756_p6 = scmp.ne.s32.totalorder %s9754_s30, 0 }
 0x18a   : > { %808 = vmatprep.mubr.f32.mxu0 %v8657_v0  ;;  %v983_v44 = vld [vmem:[#allocation2 + $0xa] sm:$0xff]  ;;  %v984_v45 = vld [vmem:[#allocation2 + $0x12] sm:$0xff]  ;;  %v985_v46 = vld [vmem:[#allocation2 + $0x1a] sm:$0xff]  ;;  %p8547_p0 = scmp.ne.s32.totalorder %s9643_s4, %s8546_s19  ;;  %p8553_p12 = scmp.lt.s32.totalorder %s9643_s4, %s8551_s2 }
 0x18b   : > { %6154 = vmatmul.mubr.msk.f32.gmra.mrb[2].mxu1 %vm674_vm1, %v700_v28  ;;  %v986_v47 = vld [vmem:[#allocation2 + $0x22] sm:$0xff]  ;;  %v987_v48 = vld [vmem:[#allocation2 + $0x2a] sm:$0xff]  ;;  %v988_v49 = vld [vmem:[#allocation2 + $0x32] sm:$0xff]  ;;  %p8554_p10 = scmp.lt.s32.totalorder %s8552_s21, %s8546_s19 }
 0x18c   : > { %832 = vmatprep.mubr.f32.mxu1 %v8657_v0  ;;  %v989_v50 = vld [vmem:[#allocation2 + $0x3a] sm:$0xff]  ;;  %p8548_p5 = pnand %p8547_p0, %p9756_p6 }
 0x18d   : > { %6151 = vmatmul.mubr.msk.f32.gmra.mrb[4].mxu0 %vm674_vm1, %v697_v27  ;;  %p8555_p2 = por %p8554_p10, %p8553_p12 }
 0x18e   : > { %814 = vmatprep.mubr.f32.mxu0 %v8657_v0  ;;  %p8549_p9 = pneg %p8548_p5 }
 0x18f   : > { %6155 = vmatmul.mubr.msk.f32.gmra.mrb[4].mxu1 %vm674_vm1, %v701_v30 }
 0x190   : > { %838 = vmatprep.mubr.f32.mxu1 %v8657_v0  ;;  %p8556_p3 = pnand %p8555_p2, %p8549_p9 }
 0x191   : > { %6152 = vmatmul.mubr.msk.f32.gmra.mrb[6].mxu0 %vm674_vm1, %v698_v29 }
 0x192   : > { %933 = vmatprep.mubr.f32.mxu0 %v8657_v0 }
 0x193   : > { %6156 = vmatmul.mubr.msk.f32.gmra.mrb[6].mxu1 %vm674_vm1, %v702_v35 }
 0x194   : > { %6258 = vmatprep.mubr.msk.f32.mxu1 %vm1267_vm3, %v9181_v55 }
 0x195   : > { %6157 = vmatmul.mubr.msk.f32.vlgmr.msra.gmra.mrb[0].mxu0 %vm674_vm1, %v683_v33 }
 0x196   : > { %939 = vmatprep.mubr.f32.mxu0 %v8657_v0  ;;  %6332 = vmatpush1.bf16.msra.mxu0 %v6331_v34 }
 0x199   : > { %6158 = vmatmul.mubr.msk.f32.gmra.mrb[2].mxu0 %vm674_vm1, %v684_v36 }
 0x19a   : > { %945 = vmatprep.mubr.f32.mxu0 %v8657_v0 }
 0x19d   : > { %6159 = vmatmul.mubr.msk.f32.gmra.mrb[4].mxu0 %vm674_vm1, %v685_v37 }
 0x19e   : > { %951 = vmatprep.mubr.f32.mxu0 %v8657_v0 }
 0x1a1   : > { %6160 = vmatmul.mubr.msk.f32.gmra.mrb[6].mxu0 %vm674_vm1, %v686_v38 }
 0x1a2   : > { %957 = vmatprep.mubr.f32.mxu0 %v8657_v0 }
 0x1a5   : > { %6161 = vmatmul.mubr.msk.f32.gmra.mrb[8].mxu0 %vm674_vm1, %v687_v39 }
 0x1a6   : > { %963 = vmatprep.mubr.f32.mxu0 %v8657_v0 }
 0x1a9   : > { %6162 = vmatmul.mubr.msk.f32.gmra.mrb[10].mxu0 %vm674_vm1, %v688_v40 }
 0x1aa   : > { %969 = vmatprep.mubr.f32.mxu0 %v8657_v0 }
 0x1ad   : > { %6163 = vmatmul.mubr.msk.f32.gmra.mrb[12].mxu0 %vm674_vm1, %v689_v41 }
 0x1ae   : > { %975 = vmatprep.mubr.f32.mxu0 %v8657_v0 }
 0x1b1   : > { %6164 = vmatmul.mubr.msk.f32.gmra.mrb[14].mxu0 %vm674_vm1, %v690_v42 }
 0x1b2   : > { %1083 = vmatprep.mubr.f32.mxu0 %v8657_v0 }
 0x1b5   : > { %6165 = vmatmul.mubr.msk.f32.vlgmr.msra.gmra.mrb[0].mxu0 %vm674_vm1, %v982_v43 }
 0x1b6   : > { %1089 = vmatprep.mubr.f32.mxu0 %v8657_v0 }
 0x1b9   : > { %6166 = vmatmul.mubr.msk.f32.gmra.mrb[2].mxu0 %vm674_vm1, %v983_v44 }
 0x1ba   : > { %1095 = vmatprep.mubr.f32.mxu0 %v8657_v0 }
 0x1bd   : > { %6167 = vmatmul.mubr.msk.f32.gmra.mrb[4].mxu0 %vm674_vm1, %v984_v45 }
 0x1be   : > { %1101 = vmatprep.mubr.f32.mxu0 %v8657_v0 }
 0x1c1   : > { %6168 = vmatmul.mubr.msk.f32.gmra.mrb[6].mxu0 %vm674_vm1, %v985_v46 }
 0x1c2   : > { %1107 = vmatprep.mubr.f32.mxu0 %v8657_v0 }
 0x1c5   : > { %6169 = vmatmul.mubr.msk.f32.gmra.mrb[8].mxu0 %vm674_vm1, %v986_v47 }
 0x1c6   : > { %1113 = vmatprep.mubr.f32.mxu0 %v8657_v0 }
 0x1c9   : > { %6170 = vmatmul.mubr.msk.f32.gmra.mrb[10].mxu0 %vm674_vm1, %v987_v48 }
 0x1ca   : > { %1119 = vmatprep.mubr.f32.mxu0 %v8657_v0 }
 0x1cd   : > { %6171 = vmatmul.mubr.msk.f32.gmra.mrb[12].mxu0 %vm674_vm1, %v988_v49 }
 0x1ce   : > { %1125 = vmatprep.mubr.f32.mxu0 %v8657_v0 }
 0x1d1   : > { %6172 = vmatmul.mubr.msk.f32.gmra.mrb[14].mxu0 %vm674_vm1, %v989_v50 }
 0x1d2   : > { %2397 = vmatprep.mubr.f32.mxu0 %v8657_v0 }
 0x25a   : > { %v822_v57 = vpop.f32.mrb[0].mxu1 }
 0x25b   : > { %v824_v58 = vpop.f32.mrb[1].mxu1 }
 0x25e   : > { %v828_v59 = vpop.f32.mrb[2].mxu1 }
 0x25f   : > { %v9189_v60 = vpop.f32.mrb[3].mxu1 }
 0x262   : > { %v9191_v61 = vpop.f32.mrb[4].mxu1 }
 0x263   : > { %v9193_v62 = vpop.f32.mrb[5].mxu1 }
 0x266   : > { %v9195_v63 = vpop.f32.mrb[6].mxu1 }
 0x267   : > { %v9197_v1 = vpop.f32.mrb[7].mxu1 }
 0x288   : > { %v1085_v9 = vpop.f32.mrb[0].mxu0 }
 0x289   : > { %v1160_v11 = vmul.f32 %v9206_v6, %v1085_v9  ;;  %v1087_v12 = vpop.f32.mrb[1].mxu0 }
 0x28a   : > { %v1161_v13 = vmul.f32 %v9209_v7, %v1087_v12 }
 0x28b   : > { %v1188_v14 = vadd.f32 %v9212_v8, %v1160_v11 }
 0x28c   : > { %v1189_v15 = vadd.f32 %v9215_v10, %v1161_v13  ;;  %v1091_v16 = vpop.f32.mrb[2].mxu0 }
 0x28d   : > { %v1204_v17 = vmax.f32 %v1188_v14, 0.0  ;;  %v1162_v18 = vmul.f32 %v9206_v6, %v1091_v16  ;;  %v1093_v19 = vpop.f32.mrb[3].mxu0 }
 0x28e   : > { %v1205_v20 = vmax.f32 %v1189_v15, 0.0  ;;  %v1163_v21 = vmul.f32 %v9209_v7, %v1093_v19 }
 0x28f   : > { %v1190_v22 = vadd.f32 %v9212_v8, %v1162_v18 }
 0x290   : > { %v1220_v23 = vmax.f32 %v1204_v17, %v1205_v20  ;;  %v1191_v24 = vadd.f32 %v9215_v10, %v1163_v21  ;;  %v1097_v25 = vpop.f32.mrb[4].mxu0 }
 0x291   : > { %v1206_v26 = vmax.f32 %v1190_v22, 0.0  ;;  %v1164_v27 = vmul.f32 %v9206_v6, %v1097_v25  ;;  %v1099_v28 = vpop.f32.mrb[5].mxu0 }
 0x292   : > { %v1207_v29 = vmax.f32 %v1191_v24, 0.0  ;;  %v1165_v30 = vmul.f32 %v9209_v7, %v1099_v28 }
 0x293   : > { %v1192_v31 = vadd.f32 %v9212_v8, %v1164_v27 }
 0x294   : > { %v1221_v32 = vmax.f32 %v1206_v26, %v1207_v29  ;;  %v1193_v33 = vadd.f32 %v9215_v10, %v1165_v30  ;;  %v1103_v34 = vpop.f32.mrb[6].mxu0 }
 0x295   : > { %v1208_v35 = vmax.f32 %v1192_v31, 0.0  ;;  %v1166_v36 = vmul.f32 %v9206_v6, %v1103_v34  ;;  %v1105_v37 = vpop.f32.mrb[7].mxu0 }
 0x296   : > { %v9230_v38 = vpack.c.bf16 %v1221_v32, %v1220_v23  ;;  %v1209_v39 = vmax.f32 %v1193_v33, 0.0  ;;  %v1167_v40 = vmul.f32 %v9209_v7, %v1105_v37  ;;  %v1230_v37 = vadd.s32 8, %v9173_v52 }
 0x297   : > { %v1194_v41 = vadd.f32 %v9212_v8, %v1166_v36 }
 0x298   : > { %v1222_v42 = vmax.f32 %v1208_v35, %v1209_v39  ;;  %v1195_v43 = vadd.f32 %v9215_v10, %v1167_v40  ;;  %v1109_v44 = vpop.f32.mrb[8].mxu0  ;;  %6334 = vmatprep.subr.bf16.mxu1 %v9230_v38  ;;  %v1231_v40 = vadd.s32 16, %v9173_v52 }
 0x299   : > { %v1210_v45 = vmax.f32 %v1194_v41, 0.0  ;;  %v7895_v46 = vadd.f32 %v1109_v44, %v822_v57  ;;  %v1111_v47 = vpop.f32.mrb[9].mxu0  ;;  %6336 = vmatpush3.bf16.msra.mxu1 %v9230_v38 }
 0x29a   : > { %v1211_v48 = vmax.f32 %v1195_v43, 0.0  ;;  %v7896_v49 = vadd.f32 %v1111_v47, %v824_v58  ;;  %v1236_v43 = vmul.u32 2, %v1230_v37  ;;  %v1237_v44 = vmul.u32 2, %v1231_v40  ;;  %v1598_v40 = vld [vmem:[#allocation11 + $0x3a8] sm:$0xff] }
 0x29b   : > { %v1168_v50 = vmul.f32 %v7895_v46, %v9206_v6 }
 0x29c   : > { %v1223_v54 = vmax.f32 %v1210_v45, %v1211_v48  ;;  %v1169_v3 = vmul.f32 %v7896_v49, %v9209_v7  ;;  %v1115_v5 = vpop.f32.mrb[10].mxu0  ;;  %vm1240_vm5 = vcmp.eq.s32.totalorder %v9176_v53, %v1236_v43  ;;  %vm1241_vm6 = vcmp.eq.s32.totalorder %v9176_v53, %v1237_v44 }
 0x29d   : > { %v1196_v9 = vadd.f32 %v9212_v8, %v1168_v50  ;;  %v7897_v11 = vadd.f32 %v1115_v5, %v828_v59  ;;  %v1117_v12 = vpop.f32.mrb[11].mxu0  ;;  %v9278_v48 = vsel %vm1255_vm4, 1.0, %v8657_v0  ;;  %v1252_v49 = vadd.s32 1, %v1236_v43  ;;  %v1546_v50 = vld [vmem:[#allocation11 + $0x208] sm:$0xff] }
 0x29e   : > { %v6337_v13 = vpack.c.bf16 %v1223_v54, %v1222_v42  ;;  %v1197_v14 = vadd.f32 %v9215_v10, %v1169_v3  ;;  %v7898_v57 = vadd.f32 %v1117_v12, %v9189_v60  ;;  %v1550_v54 = vld [vmem:[#allocation11 + $0x228] sm:$0xff] }
 0x29f   : > { %v1212_v15 = vmax.f32 %v1196_v9, 0.0  ;;  %v1170_v16 = vmul.f32 %v7897_v11, %v9206_v6  ;;  %vm1256_vm8 = vcmp.eq.s32.totalorder %v9176_v53, %v1252_v49  ;;  %v6365_v5 = vpack.c.bf16 %v1550_v54, %v1546_v50  ;;  %v1549_v9 = vld [vmem:[#allocation11 + $0x220] sm:$0xff]  ;;  %v1554_v11 = vld [vmem:[#allocation11 + $0x248] sm:$0xff] }
 0x2a0   : > { %v1213_v17 = vmax.f32 %v1197_v14, 0.0  ;;  %v1171_v58 = vmul.f32 %v7898_v57, %v9209_v7  ;;  %v1121_v18 = vpop.f32.mrb[12].mxu0  ;;  %6338 = vmatprep.subr.bf16.mxu1 %v6337_v13  ;;  %v1558_v12 = vld [vmem:[#allocation11 + $0x268] sm:$0xff]  ;;  %v6367_v14 = vpack.c.bf16 %v1549_v9, %v1545_v56  ;;  %v1551_v56 = vld [vmem:[#allocation11 + $0x230] sm:$0xff]  ;;  %v1556_v9 = vld [vmem:[#allocation11 + $0x258] sm:$0xff] }
 0x2a1   : > { %v1198_v19 = vadd.f32 %v9212_v8, %v1170_v16  ;;  %v7899_v20 = vadd.f32 %v1121_v18, %v9191_v61  ;;  %v1123_v21 = vpop.f32.mrb[13].mxu0  ;;  %6340 = vmatpush3.bf16.msra.mxu1 %v6337_v13  ;;  %v1602_v43 = vld [vmem:[#allocation11 + $0x3c8] sm:$0xff] }
 0x2a2   : > { %v1224_v59 = vmax.f32 %v1212_v15, %v1213_v17  ;;  %v1199_v22 = vadd.f32 %v9215_v10, %v1171_v58  ;;  %v7900_v23 = vadd.f32 %v1123_v21, %v9193_v62  ;;  %v6369_v15 = vpack.c.bf16 %v1558_v12, %v1554_v11  ;;  %v1553_v17 = vld [vmem:[#allocation11 + $0x240] sm:$0xff]  ;;  %v1560_v11 = vld [vmem:[#allocation11 + $0x278] sm:$0xff] }
 0x2a3   : > { %v1214_v60 = vmax.f32 %v1198_v19, 0.0  ;;  %v1172_v24 = vmul.f32 %v7899_v20, %v9206_v6  ;;  %v1557_v58 = vld [vmem:[#allocation11 + $0x260] sm:$0xff]  ;;  %v1566_v19 = vld [vmem:[#allocation11 + $0x2a8] sm:$0xff] }
 0x2a4   : > { %v1215_v25 = vmax.f32 %v1199_v22, 0.0  ;;  %v1173_v26 = vmul.f32 %v7900_v23, %v9209_v7  ;;  %v1127_v27 = vpop.f32.mrb[14].mxu0  ;;  %v6371_v18 = vpack.c.bf16 %v1557_v58, %v1553_v17  ;;  %v1561_v21 = vld [vmem:[#allocation11 + $0x280] sm:$0xff]  ;;  %v1570_v23 = vld [vmem:[#allocation11 + $0x2c8] sm:$0xff]  ;;  %v6401_v17 = vpack.c.bf16 %v1560_v11, %v1556_v9  ;;  %v1555_v58 = vld [vmem:[#allocation11 + $0x250] sm:$0xff] }
 0x2a5   : > { %v1200_v28 = vadd.f32 %v9212_v8, %v1172_v24  ;;  %v7901_v29 = vadd.f32 %v1127_v27, %v9195_v63  ;;  %v1129_v30 = vpop.f32.mrb[15].mxu0  ;;  %v1480_v9 = vld [vmem:[#allocation11 + $0x20] sm:$0xff]  ;;  %v1485_v11 = vld [vmem:[#allocation11 + $0x48] sm:$0xff] }
 0x2a6   : > { %v1225_v61 = vmax.f32 %v1214_v60, %v1215_v25  ;;  %v1201_v31 = vadd.f32 %v9215_v10, %v1173_v26  ;;  %v7902_v32 = vadd.f32 %v1129_v30, %v9197_v1  ;;  %v1574_v60 = vld [vmem:[#allocation11 + $0x2e8] sm:$0xff]  ;;  %v1569_v25 = vld [vmem:[#allocation11 + $0x2c0] sm:$0xff] }
 0x2a7   : > { %v1216_v33 = vmax.f32 %v1200_v28, 0.0  ;;  %v1174_v62 = vmul.f32 %v7901_v29, %v9206_v6  ;;  %v1232_v6 = vadd.s32 24, %v9173_v52  ;;  %v6377_v24 = vpack.c.bf16 %v1574_v60, %v1570_v23  ;;  %v1573_v26 = vld [vmem:[#allocation11 + $0x2e0] sm:$0xff]  ;;  %v1578_v28 = vld [vmem:[#allocation11 + $0x308] sm:$0xff] }
 0x2a8   : > { %v1217_v34 = vmax.f32 %v1201_v31, 0.0  ;;  %v1175_v35 = vmul.f32 %v7902_v32, %v9209_v7  ;;  %v6341_v36 = vpack.c.bf16 %v1225_v61, %v1224_v59  ;;  %v1565_v59 = vld [vmem:[#allocation11 + $0x2a0] sm:$0xff]  ;;  %v6379_v27 = vpack.c.bf16 %v1573_v26, %v1569_v25  ;;  %v1582_v29 = vld [vmem:[#allocation11 + $0x328] sm:$0xff]  ;;  %v1567_v25 = vld [vmem:[#allocation11 + $0x2b0] sm:$0xff] }
 0x2a9   : > { %v1202_v39 = vadd.f32 %v9212_v8, %v1174_v62  ;;  %v1238_v46 = vmul.u32 2, %v1232_v6  ;;  %v9264_v8 = vsel %vm1240_vm5, 1.0, %v8657_v0  ;;  %v6375_v22 = vpack.c.bf16 %v1565_v59, %v1561_v21  ;;  %v1577_v61 = vld [vmem:[#allocation11 + $0x300] sm:$0xff]  ;;  %v1590_v62 = vld [vmem:[#allocation11 + $0x368] sm:$0xff]  ;;  %v1572_v26 = vld [vmem:[#allocation11 + $0x2d8] sm:$0xff] }
 0x2aa   : > { %v1226_v63 = vmax.f32 %v1216_v33, %v1217_v34  ;;  %v1203_v41 = vadd.f32 %v9215_v10, %v1175_v35  ;;  %6342 = vmatprep.subr.bf16.mxu1 %v6341_v36  ;;  %v6175_v10 = vsel %vm1241_vm6, 1.0, %v8657_v0  ;;  %v6381_v30 = vpack.c.bf16 %v1582_v29, %v1578_v28  ;;  %v1581_v31 = vld [vmem:[#allocation11 + $0x320] sm:$0xff]  ;;  %v1586_v33 = vld [vmem:[#allocation11 + $0x348] sm:$0xff] }
 0x2ab   : > { %v1218_v42 = vmax.f32 %v1202_v39, 0.0  ;;  %6344 = vmatpush3.bf16.msra.mxu1 %v6341_v36  ;;  %vm1242_vm7 = vcmp.eq.s32.totalorder %v9176_v53, %v1238_v46  ;;  %v1254_v3 = vadd.s32 1, %v1238_v46  ;;  %v6383_v32 = vpack.c.bf16 %v1581_v31, %v1577_v61  ;;  %v1585_v35 = vld [vmem:[#allocation11 + $0x340] sm:$0xff]  ;;  %v1594_v39 = vld [vmem:[#allocation11 + $0x388] sm:$0xff]  ;;  %v1575_v61 = vld [vmem:[#allocation11 + $0x2f0] sm:$0xff] }
 0x2ac   : > { %v1219_v1 = vmax.f32 %v1203_v41, 0.0  ;;  %v6176_v47 = vsel %vm1242_vm7, 1.0, %v8657_v0  ;;  %v6385_v34 = vpack.c.bf16 %v1590_v62, %v1586_v33  ;;  %v1593_v41 = vld [vmem:[#allocation11 + $0x380] sm:$0xff]  ;;  %v1606_v6 = vld [vmem:[#allocation11 + $0x3e8] sm:$0xff]  ;;  %v1580_v31 = vld [vmem:[#allocation11 + $0x318] sm:$0xff] }
 0x2ad   : > { %vm1258_vm10 = vcmp.eq.s32.totalorder %v9176_v53, %v1254_v3 }
 0x2ae   : > { %v1227_v45 = vmax.f32 %v1218_v42, %v1219_v1  ;;  %v6180_v16 = vsel %vm1258_vm10, 1.0, %v8657_v0  ;;  %v1597_v42 = vld [vmem:[#allocation11 + $0x3a0] sm:$0xff] }
 0x2af   : > { %v6391_v1 = vpack.c.bf16 %v1597_v42, %v1593_v41  ;;  %v1591_v41 = vld [vmem:[#allocation11 + $0x370] sm:$0xff]  ;;  %v1596_v42 = vld [vmem:[#allocation11 + $0x398] sm:$0xff] }
 0x2b0   : > { %v6345_v7 = vpack.c.bf16 %v1227_v45, %v1226_v63  ;;  %v6389_v63 = vpack.c.bf16 %v1598_v40, %v1594_v39  ;;  %v1601_v45 = vld [vmem:[#allocation11 + $0x3c0] sm:$0xff] }
 0x2b2   : > { %6346 = vmatprep.subr.bf16.mxu1 %v6345_v7 }
 0x2b3   : > { %6348 = vmatpush3.bf16.msra.mxu1 %v6345_v7 }
 0x2b4   : > { %6350 = vmatprep.subr.bf16.mxu1 %v9230_v38 }
 0x2b6   : > { %6259 = vmatmul.mubr.msk.f32.vlgmr.msra.gmra.mrb[8].mxu1 %vm1267_vm3, %v9264_v8 }
 0x2b7   : > { %6352 = vmatpush3.bf16.msra.mxu1 %v9230_v38  ;;  %6261 = vmatprep.mubr.msk.f32.mxu1 %vm1267_vm3, %v6175_v10  ;;  %v1253_v38 = vadd.s32 1, %v1237_v44  ;;  %v6393_v44 = vpack.c.bf16 %v1606_v6, %v1602_v43  ;;  %v1548_v10 = vld [vmem:[#allocation11 + $0x218] sm:$0xff] }
 0x2b8   : > { %6354 = vmatprep.subr.bf16.mxu1 %v6337_v13 }
 0x2b9   : > { %vm1257_vm9 = vcmp.eq.s32.totalorder %v9176_v53, %v1253_v38  ;;  %v1562_v53 = vld [vmem:[#allocation11 + $0x288] sm:$0xff] }
 0x2ba   : > { %6262 = vmatmul.mubr.msk.f32.gmra.mrb[10].mxu1 %vm1267_vm3, %v6176_v47  ;;  %v6179_v57 = vsel %vm1257_vm9, 1.0, %v8657_v0  ;;  %v6373_v20 = vpack.c.bf16 %v1566_v19, %v1562_v53  ;;  %v1552_v47 = vld [vmem:[#allocation11 + $0x238] sm:$0xff] }
 0x2bb   : > { %6356 = vmatpush3.bf16.msra.mxu1 %v6337_v13  ;;  %6280 = vmatprep.mubr.msk.f32.mxu1 %vm1267_vm3, %v9278_v48  ;;  %v9286_v13 = vsel %vm1256_vm8, 1.0, %v8657_v0  ;;  %v6397_v49 = vpack.c.bf16 %v1552_v47, %v1548_v10  ;;  %v1564_v53 = vld [vmem:[#allocation11 + $0x298] sm:$0xff] }
 0x2bc   : > { %6358 = vmatprep.subr.bf16.mxu1 %v6341_v36  ;;  %v1568_v19 = vld [vmem:[#allocation11 + $0x2b8] sm:$0xff] }
 0x2bd   : > { %v6405_v60 = vpack.c.bf16 %v1568_v19, %v1564_v53  ;;  %v1497_v53 = vld [vmem:[#allocation11 + $0xa8] sm:$0xff] }
 0x2bf   : > { %6360 = vmatpush3.bf16.msra.mxu1 %v6341_v36  ;;  %v1589_v36 = vld [vmem:[#allocation11 + $0x360] sm:$0xff] }
 0x2c0   : > { %6362 = vmatprep.subr.bf16.mxu1 %v6345_v7  ;;  %v6387_v37 = vpack.c.bf16 %v1589_v36, %v1585_v35  ;;  %v1583_v35 = vld [vmem:[#allocation11 + $0x330] sm:$0xff]  ;;  %v1588_v36 = vld [vmem:[#allocation11 + $0x358] sm:$0xff] }
 0x2c3   : > { %6364 = vmatpush3.bf16.msra.mxu1 %v6345_v7  ;;  %v1605_v7 = vld [vmem:[#allocation11 + $0x3e0] sm:$0xff] }
 0x2c4   : > { %6366 = vmatprep.subr.bf16.mxu1 %v6365_v5  ;;  %v6395_v46 = vpack.c.bf16 %v1605_v7, %v1601_v45  ;;  %v1547_v5 = vld [vmem:[#allocation11 + $0x210] sm:$0xff]  ;;  %v1604_v7 = vld [vmem:[#allocation11 + $0x3d8] sm:$0xff] }
 0x2c5   : > { %v1599_v45 = vld [vmem:[#allocation11 + $0x3b0] sm:$0xff] }
 0x2c6   : > { %6281 = vmatmul.mubr.msk.f32.vlgmr.msra.gmra.mrb[12].mxu1 %vm1267_vm3, %v9286_v13 }
 0x2c7   : > { %6283 = vmatprep.mubr.msk.f32.mxu1 %vm1267_vm3, %v6179_v57  ;;  %6368 = vmatpush1.bf16.msra.mxu1 %v6367_v14 }
 0x2c8   : > { %6370 = vmatprep.subr.bf16.mxu1 %v6369_v15  ;;  %v6399_v15 = vpack.c.bf16 %v1551_v56, %v1547_v5  ;;  %v1476_v56 = vld [vmem:[#allocation11] sm:$0xff] }
 0x2ca   : > { %6284 = vmatmul.mubr.msk.f32.gmra.mrb[14].mxu1 %vm1267_vm3, %v6180_v16 }
 0x2cb   : > { %1673 = vmatprep.mubr.f32.mxu1 %v8657_v0  ;;  %6372 = vmatpush1.bf16.msra.mxu1 %v6371_v18  ;;  %v1559_v18 = vld [vmem:[#allocation11 + $0x270] sm:$0xff] }
 0x2cc   : > { %6374 = vmatprep.subr.bf16.mxu1 %v6373_v20 }
 0x2cf   : > { %6376 = vmatpush1.bf16.msra.mxu1 %v6375_v22  ;;  %v6403_v22 = vpack.c.bf16 %v1559_v18, %v1555_v58  ;;  %v1488_v58 = vld [vmem:[#allocation11 + $0x60] sm:$0xff]  ;;  %v1493_v18 = vld [vmem:[#allocation11 + $0x88] sm:$0xff] }
 0x2d0   : > { %6378 = vmatprep.subr.bf16.mxu1 %v6377_v24  ;;  %v1563_v24 = vld [vmem:[#allocation11 + $0x290] sm:$0xff] }
 0x2d1   : > { %v6407_v28 = vpack.c.bf16 %v1567_v25, %v1563_v24  ;;  %v1505_v24 = vld [vmem:[#allocation11 + $0xe8] sm:$0xff] }
 0x2d3   : > { %6380 = vmatpush1.bf16.msra.mxu1 %v6379_v27  ;;  %v1576_v27 = vld [vmem:[#allocation11 + $0x2f8] sm:$0xff] }
 0x2d4   : > { %6382 = vmatprep.subr.bf16.mxu1 %v6381_v30  ;;  %v6409_v29 = vpack.c.bf16 %v1576_v27, %v1572_v26  ;;  %v1571_v30 = vld [vmem:[#allocation11 + $0x2d0] sm:$0xff]  ;;  %v1500_v27 = vld [vmem:[#allocation11 + $0xc0] sm:$0xff] }
 0x2d5   : > { %v6411_v33 = vpack.c.bf16 %v1575_v61, %v1571_v30 }
 0x2d7   : > { %6384 = vmatpush1.bf16.msra.mxu1 %v6383_v32  ;;  %v1584_v32 = vld [vmem:[#allocation11 + $0x338] sm:$0xff] }
 0x2d8   : > { %6386 = vmatprep.subr.bf16.mxu1 %v6385_v34  ;;  %v6413_v62 = vpack.c.bf16 %v1584_v32, %v1580_v31  ;;  %v1579_v34 = vld [vmem:[#allocation11 + $0x310] sm:$0xff]  ;;  %v1508_v31 = vld [vmem:[#allocation11 + $0x100] sm:$0xff]  ;;  %v1517_v32 = vld [vmem:[#allocation11 + $0x148] sm:$0xff] }
 0x2d9   : > { %v6415_v39 = vpack.c.bf16 %v1583_v35, %v1579_v34  ;;  %v1516_v35 = vld [vmem:[#allocation11 + $0x140] sm:$0xff] }
 0x2db   : > { %6388 = vmatpush1.bf16.msra.mxu1 %v6387_v37  ;;  %v1592_v37 = vld [vmem:[#allocation11 + $0x378] sm:$0xff] }
 0x2dc   : > { %6390 = vmatprep.subr.bf16.mxu1 %v6389_v63  ;;  %v6417_v40 = vpack.c.bf16 %v1592_v37, %v1588_v36  ;;  %v1587_v63 = vld [vmem:[#allocation11 + $0x350] sm:$0xff]  ;;  %v1525_v36 = vld [vmem:[#allocation11 + $0x188] sm:$0xff] }
 0x2dd   : > { %v6419_v43 = vpack.c.bf16 %v1591_v41, %v1587_v63  ;;  %v1529_v37 = vld [vmem:[#allocation11 + $0x1a8] sm:$0xff]  ;;  %v1524_v63 = vld [vmem:[#allocation11 + $0x180] sm:$0xff] }
 0x2de   : > { %v1528_v41 = vld [vmem:[#allocation11 + $0x1a0] sm:$0xff] }
 0x2df   : > { %6392 = vmatpush1.bf16.msra.mxu1 %v6391_v1  ;;  %v1600_v1 = vld [vmem:[#allocation11 + $0x3b8] sm:$0xff] }
 0x2e0   : > { %6394 = vmatprep.subr.bf16.mxu1 %v6393_v44  ;;  %v6421_v6 = vpack.c.bf16 %v1600_v1, %v1596_v42  ;;  %v1595_v44 = vld [vmem:[#allocation11 + $0x390] sm:$0xff]  ;;  %v1533_v42 = vld [vmem:[#allocation11 + $0x1c8] sm:$0xff] }
 0x2e1   : > { %v6423_v10 = vpack.c.bf16 %v1599_v45, %v1595_v44  ;;  %v1537_v1 = vld [vmem:[#allocation11 + $0x1e8] sm:$0xff]  ;;  %v1536_v44 = vld [vmem:[#allocation11 + $0x1e0] sm:$0xff]  ;;  %v1479_v45 = vld [vmem:[#allocation11 + $0x18] sm:$0xff] }
 0x2e3   : > { %6396 = vmatpush1.bf16.msra.mxu1 %v6395_v46  ;;  %v1608_v46 = vld [vmem:[#allocation11 + $0x3f8] sm:$0xff] }
 0x2e4   : > { %6398 = vmatprep.subr.bf16.mxu1 %v6397_v49  ;;  %v6425_v47 = vpack.c.bf16 %v1608_v46, %v1604_v7  ;;  %v1603_v49 = vld [vmem:[#allocation11 + $0x3d0] sm:$0xff]  ;;  %v1483_v7 = vld [vmem:[#allocation11 + $0x38] sm:$0xff] }
 0x389   : > { %v6260_v38 = vpop.f32.mrb[8].mxu1 }
 0x38a   : > { %v1346_v50 = vpop.f32.mrb[9].mxu1 }
 0x38d   : > { %v6263_v54 = vpop.f32.mrb[10].mxu1 }
 0x38e   : > { %v1356_v3 = vpop.f32.mrb[11].mxu1 }
 0x399   : > { %v6282_v12 = vpop.f32.mrb[12].mxu1 }
 0x39a   : > { %v9296_v14 = vmax.f32 %v6260_v38, %v6282_v12  ;;  %v1443_v57 = vpop.f32.mrb[13].mxu1  ;;  %v1607_v38 = vld [vmem:[#allocation11 + $0x3f0] sm:$0xff]  ;;  %v1489_v12 = vld [vmem:[#allocation11 + $0x68] sm:$0xff] }
 0x39b   : > { %v9298_v16 = vmax.f32 %v1346_v50, %v1443_v57  ;;  %v1477_v50 = vld [vmem:[#allocation11 + $0x8] sm:$0xff]  ;;  %v6431_v57 = vpack.c.bf16 %v1480_v9, %v1476_v56  ;;  %v1490_v56 = vld [vmem:[#allocation11 + $0x70] sm:$0xff] }
 0x39c   : > { %1469 = vst [vmem:[#allocation3 + $0x9] sm:$0xff] %v9296_v14 }
 0x39d   : > { %1468 = vst [vmem:[#allocation3 + $0x1] sm:$0xff] %v9298_v16  ;;  %v6285_v20 = vpop.f32.mrb[14].mxu1  ;;  %1674 = vmatmul.mubr.f32.vlgmr.msra.gmra.mrb[16].mxu1 %v9298_v16 }
 0x39e   : > { %v9303_v21 = vmax.f32 %v6263_v54, %v6285_v20  ;;  %v1453_v59 = vpop.f32.mrb[15].mxu1  ;;  %6400 = vmatpush1.bf16.msra.mxu1 %v6399_v15  ;;  %1679 = vmatprep.mubr.f32.mxu1 %v8657_v0  ;;  %v1481_v54 = vld [vmem:[#allocation11 + $0x28] sm:$0xff]  ;;  %v6433_v15 = vpack.c.bf16 %v1489_v12, %v1485_v11  ;;  %v6437_v20 = vpack.c.bf16 %v1497_v53, %v1493_v18  ;;  %v1495_v11 = vld [vmem:[#allocation11 + $0x98] sm:$0xff] }
 0x39f   : > { %v9306_v23 = vmax.f32 %v1356_v3, %v1453_v59  ;;  %6402 = vmatprep.subr.bf16.mxu1 %v6401_v17  ;;  %v6427_v3 = vpack.c.bf16 %v1607_v38, %v1603_v49  ;;  %v6429_v5 = vpack.c.bf16 %v1481_v54, %v1477_v50  ;;  %v1484_v17 = vld [vmem:[#allocation11 + $0x40] sm:$0xff]  ;;  %v1482_v49 = vld [vmem:[#allocation11 + $0x30] sm:$0xff]  ;;  %v1487_v38 = vld [vmem:[#allocation11 + $0x58] sm:$0xff] }
 0x3a0   : > { %1471 = vst [vmem:[#allocation3 + $0x19] sm:$0xff] %v9303_v21  ;;  %v6435_v19 = vpack.c.bf16 %v1488_v58, %v1484_v17  ;;  %v1492_v59 = vld [vmem:[#allocation11 + $0x80] sm:$0xff]  ;;  %v1491_v50 = vld [vmem:[#allocation11 + $0x78] sm:$0xff]  ;;  %v1494_v17 = vld [vmem:[#allocation11 + $0x90] sm:$0xff] }
 0x3a1   : > { %1470 = vst [vmem:[#allocation3 + $0x11] sm:$0xff] %v9306_v23  ;;  %1680 = vmatmul.mubr.f32.gmra.mrb[18].mxu1 %v9296_v14  ;;  %v1499_v12 = vld [vmem:[#allocation11 + $0xb8] sm:$0xff]  ;;  %v1498_v58 = vld [vmem:[#allocation11 + $0xb0] sm:$0xff] }
 0x3a2   : > { %6404 = vmatpush1.bf16.msra.mxu1 %v6403_v22  ;;  %1685 = vmatprep.mubr.f32.mxu1 %v8657_v0  ;;  %v1496_v22 = vld [vmem:[#allocation11 + $0xa0] sm:$0xff]  ;;  %v1503_v53 = vld [vmem:[#allocation11 + $0xd8] sm:$0xff] }
 0x3a3   : > { %6406 = vmatprep.subr.bf16.mxu1 %v6405_v60  ;;  %v1501_v60 = vld [vmem:[#allocation11 + $0xc8] sm:$0xff]  ;;  %v6439_v25 = vpack.c.bf16 %v1496_v22, %v1492_v59  ;;  %v1502_v22 = vld [vmem:[#allocation11 + $0xd0] sm:$0xff] }
 0x3a4   : > { %v6441_v26 = vpack.c.bf16 %v1505_v24, %v1501_v60  ;;  %v9324_v9 = vld [vmem:[#allocation3] sm:$0xff]  ;;  %v9328_v18 = vld [vmem:[#allocation3 + $0x8] sm:$0xff] }
 0x3a5   : > { %1686 = vmatmul.mubr.f32.gmra.mrb[20].mxu1 %v9306_v23  ;;  %v1506_v60 = vld [vmem:[#allocation11 + $0xf0] sm:$0xff] }
 0x3a6   : > { %6408 = vmatpush1.bf16.msra.mxu1 %v6407_v28  ;;  %1691 = vmatprep.mubr.f32.mxu1 %v8657_v0  ;;  %v1509_v28 = vld [vmem:[#allocation11 + $0x108] sm:$0xff] }
 0x3a7   : > { %6410 = vmatprep.subr.bf16.mxu1 %v6409_v29  ;;  %v1513_v29 = vld [vmem:[#allocation11 + $0x128] sm:$0xff] }
 0x3a8   : > { %v6445_v61 = vpack.c.bf16 %v1513_v29, %v1509_v28  ;;  %v9332_v24 = vld [vmem:[#allocation3 + $0x10] sm:$0xff] }
 0x3a9   : > { %1692 = vmatmul.mubr.f32.gmra.mrb[22].mxu1 %v9303_v21  ;;  %v1510_v28 = vld [vmem:[#allocation11 + $0x110] sm:$0xff] }
 0x3aa   : > { %6412 = vmatpush1.bf16.msra.mxu1 %v6411_v33  ;;  %1762 = vmatprep.mubr.f32.mxu1 %v8657_v0  ;;  %v1521_v33 = vld [vmem:[#allocation11 + $0x168] sm:$0xff]  ;;  %v1514_v29 = vld [vmem:[#allocation11 + $0x130] sm:$0xff] }
 0x3ab   : > { %6414 = vmatprep.subr.bf16.mxu1 %v6413_v62  ;;  %v6449_v34 = vpack.c.bf16 %v1521_v33, %v1517_v32  ;;  %v1518_v33 = vld [vmem:[#allocation11 + $0x150] sm:$0xff] }
 0x3ae   : > { %6416 = vmatpush1.bf16.msra.mxu1 %v6415_v39 }
 0x3af   : > { %6418 = vmatprep.subr.bf16.mxu1 %v6417_v40  ;;  %v6453_v40 = vpack.c.bf16 %v1529_v37, %v1525_v36  ;;  %v1526_v37 = vld [vmem:[#allocation11 + $0x190] sm:$0xff] }
 0x3b2   : > { %6420 = vmatpush1.bf16.msra.mxu1 %v6419_v43  ;;  %v6457_v43 = vpack.c.bf16 %v1537_v1, %v1533_v42  ;;  %v1534_v1 = vld [vmem:[#allocation11 + $0x1d0] sm:$0xff] }
 0x3b3   : > { %6422 = vmatprep.subr.bf16.mxu1 %v6421_v6  ;;  %v1532_v6 = vld [vmem:[#allocation11 + $0x1c0] sm:$0xff] }
 0x3b4   : > { %v6459_v46 = vpack.c.bf16 %v1536_v44, %v1532_v6  ;;  %v1975_v6 = vld [vmem:[#allocation11 + $0x428] sm:$0xff] }
 0x3b6   : > { %6424 = vmatpush1.bf16.msra.mxu1 %v6423_v10  ;;  %v6461_v10 = vpack.c.bf16 %v1483_v7, %v1479_v45  ;;  %v1970_v7 = vld [vmem:[#allocation11 + $0x400] sm:$0xff] }
 0x3b7   : > { %6426 = vmatprep.subr.bf16.mxu1 %v6425_v47  ;;  %v1478_v47 = vld [vmem:[#allocation11 + $0x10] sm:$0xff] }
 0x3b8   : > { %v6463_v54 = vpack.c.bf16 %v1482_v49, %v1478_v47  ;;  %v1983_v47 = vld [vmem:[#allocation11 + $0x468] sm:$0xff] }
 0x3ba   : > { %6428 = vmatpush1.bf16.msra.mxu1 %v6427_v3  ;;  %v6465_v3 = vpack.c.bf16 %v1491_v50, %v1487_v38  ;;  %v1978_v50 = vld [vmem:[#allocation11 + $0x440] sm:$0xff] }
 0x3bb   : > { %6430 = vmatprep.subr.bf16.mxu1 %v6429_v5  ;;  %v1486_v5 = vld [vmem:[#allocation11 + $0x50] sm:$0xff] }
 0x3bd   : > { %1763 = vmatmul.mubr.f32.vlgmr.msra.gmra.mrb[24].mxu1 %v9298_v16  ;;  %v1504_v16 = vld [vmem:[#allocation11 + $0xe0] sm:$0xff] }
 0x3be   : > { %6432 = vmatpush1.bf16.msra.mxu1 %v6431_v57  ;;  %1768 = vmatprep.mubr.f32.mxu1 %v8657_v0  ;;  %v6443_v30 = vpack.c.bf16 %v1504_v16, %v1500_v27  ;;  %v6467_v57 = vpack.c.bf16 %v1490_v56, %v1486_v5  ;;  %v6475_v27 = vpack.c.bf16 %v1506_v60, %v1502_v22  ;;  %v1991_v5 = vld [vmem:[#allocation11 + $0x4a8] sm:$0xff] }
 0x3bf   : > { %6434 = vmatprep.subr.bf16.mxu1 %v6433_v15  ;;  %v6469_v15 = vpack.c.bf16 %v1499_v12, %v1495_v11  ;;  %v1986_v12 = vld [vmem:[#allocation11 + $0x480] sm:$0xff] }
 0x3c1   : > { %1769 = vmatmul.mubr.f32.gmra.mrb[26].mxu1 %v9296_v14  ;;  %v1512_v14 = vld [vmem:[#allocation11 + $0x120] sm:$0xff] }
 0x3c2   : > { %6436 = vmatpush1.bf16.msra.mxu1 %v6435_v19  ;;  %1774 = vmatprep.mubr.f32.mxu1 %v8657_v0  ;;  %v6447_v62 = vpack.c.bf16 %v1512_v14, %v1508_v31  ;;  %v1507_v19 = vld [vmem:[#allocation11 + $0xf8] sm:$0xff]  ;;  %v6479_v14 = vpack.c.bf16 %v1514_v29, %v1510_v28  ;;  %v2010_v29 = vld [vmem:[#allocation11 + $0x540] sm:$0xff] }
 0x3c3   : > { %6438 = vmatprep.subr.bf16.mxu1 %v6437_v20  ;;  %v6471_v20 = vpack.c.bf16 %v1498_v58, %v1494_v17  ;;  %v6473_v59 = vpack.c.bf16 %v1507_v19, %v1503_v53  ;;  %v1523_v31 = vld [vmem:[#allocation11 + $0x178] sm:$0xff]  ;;  %v1999_v17 = vld [vmem:[#allocation11 + $0x4e8] sm:$0xff]  ;;  %v1994_v19 = vld [vmem:[#allocation11 + $0x4c0] sm:$0xff] }
 0x3c5   : > { %1775 = vmatmul.mubr.f32.gmra.mrb[28].mxu1 %v9306_v23  ;;  %v1520_v23 = vld [vmem:[#allocation11 + $0x160] sm:$0xff] }
 0x3c6   : > { %6440 = vmatpush1.bf16.msra.mxu1 %v6439_v25  ;;  %1780 = vmatprep.mubr.f32.mxu1 %v8657_v0  ;;  %v6451_v39 = vpack.c.bf16 %v1520_v23, %v1516_v35  ;;  %v1511_v25 = vld [vmem:[#allocation11 + $0x118] sm:$0xff] }
 0x3c7   : > { %6442 = vmatprep.subr.bf16.mxu1 %v6441_v26  ;;  %v1515_v26 = vld [vmem:[#allocation11 + $0x138] sm:$0xff] }
 0x3c8   : > { %v6477_v16 = vpack.c.bf16 %v1515_v26, %v1511_v25  ;;  %v1531_v35 = vld [vmem:[#allocation11 + $0x1b8] sm:$0xff]  ;;  %v2002_v25 = vld [vmem:[#allocation11 + $0x500] sm:$0xff]  ;;  %v2011_v26 = vld [vmem:[#allocation11 + $0x548] sm:$0xff] }
 0x3c9   : > { %1781 = vmatmul.mubr.f32.gmra.mrb[30].mxu1 %v9303_v21  ;;  %v6455_v21 = vpack.c.bf16 %v1528_v41, %v1524_v63  ;;  %v1539_v63 = vld [vmem:[#allocation11 + $0x1f8] sm:$0xff] }
 0x3ca   : > { %6444 = vmatpush1.bf16.msra.mxu1 %v6443_v30  ;;  %1851 = vmatprep.mubr.f32.mxu1 %v8657_v0  ;;  %v9336_v30 = vld [vmem:[#allocation3 + $0x18] sm:$0xff] }
 0x3cb   : > { %6446 = vmatprep.subr.bf16.mxu1 %v6445_v61  ;;  %v1519_v61 = vld [vmem:[#allocation11 + $0x158] sm:$0xff] }
 0x3cc   : > { %v6481_v32 = vpack.c.bf16 %v1523_v31, %v1519_v61  ;;  %v2019_v61 = vld [vmem:[#allocation11 + $0x588] sm:$0xff] }
 0x3cd   : > { %v2023_v31 = vld [vmem:[#allocation11 + $0x5a8] sm:$0xff] }
 0x3ce   : > { %6448 = vmatpush1.bf16.msra.mxu1 %v6447_v62  ;;  %v1522_v62 = vld [vmem:[#allocation11 + $0x170] sm:$0xff] }
 0x3cf   : > { %6450 = vmatprep.subr.bf16.mxu1 %v6449_v34  ;;  %v1527_v34 = vld [vmem:[#allocation11 + $0x198] sm:$0xff]  ;;  %v6483_v23 = vpack.c.bf16 %v1522_v62, %v1518_v33  ;;  %v2018_v33 = vld [vmem:[#allocation11 + $0x580] sm:$0xff] }
 0x3d0   : > { %v6485_v36 = vpack.c.bf16 %v1531_v35, %v1527_v34  ;;  %v2022_v62 = vld [vmem:[#allocation11 + $0x5a0] sm:$0xff]  ;;  %v2027_v34 = vld [vmem:[#allocation11 + $0x5c8] sm:$0xff] }
 0x3d1   : > { %v2031_v35 = vld [vmem:[#allocation11 + $0x5e8] sm:$0xff] }
 0x3d2   : > { %6452 = vmatpush1.bf16.msra.mxu1 %v6451_v39  ;;  %v1530_v39 = vld [vmem:[#allocation11 + $0x1b0] sm:$0xff] }
 0x3d3   : > { %6454 = vmatprep.subr.bf16.mxu1 %v6453_v40  ;;  %v1535_v40 = vld [vmem:[#allocation11 + $0x1d8] sm:$0xff]  ;;  %v6487_v41 = vpack.c.bf16 %v1530_v39, %v1526_v37  ;;  %v2030_v37 = vld [vmem:[#allocation11 + $0x5e0] sm:$0xff] }
 0x3d4   : > { %v6489_v42 = vpack.c.bf16 %v1539_v63, %v1535_v40  ;;  %v1973_v39 = vld [vmem:[#allocation11 + $0x418] sm:$0xff] }
 0x3d5   : > { %v1977_v40 = vld [vmem:[#allocation11 + $0x438] sm:$0xff] }
 0x3d6   : > { %6456 = vmatpush1.bf16.msra.mxu1 %v6455_v21  ;;  %v1538_v21 = vld [vmem:[#allocation11 + $0x1f0] sm:$0xff] }
 0x3d7   : > { %6458 = vmatprep.subr.bf16.mxu1 %v6457_v43  ;;  %v1971_v43 = vld [vmem:[#allocation11 + $0x408] sm:$0xff]  ;;  %v6491_v44 = vpack.c.bf16 %v1538_v21, %v1534_v1  ;;  %v1976_v1 = vld [vmem:[#allocation11 + $0x430] sm:$0xff]  ;;  %v1981_v21 = vld [vmem:[#allocation11 + $0x458] sm:$0xff] }
 0x3d8   : > { %v6493_v45 = vpack.c.bf16 %v1975_v6, %v1971_v43  ;;  %v1985_v43 = vld [vmem:[#allocation11 + $0x478] sm:$0xff] }
 0x3da   : > { %6460 = vmatpush1.bf16.msra.mxu1 %v6459_v46  ;;  %v1974_v46 = vld [vmem:[#allocation11 + $0x420] sm:$0xff] }
 0x3db   : > { %6462 = vmatprep.subr.bf16.mxu1 %v6461_v10  ;;  %v1979_v10 = vld [vmem:[#allocation11 + $0x448] sm:$0xff]  ;;  %v6495_v49 = vpack.c.bf16 %v1974_v46, %v1970_v7  ;;  %v1984_v7 = vld [vmem:[#allocation11 + $0x470] sm:$0xff] }
 0x3dc   : > { %v6497_v38 = vpack.c.bf16 %v1983_v47, %v1979_v10  ;;  %v9348_v46 = vld [vmem:[#allocation3 + $0x2] sm:$0xff]  ;;  %v1989_v10 = vld [vmem:[#allocation11 + $0x498] sm:$0xff] }
 0x3dd   : > { %1852 = vmatmul.mubr.f32.vlgmr.msra.gmra.mrb[16].mxu1 %v9324_v9  ;;  %v1993_v47 = vld [vmem:[#allocation11 + $0x4b8] sm:$0xff] }
 0x3de   : > { %6464 = vmatpush1.bf16.msra.mxu1 %v6463_v54  ;;  %1857 = vmatprep.mubr.f32.mxu1 %v8657_v0  ;;  %v1982_v54 = vld [vmem:[#allocation11 + $0x460] sm:$0xff] }
 0x3df   : > { %6466 = vmatprep.subr.bf16.mxu1 %v6465_v3  ;;  %v1987_v3 = vld [vmem:[#allocation11 + $0x488] sm:$0xff]  ;;  %v6499_v56 = vpack.c.bf16 %v1982_v54, %v1978_v50  ;;  %v1988_v50 = vld [vmem:[#allocation11 + $0x490] sm:$0xff] }
 0x3e0   : > { %v6501_v11 = vpack.c.bf16 %v1991_v5, %v1987_v3  ;;  %v1992_v54 = vld [vmem:[#allocation11 + $0x4b0] sm:$0xff]  ;;  %v1997_v5 = vld [vmem:[#allocation11 + $0x4d8] sm:$0xff] }
 0x3e1   : > { %1858 = vmatmul.mubr.f32.gmra.mrb[18].mxu1 %v9328_v18  ;;  %v1966_v3 = vld [vmem:[#allocation3 + $0xa] sm:$0xff] }
 0x3e2   : > { %6468 = vmatpush1.bf16.msra.mxu1 %v6467_v57  ;;  %1863 = vmatprep.mubr.f32.mxu1 %v8657_v0  ;;  %v1990_v57 = vld [vmem:[#allocation11 + $0x4a0] sm:$0xff] }
 0x3e3   : > { %6470 = vmatprep.subr.bf16.mxu1 %v6469_v15  ;;  %v1995_v15 = vld [vmem:[#allocation11 + $0x4c8] sm:$0xff]  ;;  %v6503_v58 = vpack.c.bf16 %v1990_v57, %v1986_v12  ;;  %v1996_v57 = vld [vmem:[#allocation11 + $0x4d0] sm:$0xff] }
 0x3e4   : > { %v6505_v53 = vpack.c.bf16 %v1999_v17, %v1995_v15  ;;  %v2000_v15 = vld [vmem:[#allocation11 + $0x4f0] sm:$0xff] }
 0x3e5   : > { %1864 = vmatmul.mubr.f32.gmra.mrb[20].mxu1 %v9332_v24  ;;  %v1967_v17 = vld [vmem:[#allocation3 + $0x12] sm:$0xff] }
 0x3e6   : > { %6472 = vmatpush1.bf16.msra.mxu1 %v6471_v20  ;;  %1869 = vmatprep.mubr.f32.mxu1 %v8657_v0  ;;  %v2003_v20 = vld [vmem:[#allocation11 + $0x508] sm:$0xff] }
 0x3e7   : > { %6474 = vmatprep.subr.bf16.mxu1 %v6473_v59  ;;  %v2007_v59 = vld [vmem:[#allocation11 + $0x528] sm:$0xff] }
 0x3e8   : > { %v6509_v60 = vpack.c.bf16 %v2007_v59, %v2003_v20  ;;  %v2004_v20 = vld [vmem:[#allocation11 + $0x510] sm:$0xff] }
 0x3e9   : > { %1870 = vmatmul.mubr.f32.gmra.mrb[22].mxu1 %v9336_v30  ;;  %v2008_v59 = vld [vmem:[#allocation11 + $0x530] sm:$0xff] }
 0x3ea   : > { %6476 = vmatpush1.bf16.msra.mxu1 %v6475_v27  ;;  %1940 = vmatprep.mubr.f32.mxu1 %v8657_v0  ;;  %v2015_v27 = vld [vmem:[#allocation11 + $0x568] sm:$0xff] }
 0x3eb   : > { %6478 = vmatprep.subr.bf16.mxu1 %v6477_v16  ;;  %v6513_v28 = vpack.c.bf16 %v2015_v27, %v2011_v26  ;;  %v2012_v27 = vld [vmem:[#allocation11 + $0x550] sm:$0xff] }
 0x3ee   : > { %6480 = vmatpush1.bf16.msra.mxu1 %v6479_v14 }
 0x3ef   : > { %6482 = vmatprep.subr.bf16.mxu1 %v6481_v32  ;;  %v6517_v32 = vpack.c.bf16 %v2023_v31, %v2019_v61  ;;  %v2020_v31 = vld [vmem:[#allocation11 + $0x590] sm:$0xff] }
 0x3f2   : > { %6484 = vmatpush1.bf16.msra.mxu1 %v6483_v23  ;;  %v6521_v23 = vpack.c.bf16 %v2031_v35, %v2027_v34  ;;  %v2028_v35 = vld [vmem:[#allocation11 + $0x5d0] sm:$0xff] }
 0x3f3   : > { %6486 = vmatprep.subr.bf16.mxu1 %v6485_v36  ;;  %v2026_v36 = vld [vmem:[#allocation11 + $0x5c0] sm:$0xff] }
 0x3f4   : > { %v6523_v63 = vpack.c.bf16 %v2030_v37, %v2026_v36  ;;  %v2797_v36 = vld [vmem:[#allocation16 + $0x828] sm:$0xff] }
 0x3f5   : > { %v2805_v37 = vld [vmem:[#allocation16 + $0x868] sm:$0xff] }
 0x3f6   : > { %6488 = vmatpush1.bf16.msra.mxu1 %v6487_v41  ;;  %v6525_v41 = vpack.c.bf16 %v1977_v40, %v1973_v39  ;;  %v6701_v39 = vpack.c.bf16 %v2805_v37, %v2797_v36  ;;  %v2796_v40 = vld [vmem:[#allocation16 + $0x820] sm:$0xff] }
 0x3f7   : > { %6490 = vmatprep.subr.bf16.mxu1 %v6489_v42  ;;  %v1972_v42 = vld [vmem:[#allocation11 + $0x410] sm:$0xff] }
 0x3f8   : > { %v6527_v6 = vpack.c.bf16 %v1976_v1, %v1972_v42  ;;  %v2813_v42 = vld [vmem:[#allocation16 + $0x8a8] sm:$0xff] }
 0x3f9   : > { %v2821_v1 = vld [vmem:[#allocation16 + $0x8e8] sm:$0xff] }
 0x3fa   : > { %6492 = vmatpush1.bf16.msra.mxu1 %v6491_v44  ;;  %v6529_v44 = vpack.c.bf16 %v1985_v43, %v1981_v21  ;;  %v6705_v21 = vpack.c.bf16 %v2821_v1, %v2813_v42  ;;  %v2812_v43 = vld [vmem:[#allocation16 + $0x8a0] sm:$0xff] }
 0x3fb   : > { %6494 = vmatprep.subr.bf16.mxu1 %v6493_v45  ;;  %v1980_v45 = vld [vmem:[#allocation11 + $0x450] sm:$0xff] }
 0x3fd   : > { %1941 = vmatmul.mubr.f32.vlgmr.msra.gmra.mrb[24].mxu1 %v9324_v9  ;;  %v1998_v9 = vld [vmem:[#allocation11 + $0x4e0] sm:$0xff] }
 0x3fe   : > { %6496 = vmatpush1.bf16.msra.mxu1 %v6495_v49  ;;  %1946 = vmatprep.mubr.f32.mxu1 %v8657_v0  ;;  %v6507_v22 = vpack.c.bf16 %v1998_v9, %v1994_v19  ;;  %v6531_v49 = vpack.c.bf16 %v1984_v7, %v1980_v45  ;;  %v6539_v19 = vpack.c.bf16 %v2000_v15, %v1996_v57  ;;  %v2829_v45 = vld [vmem:[#allocation16 + $0x928] sm:$0xff]  ;;  %v2860_v15 = vld [vmem:[#allocation16 + $0xa20] sm:$0xff] }
 0x3ff   : > { %6498 = vmatprep.subr.bf16.mxu1 %v6497_v38  ;;  %v6533_v38 = vpack.c.bf16 %v1993_v47, %v1989_v10  ;;  %v2837_v7 = vld [vmem:[#allocation16 + $0x968] sm:$0xff]  ;;  %v2828_v10 = vld [vmem:[#allocation16 + $0x920] sm:$0xff] }
 0x400   : > { %v2836_v47 = vld [vmem:[#allocation16 + $0x960] sm:$0xff] }
 0x401   : > { %1947 = vmatmul.mubr.f32.gmra.mrb[26].mxu1 %v9328_v18  ;;  %v2006_v18 = vld [vmem:[#allocation11 + $0x520] sm:$0xff] }
 0x402   : > { %6500 = vmatpush1.bf16.msra.mxu1 %v6499_v56  ;;  %1952 = vmatprep.mubr.f32.mxu1 %v8657_v0  ;;  %v6511_v16 = vpack.c.bf16 %v2006_v18, %v2002_v25  ;;  %v2001_v56 = vld [vmem:[#allocation11 + $0x4f8] sm:$0xff]  ;;  %v6543_v18 = vpack.c.bf16 %v2008_v59, %v2004_v20  ;;  %v2876_v20 = vld [vmem:[#allocation16 + $0xaa0] sm:$0xff] }
 0x403   : > { %6502 = vmatprep.subr.bf16.mxu1 %v6501_v11  ;;  %v6535_v11 = vpack.c.bf16 %v1992_v54, %v1988_v50  ;;  %v6537_v12 = vpack.c.bf16 %v2001_v56, %v1997_v5  ;;  %v2017_v25 = vld [vmem:[#allocation11 + $0x578] sm:$0xff]  ;;  %v2853_v50 = vld [vmem:[#allocation16 + $0x9e8] sm:$0xff]  ;;  %v2852_v5 = vld [vmem:[#allocation16 + $0x9e0] sm:$0xff] }
 0x404   : > { %v2861_v56 = vld [vmem:[#allocation16 + $0xa28] sm:$0xff]  ;;  %v2884_v59 = vld [vmem:[#allocation16 + $0xae0] sm:$0xff] }
 0x405   : > { %1953 = vmatmul.mubr.f32.gmra.mrb[28].mxu1 %v9332_v24  ;;  %v2014_v24 = vld [vmem:[#allocation11 + $0x560] sm:$0xff] }
 0x406   : > { %6504 = vmatpush1.bf16.msra.mxu1 %v6503_v58  ;;  %1958 = vmatprep.mubr.f32.mxu1 %v8657_v0  ;;  %v6515_v14 = vpack.c.bf16 %v2014_v24, %v2010_v29  ;;  %v2005_v58 = vld [vmem:[#allocation11 + $0x518] sm:$0xff] }
 0x407   : > { %6506 = vmatprep.subr.bf16.mxu1 %v6505_v53  ;;  %v2009_v53 = vld [vmem:[#allocation11 + $0x538] sm:$0xff] }
 0x408   : > { %v6541_v9 = vpack.c.bf16 %v2009_v53, %v2005_v58  ;;  %v2025_v29 = vld [vmem:[#allocation11 + $0x5b8] sm:$0xff]  ;;  %v2877_v58 = vld [vmem:[#allocation16 + $0xaa8] sm:$0xff] }
 0x409   : > { %1959 = vmatmul.mubr.f32.gmra.mrb[30].mxu1 %v9336_v30  ;;  %v6519_v30 = vpack.c.bf16 %v2022_v62, %v2018_v33  ;;  %v2033_v33 = vld [vmem:[#allocation11 + $0x5f8] sm:$0xff]  ;;  %v2885_v53 = vld [vmem:[#allocation16 + $0xae8] sm:$0xff] }
 0x40a   : > { %6508 = vmatpush1.bf16.msra.mxu1 %v6507_v22  ;;  %2098 = vmatprep.mubr.f32.mxu1 %v8657_v0  ;;  %v1968_v22 = vld [vmem:[#allocation3 + $0x1a] sm:$0xff] }
 0x40b   : > { %6510 = vmatprep.subr.bf16.mxu1 %v6509_v60  ;;  %v2013_v60 = vld [vmem:[#allocation11 + $0x558] sm:$0xff] }
 0x40c   : > { %v6545_v26 = vpack.c.bf16 %v2017_v25, %v2013_v60  ;;  %v2901_v60 = vld [vmem:[#allocation16 + $0xb68] sm:$0xff]  ;;  %v6723_v25 = vpack.c.bf16 %v2884_v59, %v2876_v20 }
 0x40e   : > { %6512 = vmatpush1.bf16.msra.mxu1 %v6511_v16  ;;  %v2016_v16 = vld [vmem:[#allocation11 + $0x570] sm:$0xff] }
 0x40f   : > { %6514 = vmatprep.subr.bf16.mxu1 %v6513_v28  ;;  %v2021_v28 = vld [vmem:[#allocation11 + $0x598] sm:$0xff]  ;;  %v6547_v24 = vpack.c.bf16 %v2016_v16, %v2012_v27  ;;  %v2900_v27 = vld [vmem:[#allocation16 + $0xb60] sm:$0xff]  ;;  %v2909_v16 = vld [vmem:[#allocation16 + $0xba8] sm:$0xff] }
 0x410   : > { %v6549_v61 = vpack.c.bf16 %v2025_v29, %v2021_v28  ;;  %v2917_v28 = vld [vmem:[#allocation16 + $0xbe8] sm:$0xff] }
 0x412   : > { %6516 = vmatpush1.bf16.msra.mxu1 %v6515_v14  ;;  %v2024_v14 = vld [vmem:[#allocation11 + $0x5b0] sm:$0xff] }
 0x413   : > { %6518 = vmatprep.subr.bf16.mxu1 %v6517_v32  ;;  %v2029_v32 = vld [vmem:[#allocation11 + $0x5d8] sm:$0xff]  ;;  %v6551_v62 = vpack.c.bf16 %v2024_v14, %v2020_v31  ;;  %v2916_v31 = vld [vmem:[#allocation16 + $0xbe0] sm:$0xff]  ;;  %v2925_v14 = vld [vmem:[#allocation16 + $0xc28] sm:$0xff] }
 0x414   : > { %v6553_v34 = vpack.c.bf16 %v2033_v33, %v2029_v32  ;;  %v2933_v32 = vld [vmem:[#allocation16 + $0xc68] sm:$0xff] }
 0x416   : > { %6520 = vmatpush1.bf16.msra.mxu1 %v6519_v30  ;;  %v2032_v30 = vld [vmem:[#allocation11 + $0x5f0] sm:$0xff] }
 0x417   : > { %6522 = vmatprep.subr.bf16.mxu1 %v6521_v23  ;;  %v6555_v23 = vpack.c.bf16 %v2032_v30, %v2028_v35  ;;  %v2932_v35 = vld [vmem:[#allocation16 + $0xc60] sm:$0xff]  ;;  %v2941_v30 = vld [vmem:[#allocation16 + $0xca8] sm:$0xff] }
 0x41a   : > { %6524 = vmatpush1.bf16.msra.mxu1 %v6523_v63  ;;  %v2804_v63 = vld [vmem:[#allocation16 + $0x860] sm:$0xff] }
 0x41b   : > { %6526 = vmatprep.subr.bf16.mxu1 %v6525_v41  ;;  %v6703_v41 = vpack.c.bf16 %v2804_v63, %v2796_v40  ;;  %v2948_v40 = vld [vmem:[#allocation16 + $0xce0] sm:$0xff] }
 0x41d   : > { %2099 = vmatmul.mubr.f32.vlgmr.msra.gmra.mrb[16].mxu1 %v9348_v46 }
 0x41e   : > { %6528 = vmatpush1.bf16.msra.mxu1 %v6527_v6  ;;  %2104 = vmatprep.mubr.f32.mxu1 %v8657_v0  ;;  %v2820_v6 = vld [vmem:[#allocation16 + $0x8e0] sm:$0xff] }
 0x41f   : > { %6530 = vmatprep.subr.bf16.mxu1 %v6529_v44  ;;  %v6707_v44 = vpack.c.bf16 %v2820_v6, %v2812_v43 }
 0x421   : > { %2105 = vmatmul.mubr.f32.gmra.mrb[18].mxu1 %v1966_v3 }
 0x422   : > { %6532 = vmatpush1.bf16.msra.mxu1 %v6531_v49  ;;  %2110 = vmatprep.mubr.f32.mxu1 %v8657_v0  ;;  %v2845_v49 = vld [vmem:[#allocation16 + $0x9a8] sm:$0xff] }
 0x423   : > { %6534 = vmatprep.subr.bf16.mxu1 %v6533_v38  ;;  %v6711_v38 = vpack.c.bf16 %v2836_v47, %v2828_v10  ;;  %v6713_v54 = vpack.c.bf16 %v2853_v50, %v2845_v49  ;;  %v9361_v10 = vsub.s32 2, %v9173_v52  ;;  %v2266_v47 = vld [vmem:[#allocation14] sm:$0xf] }
 0x425   : > { %2111 = vmatmul.mubr.f32.gmra.mrb[20].mxu1 %v1967_v17 }
 0x426   : > { %6536 = vmatpush1.bf16.msra.mxu1 %v6535_v11  ;;  %2116 = vmatprep.mubr.f32.mxu1 %v8657_v0  ;;  %v2869_v11 = vld [vmem:[#allocation16 + $0xa68] sm:$0xff] }
 0x427   : > { %6538 = vmatprep.subr.bf16.mxu1 %v6537_v12  ;;  %v6717_v57 = vpack.c.bf16 %v2869_v11, %v2861_v56  ;;  %v2275_v56 = vrot.slane %v2266_v47, %v9203_v4 }
 0x429   : > { %2117 = vmatmul.mubr.f32.gmra.mrb[22].mxu1 %v1968_v22 }
 0x42a   : > { %6540 = vmatpush1.bf16.msra.mxu1 %v6539_v19  ;;  %2187 = vmatprep.mubr.f32.mxu1 %v8657_v0 }
 0x42b   : > { %6542 = vmatprep.subr.bf16.mxu1 %v6541_v9  ;;  %v6721_v9 = vpack.c.bf16 %v2885_v53, %v2877_v58 }
 0x42e   : > { %6544 = vmatpush1.bf16.msra.mxu1 %v6543_v18 }
 0x42f   : > { %6546 = vmatprep.subr.bf16.mxu1 %v6545_v26  ;;  %v2892_v26 = vld [vmem:[#allocation16 + $0xb20] sm:$0xff] }
 0x430   : > { %v6727_v29 = vpack.c.bf16 %v2900_v27, %v2892_v26 }
 0x432   : > { %6548 = vmatpush1.bf16.msra.mxu1 %v6547_v24  ;;  %v6729_v24 = vpack.c.bf16 %v2917_v28, %v2909_v16 }
 0x433   : > { %6550 = vmatprep.subr.bf16.mxu1 %v6549_v61  ;;  %v2908_v61 = vld [vmem:[#allocation16 + $0xba0] sm:$0xff] }
 0x434   : > { %v6731_v33 = vpack.c.bf16 %v2916_v31, %v2908_v61 }
 0x436   : > { %6552 = vmatpush1.bf16.msra.mxu1 %v6551_v62  ;;  %v6733_v62 = vpack.c.bf16 %v2933_v32, %v2925_v14 }
 0x437   : > { %6554 = vmatprep.subr.bf16.mxu1 %v6553_v34  ;;  %v2924_v34 = vld [vmem:[#allocation16 + $0xc20] sm:$0xff] }
 0x438   : > { %v6735_v36 = vpack.c.bf16 %v2932_v35, %v2924_v34 }
 0x43a   : > { %6556 = vmatpush1.bf16.msra.mxu1 %v6555_v23  ;;  %v2949_v23 = vld [vmem:[#allocation16 + $0xce8] sm:$0xff] }
 0x43b   : > { %6702 = vmatprep.subr.bf16.mxu1 %v6701_v39  ;;  %v6737_v37 = vpack.c.bf16 %v2949_v23, %v2941_v30  ;;  %v2940_v39 = vld [vmem:[#allocation16 + $0xca0] sm:$0xff] }
 0x43c   : > { %v6739_v63 = vpack.c.bf16 %v2948_v40, %v2940_v39 }
 0x43d   : > { %2188 = vmatmul.mubr.f32.vlgmr.msra.gmra.mrb[24].mxu1 %v9348_v46  ;;  %v6709_v46 = vpack.c.bf16 %v2837_v7, %v2829_v45  ;;  %v2228_v7 = vld [vmem:[#allocation13] sm:$0xf] }
 0x43e   : > { %2193 = vmatprep.mubr.f32.mxu1 %v8657_v0  ;;  %6704 = vmatpush1.bf16.msra.mxu1 %v6703_v41  ;;  %v2237_v49 = vrot.slane %v2228_v7, %v9203_v4 }
 0x43f   : > { %6706 = vmatprep.subr.bf16.mxu1 %v6705_v21 }
 0x441   : > { %2194 = vmatmul.mubr.f32.gmra.mrb[26].mxu1 %v1966_v3  ;;  %v2844_v3 = vld [vmem:[#allocation16 + $0x9a0] sm:$0xff] }
 0x442   : > { %2199 = vmatprep.mubr.f32.mxu1 %v8657_v0  ;;  %6708 = vmatpush1.bf16.msra.mxu1 %v6707_v44  ;;  %v6715_v12 = vpack.c.bf16 %v2852_v5, %v2844_v3  ;;  %v2241_v3 = vrot.slane %v2228_v7, %v9361_v10 }
 0x443   : > { %6710 = vmatprep.subr.bf16.mxu1 %v6709_v46  ;;  %v2233_v46 = vrot.slane %v2228_v7, %v9200_v2 }
 0x445   : > { %2200 = vmatmul.mubr.f32.gmra.mrb[28].mxu1 %v1967_v17  ;;  %v2868_v17 = vld [vmem:[#allocation16 + $0xa60] sm:$0xff] }
 0x446   : > { %2205 = vmatprep.mubr.f32.mxu1 %v8657_v0  ;;  %6712 = vmatpush1.bf16.msra.mxu1 %v6711_v38  ;;  %v6719_v19 = vpack.c.bf16 %v2868_v17, %v2860_v15  ;;  %v9365_v38 = vsub.s32 3, %v9173_v52 }
 0x447   : > { %6714 = vmatprep.subr.bf16.mxu1 %v6713_v54  ;;  %v2271_v54 = vrot.slane %v2266_v47, %v9200_v2 }
 0x448   : > { %v2245_v11 = vrot.slane %v2228_v7, %v9365_v38  ;;  %v2283_v15 = vrot.slane %v2266_v47, %v9365_v38 }
 0x449   : > { %2206 = vmatmul.mubr.f32.gmra.mrb[30].mxu1 %v1968_v22  ;;  %v2893_v22 = vld [vmem:[#allocation16 + $0xb28] sm:$0xff] }
 0x44a   : > { %6716 = vmatpush1.bf16.msra.mxu1 %v6715_v12  ;;  %v6725_v18 = vpack.c.bf16 %v2901_v60, %v2893_v22  ;;  %v2279_v12 = vrot.slane %v2266_v47, %v9361_v10 }
 0x44b   : > { %6718 = vmatprep.subr.bf16.mxu1 %v6717_v57 }
 0x44e   : > { %6720 = vmatpush1.bf16.msra.mxu1 %v6719_v19 }
 0x44f   : > { %6722 = vmatprep.subr.bf16.mxu1 %v6721_v9 }
 0x452   : > { %6724 = vmatpush1.bf16.msra.mxu1 %v6723_v25 }
 0x453   : > { %6726 = vmatprep.subr.bf16.mxu1 %v6725_v18 }
 0x456   : > { %6728 = vmatpush1.bf16.msra.mxu1 %v6727_v29 }
 0x457   : > { %6730 = vmatprep.subr.bf16.mxu1 %v6729_v24 }
 0x45a   : > { %6732 = vmatpush1.bf16.msra.mxu1 %v6731_v33 }
 0x45b   : > { %6734 = vmatprep.subr.bf16.mxu1 %v6733_v62 }
 0x45e   : > { %6736 = vmatpush1.bf16.msra.mxu1 %v6735_v36 }
 0x45f   : > { %6738 = vmatprep.subr.bf16.mxu1 %v6737_v37 }
 0x462   : > { %6740 = vmatpush1.bf16.msra.mxu1 %v6739_v63 }
 0x4f0   : > { %v2100_v41 = vpop.f32.mrb[16].mxu1 }
 0x4f1   : > { %v2102_v42 = vpop.f32.mrb[17].mxu1  ;;  %v2250_v50 = vmul.f32 %v2233_v46, %v2100_v41 }
 0x4f2   : > { %v2251_v5 = vmul.f32 %v2237_v49, %v2102_v42 }
 0x4f3   : > { %v2288_v17 = vadd.f32 %v2271_v54, %v2250_v50 }
 0x4f4   : > { %v2106_v1 = vpop.f32.mrb[18].mxu1  ;;  %v2289_v9 = vadd.f32 %v2275_v56, %v2251_v5 }
 0x4f5   : > { %v2108_v21 = vpop.f32.mrb[19].mxu1  ;;  %v2254_v58 = vmul.f32 %v2233_v46, %v2106_v1  ;;  %v2304_v27 = vmax.f32 %v2288_v17, 0.0 }
 0x4f6   : > { %v2255_v20 = vmul.f32 %v2237_v49, %v2108_v21  ;;  %v2305_v61 = vmax.f32 %v2289_v9, 0.0 }
 0x4f7   : > { %v2292_v16 = vadd.f32 %v2271_v54, %v2254_v58 }
 0x4f8   : > { %v2112_v43 = vpop.f32.mrb[20].mxu1  ;;  %v2293_v31 = vadd.f32 %v2275_v56, %v2255_v20 }
 0x4f9   : > { %v2114_v6 = vpop.f32.mrb[21].mxu1  ;;  %v2258_v60 = vmul.f32 %v2233_v46, %v2112_v43  ;;  %v2308_v37 = vmax.f32 %v2292_v16, 0.0 }
 0x4fa   : > { %v2259_v25 = vmul.f32 %v2237_v49, %v2114_v6  ;;  %v2309_v42 = vmax.f32 %v2293_v31, 0.0  ;;  %v2817_v31 = vld [vmem:[#allocation16 + $0x8c8] sm:$0xff] }
 0x4fb   : > { %v2296_v34 = vadd.f32 %v2271_v54, %v2258_v60 }
 0x4fc   : > { %v2118_v44 = vpop.f32.mrb[22].mxu1  ;;  %v2297_v35 = vadd.f32 %v2275_v56, %v2259_v25 }
 0x4fd   : > { %v2120_v45 = vpop.f32.mrb[23].mxu1  ;;  %v2262_v39 = vmul.f32 %v2233_v46, %v2118_v44  ;;  %v2312_v47 = vmax.f32 %v2296_v34, 0.0  ;;  %v2825_v34 = vld [vmem:[#allocation16 + $0x908] sm:$0xff] }
 0x4fe   : > { %v2263_v1 = vmul.f32 %v2237_v49, %v2120_v45  ;;  %v2313_v50 = vmax.f32 %v2297_v35, 0.0  ;;  %v2833_v35 = vld [vmem:[#allocation16 + $0x948] sm:$0xff] }
 0x4ff   : > { %v2300_v58 = vadd.f32 %v2271_v54, %v2262_v39  ;;  %v2849_v39 = vld [vmem:[#allocation16 + $0x9c8] sm:$0xff] }
 0x500   : > { %v2301_v44 = vadd.f32 %v2275_v56, %v2263_v1  ;;  %v2801_v56 = vld [vmem:[#allocation16 + $0x848] sm:$0xff] }
 0x501   : > { %v2857_v1 = vld [vmem:[#allocation16 + $0xa08] sm:$0xff] }
 0x510   : > { %v2189_v57 = vpop.f32.mrb[24].mxu1 }
 0x511   : > { %v2252_v53 = vmul.f32 %v2241_v3, %v2189_v57  ;;  %v2191_v19 = vpop.f32.mrb[25].mxu1 }
 0x512   : > { %v2253_v59 = vmul.f32 %v2245_v11, %v2191_v19 }
 0x513   : > { %v2290_v22 = vadd.f32 %v2279_v12, %v2252_v53 }
 0x514   : > { %v2291_v18 = vadd.f32 %v2283_v15, %v2253_v59  ;;  %v2195_v26 = vpop.f32.mrb[26].mxu1 }
 0x515   : > { %v2306_v28 = vmax.f32 %v2290_v22, 0.0  ;;  %v2256_v29 = vmul.f32 %v2241_v3, %v2195_v26  ;;  %v2197_v24 = vpop.f32.mrb[27].mxu1 }
 0x516   : > { %v2307_v14 = vmax.f32 %v2291_v18, 0.0  ;;  %v2257_v32 = vmul.f32 %v2245_v11, %v2197_v24  ;;  %v2316_v18 = vmax.f32 %v2300_v58, 0.0  ;;  %v2880_v58 = vld [vmem:[#allocation16 + $0xac0] sm:$0xff] }
 0x517   : > { %v2320_v33 = vmax.f32 %v2304_v27, %v2306_v28  ;;  %v2294_v62 = vadd.f32 %v2279_v12, %v2256_v29  ;;  %v2317_v27 = vmax.f32 %v2301_v44, 0.0  ;;  %v2888_v44 = vld [vmem:[#allocation16 + $0xb00] sm:$0xff] }
 0x518   : > { %v2321_v30 = vmax.f32 %v2305_v61, %v2307_v14  ;;  %v2295_v23 = vadd.f32 %v2283_v15, %v2257_v32  ;;  %v2201_v36 = vpop.f32.mrb[28].mxu1  ;;  %v2809_v61 = vld [vmem:[#allocation16 + $0x888] sm:$0xff] }
 0x519   : > { %v2310_v40 = vmax.f32 %v2294_v62, 0.0  ;;  %v2260_v63 = vmul.f32 %v2241_v3, %v2201_v36  ;;  %v2203_v41 = vpop.f32.mrb[29].mxu1  ;;  %v6577_v32 = vpack.c.bf16 %v2817_v31, %v2809_v61  ;;  %v2816_v62 = vld [vmem:[#allocation16 + $0x8c0] sm:$0xff]  ;;  %v2953_v61 = vld [vmem:[#allocation16 + $0xd08] sm:$0xff] }
 0x51a   : > { %v2311_v21 = vmax.f32 %v2295_v23, 0.0  ;;  %v2261_v43 = vmul.f32 %v2245_v11, %v2203_v41  ;;  %v6581_v23 = vpack.c.bf16 %v2833_v35, %v2825_v34  ;;  %v2832_v36 = vld [vmem:[#allocation16 + $0x940] sm:$0xff]  ;;  %v2961_v31 = vld [vmem:[#allocation16 + $0xd48] sm:$0xff] }
 0x51b   : > { %v2322_v6 = vmax.f32 %v2308_v37, %v2310_v40  ;;  %v2298_v7 = vadd.f32 %v2279_v12, %v2260_v63  ;;  %v2841_v37 = vld [vmem:[#allocation16 + $0x988] sm:$0xff]  ;;  %v2840_v41 = vld [vmem:[#allocation16 + $0x980] sm:$0xff] }
 0x51c   : > { %v2323_v5 = vmax.f32 %v2309_v42, %v2311_v21  ;;  %v2299_v57 = vadd.f32 %v2283_v15, %v2261_v43  ;;  %v2207_v17 = vpop.f32.mrb[30].mxu1  ;;  %v6585_v63 = vpack.c.bf16 %v2849_v39, %v2841_v37  ;;  %v2848_v42 = vld [vmem:[#allocation16 + $0x9c0] sm:$0xff]  ;;  %v2865_v21 = vld [vmem:[#allocation16 + $0xa48] sm:$0xff] }
 0x51d   : > { %v6559_v53 = vpack.c.bf16 %v2322_v6, %v2320_v33  ;;  %v2314_v19 = vmax.f32 %v2298_v7, 0.0  ;;  %v2264_v9 = vmul.f32 %v2241_v3, %v2207_v17  ;;  %v2209_v20 = vpop.f32.mrb[31].mxu1  ;;  %v2793_v3 = vld [vmem:[#allocation16 + $0x808] sm:$0xff]  ;;  %v2808_v33 = vld [vmem:[#allocation16 + $0x880] sm:$0xff]  ;;  %v6587_v43 = vpack.c.bf16 %v2848_v42, %v2840_v41 }
 0x51e   : > { %v2315_v46 = vmax.f32 %v2299_v57, 0.0  ;;  %v2265_v59 = vmul.f32 %v2245_v11, %v2209_v20  ;;  %v6557_v22 = vpack.c.bf16 %v2323_v5, %v2321_v30  ;;  %v6573_v11 = vpack.c.bf16 %v2801_v56, %v2793_v3  ;;  %v2856_v7 = vld [vmem:[#allocation16 + $0xa00] sm:$0xff]  ;;  %v2881_v5 = vld [vmem:[#allocation16 + $0xac8] sm:$0xff] }
 0x51f   : > { %v2324_v60 = vmax.f32 %v2312_v47, %v2314_v19  ;;  %v2302_v45 = vadd.f32 %v2279_v12, %v2264_v9  ;;  %v2792_v12 = vld [vmem:[#allocation16 + $0x800] sm:$0xff]  ;;  %v6579_v30 = vpack.c.bf16 %v2816_v62, %v2808_v33  ;;  %v6589_v6 = vpack.c.bf16 %v2865_v21, %v2857_v1  ;;  %v2897_v19 = vld [vmem:[#allocation16 + $0xb48] sm:$0xff] }
 0x520   : > { %v2325_v49 = vmax.f32 %v2313_v50, %v2315_v46  ;;  %v2303_v25 = vadd.f32 %v2283_v15, %v2265_v59  ;;  %6558 = vmatprep.subr.bf16.mxu0 %v6557_v22  ;;  %v2800_v15 = vld [vmem:[#allocation16 + $0x840] sm:$0xff]  ;;  %v2873_v50 = vld [vmem:[#allocation16 + $0xa88] sm:$0xff] }
 0x521   : > { %v2318_v26 = vmax.f32 %v2302_v45, 0.0  ;;  %6560 = vmatpush1.bf16.msra.mxu0 %v6559_v53  ;;  %v6575_v14 = vpack.c.bf16 %v2800_v15, %v2792_v12  ;;  %v2864_v47 = vld [vmem:[#allocation16 + $0xa40] sm:$0xff]  ;;  %v2905_v59 = vld [vmem:[#allocation16 + $0xb88] sm:$0xff] }
 0x522   : > { %v2319_v16 = vmax.f32 %v2303_v25, 0.0  ;;  %v6591_v57 = vpack.c.bf16 %v2864_v47, %v2856_v7  ;;  %v2872_v17 = vld [vmem:[#allocation16 + $0xa80] sm:$0xff]  ;;  %v2965_v33 = vld [vmem:[#allocation16 + $0xd68] sm:$0xff] }
 0x523   : > { %v2326_v28 = vmax.f32 %v2316_v18, %v2318_v26  ;;  %v6595_v9 = vpack.c.bf16 %v2880_v58, %v2872_v17  ;;  %v2896_v46 = vld [vmem:[#allocation16 + $0xb40] sm:$0xff]  ;;  %v2921_v18 = vld [vmem:[#allocation16 + $0xc08] sm:$0xff] }
 0x524   : > { %v2327_v54 = vmax.f32 %v2317_v27, %v2319_v16  ;;  %v2912_v25 = vld [vmem:[#allocation16 + $0xbc0] sm:$0xff]  ;;  %v2929_v26 = vld [vmem:[#allocation16 + $0xc48] sm:$0xff] }
 0x525   : > { %v6563_v29 = vpack.c.bf16 %v2326_v28, %v2324_v60  ;;  %v6599_v60 = vpack.c.bf16 %v2896_v46, %v2888_v44  ;;  %v6605_v16 = vpack.c.bf16 %v2929_v26, %v2921_v18  ;;  %v2920_v28 = vld [vmem:[#allocation16 + $0xc00] sm:$0xff]  ;;  %v2969_v37 = vld [vmem:[#allocation16 + $0xd88] sm:$0xff] }
 0x526   : > { %v6561_v24 = vpack.c.bf16 %v2327_v54, %v2325_v49  ;;  %v2904_v49 = vld [vmem:[#allocation16 + $0xb80] sm:$0xff]  ;;  %v2977_v39 = vld [vmem:[#allocation16 + $0xdc8] sm:$0xff] }
 0x527   : > { %v6603_v27 = vpack.c.bf16 %v2912_v25, %v2904_v49  ;;  %v2928_v54 = vld [vmem:[#allocation16 + $0xc40] sm:$0xff]  ;;  %v2981_v41 = vld [vmem:[#allocation16 + $0xde8] sm:$0xff] }
 0x528   : > { %6562 = vmatprep.subr.bf16.mxu0 %v6561_v24  ;;  %v6607_v3 = vpack.c.bf16 %v2928_v54, %v2920_v28  ;;  %v2944_v12 = vld [vmem:[#allocation16 + $0xcc0] sm:$0xff]  ;;  %v2997_v17 = vld [vmem:[#allocation16 + $0xe68] sm:$0xff] }
 0x529   : > { %6564 = vmatpush1.bf16.msra.mxu0 %v6563_v29  ;;  %v2952_v62 = vld [vmem:[#allocation16 + $0xd00] sm:$0xff]  ;;  %v3013_v49 = vld [vmem:[#allocation16 + $0xee8] sm:$0xff] }
 0x52a   : > { %6566 = vmatprep.subr.bf16.mxu0 %v6557_v22  ;;  %v2913_v22 = vld [vmem:[#allocation16 + $0xbc8] sm:$0xff]  ;;  %v2960_v34 = vld [vmem:[#allocation16 + $0xd40] sm:$0xff] }
 0x52b   : > { %v6601_v45 = vpack.c.bf16 %v2913_v22, %v2905_v59  ;;  %v2968_v42 = vld [vmem:[#allocation16 + $0xd80] sm:$0xff]  ;;  %v3001_v59 = vld [vmem:[#allocation16 + $0xe88] sm:$0xff] }
 0x52c   : > { %6189 = vmatmul.mubr.msk.f32.vlgmr.msra.gmra.mrb[16].mxu0 %vm2328_vm11, %v9181_v55  ;;  %v2976_v1 = vld [vmem:[#allocation16 + $0xdc0] sm:$0xff]  ;;  %v3009_v22 = vld [vmem:[#allocation16 + $0xec8] sm:$0xff] }
 0x52d   : > { %6568 = vmatpush1.bf16.msra.mxu0 %v6559_v53  ;;  %2403 = vmatprep.mubr.f32.mxu0 %v8657_v0  ;;  %v2889_v53 = vld [vmem:[#allocation16 + $0xb08] sm:$0xff]  ;;  %v2980_v7 = vld [vmem:[#allocation16 + $0xde0] sm:$0xff] }
 0x52e   : > { %6570 = vmatprep.subr.bf16.mxu0 %v6561_v24  ;;  %v6597_v20 = vpack.c.bf16 %v2897_v19, %v2889_v53  ;;  %v2945_v24 = vld [vmem:[#allocation16 + $0xcc8] sm:$0xff]  ;;  %v2984_v58 = vld [vmem:[#allocation16 + $0xe00] sm:$0xff] }
 0x52f   : > { %v2992_v53 = vld [vmem:[#allocation16 + $0xe40] sm:$0xff] }
 0x530   : > { %6190 = vmatmul.mubr.msk.f32.gmra.mrb[18].mxu0 %vm2328_vm11, %v9264_v8  ;;  %v2824_v8 = vld [vmem:[#allocation16 + $0x900] sm:$0xff] }
 0x531   : > { %6572 = vmatpush1.bf16.msra.mxu0 %v6563_v29  ;;  %2478 = vmatprep.mubr.f32.mxu0 %v8657_v0  ;;  %v6583_v40 = vpack.c.bf16 %v2832_v36, %v2824_v8  ;;  %v2937_v29 = vld [vmem:[#allocation16 + $0xc88] sm:$0xff]  ;;  %v2964_v8 = vld [vmem:[#allocation16 + $0xd60] sm:$0xff] }
 0x532   : > { %6574 = vmatprep.subr.bf16.mxu0 %v6573_v11  ;;  %v6609_v56 = vpack.c.bf16 %v2945_v24, %v2937_v29  ;;  %v2936_v11 = vld [vmem:[#allocation16 + $0xc80] sm:$0xff]  ;;  %v3017_v29 = vld [vmem:[#allocation16 + $0xf08] sm:$0xff] }
 0x533   : > { %v6611_v15 = vpack.c.bf16 %v2944_v12, %v2936_v11  ;;  %v2996_v44 = vld [vmem:[#allocation16 + $0xe60] sm:$0xff]  ;;  %v3025_v24 = vld [vmem:[#allocation16 + $0xf48] sm:$0xff] }
 0x534   : > { %6191 = vmatmul.mubr.msk.f32.vlgmr.msra.gmra.mrb[20].mxu0 %vm2328_vm11, %v9278_v48  ;;  %v3000_v25 = vld [vmem:[#allocation16 + $0xe80] sm:$0xff]  ;;  %v3029_v11 = vld [vmem:[#allocation16 + $0xf68] sm:$0xff] }
 0x535   : > { %2484 = vmatprep.mubr.f32.mxu0 %v8657_v0  ;;  %6576 = vmatpush1.bf16.msra.mxu0 %v6575_v14  ;;  %v2957_v14 = vld [vmem:[#allocation16 + $0xd28] sm:$0xff]  ;;  %v3008_v18 = vld [vmem:[#allocation16 + $0xec0] sm:$0xff] }
 0x536   : > { %6578 = vmatprep.subr.bf16.mxu0 %v6577_v32  ;;  %v6613_v32 = vpack.c.bf16 %v2961_v31, %v2953_v61  ;;  %v6741_v35 = vpack.c.bf16 %v2965_v33, %v2957_v14  ;;  %v3012_v28 = vld [vmem:[#allocation16 + $0xee0] sm:$0xff]  ;;  %v3033_v33 = vld [vmem:[#allocation16 + $0xf88] sm:$0xff] }
 0x537   : > { %v3016_v12 = vld [vmem:[#allocation16 + $0xf00] sm:$0xff] }
 0x538   : > { %6192 = vmatmul.mubr.msk.f32.gmra.mrb[22].mxu0 %vm2328_vm11, %v9286_v13  ;;  %v6593_v13 = vpack.c.bf16 %v2881_v5, %v2873_v50  ;;  %6742 = vmatprep.subr.bf16.mxu1 %v6741_v35  ;;  %v2985_v50 = vld [vmem:[#allocation16 + $0xe08] sm:$0xff]  ;;  %v3020_v14 = vld [vmem:[#allocation16 + $0xf20] sm:$0xff] }
 0x539   : > { %6580 = vmatpush1.bf16.msra.mxu0 %v6579_v30  ;;  %v6615_v30 = vpack.c.bf16 %v2960_v34, %v2952_v62  ;;  %v2993_v5 = vld [vmem:[#allocation16 + $0xe48] sm:$0xff] }
 0x53a   : > { %6582 = vmatprep.subr.bf16.mxu0 %v6581_v23  ;;  %v2956_v23 = vld [vmem:[#allocation16 + $0xd20] sm:$0xff]  ;;  %v3041_v62 = vld [vmem:[#allocation16 + $0xfc8] sm:$0xff] }
 0x53b   : > { %v6743_v36 = vpack.c.bf16 %v2964_v8, %v2956_v23  ;;  %v3037_v34 = vld [vmem:[#allocation16 + $0xfa8] sm:$0xff]  ;;  %v6633_v35 = vpack.c.bf16 %v3041_v62, %v3033_v33  ;;  %v3032_v23 = vld [vmem:[#allocation16 + $0xf80] sm:$0xff] }
 0x53c   : > { %v3040_v8 = vld [vmem:[#allocation16 + $0xfc0] sm:$0xff] }
 0x53d   : > { %6584 = vmatpush1.bf16.msra.mxu0 %v6583_v40  ;;  %v2973_v40 = vld [vmem:[#allocation16 + $0xda8] sm:$0xff]  ;;  %6744 = vmatpush1.bf16.msra.mxu1 %v6743_v36 }
 0x53e   : > { %6586 = vmatprep.subr.bf16.mxu0 %v6585_v63  ;;  %v6617_v63 = vpack.c.bf16 %v2977_v39, %v2969_v37  ;;  %v6745_v21 = vpack.c.bf16 %v2981_v41, %v2973_v40  ;;  %v6635_v37 = vpack.c.bf16 %v3040_v8, %v3032_v23  ;;  %v3036_v39 = vld [vmem:[#allocation16 + $0xfa0] sm:$0xff]  ;;  %v2795_v41 = vld [vmem:[#allocation16 + $0x818] sm:$0xff] }
 0x53f   : > { %v3044_v40 = vld [vmem:[#allocation16 + $0xfe0] sm:$0xff] }
 0x540   : > { %6746 = vmatprep.subr.bf16.mxu1 %v6745_v21 }
 0x541   : > { %6588 = vmatpush1.bf16.msra.mxu0 %v6587_v43  ;;  %v6619_v43 = vpack.c.bf16 %v2976_v1, %v2968_v42  ;;  %v2803_v42 = vld [vmem:[#allocation16 + $0x858] sm:$0xff]  ;;  %v2536_v1 = vld [vmem:[#allocation16 + $0x28] sm:$0xff] }
 0x542   : > { %6590 = vmatprep.subr.bf16.mxu0 %v6589_v6  ;;  %v2972_v6 = vld [vmem:[#allocation16 + $0xda0] sm:$0xff]  ;;  %v6637_v21 = vpack.c.bf16 %v2803_v42, %v2795_v41 }
 0x543   : > { %v6747_v47 = vpack.c.bf16 %v2980_v7, %v2972_v6 }
 0x545   : > { %6592 = vmatpush1.bf16.msra.mxu0 %v6591_v57  ;;  %v2989_v57 = vld [vmem:[#allocation16 + $0xe28] sm:$0xff]  ;;  %6748 = vmatpush1.bf16.msra.mxu1 %v6747_v47 }
 0x546   : > { %6594 = vmatprep.subr.bf16.mxu0 %v6593_v13  ;;  %v6621_v13 = vpack.c.bf16 %v2993_v5, %v2985_v50  ;;  %v6749_v19 = vpack.c.bf16 %v2997_v17, %v2989_v57 }
 0x548   : > { %6750 = vmatprep.subr.bf16.mxu1 %v6749_v19 }
 0x549   : > { %6596 = vmatpush1.bf16.msra.mxu0 %v6595_v9  ;;  %v6623_v9 = vpack.c.bf16 %v2992_v53, %v2984_v58 }
 0x54a   : > { %6598 = vmatprep.subr.bf16.mxu0 %v6597_v20  ;;  %v2988_v20 = vld [vmem:[#allocation16 + $0xe20] sm:$0xff] }
 0x54b   : > { %v6751_v46 = vpack.c.bf16 %v2996_v44, %v2988_v20 }
 0x54d   : > { %6600 = vmatpush1.bf16.msra.mxu0 %v6599_v60  ;;  %v3005_v60 = vld [vmem:[#allocation16 + $0xea8] sm:$0xff]  ;;  %6752 = vmatpush1.bf16.msra.mxu1 %v6751_v46 }
 0x54e   : > { %6602 = vmatprep.subr.bf16.mxu0 %v6601_v45  ;;  %v6625_v45 = vpack.c.bf16 %v3009_v22, %v3001_v59  ;;  %v6753_v26 = vpack.c.bf16 %v3013_v49, %v3005_v60  ;;  %v2794_v49 = vld [vmem:[#allocation16 + $0x810] sm:$0xff] }
 0x550   : > { %6754 = vmatprep.subr.bf16.mxu1 %v6753_v26  ;;  %v2543_v26 = vld [vmem:[#allocation16 + $0x60] sm:$0xff] }
 0x551   : > { %6604 = vmatpush1.bf16.msra.mxu0 %v6603_v27  ;;  %v6627_v27 = vpack.c.bf16 %v3008_v18, %v3000_v25  ;;  %v2802_v25 = vld [vmem:[#allocation16 + $0x850] sm:$0xff]  ;;  %v2535_v18 = vld [vmem:[#allocation16 + $0x20] sm:$0xff] }
 0x552   : > { %6606 = vmatprep.subr.bf16.mxu0 %v6605_v16  ;;  %v3004_v16 = vld [vmem:[#allocation16 + $0xea0] sm:$0xff] }
 0x553   : > { %v6755_v54 = vpack.c.bf16 %v3012_v28, %v3004_v16  ;;  %v2811_v16 = vld [vmem:[#allocation16 + $0x898] sm:$0xff] }
 0x554   : > { %v2819_v28 = vld [vmem:[#allocation16 + $0x8d8] sm:$0xff] }
 0x555   : > { %6608 = vmatpush1.bf16.msra.mxu0 %v6607_v3  ;;  %v3021_v3 = vld [vmem:[#allocation16 + $0xf28] sm:$0xff]  ;;  %6756 = vmatpush1.bf16.msra.mxu1 %v6755_v54 }
 0x556   : > { %6610 = vmatprep.subr.bf16.mxu0 %v6609_v56  ;;  %v6629_v56 = vpack.c.bf16 %v3025_v24, %v3017_v29  ;;  %v6757_v61 = vpack.c.bf16 %v3029_v11, %v3021_v3  ;;  %v2552_v24 = vld [vmem:[#allocation16 + $0xa8] sm:$0xff] }
 0x557   : > { %v2560_v3 = vld [vmem:[#allocation16 + $0xe8] sm:$0xff] }
 0x558   : > { %6758 = vmatprep.subr.bf16.mxu1 %v6757_v61  ;;  %v6959_v61 = vpack.c.bf16 %v2543_v26, %v2535_v18  ;;  %v6961_v33 = vpack.c.bf16 %v2560_v3, %v2552_v24  ;;  %v2867_v18 = vld [vmem:[#allocation16 + $0xa58] sm:$0xff]  ;;  %v2600_v26 = vld [vmem:[#allocation16 + $0x228] sm:$0xff] }
 0x559   : > { %6612 = vmatpush1.bf16.msra.mxu0 %v6611_v15  ;;  %v3024_v15 = vld [vmem:[#allocation16 + $0xf40] sm:$0xff] }
 0x55a   : > { %6614 = vmatprep.subr.bf16.mxu0 %v6613_v32  ;;  %v6631_v31 = vpack.c.bf16 %v3024_v15, %v3016_v12  ;;  %v3028_v32 = vld [vmem:[#allocation16 + $0xf60] sm:$0xff]  ;;  %v6639_v15 = vpack.c.bf16 %v2802_v25, %v2794_v49  ;;  %v2859_v25 = vld [vmem:[#allocation16 + $0xa18] sm:$0xff] }
 0x55b   : > { %v6759_v51 = vpack.c.bf16 %v3028_v32, %v3020_v14  ;;  %v2818_v14 = vld [vmem:[#allocation16 + $0x8d0] sm:$0xff]  ;;  %v2591_v49 = vld [vmem:[#allocation16 + $0x1e0] sm:$0xff]  ;;  %v6653_v24 = vpack.c.bf16 %v2867_v18, %v2859_v25  ;;  %v2664_v25 = vld [vmem:[#allocation16 + $0x428] sm:$0xff] }
 0x55c   : > { %v2672_v18 = vld [vmem:[#allocation16 + $0x468] sm:$0xff] }
 0x55d   : > { %6616 = vmatpush1.bf16.msra.mxu0 %v6615_v30  ;;  %6760 = vmatpush1.bf16.msra.mxu1 %v6759_v51  ;;  %v3045_v30 = vld [vmem:[#allocation16 + $0xfe8] sm:$0xff]  ;;  %v6641_v51 = vpack.c.bf16 %v2819_v28, %v2811_v16 }
 0x55e   : > { %6618 = vmatprep.subr.bf16.mxu0 %v6617_v63  ;;  %v6761_v36 = vpack.c.bf16 %v3045_v30, %v3037_v34  ;;  %v6763_v63 = vpack.c.bf16 %v3044_v40, %v3036_v39  ;;  %v2551_v34 = vld [vmem:[#allocation16 + $0xa0] sm:$0xff]  ;;  %v2835_v39 = vld [vmem:[#allocation16 + $0x958] sm:$0xff]  ;;  %v2568_v40 = vld [vmem:[#allocation16 + $0x128] sm:$0xff] }
 0x560   : > { %6762 = vmatprep.subr.bf16.mxu1 %v6761_v36  ;;  %v2827_v36 = vld [vmem:[#allocation16 + $0x918] sm:$0xff] }
 0x561   : > { %6620 = vmatpush1.bf16.msra.mxu0 %v6619_v43  ;;  %6764 = vmatpush1.bf16.msra.mxu1 %v6763_v63  ;;  %v2544_v43 = vld [vmem:[#allocation16 + $0x68] sm:$0xff] }
 0x562   : > { %6622 = vmatprep.subr.bf16.mxu0 %v6621_v13  ;;  %v6957_v6 = vpack.c.bf16 %v2544_v43, %v2536_v1  ;;  %v2576_v63 = vld [vmem:[#allocation16 + $0x168] sm:$0xff]  ;;  %v2826_v1 = vld [vmem:[#allocation16 + $0x910] sm:$0xff] }
 0x564   : > { %6958 = vmatprep.subr.bf16.mxu1 %v6957_v6  ;;  %v2567_v6 = vld [vmem:[#allocation16 + $0x120] sm:$0xff] }
 0x565   : > { %6624 = vmatpush1.bf16.msra.mxu0 %v6623_v9 }
 0x566   : > { %6626 = vmatprep.subr.bf16.mxu0 %v6625_v45 }
 0x569   : > { %6628 = vmatpush1.bf16.msra.mxu0 %v6627_v27 }
 0x56a   : > { %6630 = vmatprep.subr.bf16.mxu0 %v6629_v56 }
 0x56d   : > { %6632 = vmatpush1.bf16.msra.mxu0 %v6631_v31  ;;  %v2810_v31 = vld [vmem:[#allocation16 + $0x890] sm:$0xff] }
 0x56e   : > { %6634 = vmatprep.subr.bf16.mxu0 %v6633_v35  ;;  %v2559_v35 = vld [vmem:[#allocation16 + $0xe0] sm:$0xff]  ;;  %v6643_v41 = vpack.c.bf16 %v2818_v14, %v2810_v31  ;;  %v2624_v31 = vld [vmem:[#allocation16 + $0x2e8] sm:$0xff] }
 0x56f   : > { %v6963_v42 = vpack.c.bf16 %v2559_v35, %v2551_v34 }
 0x571   : > { %6636 = vmatpush1.bf16.msra.mxu0 %v6635_v37 }
 0x572   : > { %6638 = vmatprep.subr.bf16.mxu0 %v6637_v21  ;;  %v2834_v21 = vld [vmem:[#allocation16 + $0x950] sm:$0xff] }
 0x5ff   : > { %v2399_v7 = vpop.f32.mrb[16].mxu0 }
 0x600   : > { %v2401_v47 = vpop.f32.mrb[17].mxu0 }
 0x603   : > { %v2405_v50 = vpop.f32.mrb[18].mxu0 }
 0x604   : > { %v2407_v5 = vpop.f32.mrb[19].mxu0 }
 0x607   : > { %v2480_v57 = vpop.f32.mrb[20].mxu0 }
 0x608   : > { %v2491_v13 = vmax.f32 %v2399_v7, %v2480_v57  ;;  %v2482_v17 = vpop.f32.mrb[21].mxu0  ;;  %v2575_v7 = vld [vmem:[#allocation16 + $0x160] sm:$0xff]  ;;  %v6965_v57 = vpack.c.bf16 %v2576_v63, %v2568_v40  ;;  %v2640_v40 = vld [vmem:[#allocation16 + $0x368] sm:$0xff] }
 0x609   : > { %v2492_v58 = vmax.f32 %v2401_v47, %v2482_v17  ;;  %v2843_v47 = vld [vmem:[#allocation16 + $0x998] sm:$0xff]  ;;  %v2584_v17 = vld [vmem:[#allocation16 + $0x1a8] sm:$0xff] }
 0x60a   : > { %v2509_v53 = vrot.slane %v2491_v13, 7  ;;  %v2851_v13 = vld [vmem:[#allocation16 + $0x9d8] sm:$0xff] }
 0x60b   : > { %v2510_v19 = vrot.slane %v2492_v58, 7  ;;  %v2486_v9 = vpop.f32.mrb[22].mxu0  ;;  %v2592_v58 = vld [vmem:[#allocation16 + $0x1e8] sm:$0xff] }
 0x60c   : > { %2521 = vst [vmem:[#allocation4] sm:$0xfe] %v2509_v53  ;;  %v2493_v20 = vmax.f32 %v2405_v50, %v2486_v9  ;;  %v2488_v44 = vpop.f32.mrb[23].mxu0  ;;  %v6967_v9 = vpack.c.bf16 %v2575_v7, %v2567_v6  ;;  %v2631_v7 = vld [vmem:[#allocation16 + $0x320] sm:$0xff] }
 0x60d   : > { %2522 = vst [vmem:[#allocation4 + $0x8] sm:$0xfe] %v2510_v19  ;;  %v2494_v46 = vmax.f32 %v2407_v5, %v2488_v44  ;;  %v6645_v5 = vpack.c.bf16 %v2835_v39, %v2827_v36  ;;  %v2850_v44 = vld [vmem:[#allocation16 + $0x9d0] sm:$0xff]  ;;  %v2891_v36 = vld [vmem:[#allocation16 + $0xb18] sm:$0xff]  ;;  %v2632_v39 = vld [vmem:[#allocation16 + $0x328] sm:$0xff] }
 0x60e   : > { %v2511_v59 = vrot.slane %v2493_v20, 7  ;;  %v2842_v20 = vld [vmem:[#allocation16 + $0x990] sm:$0xff]  ;;  %v6981_v6 = vpack.c.bf16 %v2640_v40, %v2632_v39 }
 0x60f   : > { %v2513_v22 = vrot.slane %v2494_v46, 7  ;;  %v6649_v46 = vpack.c.bf16 %v2851_v13, %v2843_v47  ;;  %v6651_v16 = vpack.c.bf16 %v2850_v44, %v2842_v20  ;;  %v2639_v47 = vld [vmem:[#allocation16 + $0x360] sm:$0xff]  ;;  %v2648_v13 = vld [vmem:[#allocation16 + $0x3a8] sm:$0xff] }
 0x610   : > { %v9387_v60 = vsel %vm2508_vm13, %v2509_v53, %v2511_v59  ;;  %2525 = vst [vmem:[#allocation4 + $0x20] sm:$0x1] %v2511_v59  ;;  %v6969_v59 = vpack.c.bf16 %v2592_v58, %v2584_v17  ;;  %v2656_v17 = vld [vmem:[#allocation16 + $0x3e8] sm:$0xff] }
 0x611   : > { %2523 = vst [vmem:[#allocation4 + $0x10] sm:$0xff] %v9387_v60  ;;  %v9390_v45 = vsel %vm2508_vm13, %v2510_v19, %v2513_v22  ;;  %2526 = vst [vmem:[#allocation4 + $0x28] sm:$0x1] %v2513_v22  ;;  %v3056_v12 = vrot.slane %v9387_v60, 1  ;;  %v6647_v19 = vpack.c.bf16 %v2834_v21, %v2826_v1  ;;  %v2583_v22 = vld [vmem:[#allocation16 + $0x1a0] sm:$0xff]  ;;  %v2898_v1 = vld [vmem:[#allocation16 + $0xb50] sm:$0xff]  ;;  %v6985_v44 = vpack.c.bf16 %v2656_v17, %v2648_v13 }
 0x612   : > { %2524 = vst [vmem:[#allocation4 + $0x18] sm:$0xff] %v9390_v45  ;;  %v3059_v11 = vrot.slane %v9390_v45, 1  ;;  %v6971_v28 = vpack.c.bf16 %v2591_v49, %v2583_v22  ;;  %v2923_v22 = vld [vmem:[#allocation16 + $0xc18] sm:$0xff] }
 0x613   : > { %v2787_v27 = vld [vmem:[#allocation4] sm:$0xfe]  ;;  %v2931_v49 = vld [vmem:[#allocation16 + $0xc58] sm:$0xff] }
 0x614   : > { %v2788_v54 = vld [vmem:[#allocation4 + $0x8] sm:$0xfe]  ;;  %v3055_v29 = vrot.slane %v2787_v27, 1 }
 0x615   : > { %v3058_v56 = vrot.slane %v2788_v54, 1  ;;  %v2528_v53 = vld [vmem:[#allocation4 + $0x8] sm:$0xff] }
 0x616   : > { %v9401_v30 = vsel %vm3054_vm14, %v3055_v29, %v3056_v12  ;;  %v2608_v27 = vld [vmem:[#allocation16 + $0x268] sm:$0xff]  ;;  %v2858_v54 = vld [vmem:[#allocation16 + $0xa10] sm:$0xff] }
 0x617   : > { %v9396_v32 = vsel %vm3054_vm14, %v3058_v56, %v3059_v11  ;;  %v2789_v62 = vld [vmem:[#allocation4 + $0x20] sm:$0x1]  ;;  %v2866_v29 = vld [vmem:[#allocation16 + $0xa50] sm:$0xff]  ;;  %v6973_v3 = vpack.c.bf16 %v2608_v27, %v2600_v26 }
 0x618   : > { %3133 = vmatprep.mubr.f32.mxu0 %v9396_v32  ;;  %3287 = vmatprep.mubr.f32.mxu1 %v9396_v32  ;;  %v2790_v23 = vld [vmem:[#allocation4 + $0x28] sm:$0x1]  ;;  %v3061_v8 = vrot.slane %v2789_v62, 1  ;;  %v2599_v56 = vld [vmem:[#allocation16 + $0x220] sm:$0xff]  ;;  %v6655_v14 = vpack.c.bf16 %v2866_v29, %v2858_v54  ;;  %v2882_v62 = vld [vmem:[#allocation16 + $0xad0] sm:$0xff]  ;;  %v6669_v54 = vpack.c.bf16 %v2931_v49, %v2923_v22  ;;  %v6989_v29 = vpack.c.bf16 %v2672_v18, %v2664_v25 }
 0x619   : > { %3134 = vmatmul.mubr.f32.vlgmr.msra.gmra.mrb[24].mxu0 %v9401_v30  ;;  %3288 = vmatmul.mubr.f32.vlgmr.msra.gmra.mrb[32].mxu1 %v9401_v30  ;;  %v3063_v37 = vrot.slane %v2790_v23, 1  ;;  %v2615_v23 = vld [vmem:[#allocation16 + $0x2a0] sm:$0xff]  ;;  %v2728_v22 = vld [vmem:[#allocation16 + $0x628] sm:$0xff] }
 0x61a   : > { %6640 = vmatpush1.bf16.msra.mxu0 %v6639_v15  ;;  %6960 = vmatpush1.bf16.msra.mxu1 %v6959_v61  ;;  %v9411_v50 = vsel %vm3054_vm14, %v3056_v12, %v3061_v8  ;;  %v2875_v12 = vld [vmem:[#allocation16 + $0xa98] sm:$0xff]  ;;  %v2616_v61 = vld [vmem:[#allocation16 + $0x2a8] sm:$0xff]  ;;  %v2623_v8 = vld [vmem:[#allocation16 + $0x2e0] sm:$0xff] }
 0x61b   : > { %v9406_v43 = vsel %vm3054_vm14, %v3059_v11, %v3063_v37  ;;  %6642 = vmatprep.subr.bf16.mxu0 %v6641_v51  ;;  %6962 = vmatprep.subr.bf16.mxu1 %v6961_v33  ;;  %v2607_v11 = vld [vmem:[#allocation16 + $0x260] sm:$0xff]  ;;  %v2883_v15 = vld [vmem:[#allocation16 + $0xad8] sm:$0xff]  ;;  %v2874_v33 = vld [vmem:[#allocation16 + $0xa90] sm:$0xff]  ;;  %v6977_v35 = vpack.c.bf16 %v2624_v31, %v2616_v61 }
 0x61c   : > { %3139 = vmatprep.mubr.f32.mxu0 %v9406_v43  ;;  %3293 = vmatprep.mubr.f32.mxu1 %v9406_v43  ;;  %v6975_v51 = vpack.c.bf16 %v2607_v11, %v2599_v56  ;;  %v6657_v34 = vpack.c.bf16 %v2883_v15, %v2875_v12  ;;  %v2899_v37 = vld [vmem:[#allocation16 + $0xb58] sm:$0xff]  ;;  %v6659_v63 = vpack.c.bf16 %v2882_v62, %v2874_v33  ;;  %v2680_v12 = vld [vmem:[#allocation16 + $0x4a8] sm:$0xff] }
 0x61d   : > { %3140 = vmatmul.mubr.f32.gmra.mrb[26].mxu0 %v9411_v50  ;;  %3294 = vmatmul.mubr.f32.gmra.mrb[34].mxu1 %v9411_v50  ;;  %v6661_v21 = vpack.c.bf16 %v2899_v37, %v2891_v36  ;;  %v2939_v56 = vld [vmem:[#allocation16 + $0xc98] sm:$0xff]  ;;  %v2688_v15 = vld [vmem:[#allocation16 + $0x4e8] sm:$0xff] }
 0x61e   : > { %6644 = vmatpush1.bf16.msra.mxu0 %v6643_v41  ;;  %6964 = vmatpush1.bf16.msra.mxu1 %v6963_v42  ;;  %v6979_v41 = vpack.c.bf16 %v2623_v8, %v2615_v23  ;;  %v2890_v42 = vld [vmem:[#allocation16 + $0xb10] sm:$0xff]  ;;  %v2947_v11 = vld [vmem:[#allocation16 + $0xcd8] sm:$0xff]  ;;  %v6993_v62 = vpack.c.bf16 %v2688_v15, %v2680_v12  ;;  %v2696_v36 = vld [vmem:[#allocation16 + $0x528] sm:$0xff] }
 0x61f   : > { %3210 = vmatprep.mubr.f32.mxu0 %v9396_v32  ;;  %3595 = vmatprep.mubr.f32.mxu1 %v2528_v53  ;;  %v6663_v58 = vpack.c.bf16 %v2898_v1, %v2890_v42  ;;  %v6983_v53 = vpack.c.bf16 %v2639_v47, %v2631_v7  ;;  %v6673_v33 = vpack.c.bf16 %v2947_v11, %v2939_v56  ;;  %v2955_v23 = vld [vmem:[#allocation16 + $0xd18] sm:$0xff]  ;;  %v2704_v37 = vld [vmem:[#allocation16 + $0x568] sm:$0xff] }
 0x620   : > { %6646 = vmatprep.subr.bf16.mxu0 %v6645_v5  ;;  %6966 = vmatprep.subr.bf16.mxu1 %v6965_v57  ;;  %v2907_v5 = vld [vmem:[#allocation16 + $0xb98] sm:$0xff]  ;;  %v6997_v1 = vpack.c.bf16 %v2704_v37, %v2696_v36  ;;  %v2736_v49 = vld [vmem:[#allocation16 + $0x668] sm:$0xff] }
 0x621   : > { %v2915_v57 = vld [vmem:[#allocation16 + $0xbd8] sm:$0xff]  ;;  %v2744_v56 = vld [vmem:[#allocation16 + $0x6a8] sm:$0xff] }
 0x622   : > { %6648 = vmatpush1.bf16.msra.mxu0 %v6647_v19  ;;  %6968 = vmatpush1.bf16.msra.mxu1 %v6967_v9  ;;  %v2906_v19 = vld [vmem:[#allocation16 + $0xb90] sm:$0xff]  ;;  %v6665_v20 = vpack.c.bf16 %v2915_v57, %v2907_v5  ;;  %v2963_v8 = vld [vmem:[#allocation16 + $0xd58] sm:$0xff]  ;;  %v2712_v5 = vld [vmem:[#allocation16 + $0x5a8] sm:$0xff] }
 0x623   : > { %6650 = vmatprep.subr.bf16.mxu0 %v6649_v46  ;;  %6970 = vmatprep.subr.bf16.mxu1 %v6969_v59  ;;  %v2914_v9 = vld [vmem:[#allocation16 + $0xbd0] sm:$0xff]  ;;  %v2647_v46 = vld [vmem:[#allocation16 + $0x3a0] sm:$0xff]  ;;  %v6677_v42 = vpack.c.bf16 %v2963_v8, %v2955_v23  ;;  %v2971_v7 = vld [vmem:[#allocation16 + $0xd98] sm:$0xff] }
 0x624   : > { %v2655_v59 = vld [vmem:[#allocation16 + $0x3e0] sm:$0xff]  ;;  %v6667_v26 = vpack.c.bf16 %v2914_v9, %v2906_v19  ;;  %v2979_v47 = vld [vmem:[#allocation16 + $0xdd8] sm:$0xff]  ;;  %v2720_v57 = vld [vmem:[#allocation16 + $0x5e8] sm:$0xff] }
 0x625   : > { %v6987_v27 = vpack.c.bf16 %v2655_v59, %v2647_v46  ;;  %v6681_v19 = vpack.c.bf16 %v2979_v47, %v2971_v7  ;;  %v7001_v9 = vpack.c.bf16 %v2720_v57, %v2712_v5  ;;  %v2987_v46 = vld [vmem:[#allocation16 + $0xe18] sm:$0xff]  ;;  %v2752_v11 = vld [vmem:[#allocation16 + $0x6e8] sm:$0xff] }
 0x626   : > { %6652 = vmatpush1.bf16.msra.mxu0 %v6651_v16  ;;  %6972 = vmatpush1.bf16.msra.mxu1 %v6971_v28  ;;  %v2922_v16 = vld [vmem:[#allocation16 + $0xc10] sm:$0xff]  ;;  %v2995_v59 = vld [vmem:[#allocation16 + $0xe58] sm:$0xff]  ;;  %v2760_v23 = vld [vmem:[#allocation16 + $0x728] sm:$0xff] }
 0x627   : > { %6654 = vmatprep.subr.bf16.mxu0 %v6653_v24  ;;  %6974 = vmatprep.subr.bf16.mxu1 %v6973_v3  ;;  %v2930_v28 = vld [vmem:[#allocation16 + $0xc50] sm:$0xff]  ;;  %v2663_v24 = vld [vmem:[#allocation16 + $0x420] sm:$0xff]  ;;  %v2768_v8 = vld [vmem:[#allocation16 + $0x768] sm:$0xff] }
 0x628   : > { %v2671_v3 = vld [vmem:[#allocation16 + $0x460] sm:$0xff]  ;;  %v6671_v61 = vpack.c.bf16 %v2930_v28, %v2922_v16  ;;  %v6685_v16 = vpack.c.bf16 %v2995_v59, %v2987_v46  ;;  %v7005_v28 = vpack.c.bf16 %v2736_v49, %v2728_v22  ;;  %v2776_v7 = vld [vmem:[#allocation16 + $0x7a8] sm:$0xff] }
 0x629   : > { %v6991_v31 = vpack.c.bf16 %v2671_v3, %v2663_v24  ;;  %v3003_v24 = vld [vmem:[#allocation16 + $0xe98] sm:$0xff]  ;;  %v2784_v47 = vld [vmem:[#allocation16 + $0x7e8] sm:$0xff] }
 0x62a   : > { %6656 = vmatpush1.bf16.msra.mxu0 %v6655_v14  ;;  %6976 = vmatpush1.bf16.msra.mxu1 %v6975_v51  ;;  %v2938_v14 = vld [vmem:[#allocation16 + $0xc90] sm:$0xff]  ;;  %v3011_v3 = vld [vmem:[#allocation16 + $0xed8] sm:$0xff]  ;;  %v3695_v46 = vld [vmem:[#allocation16 + $0x1028] sm:$0xff] }
 0x62b   : > { %6658 = vmatprep.subr.bf16.mxu0 %v6657_v34  ;;  %6978 = vmatprep.subr.bf16.mxu1 %v6977_v35  ;;  %v2946_v51 = vld [vmem:[#allocation16 + $0xcd0] sm:$0xff]  ;;  %v2679_v34 = vld [vmem:[#allocation16 + $0x4a0] sm:$0xff]  ;;  %v3703_v59 = vld [vmem:[#allocation16 + $0x1068] sm:$0xff] }
 0x62c   : > { %v2687_v35 = vld [vmem:[#allocation16 + $0x4e0] sm:$0xff]  ;;  %v6675_v39 = vpack.c.bf16 %v2946_v51, %v2938_v14  ;;  %v6689_v14 = vpack.c.bf16 %v3011_v3, %v3003_v24  ;;  %v7009_v51 = vpack.c.bf16 %v2752_v11, %v2744_v56  ;;  %v3711_v24 = vld [vmem:[#allocation16 + $0x10a8] sm:$0xff]  ;;  %v2814_v11 = vld [vmem:[#allocation16 + $0x8b0] sm:$0xff] }
 0x62d   : > { %v6995_v40 = vpack.c.bf16 %v2687_v35, %v2679_v34  ;;  %v3019_v34 = vld [vmem:[#allocation16 + $0xf18] sm:$0xff]  ;;  %v3719_v3 = vld [vmem:[#allocation16 + $0x10e8] sm:$0xff] }
 0x62e   : > { %6660 = vmatpush1.bf16.msra.mxu0 %v6659_v63  ;;  %6980 = vmatpush1.bf16.msra.mxu1 %v6979_v41  ;;  %v2954_v63 = vld [vmem:[#allocation16 + $0xd10] sm:$0xff]  ;;  %v3027_v35 = vld [vmem:[#allocation16 + $0xf58] sm:$0xff] }
 0x62f   : > { %6662 = vmatprep.subr.bf16.mxu0 %v6661_v21  ;;  %6982 = vmatprep.subr.bf16.mxu1 %v6981_v6  ;;  %v2962_v41 = vld [vmem:[#allocation16 + $0xd50] sm:$0xff]  ;;  %v2695_v21 = vld [vmem:[#allocation16 + $0x520] sm:$0xff] }
 0x630   : > { %v2703_v6 = vld [vmem:[#allocation16 + $0x560] sm:$0xff]  ;;  %v6679_v13 = vpack.c.bf16 %v2962_v41, %v2954_v63  ;;  %v6693_v63 = vpack.c.bf16 %v3027_v35, %v3019_v34  ;;  %v7013_v41 = vpack.c.bf16 %v2768_v8, %v2760_v23  ;;  %v2831_v34 = vld [vmem:[#allocation16 + $0x938] sm:$0xff]  ;;  %v3727_v23 = vld [vmem:[#allocation16 + $0x1128] sm:$0xff] }
 0x631   : > { %v6999_v17 = vpack.c.bf16 %v2703_v6, %v2695_v21  ;;  %v3035_v21 = vld [vmem:[#allocation16 + $0xf98] sm:$0xff]  ;;  %v3735_v8 = vld [vmem:[#allocation16 + $0x1168] sm:$0xff] }
 0x632   : > { %6664 = vmatpush1.bf16.msra.mxu0 %v6663_v58  ;;  %6984 = vmatpush1.bf16.msra.mxu1 %v6983_v53  ;;  %v2970_v58 = vld [vmem:[#allocation16 + $0xd90] sm:$0xff]  ;;  %v3043_v6 = vld [vmem:[#allocation16 + $0xfd8] sm:$0xff] }
 0x633   : > { %6666 = vmatprep.subr.bf16.mxu0 %v6665_v20  ;;  %6986 = vmatprep.subr.bf16.mxu1 %v6985_v44  ;;  %v2978_v53 = vld [vmem:[#allocation16 + $0xdd0] sm:$0xff]  ;;  %v2711_v20 = vld [vmem:[#allocation16 + $0x5a0] sm:$0xff]  ;;  %v2839_v35 = vld [vmem:[#allocation16 + $0x978] sm:$0xff] }
 0x634   : > { %v2719_v44 = vld [vmem:[#allocation16 + $0x5e0] sm:$0xff]  ;;  %v6683_v25 = vpack.c.bf16 %v2978_v53, %v2970_v58  ;;  %v6697_v58 = vpack.c.bf16 %v3043_v6, %v3035_v21  ;;  %v7017_v53 = vpack.c.bf16 %v2784_v47, %v2776_v7  ;;  %v7221_v21 = vpack.c.bf16 %v3735_v8, %v3727_v23  ;;  %v2847_v7 = vld [vmem:[#allocation16 + $0x9b8] sm:$0xff]  ;;  %v3791_v23 = vld [vmem:[#allocation16 + $0x1328] sm:$0xff] }
 0x635   : > { %v7003_v18 = vpack.c.bf16 %v2719_v44, %v2711_v20  ;;  %v2799_v20 = vld [vmem:[#allocation16 + $0x838] sm:$0xff]  ;;  %v3734_v6 = vld [vmem:[#allocation16 + $0x1160] sm:$0xff]  ;;  %v3799_v8 = vld [vmem:[#allocation16 + $0x1368] sm:$0xff] }
 0x636   : > { %6668 = vmatpush1.bf16.msra.mxu0 %v6667_v26  ;;  %6988 = vmatpush1.bf16.msra.mxu1 %v6987_v27  ;;  %v2986_v26 = vld [vmem:[#allocation16 + $0xe10] sm:$0xff]  ;;  %v2807_v44 = vld [vmem:[#allocation16 + $0x878] sm:$0xff] }
 0x637   : > { %6670 = vmatprep.subr.bf16.mxu0 %v6669_v54  ;;  %6990 = vmatprep.subr.bf16.mxu1 %v6989_v29  ;;  %v2994_v27 = vld [vmem:[#allocation16 + $0xe50] sm:$0xff]  ;;  %v2727_v54 = vld [vmem:[#allocation16 + $0x620] sm:$0xff]  ;;  %v2855_v47 = vld [vmem:[#allocation16 + $0x9f8] sm:$0xff] }
 0x638   : > { %v2735_v29 = vld [vmem:[#allocation16 + $0x660] sm:$0xff]  ;;  %v6687_v12 = vpack.c.bf16 %v2994_v27, %v2986_v26  ;;  %v2798_v26 = vld [vmem:[#allocation16 + $0x830] sm:$0xff] }
 0x639   : > { %v7007_v15 = vpack.c.bf16 %v2735_v29, %v2727_v54  ;;  %v2806_v27 = vld [vmem:[#allocation16 + $0x870] sm:$0xff]  ;;  %v2815_v54 = vld [vmem:[#allocation16 + $0x8b8] sm:$0xff] }
 0x63a   : > { %6672 = vmatpush1.bf16.msra.mxu0 %v6671_v61  ;;  %6992 = vmatpush1.bf16.msra.mxu1 %v6991_v31  ;;  %v3002_v61 = vld [vmem:[#allocation16 + $0xe90] sm:$0xff]  ;;  %v2823_v29 = vld [vmem:[#allocation16 + $0x8f8] sm:$0xff]  ;;  %v6767_v56 = vpack.c.bf16 %v2806_v27, %v2798_v26 }
 0x63b   : > { %6674 = vmatprep.subr.bf16.mxu0 %v6673_v33  ;;  %6994 = vmatprep.subr.bf16.mxu1 %v6993_v62  ;;  %v3010_v31 = vld [vmem:[#allocation16 + $0xed0] sm:$0xff]  ;;  %v2743_v33 = vld [vmem:[#allocation16 + $0x6a0] sm:$0xff] }
 0x63c   : > { %v2751_v62 = vld [vmem:[#allocation16 + $0x6e0] sm:$0xff]  ;;  %v6691_v36 = vpack.c.bf16 %v3010_v31, %v3002_v61  ;;  %v3686_v31 = vld [vmem:[#allocation4 + $0x8] sm:$0xfc] }
 0x63d   : > { %v7011_v37 = vpack.c.bf16 %v2751_v62, %v2743_v33  ;;  %v3710_v61 = vld [vmem:[#allocation16 + $0x10a0] sm:$0xff]  ;;  %v7217_v33 = vpack.c.bf16 %v3719_v3, %v3711_v24  ;;  %v2862_v26 = vld [vmem:[#allocation16 + $0xa30] sm:$0xff]  ;;  %v2887_v24 = vld [vmem:[#allocation16 + $0xaf8] sm:$0xff] }
 0x63e   : > { %6676 = vmatpush1.bf16.msra.mxu0 %v6675_v39  ;;  %6996 = vmatpush1.bf16.msra.mxu1 %v6995_v40  ;;  %v3018_v39 = vld [vmem:[#allocation16 + $0xf10] sm:$0xff]  ;;  %v3718_v62 = vld [vmem:[#allocation16 + $0x10e0] sm:$0xff]  ;;  %v3775_v3 = vld [vmem:[#allocation16 + $0x12a8] sm:$0xff] }
 0x63f   : > { %6678 = vmatprep.subr.bf16.mxu0 %v6677_v42  ;;  %6998 = vmatprep.subr.bf16.mxu1 %v6997_v1  ;;  %v3026_v40 = vld [vmem:[#allocation16 + $0xf50] sm:$0xff]  ;;  %v2759_v42 = vld [vmem:[#allocation16 + $0x720] sm:$0xff] }
 0x640   : > { %v2767_v1 = vld [vmem:[#allocation16 + $0x760] sm:$0xff]  ;;  %v6695_v5 = vpack.c.bf16 %v3026_v40, %v3018_v39  ;;  %v7219_v39 = vpack.c.bf16 %v3718_v62, %v3710_v61  ;;  %v2830_v40 = vld [vmem:[#allocation16 + $0x930] sm:$0xff] }
 0x641   : > { %v7015_v57 = vpack.c.bf16 %v2767_v1, %v2759_v42  ;;  %v3955_v42 = vrot.slane %v9390_v45, 2  ;;  %v6773_v1 = vpack.c.bf16 %v2839_v35, %v2831_v34  ;;  %v2870_v27 = vld [vmem:[#allocation16 + $0xa70] sm:$0xff]  ;;  %v3782_v62 = vld [vmem:[#allocation16 + $0x12e0] sm:$0xff]  ;;  %v2895_v34 = vld [vmem:[#allocation16 + $0xb38] sm:$0xff] }
 0x642   : > { %6680 = vmatpush1.bf16.msra.mxu0 %v6679_v13  ;;  %7000 = vmatpush1.bf16.msra.mxu1 %v6999_v17  ;;  %v3034_v13 = vld [vmem:[#allocation16 + $0xf90] sm:$0xff]  ;;  %v2903_v35 = vld [vmem:[#allocation16 + $0xb78] sm:$0xff] }
 0x643   : > { %6682 = vmatprep.subr.bf16.mxu0 %v6681_v19  ;;  %7002 = vmatprep.subr.bf16.mxu1 %v7001_v9  ;;  %v3042_v17 = vld [vmem:[#allocation16 + $0xfd0] sm:$0xff]  ;;  %v2775_v19 = vld [vmem:[#allocation16 + $0x7a0] sm:$0xff] }
 0x644   : > { %v2783_v9 = vld [vmem:[#allocation16 + $0x7e0] sm:$0xff]  ;;  %v6699_v22 = vpack.c.bf16 %v3042_v17, %v3034_v13  ;;  %v2878_v61 = vld [vmem:[#allocation16 + $0xab0] sm:$0xff] }
 0x645   : > { %v7019_v49 = vpack.c.bf16 %v2783_v9, %v2775_v19  ;;  %v2846_v19 = vld [vmem:[#allocation16 + $0x9b0] sm:$0xff] }
 0x646   : > { %6684 = vmatpush1.bf16.msra.mxu0 %v6683_v25  ;;  %7004 = vmatpush1.bf16.msra.mxu1 %v7003_v18  ;;  %v6765_v25 = vpack.c.bf16 %v2807_v44, %v2799_v20  ;;  %v7213_v18 = vpack.c.bf16 %v3703_v59, %v3695_v46  ;;  %v2854_v9 = vld [vmem:[#allocation16 + $0x9f0] sm:$0xff]  ;;  %v3742_v20 = vld [vmem:[#allocation16 + $0x11a0] sm:$0xff]  ;;  %v2863_v46 = vld [vmem:[#allocation16 + $0xa38] sm:$0xff] }
 0x647   : > { %6686 = vmatprep.subr.bf16.mxu0 %v6685_v16  ;;  %7006 = vmatprep.subr.bf16.mxu1 %v7005_v28  ;;  %v3694_v16 = vld [vmem:[#allocation16 + $0x1020] sm:$0xff]  ;;  %v3759_v59 = vld [vmem:[#allocation16 + $0x1228] sm:$0xff] }
 0x648   : > { %v3702_v28 = vld [vmem:[#allocation16 + $0x1060] sm:$0xff] }
 0x649   : > { %v3750_v44 = vld [vmem:[#allocation16 + $0x11e0] sm:$0xff] }
 0x64a   : > { %6688 = vmatpush1.bf16.msra.mxu0 %v6687_v12  ;;  %7008 = vmatpush1.bf16.msra.mxu1 %v7007_v15  ;;  %v7215_v12 = vpack.c.bf16 %v3702_v28, %v3694_v16  ;;  %v2822_v15 = vld [vmem:[#allocation16 + $0x8f0] sm:$0xff]  ;;  %v3758_v16 = vld [vmem:[#allocation16 + $0x1220] sm:$0xff] }
 0x64b   : > { %6690 = vmatprep.subr.bf16.mxu0 %v6689_v14  ;;  %7010 = vmatprep.subr.bf16.mxu1 %v7009_v51  ;;  %v9416_v14 = vld [vmem:[#allocation4] sm:$0xff]  ;;  %v6769_v51 = vpack.c.bf16 %v2823_v29, %v2815_v54  ;;  %v2879_v29 = vld [vmem:[#allocation16 + $0xab8] sm:$0xff] }
 0x64c   : > { %v3766_v54 = vld [vmem:[#allocation16 + $0x1260] sm:$0xff] }
 0x64e   : > { %6692 = vmatpush1.bf16.msra.mxu0 %v6691_v36  ;;  %7012 = vmatpush1.bf16.msra.mxu1 %v7011_v37  ;;  %v6771_v36 = vpack.c.bf16 %v2822_v15, %v2814_v11  ;;  %v3954_v37 = vrot.slane %v3686_v31, 2  ;;  %v6783_v11 = vpack.c.bf16 %v2870_v27, %v2862_v26  ;;  %v6785_v15 = vpack.c.bf16 %v2887_v24, %v2879_v29  ;;  %v2886_v31 = vld [vmem:[#allocation16 + $0xaf0] sm:$0xff]  ;;  %v3822_v27 = vld [vmem:[#allocation16 + $0x1420] sm:$0xff]  ;;  %v2951_v29 = vld [vmem:[#allocation16 + $0xcf8] sm:$0xff] }
 0x64f   : > { %6694 = vmatprep.subr.bf16.mxu0 %v6693_v63  ;;  %7014 = vmatprep.subr.bf16.mxu1 %v7013_v41  ;;  %v2838_v63 = vld [vmem:[#allocation16 + $0x970] sm:$0xff]  ;;  %v3726_v41 = vld [vmem:[#allocation16 + $0x1120] sm:$0xff]  ;;  %v3839_v24 = vld [vmem:[#allocation16 + $0x14a8] sm:$0xff] }
 0x650   : > { %v9429_v13 = vsel %vm3950_vm15, %v3954_v37, %v3955_v42  ;;  %v6775_v17 = vpack.c.bf16 %v2838_v63, %v2830_v40  ;;  %v2894_v40 = vld [vmem:[#allocation16 + $0xb30] sm:$0xff] }
 0x651   : > { %v2902_v63 = vld [vmem:[#allocation16 + $0xb70] sm:$0xff] }
 0x652   : > { %6696 = vmatpush1.bf16.msra.mxu0 %v6695_v5  ;;  %7016 = vmatpush1.bf16.msra.mxu1 %v7015_v57  ;;  %v3743_v5 = vld [vmem:[#allocation16 + $0x11a8] sm:$0xff]  ;;  %v2934_v26 = vld [vmem:[#allocation16 + $0xc70] sm:$0xff] }
 0x653   : > { %6698 = vmatprep.subr.bf16.mxu0 %v6697_v58  ;;  %7018 = vmatprep.subr.bf16.mxu1 %v7017_v53  ;;  %v3751_v57 = vld [vmem:[#allocation16 + $0x11e8] sm:$0xff]  ;;  %v7223_v58 = vpack.c.bf16 %v3734_v6, %v3726_v41  ;;  %v6777_v53 = vpack.c.bf16 %v2855_v47, %v2847_v7  ;;  %v3790_v41 = vld [vmem:[#allocation16 + $0x1320] sm:$0xff]  ;;  %v2911_v6 = vld [vmem:[#allocation16 + $0xbb8] sm:$0xff] }
 0x654   : > { %v2919_v7 = vld [vmem:[#allocation16 + $0xbf8] sm:$0xff]  ;;  %v3807_v47 = vld [vmem:[#allocation16 + $0x13a8] sm:$0xff] }
 0x656   : > { %6700 = vmatpush1.bf16.msra.mxu0 %v6699_v22  ;;  %7020 = vmatpush1.bf16.msra.mxu1 %v7019_v49  ;;  %v3767_v22 = vld [vmem:[#allocation16 + $0x1268] sm:$0xff]  ;;  %v6779_v49 = vpack.c.bf16 %v2854_v9, %v2846_v19  ;;  %v2918_v19 = vld [vmem:[#allocation16 + $0xbf0] sm:$0xff]  ;;  %v3806_v9 = vld [vmem:[#allocation16 + $0x13a0] sm:$0xff] }
 0x657   : > { %6766 = vmatprep.subr.bf16.mxu0 %v6765_v25  ;;  %7214 = vmatprep.subr.bf16.mxu1 %v7213_v18  ;;  %v7227_v25 = vpack.c.bf16 %v3750_v44, %v3742_v20  ;;  %v7229_v28 = vpack.c.bf16 %v3767_v22, %v3759_v59  ;;  %v2927_v44 = vld [vmem:[#allocation16 + $0xc38] sm:$0xff]  ;;  %v3831_v59 = vld [vmem:[#allocation16 + $0x1468] sm:$0xff] }
 0x659   : > { %3211 = vmatmul.mubr.f32.vlgmr.msra.gmra.mrb[28].mxu0 %v9401_v30  ;;  %3596 = vmatmul.mubr.f32.vlgmr.msra.gmra.mrb[32].mxu1 %v9416_v14 }
 0x65a   : > { %3216 = vmatprep.mubr.f32.mxu0 %v9406_v43  ;;  %6768 = vmatpush1.bf16.msra.mxu0 %v6767_v56  ;;  %v3783_v56 = vld [vmem:[#allocation16 + $0x12e8] sm:$0xff] }
 0x65b   : > { %3601 = vmatprep.mubr.f32.mxu1 %v9390_v45  ;;  %7216 = vmatpush1.bf16.msra.mxu1 %v7215_v12  ;;  %v7231_v12 = vpack.c.bf16 %v3766_v54, %v3758_v16  ;;  %v2943_v54 = vld [vmem:[#allocation16 + $0xcb8] sm:$0xff]  ;;  %v9452_v45 = vld [vmem:[#allocation4 + $0x8] sm:$0xff] }
 0x65c   : > { %6770 = vmatprep.subr.bf16.mxu0 %v6769_v51  ;;  %7218 = vmatprep.subr.bf16.mxu1 %v7217_v33  ;;  %v3774_v51 = vld [vmem:[#allocation16 + $0x12a0] sm:$0xff]  ;;  %v7233_v33 = vpack.c.bf16 %v3783_v56, %v3775_v3  ;;  %v3847_v3 = vld [vmem:[#allocation16 + $0x14e8] sm:$0xff] }
 0x65d   : > { %3217 = vmatmul.mubr.f32.gmra.mrb[30].mxu0 %v9411_v50  ;;  %3602 = vmatmul.mubr.f32.gmra.mrb[34].mxu1 %v9387_v60  ;;  %v7225_v60 = vpack.c.bf16 %v3751_v57, %v3743_v5  ;;  %v7235_v37 = vpack.c.bf16 %v3782_v62, %v3774_v51  ;;  %v3815_v5 = vld [vmem:[#allocation16 + $0x13e8] sm:$0xff]  ;;  %v6791_v57 = vpack.c.bf16 %v2902_v63, %v2894_v40  ;;  %v2959_v62 = vld [vmem:[#allocation16 + $0xd38] sm:$0xff]  ;;  %v2966_v40 = vld [vmem:[#allocation16 + $0xd70] sm:$0xff] }
 0x65e   : > { %6772 = vmatpush1.bf16.msra.mxu0 %v6771_v36  ;;  %3364 = vmatprep.mubr.f32.mxu0 %v9396_v32  ;;  %v2871_v32 = vld [vmem:[#allocation16 + $0xa78] sm:$0xff]  ;;  %v6787_v36 = vpack.c.bf16 %v2886_v31, %v2878_v61  ;;  %v7241_v20 = vpack.c.bf16 %v3815_v5, %v3807_v47  ;;  %v2950_v61 = vld [vmem:[#allocation16 + $0xcf0] sm:$0xff]  ;;  %v3838_v31 = vld [vmem:[#allocation16 + $0x14a0] sm:$0xff]  ;;  %v7249_v51 = vpack.c.bf16 %v3847_v3, %v3839_v24 }
 0x65f   : > { %7220 = vmatpush1.bf16.msra.mxu1 %v7219_v39  ;;  %4183 = vmatprep.mubr.f32.mxu1 %v9429_v13  ;;  %v6781_v18 = vpack.c.bf16 %v2871_v32, %v2863_v46  ;;  %v6789_v39 = vpack.c.bf16 %v2903_v35, %v2895_v34  ;;  %v2935_v46 = vld [vmem:[#allocation16 + $0xc78] sm:$0xff]  ;;  %v3823_v32 = vld [vmem:[#allocation16 + $0x1428] sm:$0xff]  ;;  %v3854_v63 = vld [vmem:[#allocation16 + $0x1520] sm:$0xff] }
 0x660   : > { %6774 = vmatprep.subr.bf16.mxu0 %v6773_v1  ;;  %7222 = vmatprep.subr.bf16.mxu1 %v7221_v21  ;;  %v7237_v1 = vpack.c.bf16 %v3799_v8, %v3791_v23  ;;  %v3798_v21 = vld [vmem:[#allocation16 + $0x1360] sm:$0xff]  ;;  %v7245_v16 = vpack.c.bf16 %v3831_v59, %v3823_v32  ;;  %v2967_v34 = vld [vmem:[#allocation16 + $0xd78] sm:$0xff]  ;;  %v3855_v35 = vld [vmem:[#allocation16 + $0x1528] sm:$0xff] }
 0x661   : > { %v3863_v23 = vld [vmem:[#allocation16 + $0x1568] sm:$0xff] }
 0x662   : > { %6776 = vmatpush1.bf16.msra.mxu0 %v6775_v17  ;;  %v7239_v17 = vpack.c.bf16 %v3798_v21, %v3790_v41  ;;  %v7253_v41 = vpack.c.bf16 %v3863_v23, %v3855_v35  ;;  %v2975_v21 = vld [vmem:[#allocation16 + $0xdb8] sm:$0xff]  ;;  %v3879_v47 = vld [vmem:[#allocation16 + $0x15e8] sm:$0xff] }
 0x663   : > { %7224 = vmatpush1.bf16.msra.mxu1 %v7223_v58  ;;  %6778 = vmatprep.subr.bf16.mxu0 %v6777_v53  ;;  %v6793_v58 = vpack.c.bf16 %v2919_v7, %v2911_v6  ;;  %v2910_v53 = vld [vmem:[#allocation16 + $0xbb0] sm:$0xff]  ;;  %v2983_v6 = vld [vmem:[#allocation16 + $0xdf8] sm:$0xff]  ;;  %v3871_v7 = vld [vmem:[#allocation16 + $0x15a8] sm:$0xff] }
 0x664   : > { %7226 = vmatprep.subr.bf16.mxu1 %v7225_v60  ;;  %v3814_v60 = vld [vmem:[#allocation16 + $0x13e0] sm:$0xff]  ;;  %v6795_v22 = vpack.c.bf16 %v2918_v19, %v2910_v53  ;;  %v2982_v53 = vld [vmem:[#allocation16 + $0xdf0] sm:$0xff]  ;;  %v3895_v32 = vld [vmem:[#allocation16 + $0x1668] sm:$0xff] }
 0x665   : > { %v3870_v19 = vld [vmem:[#allocation16 + $0x15a0] sm:$0xff]  ;;  %v3911_v24 = vld [vmem:[#allocation16 + $0x16e8] sm:$0xff] }
 0x666   : > { %6780 = vmatpush1.bf16.msra.mxu0 %v6779_v49  ;;  %v7243_v49 = vpack.c.bf16 %v3814_v60, %v3806_v9  ;;  %v7257_v9 = vpack.c.bf16 %v3879_v47, %v3871_v7  ;;  %v2991_v60 = vld [vmem:[#allocation16 + $0xe38] sm:$0xff]  ;;  %v3927_v35 = vld [vmem:[#allocation16 + $0x1768] sm:$0xff] }
 0x667   : > { %7228 = vmatpush1.bf16.msra.mxu1 %v7227_v25  ;;  %6782 = vmatprep.subr.bf16.mxu0 %v6781_v18  ;;  %v6797_v25 = vpack.c.bf16 %v2935_v46, %v2927_v44  ;;  %v2926_v18 = vld [vmem:[#allocation16 + $0xc30] sm:$0xff]  ;;  %v2999_v44 = vld [vmem:[#allocation16 + $0xe78] sm:$0xff]  ;;  %v3887_v46 = vld [vmem:[#allocation16 + $0x1628] sm:$0xff] }
 0x668   : > { %7230 = vmatprep.subr.bf16.mxu1 %v7229_v28  ;;  %v3830_v28 = vld [vmem:[#allocation16 + $0x1460] sm:$0xff]  ;;  %v6799_v56 = vpack.c.bf16 %v2934_v26, %v2926_v18  ;;  %v2998_v18 = vld [vmem:[#allocation16 + $0xe70] sm:$0xff]  ;;  %v3943_v7 = vld [vmem:[#allocation16 + $0x17e8] sm:$0xff] }
 0x669   : > { %v3886_v26 = vld [vmem:[#allocation16 + $0x1620] sm:$0xff] }
 0x66a   : > { %6784 = vmatpush1.bf16.msra.mxu0 %v6783_v11  ;;  %v7247_v11 = vpack.c.bf16 %v3830_v28, %v3822_v27  ;;  %v7261_v27 = vpack.c.bf16 %v3895_v32, %v3887_v46  ;;  %v3007_v28 = vld [vmem:[#allocation16 + $0xeb8] sm:$0xff]  ;;  %v3685_v46 = vld [vmem:[#allocation4] sm:$0xfc] }
 0x66b   : > { %7232 = vmatpush1.bf16.msra.mxu1 %v7231_v12  ;;  %6786 = vmatprep.subr.bf16.mxu0 %v6785_v15  ;;  %v6801_v12 = vpack.c.bf16 %v2951_v29, %v2943_v54  ;;  %v2942_v15 = vld [vmem:[#allocation16 + $0xcb0] sm:$0xff]  ;;  %v3015_v54 = vld [vmem:[#allocation16 + $0xef8] sm:$0xff]  ;;  %v3903_v29 = vld [vmem:[#allocation16 + $0x16a8] sm:$0xff] }
 0x66c   : > { %7234 = vmatprep.subr.bf16.mxu1 %v7233_v33  ;;  %v3846_v33 = vld [vmem:[#allocation16 + $0x14e0] sm:$0xff]  ;;  %v6803_v8 = vpack.c.bf16 %v2950_v61, %v2942_v15  ;;  %v3014_v15 = vld [vmem:[#allocation16 + $0xef0] sm:$0xff] }
 0x66d   : > { %v3902_v61 = vld [vmem:[#allocation16 + $0x16a0] sm:$0xff] }
 0x66e   : > { %6788 = vmatpush1.bf16.msra.mxu0 %v6787_v36  ;;  %v7251_v36 = vpack.c.bf16 %v3846_v33, %v3838_v31  ;;  %v7265_v31 = vpack.c.bf16 %v3911_v24, %v3903_v29  ;;  %v3023_v33 = vld [vmem:[#allocation16 + $0xf38] sm:$0xff] }
 0x66f   : > { %7236 = vmatpush1.bf16.msra.mxu1 %v7235_v37  ;;  %6790 = vmatprep.subr.bf16.mxu0 %v6789_v39  ;;  %v6805_v37 = vpack.c.bf16 %v2967_v34, %v2959_v62  ;;  %v2958_v39 = vld [vmem:[#allocation16 + $0xd30] sm:$0xff]  ;;  %v3031_v62 = vld [vmem:[#allocation16 + $0xf78] sm:$0xff]  ;;  %v3919_v34 = vld [vmem:[#allocation16 + $0x1728] sm:$0xff] }
 0x670   : > { %7238 = vmatprep.subr.bf16.mxu1 %v7237_v1  ;;  %v3862_v1 = vld [vmem:[#allocation16 + $0x1560] sm:$0xff]  ;;  %v6807_v5 = vpack.c.bf16 %v2966_v40, %v2958_v39  ;;  %v3030_v39 = vld [vmem:[#allocation16 + $0xf70] sm:$0xff] }
 0x671   : > { %v3918_v40 = vld [vmem:[#allocation16 + $0x1720] sm:$0xff] }
 0x672   : > { %6792 = vmatpush1.bf16.msra.mxu0 %v6791_v57  ;;  %v7255_v57 = vpack.c.bf16 %v3862_v1, %v3854_v63  ;;  %v7269_v63 = vpack.c.bf16 %v3927_v35, %v3919_v34  ;;  %v3039_v1 = vld [vmem:[#allocation16 + $0xfb8] sm:$0xff]  ;;  %v2571_v34 = vld [vmem:[#allocation16 + $0x140] sm:$0xff] }
 0x673   : > { %7240 = vmatpush1.bf16.msra.mxu1 %v7239_v17  ;;  %6794 = vmatprep.subr.bf16.mxu0 %v6793_v58  ;;  %v6809_v17 = vpack.c.bf16 %v2983_v6, %v2975_v21  ;;  %v2974_v58 = vld [vmem:[#allocation16 + $0xdb0] sm:$0xff]  ;;  %v3047_v21 = vld [vmem:[#allocation16 + $0xff8] sm:$0xff]  ;;  %v3935_v6 = vld [vmem:[#allocation16 + $0x17a8] sm:$0xff] }
 0x674   : > { %7242 = vmatprep.subr.bf16.mxu1 %v7241_v20  ;;  %v3878_v20 = vld [vmem:[#allocation16 + $0x15e0] sm:$0xff]  ;;  %v6811_v59 = vpack.c.bf16 %v2982_v53, %v2974_v58  ;;  %v3046_v58 = vld [vmem:[#allocation16 + $0xff0] sm:$0xff] }
 0x675   : > { %v3934_v53 = vld [vmem:[#allocation16 + $0x17a0] sm:$0xff] }
 0x676   : > { %6796 = vmatpush1.bf16.msra.mxu0 %v6795_v22  ;;  %v7259_v22 = vpack.c.bf16 %v3878_v20, %v3870_v19  ;;  %v7273_v19 = vpack.c.bf16 %v3943_v7, %v3935_v6  ;;  %v2532_v20 = vld [vmem:[#allocation16 + $0x8] sm:$0xff] }
 0x677   : > { %7244 = vmatpush1.bf16.msra.mxu1 %v7243_v49  ;;  %6798 = vmatprep.subr.bf16.mxu0 %v6797_v25  ;;  %v6813_v49 = vpack.c.bf16 %v2999_v44, %v2991_v60  ;;  %v2990_v25 = vld [vmem:[#allocation16 + $0xe30] sm:$0xff]  ;;  %v2540_v60 = vld [vmem:[#allocation16 + $0x48] sm:$0xff] }
 0x678   : > { %7246 = vmatprep.subr.bf16.mxu1 %v7245_v16  ;;  %v3894_v16 = vld [vmem:[#allocation16 + $0x1660] sm:$0xff]  ;;  %v6815_v3 = vpack.c.bf16 %v2998_v18, %v2990_v25  ;;  %v3951_v18 = vrot.slane %v3685_v46, 2  ;;  %v2620_v6 = vld [vmem:[#allocation16 + $0x2c8] sm:$0xff] }
 0x679   : > { %v2539_v25 = vld [vmem:[#allocation16 + $0x40] sm:$0xff] }
 0x67a   : > { %6800 = vmatpush1.bf16.msra.mxu0 %v6799_v56  ;;  %v7263_v56 = vpack.c.bf16 %v3894_v16, %v3886_v26  ;;  %v2548_v26 = vld [vmem:[#allocation16 + $0x88] sm:$0xff] }
 0x67b   : > { %7248 = vmatpush1.bf16.msra.mxu1 %v7247_v11  ;;  %6802 = vmatprep.subr.bf16.mxu0 %v6801_v12  ;;  %v6817_v11 = vpack.c.bf16 %v3015_v54, %v3007_v28  ;;  %v3006_v12 = vld [vmem:[#allocation16 + $0xeb0] sm:$0xff]  ;;  %v3687_v28 = vld [vmem:[#allocation4 + $0x20] sm:$0x3] }
 0x67c   : > { %7250 = vmatprep.subr.bf16.mxu1 %v7249_v51  ;;  %v3910_v51 = vld [vmem:[#allocation16 + $0x16e0] sm:$0xff]  ;;  %v6819_v23 = vpack.c.bf16 %v3014_v15, %v3006_v12  ;;  %v9432_v54 = vld [vmem:[#allocation4 + $0x10] sm:$0xff]  ;;  %v3957_v15 = vrot.slane %v3687_v28, 2  ;;  %v2676_v28 = vld [vmem:[#allocation16 + $0x488] sm:$0xff] }
 0x67d   : > { %v3952_v29 = vrot.slane %v9432_v54, 2 }
 0x67e   : > { %6804 = vmatpush1.bf16.msra.mxu0 %v6803_v8  ;;  %v7267_v8 = vpack.c.bf16 %v3910_v51, %v3902_v61  ;;  %v2564_v61 = vld [vmem:[#allocation16 + $0x108] sm:$0xff] }
 0x67f   : > { %7252 = vmatpush1.bf16.msra.mxu1 %v7251_v36  ;;  %6806 = vmatprep.subr.bf16.mxu0 %v6805_v37  ;;  %v6821_v36 = vpack.c.bf16 %v3031_v62, %v3023_v33  ;;  %v3022_v37 = vld [vmem:[#allocation16 + $0xf30] sm:$0xff]  ;;  %v9437_v12 = vsel %vm3950_vm15, %v3951_v18, %v3952_v29  ;;  %v2563_v62 = vld [vmem:[#allocation16 + $0x100] sm:$0xff]  ;;  %v9449_v35 = vsel %vm3950_vm15, %v3952_v29, %v3957_v15  ;;  %v2684_v29 = vld [vmem:[#allocation16 + $0x4c8] sm:$0xff] }
 0x680   : > { %7254 = vmatprep.subr.bf16.mxu1 %v7253_v41  ;;  %v3926_v41 = vld [vmem:[#allocation16 + $0x1760] sm:$0xff]  ;;  %v6823_v47 = vpack.c.bf16 %v3030_v39, %v3022_v37  ;;  %v2604_v39 = vld [vmem:[#allocation16 + $0x248] sm:$0xff] }
 0x681   : > { %v2587_v37 = vld [vmem:[#allocation16 + $0x1c0] sm:$0xff]  ;;  %v2692_v15 = vld [vmem:[#allocation16 + $0x508] sm:$0xff] }
 0x682   : > { %6808 = vmatpush1.bf16.msra.mxu0 %v6807_v5  ;;  %v7271_v5 = vpack.c.bf16 %v3926_v41, %v3918_v40  ;;  %v2595_v41 = vld [vmem:[#allocation16 + $0x200] sm:$0xff] }
 0x683   : > { %7256 = vmatpush1.bf16.msra.mxu1 %v7255_v57  ;;  %6810 = vmatprep.subr.bf16.mxu0 %v6809_v17  ;;  %v6825_v57 = vpack.c.bf16 %v3047_v21, %v3039_v1  ;;  %v3038_v17 = vld [vmem:[#allocation16 + $0xfb0] sm:$0xff]  ;;  %v2603_v1 = vld [vmem:[#allocation16 + $0x240] sm:$0xff]  ;;  %v2612_v21 = vld [vmem:[#allocation16 + $0x288] sm:$0xff] }
 0x684   : > { %7258 = vmatprep.subr.bf16.mxu1 %v7257_v9  ;;  %v3942_v9 = vld [vmem:[#allocation16 + $0x17e0] sm:$0xff]  ;;  %v6827_v44 = vpack.c.bf16 %v3046_v58, %v3038_v17  ;;  %v6847_v7 = vpack.c.bf16 %v2603_v1, %v2595_v41  ;;  %v2628_v17 = vld [vmem:[#allocation16 + $0x308] sm:$0xff] }
 0x685   : > { %v7275_v32 = vpack.c.bf16 %v3942_v9, %v3934_v53  ;;  %v2636_v58 = vld [vmem:[#allocation16 + $0x348] sm:$0xff]  ;;  %v2627_v9 = vld [vmem:[#allocation16 + $0x300] sm:$0xff] }
 0x686   : > { %6812 = vmatpush1.bf16.msra.mxu0 %v6811_v59  ;;  %v6829_v59 = vpack.c.bf16 %v2540_v60, %v2532_v20  ;;  %v2635_v20 = vld [vmem:[#allocation16 + $0x340] sm:$0xff]  ;;  %v2644_v60 = vld [vmem:[#allocation16 + $0x388] sm:$0xff] }
 0x687   : > { %7260 = vmatpush1.bf16.msra.mxu1 %v7259_v22  ;;  %6814 = vmatprep.subr.bf16.mxu0 %v6813_v49  ;;  %v3688_v22 = vld [vmem:[#allocation4 + $0x28] sm:$0x3]  ;;  %v2531_v49 = vld [vmem:[#allocation16] sm:$0xff]  ;;  %v6855_v46 = vpack.c.bf16 %v2635_v20, %v2627_v9 }
 0x688   : > { %7262 = vmatprep.subr.bf16.mxu1 %v7261_v27  ;;  %v2556_v27 = vld [vmem:[#allocation16 + $0xc8] sm:$0xff]  ;;  %v3959_v16 = vrot.slane %v3688_v22, 2  ;;  %v6831_v24 = vpack.c.bf16 %v2539_v25, %v2531_v49  ;;  %v2651_v22 = vld [vmem:[#allocation16 + $0x3c0] sm:$0xff] }
 0x689   : > { %v2660_v49 = vld [vmem:[#allocation16 + $0x408] sm:$0xff]  ;;  %v2731_v41 = vld [vmem:[#allocation16 + $0x640] sm:$0xff] }
 0x68a   : > { %6816 = vmatpush1.bf16.msra.mxu0 %v6815_v3  ;;  %v6833_v3 = vpack.c.bf16 %v2556_v27, %v2548_v26  ;;  %v9444_v51 = vsel %vm3950_vm15, %v3955_v42, %v3959_v16  ;;  %v6839_v42 = vpack.c.bf16 %v2571_v34, %v2563_v62  ;;  %v2668_v25 = vld [vmem:[#allocation16 + $0x448] sm:$0xff]  ;;  %v2659_v27 = vld [vmem:[#allocation16 + $0x400] sm:$0xff] }
 0x68b   : > { %7264 = vmatpush1.bf16.msra.mxu1 %v7263_v56  ;;  %6818 = vmatprep.subr.bf16.mxu0 %v6817_v11  ;;  %v2547_v56 = vld [vmem:[#allocation16 + $0x80] sm:$0xff]  ;;  %v6861_v26 = vpack.c.bf16 %v2668_v25, %v2660_v49  ;;  %v2708_v34 = vld [vmem:[#allocation16 + $0x588] sm:$0xff]  ;;  %v2542_v49 = vld [vmem:[#allocation16 + $0x58] sm:$0xff] }
 0x68c   : > { %7266 = vmatprep.subr.bf16.mxu1 %v7265_v31  ;;  %v2555_v11 = vld [vmem:[#allocation16 + $0xc0] sm:$0xff]  ;;  %v2572_v31 = vld [vmem:[#allocation16 + $0x148] sm:$0xff] }
 0x68d   : > { %v6835_v33 = vpack.c.bf16 %v2555_v11, %v2547_v56  ;;  %v2667_v16 = vld [vmem:[#allocation16 + $0x440] sm:$0xff]  ;;  %v2740_v1 = vld [vmem:[#allocation16 + $0x688] sm:$0xff] }
 0x68e   : > { %6820 = vmatpush1.bf16.msra.mxu0 %v6819_v23  ;;  %v2580_v23 = vld [vmem:[#allocation16 + $0x188] sm:$0xff]  ;;  %v2675_v56 = vld [vmem:[#allocation16 + $0x480] sm:$0xff] }
 0x68f   : > { %7268 = vmatpush1.bf16.msra.mxu1 %v7267_v8  ;;  %6822 = vmatprep.subr.bf16.mxu0 %v6821_v36  ;;  %v2579_v36 = vld [vmem:[#allocation16 + $0x180] sm:$0xff]  ;;  %v2772_v20 = vld [vmem:[#allocation16 + $0x788] sm:$0xff] }
 0x690   : > { %7270 = vmatprep.subr.bf16.mxu1 %v7269_v63  ;;  %v6843_v40 = vpack.c.bf16 %v2587_v37, %v2579_v36  ;;  %v2683_v11 = vld [vmem:[#allocation16 + $0x4c0] sm:$0xff]  ;;  %v2724_v37 = vld [vmem:[#allocation16 + $0x608] sm:$0xff] }
 0x691   : > { %v2699_v62 = vld [vmem:[#allocation16 + $0x540] sm:$0xff] }
 0x692   : > { %6824 = vmatpush1.bf16.msra.mxu0 %v6823_v47  ;;  %v6849_v47 = vpack.c.bf16 %v2620_v6, %v2612_v21  ;;  %v2715_v36 = vld [vmem:[#allocation16 + $0x5c0] sm:$0xff]  ;;  %v2748_v21 = vld [vmem:[#allocation16 + $0x6c8] sm:$0xff] }
 0x693   : > { %7272 = vmatpush1.bf16.msra.mxu1 %v7271_v5  ;;  %6826 = vmatprep.subr.bf16.mxu0 %v6825_v57  ;;  %v2611_v5 = vld [vmem:[#allocation16 + $0x280] sm:$0xff] }
 0x694   : > { %7274 = vmatprep.subr.bf16.mxu1 %v7273_v19  ;;  %v2619_v57 = vld [vmem:[#allocation16 + $0x2c0] sm:$0xff]  ;;  %v6853_v19 = vpack.c.bf16 %v2636_v58, %v2628_v17  ;;  %v2764_v17 = vld [vmem:[#allocation16 + $0x748] sm:$0xff] }
 0x695   : > { %v6851_v53 = vpack.c.bf16 %v2619_v57, %v2611_v5  ;;  %v2747_v5 = vld [vmem:[#allocation16 + $0x6c0] sm:$0xff]  ;;  %v2756_v57 = vld [vmem:[#allocation16 + $0x708] sm:$0xff] }
 0x696   : > { %6828 = vmatpush1.bf16.msra.mxu0 %v6827_v44  ;;  %v2652_v44 = vld [vmem:[#allocation16 + $0x3c8] sm:$0xff]  ;;  %v2763_v9 = vld [vmem:[#allocation16 + $0x740] sm:$0xff] }
 0x697   : > { %7276 = vmatpush1.bf16.msra.mxu1 %v7275_v32  ;;  %6830 = vmatprep.subr.bf16.mxu0 %v6829_v59  ;;  %v6857_v32 = vpack.c.bf16 %v2652_v44, %v2644_v60  ;;  %v2643_v59 = vld [vmem:[#allocation16 + $0x380] sm:$0xff]  ;;  %v2780_v60 = vld [vmem:[#allocation16 + $0x7c8] sm:$0xff] }
 0x698   : > { %v6859_v18 = vpack.c.bf16 %v2651_v22, %v2643_v59  ;;  %v2779_v59 = vld [vmem:[#allocation16 + $0x7c0] sm:$0xff]  ;;  %v2534_v22 = vld [vmem:[#allocation16 + $0x18] sm:$0xff] }
 0x699   : > { %3365 = vmatmul.mubr.f32.vlgmr.msra.gmra.mrb[32].mxu0 %v9401_v30  ;;  %v6837_v30 = vpack.c.bf16 %v2572_v31, %v2564_v61  ;;  %v2700_v61 = vld [vmem:[#allocation16 + $0x548] sm:$0xff]  ;;  %v6867_v31 = vpack.c.bf16 %v2683_v11, %v2675_v56  ;;  %v2557_v56 = vld [vmem:[#allocation16 + $0xd0] sm:$0xff]  ;;  %v2566_v11 = vld [vmem:[#allocation16 + $0x118] sm:$0xff] }
 0x69a   : > { %4184 = vmatmul.mubr.f32.vlgmr.msra.gmra.mrb[32].mxu1 %v9437_v12  ;;  %3370 = vmatprep.mubr.f32.mxu0 %v9406_v43  ;;  %v2588_v43 = vld [vmem:[#allocation16 + $0x1c8] sm:$0xff] }
 0x69b   : > { %6832 = vmatpush1.bf16.msra.mxu0 %v6831_v24  ;;  %4189 = vmatprep.mubr.f32.mxu1 %v9444_v51  ;;  %v6841_v8 = vpack.c.bf16 %v2588_v43, %v2580_v23  ;;  %v6863_v24 = vpack.c.bf16 %v2667_v16, %v2659_v27  ;;  %v2716_v23 = vld [vmem:[#allocation16 + $0x5c8] sm:$0xff]  ;;  %v2541_v27 = vld [vmem:[#allocation16 + $0x50] sm:$0xff]  ;;  %v2550_v16 = vld [vmem:[#allocation16 + $0x98] sm:$0xff] }
 0x69c   : > { %6834 = vmatprep.subr.bf16.mxu0 %v6833_v3  ;;  %v6865_v3 = vpack.c.bf16 %v2684_v29, %v2676_v28  ;;  %v2558_v28 = vld [vmem:[#allocation16 + $0xd8] sm:$0xff] }
 0x69d   : > { %3371 = vmatmul.mubr.f32.gmra.mrb[34].mxu0 %v9411_v50  ;;  %v2596_v50 = vld [vmem:[#allocation16 + $0x208] sm:$0xff] }
 0x69e   : > { %4190 = vmatmul.mubr.f32.gmra.mrb[34].mxu1 %v9449_v35  ;;  %3441 = vmatprep.mubr.f32.mxu0 %v9452_v45  ;;  %v6845_v63 = vpack.c.bf16 %v2604_v39, %v2596_v50  ;;  %v2732_v50 = vld [vmem:[#allocation16 + $0x648] sm:$0xff] }
 0x69f   : > { %6836 = vmatpush1.bf16.msra.mxu0 %v6835_v33  ;;  %4495 = vmatprep.mubr.f32.mxu1 %v8657_v0  ;;  %v6869_v33 = vpack.c.bf16 %v2700_v61, %v2692_v15  ;;  %v2574_v15 = vld [vmem:[#allocation16 + $0x158] sm:$0xff] }
 0x6a0   : > { %6838 = vmatprep.subr.bf16.mxu0 %v6837_v30  ;;  %v2691_v30 = vld [vmem:[#allocation16 + $0x500] sm:$0xff] }
 0x6a1   : > { %v6871_v43 = vpack.c.bf16 %v2699_v62, %v2691_v30  ;;  %v9457_v61 = vld [vmem:[#allocation4 + $0x18] sm:$0xff]  ;;  %v2565_v30 = vld [vmem:[#allocation16 + $0x110] sm:$0xff] }
 0x6a2   : > { %v2573_v62 = vld [vmem:[#allocation16 + $0x150] sm:$0xff] }
 0x6a3   : > { %6840 = vmatpush1.bf16.msra.mxu0 %v6839_v42  ;;  %v6873_v42 = vpack.c.bf16 %v2716_v23, %v2708_v34  ;;  %v2582_v34 = vld [vmem:[#allocation16 + $0x198] sm:$0xff] }
 0x6a4   : > { %6842 = vmatprep.subr.bf16.mxu0 %v6841_v8  ;;  %v2707_v8 = vld [vmem:[#allocation16 + $0x580] sm:$0xff]  ;;  %v2590_v23 = vld [vmem:[#allocation16 + $0x1d8] sm:$0xff] }
 0x6a5   : > { %v6875_v39 = vpack.c.bf16 %v2715_v36, %v2707_v8  ;;  %v2589_v8 = vld [vmem:[#allocation16 + $0x1d0] sm:$0xff]  ;;  %v2598_v36 = vld [vmem:[#allocation16 + $0x218] sm:$0xff] }
 0x6a7   : > { %6844 = vmatpush1.bf16.msra.mxu0 %v6843_v40  ;;  %v6877_v40 = vpack.c.bf16 %v2732_v50, %v2724_v37  ;;  %v2606_v37 = vld [vmem:[#allocation16 + $0x258] sm:$0xff] }
 0x6a8   : > { %6846 = vmatprep.subr.bf16.mxu0 %v6845_v63  ;;  %v2723_v63 = vld [vmem:[#allocation16 + $0x600] sm:$0xff] }
 0x6a9   : > { %v6879_v6 = vpack.c.bf16 %v2731_v41, %v2723_v63  ;;  %v2605_v63 = vld [vmem:[#allocation16 + $0x250] sm:$0xff]  ;;  %v2614_v41 = vld [vmem:[#allocation16 + $0x298] sm:$0xff] }
 0x6ab   : > { %6848 = vmatpush1.bf16.msra.mxu0 %v6847_v7  ;;  %v6881_v7 = vpack.c.bf16 %v2748_v21, %v2740_v1  ;;  %v2622_v1 = vld [vmem:[#allocation16 + $0x2d8] sm:$0xff] }
 0x6ac   : > { %6850 = vmatprep.subr.bf16.mxu0 %v6849_v47  ;;  %v2739_v47 = vld [vmem:[#allocation16 + $0x680] sm:$0xff] }
 0x6ad   : > { %v6883_v58 = vpack.c.bf16 %v2747_v5, %v2739_v47  ;;  %v2621_v47 = vld [vmem:[#allocation16 + $0x2d0] sm:$0xff]  ;;  %v2630_v5 = vld [vmem:[#allocation16 + $0x318] sm:$0xff] }
 0x6af   : > { %6852 = vmatpush1.bf16.msra.mxu0 %v6851_v53  ;;  %v6885_v53 = vpack.c.bf16 %v2764_v17, %v2756_v57  ;;  %v2638_v57 = vld [vmem:[#allocation16 + $0x358] sm:$0xff] }
 0x6b0   : > { %6854 = vmatprep.subr.bf16.mxu0 %v6853_v19  ;;  %v2755_v19 = vld [vmem:[#allocation16 + $0x700] sm:$0xff] }
 0x6b1   : > { %v6887_v44 = vpack.c.bf16 %v2763_v9, %v2755_v19  ;;  %v2637_v19 = vld [vmem:[#allocation16 + $0x350] sm:$0xff]  ;;  %v2646_v9 = vld [vmem:[#allocation16 + $0x398] sm:$0xff] }
 0x6b3   : > { %6856 = vmatpush1.bf16.msra.mxu0 %v6855_v46  ;;  %v6889_v46 = vpack.c.bf16 %v2780_v60, %v2772_v20  ;;  %v2654_v20 = vld [vmem:[#allocation16 + $0x3d8] sm:$0xff] }
 0x6b4   : > { %6858 = vmatprep.subr.bf16.mxu0 %v6857_v32  ;;  %v2771_v32 = vld [vmem:[#allocation16 + $0x780] sm:$0xff] }
 0x6b5   : > { %v6891_v25 = vpack.c.bf16 %v2779_v59, %v2771_v32  ;;  %v2653_v32 = vld [vmem:[#allocation16 + $0x3d0] sm:$0xff]  ;;  %v2662_v59 = vld [vmem:[#allocation16 + $0x418] sm:$0xff] }
 0x6b7   : > { %6860 = vmatpush1.bf16.msra.mxu0 %v6859_v18  ;;  %v6893_v18 = vpack.c.bf16 %v2542_v49, %v2534_v22  ;;  %v2670_v22 = vld [vmem:[#allocation16 + $0x458] sm:$0xff] }
 0x6b8   : > { %6862 = vmatprep.subr.bf16.mxu0 %v6861_v26  ;;  %v2533_v26 = vld [vmem:[#allocation16 + $0x10] sm:$0xff] }
 0x6b9   : > { %v6895_v29 = vpack.c.bf16 %v2541_v27, %v2533_v26  ;;  %v2669_v26 = vld [vmem:[#allocation16 + $0x450] sm:$0xff]  ;;  %v2678_v27 = vld [vmem:[#allocation16 + $0x498] sm:$0xff] }
 0x6bb   : > { %6864 = vmatpush1.bf16.msra.mxu0 %v6863_v24  ;;  %v6897_v24 = vpack.c.bf16 %v2558_v28, %v2550_v16  ;;  %v2686_v16 = vld [vmem:[#allocation16 + $0x4d8] sm:$0xff] }
 0x6bc   : > { %6866 = vmatprep.subr.bf16.mxu0 %v6865_v3  ;;  %v2549_v3 = vld [vmem:[#allocation16 + $0x90] sm:$0xff] }
 0x6bf   : > { %6868 = vmatpush1.bf16.msra.mxu0 %v6867_v31  ;;  %v6899_v31 = vpack.c.bf16 %v2557_v56, %v2549_v3  ;;  %v2685_v3 = vld [vmem:[#allocation16 + $0x4d0] sm:$0xff]  ;;  %v2694_v56 = vld [vmem:[#allocation16 + $0x518] sm:$0xff] }
 0x6c0   : > { %6870 = vmatprep.subr.bf16.mxu0 %v6869_v33  ;;  %v6901_v33 = vpack.c.bf16 %v2574_v15, %v2566_v11  ;;  %v2702_v11 = vld [vmem:[#allocation16 + $0x558] sm:$0xff] }
 0x6c3   : > { %6872 = vmatpush1.bf16.msra.mxu0 %v6871_v43  ;;  %v6903_v43 = vpack.c.bf16 %v2573_v62, %v2565_v30  ;;  %v2701_v30 = vld [vmem:[#allocation16 + $0x550] sm:$0xff]  ;;  %v2710_v62 = vld [vmem:[#allocation16 + $0x598] sm:$0xff] }
 0x6c4   : > { %6874 = vmatprep.subr.bf16.mxu0 %v6873_v42  ;;  %v2581_v42 = vld [vmem:[#allocation16 + $0x190] sm:$0xff] }
 0x6c5   : > { %v6907_v50 = vpack.c.bf16 %v2589_v8, %v2581_v42  ;;  %v2717_v42 = vld [vmem:[#allocation16 + $0x5d0] sm:$0xff]  ;;  %v2726_v8 = vld [vmem:[#allocation16 + $0x618] sm:$0xff] }
 0x6c7   : > { %6876 = vmatpush1.bf16.msra.mxu0 %v6875_v39  ;;  %v6909_v39 = vpack.c.bf16 %v2606_v37, %v2598_v36  ;;  %v2734_v36 = vld [vmem:[#allocation16 + $0x658] sm:$0xff] }
 0x6c8   : > { %6878 = vmatprep.subr.bf16.mxu0 %v6877_v40  ;;  %v2597_v40 = vld [vmem:[#allocation16 + $0x210] sm:$0xff] }
 0x6c9   : > { %v6911_v21 = vpack.c.bf16 %v2605_v63, %v2597_v40  ;;  %v2733_v40 = vld [vmem:[#allocation16 + $0x650] sm:$0xff]  ;;  %v2742_v63 = vld [vmem:[#allocation16 + $0x698] sm:$0xff] }
 0x6cb   : > { %6880 = vmatpush1.bf16.msra.mxu0 %v6879_v6  ;;  %v6913_v6 = vpack.c.bf16 %v2622_v1, %v2614_v41  ;;  %v2750_v41 = vld [vmem:[#allocation16 + $0x6d8] sm:$0xff] }
 0x6cc   : > { %6882 = vmatprep.subr.bf16.mxu0 %v6881_v7  ;;  %v2613_v7 = vld [vmem:[#allocation16 + $0x290] sm:$0xff] }
 0x6cd   : > { %v6915_v17 = vpack.c.bf16 %v2621_v47, %v2613_v7  ;;  %v2749_v7 = vld [vmem:[#allocation16 + $0x6d0] sm:$0xff]  ;;  %v2758_v47 = vld [vmem:[#allocation16 + $0x718] sm:$0xff] }
 0x6cf   : > { %6884 = vmatpush1.bf16.msra.mxu0 %v6883_v58  ;;  %v6917_v58 = vpack.c.bf16 %v2638_v57, %v2630_v5  ;;  %v2766_v5 = vld [vmem:[#allocation16 + $0x758] sm:$0xff] }
 0x6d0   : > { %6886 = vmatprep.subr.bf16.mxu0 %v6885_v53  ;;  %v2629_v53 = vld [vmem:[#allocation16 + $0x310] sm:$0xff] }
 0x6d1   : > { %v6919_v60 = vpack.c.bf16 %v2637_v19, %v2629_v53  ;;  %v2765_v53 = vld [vmem:[#allocation16 + $0x750] sm:$0xff]  ;;  %v2774_v19 = vld [vmem:[#allocation16 + $0x798] sm:$0xff] }
 0x6d3   : > { %6888 = vmatpush1.bf16.msra.mxu0 %v6887_v44  ;;  %v6921_v44 = vpack.c.bf16 %v2654_v20, %v2646_v9  ;;  %v2782_v9 = vld [vmem:[#allocation16 + $0x7d8] sm:$0xff] }
 0x6d4   : > { %6890 = vmatprep.subr.bf16.mxu0 %v6889_v46  ;;  %v2645_v46 = vld [vmem:[#allocation16 + $0x390] sm:$0xff] }
 0x6d5   : > { %v6923_v49 = vpack.c.bf16 %v2653_v32, %v2645_v46  ;;  %v2781_v46 = vld [vmem:[#allocation16 + $0x7d0] sm:$0xff]  ;;  %v2538_v32 = vld [vmem:[#allocation16 + $0x38] sm:$0xff] }
 0x6d7   : > { %6892 = vmatpush1.bf16.msra.mxu0 %v6891_v25  ;;  %v6925_v25 = vpack.c.bf16 %v2670_v22, %v2662_v59  ;;  %v2546_v59 = vld [vmem:[#allocation16 + $0x78] sm:$0xff] }
 0x6d8   : > { %6894 = vmatprep.subr.bf16.mxu0 %v6893_v18  ;;  %v2661_v18 = vld [vmem:[#allocation16 + $0x410] sm:$0xff] }
 0x6d9   : > { %v6927_v28 = vpack.c.bf16 %v2669_v26, %v2661_v18  ;;  %v2545_v18 = vld [vmem:[#allocation16 + $0x70] sm:$0xff]  ;;  %v2554_v26 = vld [vmem:[#allocation16 + $0xb8] sm:$0xff] }
 0x6da   : > { %3442 = vmatmul.mubr.f32.vlgmr.msra.gmra.mrb[24].mxu0 %v9416_v14  ;;  %v6905_v14 = vpack.c.bf16 %v2590_v23, %v2582_v34  ;;  %v2718_v34 = vld [vmem:[#allocation16 + $0x5d8] sm:$0xff] }
 0x6db   : > { %3447 = vmatprep.mubr.f32.mxu0 %v9457_v61  ;;  %6896 = vmatpush1.bf16.msra.mxu0 %v6895_v29  ;;  %v6929_v29 = vpack.c.bf16 %v2686_v16, %v2678_v27  ;;  %v2562_v27 = vld [vmem:[#allocation16 + $0xf8] sm:$0xff] }
 0x6dc   : > { %6898 = vmatprep.subr.bf16.mxu0 %v6897_v24  ;;  %v2677_v24 = vld [vmem:[#allocation16 + $0x490] sm:$0xff] }
 0x6dd   : > { %v6931_v15 = vpack.c.bf16 %v2685_v3, %v2677_v24  ;;  %v2561_v24 = vld [vmem:[#allocation16 + $0xf0] sm:$0xff]  ;;  %v2570_v3 = vld [vmem:[#allocation16 + $0x138] sm:$0xff] }
 0x6de   : > { %3448 = vmatmul.mubr.f32.gmra.mrb[26].mxu0 %v9432_v54 }
 0x6df   : > { %6900 = vmatpush1.bf16.msra.mxu0 %v6899_v31  ;;  %3518 = vmatprep.mubr.f32.mxu0 %v9452_v45  ;;  %v6933_v31 = vpack.c.bf16 %v2702_v11, %v2694_v56  ;;  %v2578_v56 = vld [vmem:[#allocation16 + $0x178] sm:$0xff]  ;;  %v9462_v11 = vld [vmem:[#allocation4] sm:$0xff] }
 0x6e0   : > { %6902 = vmatprep.subr.bf16.mxu0 %v6901_v33  ;;  %v2693_v33 = vld [vmem:[#allocation16 + $0x510] sm:$0xff] }
 0x6e1   : > { %v6935_v23 = vpack.c.bf16 %v2701_v30, %v2693_v33  ;;  %v2569_v33 = vld [vmem:[#allocation16 + $0x130] sm:$0xff] }
 0x6e2   : > { %v2577_v30 = vld [vmem:[#allocation16 + $0x170] sm:$0xff] }
 0x6e3   : > { %6904 = vmatpush1.bf16.msra.mxu0 %v6903_v43  ;;  %v6937_v43 = vpack.c.bf16 %v2718_v34, %v2710_v62  ;;  %v2586_v62 = vld [vmem:[#allocation16 + $0x1b8] sm:$0xff] }
 0x6e4   : > { %6906 = vmatprep.subr.bf16.mxu0 %v6905_v14  ;;  %v2709_v14 = vld [vmem:[#allocation16 + $0x590] sm:$0xff]  ;;  %v2594_v34 = vld [vmem:[#allocation16 + $0x1f8] sm:$0xff] }
 0x6e5   : > { %v6939_v37 = vpack.c.bf16 %v2717_v42, %v2709_v14  ;;  %v2585_v14 = vld [vmem:[#allocation16 + $0x1b0] sm:$0xff] }
 0x6e6   : > { %v2593_v42 = vld [vmem:[#allocation16 + $0x1f0] sm:$0xff] }
 0x6e7   : > { %6908 = vmatpush1.bf16.msra.mxu0 %v6907_v50  ;;  %v6941_v50 = vpack.c.bf16 %v2734_v36, %v2726_v8  ;;  %v2602_v8 = vld [vmem:[#allocation16 + $0x238] sm:$0xff] }
 0x6e8   : > { %6910 = vmatprep.subr.bf16.mxu0 %v6909_v39  ;;  %v2725_v39 = vld [vmem:[#allocation16 + $0x610] sm:$0xff]  ;;  %v2610_v36 = vld [vmem:[#allocation16 + $0x278] sm:$0xff] }
 0x6e9   : > { %v6943_v1 = vpack.c.bf16 %v2733_v40, %v2725_v39  ;;  %v2601_v39 = vld [vmem:[#allocation16 + $0x230] sm:$0xff] }
 0x6ea   : > { %v2609_v40 = vld [vmem:[#allocation16 + $0x270] sm:$0xff] }
 0x6eb   : > { %6912 = vmatpush1.bf16.msra.mxu0 %v6911_v21  ;;  %v6945_v21 = vpack.c.bf16 %v2750_v41, %v2742_v63  ;;  %v2618_v63 = vld [vmem:[#allocation16 + $0x2b8] sm:$0xff] }
 0x6ec   : > { %6914 = vmatprep.subr.bf16.mxu0 %v6913_v6  ;;  %v2741_v6 = vld [vmem:[#allocation16 + $0x690] sm:$0xff]  ;;  %v2626_v41 = vld [vmem:[#allocation16 + $0x2f8] sm:$0xff] }
 0x6ed   : > { %v6947_v57 = vpack.c.bf16 %v2749_v7, %v2741_v6  ;;  %v2625_v6 = vld [vmem:[#allocation16 + $0x2f0] sm:$0xff]  ;;  %v2634_v7 = vld [vmem:[#allocation16 + $0x338] sm:$0xff] }
 0x6ef   : > { %6916 = vmatpush1.bf16.msra.mxu0 %v6915_v17  ;;  %v6949_v17 = vpack.c.bf16 %v2766_v5, %v2758_v47  ;;  %v2642_v47 = vld [vmem:[#allocation16 + $0x378] sm:$0xff] }
 0x6f0   : > { %6918 = vmatprep.subr.bf16.mxu0 %v6917_v58  ;;  %v2757_v58 = vld [vmem:[#allocation16 + $0x710] sm:$0xff] }
 0x6f1   : > { %v6951_v20 = vpack.c.bf16 %v2765_v53, %v2757_v58  ;;  %v2641_v58 = vld [vmem:[#allocation16 + $0x370] sm:$0xff]  ;;  %v2650_v53 = vld [vmem:[#allocation16 + $0x3b8] sm:$0xff] }
 0x6f3   : > { %6920 = vmatpush1.bf16.msra.mxu0 %v6919_v60  ;;  %v6953_v60 = vpack.c.bf16 %v2782_v9, %v2774_v19  ;;  %v2658_v19 = vld [vmem:[#allocation16 + $0x3f8] sm:$0xff] }
 0x6f4   : > { %6922 = vmatprep.subr.bf16.mxu0 %v6921_v44  ;;  %v2773_v44 = vld [vmem:[#allocation16 + $0x790] sm:$0xff] }
 0x6f5   : > { %v6955_v22 = vpack.c.bf16 %v2781_v46, %v2773_v44  ;;  %v2657_v44 = vld [vmem:[#allocation16 + $0x3f0] sm:$0xff]  ;;  %v2666_v46 = vld [vmem:[#allocation16 + $0x438] sm:$0xff] }
 0x6f7   : > { %6924 = vmatpush1.bf16.msra.mxu0 %v6923_v49  ;;  %v7021_v49 = vpack.c.bf16 %v2546_v59, %v2538_v32  ;;  %v2674_v32 = vld [vmem:[#allocation16 + $0x478] sm:$0xff] }
 0x6f8   : > { %6926 = vmatprep.subr.bf16.mxu0 %v6925_v25  ;;  %v2537_v25 = vld [vmem:[#allocation16 + $0x30] sm:$0xff] }
 0x6f9   : > { %v7023_v16 = vpack.c.bf16 %v2545_v18, %v2537_v25  ;;  %v2673_v25 = vld [vmem:[#allocation16 + $0x470] sm:$0xff]  ;;  %v2682_v18 = vld [vmem:[#allocation16 + $0x4b8] sm:$0xff] }
 0x6fb   : > { %6928 = vmatpush1.bf16.msra.mxu0 %v6927_v28  ;;  %v7025_v28 = vpack.c.bf16 %v2562_v27, %v2554_v26  ;;  %v2690_v26 = vld [vmem:[#allocation16 + $0x4f8] sm:$0xff] }
 0x6fc   : > { %6930 = vmatprep.subr.bf16.mxu0 %v6929_v29  ;;  %v2553_v29 = vld [vmem:[#allocation16 + $0xb0] sm:$0xff] }
 0x6ff   : > { %6932 = vmatpush1.bf16.msra.mxu0 %v6931_v15  ;;  %v7027_v15 = vpack.c.bf16 %v2561_v24, %v2553_v29  ;;  %v2689_v29 = vld [vmem:[#allocation16 + $0x4f0] sm:$0xff]  ;;  %v2698_v24 = vld [vmem:[#allocation16 + $0x538] sm:$0xff] }
 0x700   : > { %6934 = vmatprep.subr.bf16.mxu0 %v6933_v31  ;;  %v7029_v31 = vpack.c.bf16 %v2578_v56, %v2570_v3  ;;  %v2706_v3 = vld [vmem:[#allocation16 + $0x578] sm:$0xff] }
 0x703   : > { %6936 = vmatpush1.bf16.msra.mxu0 %v6935_v23  ;;  %v7031_v23 = vpack.c.bf16 %v2577_v30, %v2569_v33  ;;  %v2705_v33 = vld [vmem:[#allocation16 + $0x570] sm:$0xff]  ;;  %v2714_v30 = vld [vmem:[#allocation16 + $0x5b8] sm:$0xff] }
 0x704   : > { %6938 = vmatprep.subr.bf16.mxu0 %v6937_v43  ;;  %v7033_v43 = vpack.c.bf16 %v2594_v34, %v2586_v62  ;;  %v2722_v62 = vld [vmem:[#allocation16 + $0x5f8] sm:$0xff] }
 0x707   : > { %6940 = vmatpush1.bf16.msra.mxu0 %v6939_v37  ;;  %v7035_v37 = vpack.c.bf16 %v2593_v42, %v2585_v14  ;;  %v2721_v14 = vld [vmem:[#allocation16 + $0x5f0] sm:$0xff]  ;;  %v2730_v42 = vld [vmem:[#allocation16 + $0x638] sm:$0xff] }
 0x708   : > { %6942 = vmatprep.subr.bf16.mxu0 %v6941_v50  ;;  %v7037_v50 = vpack.c.bf16 %v2610_v36, %v2602_v8  ;;  %v2738_v8 = vld [vmem:[#allocation16 + $0x678] sm:$0xff] }
 0x70b   : > { %6944 = vmatpush1.bf16.msra.mxu0 %v6943_v1  ;;  %v7039_v1 = vpack.c.bf16 %v2609_v40, %v2601_v39  ;;  %v2737_v39 = vld [vmem:[#allocation16 + $0x670] sm:$0xff]  ;;  %v2746_v40 = vld [vmem:[#allocation16 + $0x6b8] sm:$0xff] }
 0x70c   : > { %6946 = vmatprep.subr.bf16.mxu0 %v6945_v21  ;;  %v7041_v21 = vpack.c.bf16 %v2626_v41, %v2618_v63  ;;  %v2754_v63 = vld [vmem:[#allocation16 + $0x6f8] sm:$0xff] }
 0x70f   : > { %6948 = vmatpush1.bf16.msra.mxu0 %v6947_v57  ;;  %v7045_v57 = vpack.c.bf16 %v2642_v47, %v2634_v7  ;;  %v2770_v7 = vld [vmem:[#allocation16 + $0x778] sm:$0xff] }
 0x710   : > { %6950 = vmatprep.subr.bf16.mxu0 %v6949_v17  ;;  %v2633_v17 = vld [vmem:[#allocation16 + $0x330] sm:$0xff] }
 0x711   : > { %v7047_v9 = vpack.c.bf16 %v2641_v58, %v2633_v17  ;;  %v2769_v17 = vld [vmem:[#allocation16 + $0x770] sm:$0xff]  ;;  %v2778_v58 = vld [vmem:[#allocation16 + $0x7b8] sm:$0xff] }
 0x713   : > { %6952 = vmatpush1.bf16.msra.mxu0 %v6951_v20  ;;  %v7049_v20 = vpack.c.bf16 %v2658_v19, %v2650_v53  ;;  %v2786_v53 = vld [vmem:[#allocation16 + $0x7f8] sm:$0xff] }
 0x714   : > { %6954 = vmatprep.subr.bf16.mxu0 %v6953_v60  ;;  %v2649_v60 = vld [vmem:[#allocation16 + $0x3b0] sm:$0xff] }
 0x715   : > { %v7051_v59 = vpack.c.bf16 %v2657_v44, %v2649_v60  ;;  %v2785_v60 = vld [vmem:[#allocation16 + $0x7f0] sm:$0xff]  ;;  %v3691_v44 = vld [vmem:[#allocation16 + $0x1008] sm:$0xff] }
 0x717   : > { %6956 = vmatpush1.bf16.msra.mxu0 %v6955_v22  ;;  %v7053_v22 = vpack.c.bf16 %v2674_v32, %v2666_v46  ;;  %v3699_v46 = vld [vmem:[#allocation16 + $0x1048] sm:$0xff] }
 0x718   : > { %7022 = vmatprep.subr.bf16.mxu0 %v7021_v49  ;;  %v2665_v49 = vld [vmem:[#allocation16 + $0x430] sm:$0xff] }
 0x719   : > { %v7055_v27 = vpack.c.bf16 %v2673_v25, %v2665_v49  ;;  %v3698_v49 = vld [vmem:[#allocation16 + $0x1040] sm:$0xff]  ;;  %v3707_v25 = vld [vmem:[#allocation16 + $0x1088] sm:$0xff] }
 0x71a   : > { %3519 = vmatmul.mubr.f32.vlgmr.msra.gmra.mrb[28].mxu0 %v9462_v11 }
 0x71b   : > { %3524 = vmatprep.mubr.f32.mxu0 %v9457_v61  ;;  %7024 = vmatpush1.bf16.msra.mxu0 %v7023_v16  ;;  %v7057_v16 = vpack.c.bf16 %v2690_v26, %v2682_v18  ;;  %v3715_v18 = vld [vmem:[#allocation16 + $0x10c8] sm:$0xff] }
 0x71c   : > { %7026 = vmatprep.subr.bf16.mxu0 %v7025_v28  ;;  %v2681_v28 = vld [vmem:[#allocation16 + $0x4b0] sm:$0xff] }
 0x71d   : > { %v7059_v56 = vpack.c.bf16 %v2689_v29, %v2681_v28  ;;  %v3714_v28 = vld [vmem:[#allocation16 + $0x10c0] sm:$0xff]  ;;  %v3723_v29 = vld [vmem:[#allocation16 + $0x1108] sm:$0xff] }
 0x71e   : > { %3525 = vmatmul.mubr.f32.gmra.mrb[30].mxu0 %v9432_v54 }
 0x71f   : > { %7028 = vmatpush1.bf16.msra.mxu0 %v7027_v15  ;;  %3672 = vmatprep.mubr.f32.mxu0 %v9452_v45  ;;  %v2617_v45 = vld [vmem:[#allocation16 + $0x2b0] sm:$0xff]  ;;  %v7061_v15 = vpack.c.bf16 %v2706_v3, %v2698_v24  ;;  %v3731_v24 = vld [vmem:[#allocation16 + $0x1148] sm:$0xff] }
 0x720   : > { %7030 = vmatprep.subr.bf16.mxu0 %v7029_v31  ;;  %v7043_v5 = vpack.c.bf16 %v2625_v6, %v2617_v45  ;;  %v2697_v31 = vld [vmem:[#allocation16 + $0x530] sm:$0xff]  ;;  %v2762_v6 = vld [vmem:[#allocation16 + $0x738] sm:$0xff] }
 0x721   : > { %v7063_v34 = vpack.c.bf16 %v2705_v33, %v2697_v31  ;;  %v2753_v45 = vld [vmem:[#allocation16 + $0x6f0] sm:$0xff]  ;;  %v3730_v31 = vld [vmem:[#allocation16 + $0x1140] sm:$0xff]  ;;  %v3739_v33 = vld [vmem:[#allocation16 + $0x1188] sm:$0xff] }
 0x723   : > { %7032 = vmatpush1.bf16.msra.mxu0 %v7031_v23  ;;  %v7065_v23 = vpack.c.bf16 %v2722_v62, %v2714_v30  ;;  %v3747_v30 = vld [vmem:[#allocation16 + $0x11c8] sm:$0xff] }
 0x724   : > { %7034 = vmatprep.subr.bf16.mxu0 %v7033_v43  ;;  %v2713_v43 = vld [vmem:[#allocation16 + $0x5b0] sm:$0xff] }
 0x725   : > { %v7067_v36 = vpack.c.bf16 %v2721_v14, %v2713_v43  ;;  %v3755_v43 = vld [vmem:[#allocation16 + $0x1208] sm:$0xff] }
 0x727   : > { %7036 = vmatpush1.bf16.msra.mxu0 %v7035_v37  ;;  %v7069_v37 = vpack.c.bf16 %v2738_v8, %v2730_v42  ;;  %v3754_v8 = vld [vmem:[#allocation16 + $0x1200] sm:$0xff] }
 0x728   : > { %7038 = vmatprep.subr.bf16.mxu0 %v7037_v50  ;;  %v2729_v50 = vld [vmem:[#allocation16 + $0x630] sm:$0xff] }
 0x729   : > { %v7071_v41 = vpack.c.bf16 %v2737_v39, %v2729_v50  ;;  %v3779_v50 = vld [vmem:[#allocation16 + $0x12c8] sm:$0xff] }
 0x72b   : > { %7040 = vmatpush1.bf16.msra.mxu0 %v7039_v1  ;;  %v7073_v1 = vpack.c.bf16 %v2754_v63, %v2746_v40  ;;  %v3770_v40 = vld [vmem:[#allocation16 + $0x1280] sm:$0xff] }
 0x72c   : > { %7042 = vmatprep.subr.bf16.mxu0 %v7041_v21  ;;  %v2745_v21 = vld [vmem:[#allocation16 + $0x6b0] sm:$0xff]  ;;  %v3778_v63 = vld [vmem:[#allocation16 + $0x12c0] sm:$0xff] }
 0x72d   : > { %v7075_v47 = vpack.c.bf16 %v2753_v45, %v2745_v21  ;;  %v7107_v21 = vpack.c.bf16 %v3778_v63, %v3770_v40  ;;  %v3898_v40 = vld [vmem:[#allocation16 + $0x1680] sm:$0xff] }
 0x72e   : > { %v3906_v63 = vld [vmem:[#allocation16 + $0x16c0] sm:$0xff] }
 0x72f   : > { %7044 = vmatpush1.bf16.msra.mxu0 %v7043_v5  ;;  %v7077_v5 = vpack.c.bf16 %v2770_v7, %v2762_v6  ;;  %v3786_v6 = vld [vmem:[#allocation16 + $0x1300] sm:$0xff] }
 0x730   : > { %7046 = vmatprep.subr.bf16.mxu0 %v7045_v57  ;;  %v2761_v57 = vld [vmem:[#allocation16 + $0x730] sm:$0xff]  ;;  %v3794_v7 = vld [vmem:[#allocation16 + $0x1340] sm:$0xff] }
 0x731   : > { %v7079_v19 = vpack.c.bf16 %v2769_v17, %v2761_v57  ;;  %v3811_v57 = vld [vmem:[#allocation16 + $0x13c8] sm:$0xff] }
 0x733   : > { %7048 = vmatpush1.bf16.msra.mxu0 %v7047_v9  ;;  %v7081_v9 = vpack.c.bf16 %v2786_v53, %v2778_v58  ;;  %v7111_v58 = vpack.c.bf16 %v3794_v7, %v3786_v6  ;;  %v3914_v6 = vld [vmem:[#allocation16 + $0x1700] sm:$0xff] }
 0x734   : > { %7050 = vmatprep.subr.bf16.mxu0 %v7049_v20  ;;  %v2777_v20 = vld [vmem:[#allocation16 + $0x7b0] sm:$0xff]  ;;  %v3922_v7 = vld [vmem:[#allocation16 + $0x1740] sm:$0xff] }
 0x735   : > { %v7083_v32 = vpack.c.bf16 %v2785_v60, %v2777_v20  ;;  %v3819_v60 = vld [vmem:[#allocation16 + $0x1408] sm:$0xff] }
 0x737   : > { %7052 = vmatpush1.bf16.msra.mxu0 %v7051_v59  ;;  %v7085_v59 = vpack.c.bf16 %v3699_v46, %v3691_v44  ;;  %v3827_v44 = vld [vmem:[#allocation16 + $0x1448] sm:$0xff] }
 0x738   : > { %7054 = vmatprep.subr.bf16.mxu0 %v7053_v22  ;;  %v3690_v22 = vld [vmem:[#allocation16 + $0x1000] sm:$0xff] }
 0x739   : > { %v7087_v26 = vpack.c.bf16 %v3698_v49, %v3690_v22  ;;  %v3818_v22 = vld [vmem:[#allocation16 + $0x1400] sm:$0xff] }
 0x73a   : > { %v3826_v49 = vld [vmem:[#allocation16 + $0x1440] sm:$0xff] }
 0x73b   : > { %7056 = vmatpush1.bf16.msra.mxu0 %v7055_v27  ;;  %v7089_v27 = vpack.c.bf16 %v3715_v18, %v3707_v25  ;;  %v3835_v25 = vld [vmem:[#allocation16 + $0x1488] sm:$0xff] }
 0x73c   : > { %7058 = vmatprep.subr.bf16.mxu0 %v7057_v16  ;;  %v3706_v16 = vld [vmem:[#allocation16 + $0x1080] sm:$0xff]  ;;  %v3843_v18 = vld [vmem:[#allocation16 + $0x14c8] sm:$0xff] }
 0x73d   : > { %v7091_v3 = vpack.c.bf16 %v3714_v28, %v3706_v16  ;;  %v3834_v16 = vld [vmem:[#allocation16 + $0x1480] sm:$0xff] }
 0x73e   : > { %v3842_v28 = vld [vmem:[#allocation16 + $0x14c0] sm:$0xff] }
 0x73f   : > { %7060 = vmatpush1.bf16.msra.mxu0 %v7059_v56  ;;  %v7093_v56 = vpack.c.bf16 %v3731_v24, %v3723_v29  ;;  %v3851_v29 = vld [vmem:[#allocation16 + $0x1508] sm:$0xff] }
 0x740   : > { %7062 = vmatprep.subr.bf16.mxu0 %v7061_v15  ;;  %v3722_v15 = vld [vmem:[#allocation16 + $0x1100] sm:$0xff]  ;;  %v3859_v24 = vld [vmem:[#allocation16 + $0x1548] sm:$0xff] }
 0x741   : > { %v7095_v62 = vpack.c.bf16 %v3730_v31, %v3722_v15  ;;  %v3850_v15 = vld [vmem:[#allocation16 + $0x1500] sm:$0xff] }
 0x742   : > { %v3858_v31 = vld [vmem:[#allocation16 + $0x1540] sm:$0xff] }
 0x743   : > { %7064 = vmatpush1.bf16.msra.mxu0 %v7063_v34  ;;  %v7097_v34 = vpack.c.bf16 %v3747_v30, %v3739_v33  ;;  %v3867_v33 = vld [vmem:[#allocation16 + $0x1588] sm:$0xff] }
 0x744   : > { %7066 = vmatprep.subr.bf16.mxu0 %v7065_v23  ;;  %v3738_v23 = vld [vmem:[#allocation16 + $0x1180] sm:$0xff]  ;;  %v3875_v30 = vld [vmem:[#allocation16 + $0x15c8] sm:$0xff] }
 0x747   : > { %7068 = vmatpush1.bf16.msra.mxu0 %v7067_v36  ;;  %v3762_v36 = vld [vmem:[#allocation16 + $0x1240] sm:$0xff] }
 0x748   : > { %7070 = vmatprep.subr.bf16.mxu0 %v7069_v37  ;;  %v3771_v37 = vld [vmem:[#allocation16 + $0x1288] sm:$0xff] }
 0x749   : > { %v7105_v39 = vpack.c.bf16 %v3779_v50, %v3771_v37  ;;  %v3899_v37 = vld [vmem:[#allocation16 + $0x1688] sm:$0xff] }
 0x74a   : > { %v3907_v50 = vld [vmem:[#allocation16 + $0x16c8] sm:$0xff] }
 0x74b   : > { %7072 = vmatpush1.bf16.msra.mxu0 %v7071_v41  ;;  %v3787_v41 = vld [vmem:[#allocation16 + $0x1308] sm:$0xff] }
 0x74c   : > { %7074 = vmatprep.subr.bf16.mxu0 %v7073_v1  ;;  %v3795_v1 = vld [vmem:[#allocation16 + $0x1348] sm:$0xff] }
 0x74d   : > { %v7109_v45 = vpack.c.bf16 %v3795_v1, %v3787_v41  ;;  %v3915_v41 = vld [vmem:[#allocation16 + $0x1708] sm:$0xff] }
 0x74e   : > { %v3923_v1 = vld [vmem:[#allocation16 + $0x1748] sm:$0xff] }
 0x74f   : > { %7076 = vmatpush1.bf16.msra.mxu0 %v7075_v47 }
 0x750   : > { %7078 = vmatprep.subr.bf16.mxu0 %v7077_v5  ;;  %v3803_v5 = vld [vmem:[#allocation16 + $0x1388] sm:$0xff] }
 0x751   : > { %v7113_v53 = vpack.c.bf16 %v3811_v57, %v3803_v5  ;;  %v3931_v5 = vld [vmem:[#allocation16 + $0x1788] sm:$0xff] }
 0x752   : > { %v3939_v57 = vld [vmem:[#allocation16 + $0x17c8] sm:$0xff] }
 0x753   : > { %7080 = vmatpush1.bf16.msra.mxu0 %v7079_v19  ;;  %v3802_v19 = vld [vmem:[#allocation16 + $0x1380] sm:$0xff] }
 0x754   : > { %7082 = vmatprep.subr.bf16.mxu0 %v7081_v9  ;;  %v3810_v9 = vld [vmem:[#allocation16 + $0x13c0] sm:$0xff] }
 0x757   : > { %7084 = vmatpush1.bf16.msra.mxu0 %v7083_v32  ;;  %v7115_v32 = vpack.c.bf16 %v3810_v9, %v3802_v19  ;;  %v3930_v19 = vld [vmem:[#allocation16 + $0x1780] sm:$0xff] }
 0x758   : > { %7086 = vmatprep.subr.bf16.mxu0 %v7085_v59  ;;  %v7117_v59 = vpack.c.bf16 %v3827_v44, %v3819_v60  ;;  %v3938_v9 = vld [vmem:[#allocation16 + $0x17c0] sm:$0xff]  ;;  %v3693_v60 = vld [vmem:[#allocation16 + $0x1018] sm:$0xff] }
 0x759   : > { %v3701_v44 = vld [vmem:[#allocation16 + $0x1058] sm:$0xff] }
 0x75a   : > { %3673 = vmatmul.mubr.f32.vlgmr.msra.gmra.mrb[32].mxu0 %v9462_v11  ;;  %v3746_v11 = vld [vmem:[#allocation16 + $0x11c0] sm:$0xff] }
 0x75b   : > { %3678 = vmatprep.mubr.f32.mxu0 %v9457_v61  ;;  %7088 = vmatpush1.bf16.msra.mxu0 %v7087_v26  ;;  %v3763_v61 = vld [vmem:[#allocation16 + $0x1248] sm:$0xff]  ;;  %v7099_v14 = vpack.c.bf16 %v3746_v11, %v3738_v23  ;;  %v7119_v26 = vpack.c.bf16 %v3826_v49, %v3818_v22  ;;  %v3866_v23 = vld [vmem:[#allocation16 + $0x1580] sm:$0xff]  ;;  %v3692_v22 = vld [vmem:[#allocation16 + $0x1010] sm:$0xff] }
 0x75c   : > { %7090 = vmatprep.subr.bf16.mxu0 %v7089_v27  ;;  %v7101_v42 = vpack.c.bf16 %v3763_v61, %v3755_v43  ;;  %v7121_v27 = vpack.c.bf16 %v3843_v18, %v3835_v25  ;;  %v3874_v11 = vld [vmem:[#allocation16 + $0x15c0] sm:$0xff]  ;;  %v3883_v43 = vld [vmem:[#allocation16 + $0x1608] sm:$0xff]  ;;  %v3700_v49 = vld [vmem:[#allocation16 + $0x1050] sm:$0xff] }
 0x75d   : > { %v3891_v61 = vld [vmem:[#allocation16 + $0x1648] sm:$0xff]  ;;  %v3709_v25 = vld [vmem:[#allocation16 + $0x1098] sm:$0xff] }
 0x75e   : > { %3679 = vmatmul.mubr.f32.gmra.mrb[34].mxu0 %v9432_v54  ;;  %v7103_v54 = vpack.c.bf16 %v3762_v36, %v3754_v8  ;;  %v3882_v8 = vld [vmem:[#allocation16 + $0x1600] sm:$0xff]  ;;  %v3717_v18 = vld [vmem:[#allocation16 + $0x10d8] sm:$0xff] }
 0x75f   : > { %7092 = vmatpush1.bf16.msra.mxu0 %v7091_v3  ;;  %4029 = vmatprep.mubr.f32.mxu0 %v9429_v13  ;;  %v7123_v3 = vpack.c.bf16 %v3842_v28, %v3834_v16  ;;  %v3890_v36 = vld [vmem:[#allocation16 + $0x1640] sm:$0xff]  ;;  %v3708_v16 = vld [vmem:[#allocation16 + $0x1090] sm:$0xff] }
 0x760   : > { %7094 = vmatprep.subr.bf16.mxu0 %v7093_v56  ;;  %v7125_v56 = vpack.c.bf16 %v3859_v24, %v3851_v29  ;;  %v3716_v28 = vld [vmem:[#allocation16 + $0x10d0] sm:$0xff]  ;;  %v3725_v29 = vld [vmem:[#allocation16 + $0x1118] sm:$0xff] }
 0x761   : > { %v3733_v24 = vld [vmem:[#allocation16 + $0x1158] sm:$0xff] }
 0x763   : > { %7096 = vmatpush1.bf16.msra.mxu0 %v7095_v62  ;;  %v7127_v62 = vpack.c.bf16 %v3858_v31, %v3850_v15  ;;  %v3724_v15 = vld [vmem:[#allocation16 + $0x1110] sm:$0xff] }
 0x764   : > { %7098 = vmatprep.subr.bf16.mxu0 %v7097_v34  ;;  %v7129_v34 = vpack.c.bf16 %v3875_v30, %v3867_v33  ;;  %v3732_v31 = vld [vmem:[#allocation16 + $0x1150] sm:$0xff]  ;;  %v3741_v33 = vld [vmem:[#allocation16 + $0x1198] sm:$0xff] }
 0x765   : > { %v3749_v30 = vld [vmem:[#allocation16 + $0x11d8] sm:$0xff] }
 0x767   : > { %7100 = vmatpush1.bf16.msra.mxu0 %v7099_v14  ;;  %v7131_v14 = vpack.c.bf16 %v3874_v11, %v3866_v23  ;;  %v3740_v23 = vld [vmem:[#allocation16 + $0x1190] sm:$0xff] }
 0x768   : > { %7102 = vmatprep.subr.bf16.mxu0 %v7101_v42  ;;  %v7133_v42 = vpack.c.bf16 %v3891_v61, %v3883_v43  ;;  %v3748_v11 = vld [vmem:[#allocation16 + $0x11d0] sm:$0xff]  ;;  %v3757_v43 = vld [vmem:[#allocation16 + $0x1218] sm:$0xff] }
 0x769   : > { %v3765_v61 = vld [vmem:[#allocation16 + $0x1258] sm:$0xff] }
 0x76b   : > { %7104 = vmatpush1.bf16.msra.mxu0 %v7103_v54  ;;  %v7135_v54 = vpack.c.bf16 %v3890_v36, %v3882_v8  ;;  %v3756_v8 = vld [vmem:[#allocation16 + $0x1210] sm:$0xff] }
 0x76c   : > { %7106 = vmatprep.subr.bf16.mxu0 %v7105_v39  ;;  %v7137_v39 = vpack.c.bf16 %v3907_v50, %v3899_v37  ;;  %v3764_v36 = vld [vmem:[#allocation16 + $0x1250] sm:$0xff]  ;;  %v3773_v37 = vld [vmem:[#allocation16 + $0x1298] sm:$0xff] }
 0x76d   : > { %v9472_v47 = vpop.f32.mrb[32].mxu1  ;;  %v3781_v50 = vld [vmem:[#allocation16 + $0x12d8] sm:$0xff] }
 0x76e   : > { %v9474_v17 = vpop.f32.mrb[33].mxu1 }
 0x76f   : > { %7108 = vmatpush1.bf16.msra.mxu0 %v7107_v21  ;;  %v7139_v21 = vpack.c.bf16 %v3906_v63, %v3898_v40  ;;  %v3772_v40 = vld [vmem:[#allocation16 + $0x1290] sm:$0xff] }
 0x770   : > { %7110 = vmatprep.subr.bf16.mxu0 %v7109_v45  ;;  %v7141_v45 = vpack.c.bf16 %v3923_v1, %v3915_v41  ;;  %v3780_v63 = vld [vmem:[#allocation16 + $0x12d0] sm:$0xff]  ;;  %v3789_v41 = vld [vmem:[#allocation16 + $0x1318] sm:$0xff] }
 0x771   : > { %v9476_v20 = vpop.f32.mrb[34].mxu1  ;;  %v3797_v1 = vld [vmem:[#allocation16 + $0x1358] sm:$0xff] }
 0x772   : > { %v9478_v46 = vpop.f32.mrb[35].mxu1 }
 0x773   : > { %7112 = vmatpush1.bf16.msra.mxu0 %v7111_v58  ;;  %v7143_v58 = vpack.c.bf16 %v3922_v7, %v3914_v6  ;;  %v3788_v6 = vld [vmem:[#allocation16 + $0x1310] sm:$0xff] }
 0x774   : > { %7114 = vmatprep.subr.bf16.mxu0 %v7113_v53  ;;  %v7145_v53 = vpack.c.bf16 %v3939_v57, %v3931_v5  ;;  %v3796_v7 = vld [vmem:[#allocation16 + $0x1350] sm:$0xff]  ;;  %v3805_v5 = vld [vmem:[#allocation16 + $0x1398] sm:$0xff] }
 0x775   : > { %v3813_v57 = vld [vmem:[#allocation16 + $0x13d8] sm:$0xff] }
 0x777   : > { %7116 = vmatpush1.bf16.msra.mxu0 %v7115_v32  ;;  %v7147_v32 = vpack.c.bf16 %v3938_v9, %v3930_v19  ;;  %v3804_v19 = vld [vmem:[#allocation16 + $0x1390] sm:$0xff] }
 0x778   : > { %7118 = vmatprep.subr.bf16.mxu0 %v7117_v59  ;;  %v7149_v59 = vpack.c.bf16 %v3701_v44, %v3693_v60  ;;  %v3812_v9 = vld [vmem:[#allocation16 + $0x13d0] sm:$0xff]  ;;  %v3821_v60 = vld [vmem:[#allocation16 + $0x1418] sm:$0xff] }
 0x779   : > { %v3829_v44 = vld [vmem:[#allocation16 + $0x1458] sm:$0xff] }
 0x77b   : > { %7120 = vmatpush1.bf16.msra.mxu0 %v7119_v26  ;;  %v7151_v26 = vpack.c.bf16 %v3700_v49, %v3692_v22  ;;  %v3820_v22 = vld [vmem:[#allocation16 + $0x1410] sm:$0xff] }
 0x77c   : > { %7122 = vmatprep.subr.bf16.mxu0 %v7121_v27  ;;  %v7153_v27 = vpack.c.bf16 %v3717_v18, %v3709_v25  ;;  %v3828_v49 = vld [vmem:[#allocation16 + $0x1450] sm:$0xff]  ;;  %v3837_v25 = vld [vmem:[#allocation16 + $0x1498] sm:$0xff] }
 0x77d   : > { %v3845_v18 = vld [vmem:[#allocation16 + $0x14d8] sm:$0xff] }
 0x77f   : > { %7124 = vmatpush1.bf16.msra.mxu0 %v7123_v3  ;;  %v7155_v3 = vpack.c.bf16 %v3716_v28, %v3708_v16  ;;  %v3836_v16 = vld [vmem:[#allocation16 + $0x1490] sm:$0xff] }
 0x780   : > { %7126 = vmatprep.subr.bf16.mxu0 %v7125_v56  ;;  %v7157_v56 = vpack.c.bf16 %v3733_v24, %v3725_v29  ;;  %v3844_v28 = vld [vmem:[#allocation16 + $0x14d0] sm:$0xff]  ;;  %v3853_v29 = vld [vmem:[#allocation16 + $0x1518] sm:$0xff] }
 0x781   : > { %v3861_v24 = vld [vmem:[#allocation16 + $0x1558] sm:$0xff] }
 0x783   : > { %7128 = vmatpush1.bf16.msra.mxu0 %v7127_v62  ;;  %v7159_v62 = vpack.c.bf16 %v3732_v31, %v3724_v15  ;;  %v3852_v15 = vld [vmem:[#allocation16 + $0x1510] sm:$0xff] }
 0x784   : > { %7130 = vmatprep.subr.bf16.mxu0 %v7129_v34  ;;  %v7161_v34 = vpack.c.bf16 %v3749_v30, %v3741_v33  ;;  %v3860_v31 = vld [vmem:[#allocation16 + $0x1550] sm:$0xff]  ;;  %v3869_v33 = vld [vmem:[#allocation16 + $0x1598] sm:$0xff] }
 0x785   : > { %v3877_v30 = vld [vmem:[#allocation16 + $0x15d8] sm:$0xff] }
 0x787   : > { %7132 = vmatpush1.bf16.msra.mxu0 %v7131_v14  ;;  %v7163_v14 = vpack.c.bf16 %v3748_v11, %v3740_v23  ;;  %v3868_v23 = vld [vmem:[#allocation16 + $0x1590] sm:$0xff] }
 0x788   : > { %7134 = vmatprep.subr.bf16.mxu0 %v7133_v42  ;;  %v7165_v42 = vpack.c.bf16 %v3765_v61, %v3757_v43  ;;  %v3876_v11 = vld [vmem:[#allocation16 + $0x15d0] sm:$0xff]  ;;  %v3885_v43 = vld [vmem:[#allocation16 + $0x1618] sm:$0xff] }
 0x789   : > { %v3893_v61 = vld [vmem:[#allocation16 + $0x1658] sm:$0xff] }
 0x78b   : > { %7136 = vmatpush1.bf16.msra.mxu0 %v7135_v54  ;;  %v7167_v54 = vpack.c.bf16 %v3764_v36, %v3756_v8  ;;  %v3884_v8 = vld [vmem:[#allocation16 + $0x1610] sm:$0xff] }
 0x78c   : > { %7138 = vmatprep.subr.bf16.mxu0 %v7137_v39  ;;  %v7169_v39 = vpack.c.bf16 %v3781_v50, %v3773_v37  ;;  %v3892_v36 = vld [vmem:[#allocation16 + $0x1650] sm:$0xff]  ;;  %v3901_v37 = vld [vmem:[#allocation16 + $0x1698] sm:$0xff] }
 0x78d   : > { %v3909_v50 = vld [vmem:[#allocation16 + $0x16d8] sm:$0xff] }
 0x78f   : > { %7140 = vmatpush1.bf16.msra.mxu0 %v7139_v21  ;;  %v7171_v21 = vpack.c.bf16 %v3780_v63, %v3772_v40  ;;  %v3900_v40 = vld [vmem:[#allocation16 + $0x1690] sm:$0xff] }
 0x790   : > { %7142 = vmatprep.subr.bf16.mxu0 %v7141_v45  ;;  %v7173_v45 = vpack.c.bf16 %v3797_v1, %v3789_v41  ;;  %v3908_v63 = vld [vmem:[#allocation16 + $0x16d0] sm:$0xff]  ;;  %v3917_v41 = vld [vmem:[#allocation16 + $0x1718] sm:$0xff] }
 0x791   : > { %v3925_v1 = vld [vmem:[#allocation16 + $0x1758] sm:$0xff] }
 0x793   : > { %7144 = vmatpush1.bf16.msra.mxu0 %v7143_v58  ;;  %v7175_v58 = vpack.c.bf16 %v3796_v7, %v3788_v6  ;;  %v3916_v6 = vld [vmem:[#allocation16 + $0x1710] sm:$0xff] }
 0x794   : > { %7146 = vmatprep.subr.bf16.mxu0 %v7145_v53  ;;  %v7177_v53 = vpack.c.bf16 %v3813_v57, %v3805_v5  ;;  %v3924_v7 = vld [vmem:[#allocation16 + $0x1750] sm:$0xff]  ;;  %v3933_v5 = vld [vmem:[#allocation16 + $0x1798] sm:$0xff] }
 0x795   : > { %v3941_v57 = vld [vmem:[#allocation16 + $0x17d8] sm:$0xff] }
 0x797   : > { %7148 = vmatpush1.bf16.msra.mxu0 %v7147_v32  ;;  %v7179_v32 = vpack.c.bf16 %v3812_v9, %v3804_v19  ;;  %v3932_v19 = vld [vmem:[#allocation16 + $0x1790] sm:$0xff] }
 0x798   : > { %7150 = vmatprep.subr.bf16.mxu0 %v7149_v59  ;;  %v7181_v59 = vpack.c.bf16 %v3829_v44, %v3821_v60  ;;  %v3940_v9 = vld [vmem:[#allocation16 + $0x17d0] sm:$0xff]  ;;  %v3697_v60 = vld [vmem:[#allocation16 + $0x1038] sm:$0xff] }
 0x799   : > { %v3705_v44 = vld [vmem:[#allocation16 + $0x1078] sm:$0xff] }
 0x79a   : > { %4030 = vmatmul.mubr.f32.vlgmr.msra.gmra.mrb[24].mxu0 %v9437_v12 }
 0x79b   : > { %4035 = vmatprep.mubr.f32.mxu0 %v9444_v51  ;;  %7152 = vmatpush1.bf16.msra.mxu0 %v7151_v26  ;;  %v7183_v26 = vpack.c.bf16 %v3828_v49, %v3820_v22  ;;  %v3696_v22 = vld [vmem:[#allocation16 + $0x1030] sm:$0xff] }
 0x79c   : > { %7154 = vmatprep.subr.bf16.mxu0 %v7153_v27  ;;  %v7185_v27 = vpack.c.bf16 %v3845_v18, %v3837_v25  ;;  %v3704_v49 = vld [vmem:[#allocation16 + $0x1070] sm:$0xff]  ;;  %v3713_v25 = vld [vmem:[#allocation16 + $0x10b8] sm:$0xff] }
 0x79d   : > { %v3721_v18 = vld [vmem:[#allocation16 + $0x10f8] sm:$0xff] }
 0x79e   : > { %4036 = vmatmul.mubr.f32.gmra.mrb[26].mxu0 %v9449_v35 }
 0x79f   : > { %7156 = vmatpush1.bf16.msra.mxu0 %v7155_v3  ;;  %4106 = vmatprep.mubr.f32.mxu0 %v9429_v13  ;;  %v7187_v3 = vpack.c.bf16 %v3844_v28, %v3836_v16  ;;  %v3712_v16 = vld [vmem:[#allocation16 + $0x10b0] sm:$0xff] }
 0x7a0   : > { %7158 = vmatprep.subr.bf16.mxu0 %v7157_v56  ;;  %v7189_v56 = vpack.c.bf16 %v3861_v24, %v3853_v29  ;;  %v3720_v28 = vld [vmem:[#allocation16 + $0x10f0] sm:$0xff]  ;;  %v3729_v29 = vld [vmem:[#allocation16 + $0x1138] sm:$0xff] }
 0x7a1   : > { %v3737_v24 = vld [vmem:[#allocation16 + $0x1178] sm:$0xff] }
 0x7a3   : > { %7160 = vmatpush1.bf16.msra.mxu0 %v7159_v62  ;;  %v7191_v62 = vpack.c.bf16 %v3860_v31, %v3852_v15  ;;  %v3728_v15 = vld [vmem:[#allocation16 + $0x1130] sm:$0xff] }
 0x7a4   : > { %7162 = vmatprep.subr.bf16.mxu0 %v7161_v34  ;;  %v7193_v34 = vpack.c.bf16 %v3877_v30, %v3869_v33  ;;  %v3736_v31 = vld [vmem:[#allocation16 + $0x1170] sm:$0xff]  ;;  %v3745_v33 = vld [vmem:[#allocation16 + $0x11b8] sm:$0xff] }
 0x7a5   : > { %v3753_v30 = vld [vmem:[#allocation16 + $0x11f8] sm:$0xff] }
 0x7a7   : > { %7164 = vmatpush1.bf16.msra.mxu0 %v7163_v14  ;;  %v7195_v14 = vpack.c.bf16 %v3876_v11, %v3868_v23  ;;  %v3744_v23 = vld [vmem:[#allocation16 + $0x11b0] sm:$0xff] }
 0x7a8   : > { %7166 = vmatprep.subr.bf16.mxu0 %v7165_v42  ;;  %v7197_v42 = vpack.c.bf16 %v3893_v61, %v3885_v43  ;;  %v3752_v11 = vld [vmem:[#allocation16 + $0x11f0] sm:$0xff]  ;;  %v3761_v43 = vld [vmem:[#allocation16 + $0x1238] sm:$0xff] }
 0x7a9   : > { %v3769_v61 = vld [vmem:[#allocation16 + $0x1278] sm:$0xff] }
 0x7ab   : > { %7168 = vmatpush1.bf16.msra.mxu0 %v7167_v54  ;;  %v7199_v54 = vpack.c.bf16 %v3892_v36, %v3884_v8  ;;  %v3760_v8 = vld [vmem:[#allocation16 + $0x1230] sm:$0xff] }
 0x7ac   : > { %7170 = vmatprep.subr.bf16.mxu0 %v7169_v39  ;;  %v7201_v39 = vpack.c.bf16 %v3909_v50, %v3901_v37  ;;  %v3768_v36 = vld [vmem:[#allocation16 + $0x1270] sm:$0xff]  ;;  %v3777_v37 = vld [vmem:[#allocation16 + $0x12b8] sm:$0xff] }
 0x7ad   : > { %v3785_v50 = vld [vmem:[#allocation16 + $0x12f8] sm:$0xff] }
 0x7af   : > { %7172 = vmatpush1.bf16.msra.mxu0 %v7171_v21  ;;  %v7203_v21 = vpack.c.bf16 %v3908_v63, %v3900_v40  ;;  %v3784_v40 = vld [vmem:[#allocation16 + $0x12f0] sm:$0xff]  ;;  %v3793_v63 = vld [vmem:[#allocation16 + $0x1338] sm:$0xff] }
 0x7b0   : > { %7174 = vmatprep.subr.bf16.mxu0 %v7173_v45  ;;  %v7205_v45 = vpack.c.bf16 %v3925_v1, %v3917_v41  ;;  %v3801_v41 = vld [vmem:[#allocation16 + $0x1378] sm:$0xff] }
 0x7b3   : > { %7176 = vmatpush1.bf16.msra.mxu0 %v7175_v58  ;;  %v7207_v58 = vpack.c.bf16 %v3924_v7, %v3916_v6  ;;  %v3800_v6 = vld [vmem:[#allocation16 + $0x1370] sm:$0xff]  ;;  %v3809_v7 = vld [vmem:[#allocation16 + $0x13b8] sm:$0xff] }
 0x7b4   : > { %7178 = vmatprep.subr.bf16.mxu0 %v7177_v53  ;;  %v7209_v53 = vpack.c.bf16 %v3941_v57, %v3933_v5  ;;  %v3817_v5 = vld [vmem:[#allocation16 + $0x13f8] sm:$0xff] }
 0x7b7   : > { %7180 = vmatpush1.bf16.msra.mxu0 %v7179_v32  ;;  %v7211_v32 = vpack.c.bf16 %v3940_v9, %v3932_v19  ;;  %v3816_v19 = vld [vmem:[#allocation16 + $0x13f0] sm:$0xff]  ;;  %v3825_v9 = vld [vmem:[#allocation16 + $0x1438] sm:$0xff] }
 0x7b8   : > { %7182 = vmatprep.subr.bf16.mxu0 %v7181_v59  ;;  %v7277_v59 = vpack.c.bf16 %v3705_v44, %v3697_v60  ;;  %v3833_v60 = vld [vmem:[#allocation16 + $0x1478] sm:$0xff] }
 0x7bb   : > { %7184 = vmatpush1.bf16.msra.mxu0 %v7183_v26  ;;  %v7279_v26 = vpack.c.bf16 %v3704_v49, %v3696_v22  ;;  %v3832_v22 = vld [vmem:[#allocation16 + $0x1470] sm:$0xff]  ;;  %v3841_v49 = vld [vmem:[#allocation16 + $0x14b8] sm:$0xff] }
 0x7bc   : > { %7186 = vmatprep.subr.bf16.mxu0 %v7185_v27  ;;  %v7281_v27 = vpack.c.bf16 %v3721_v18, %v3713_v25  ;;  %v3849_v25 = vld [vmem:[#allocation16 + $0x14f8] sm:$0xff] }
 0x7bf   : > { %7188 = vmatpush1.bf16.msra.mxu0 %v7187_v3  ;;  %v7283_v3 = vpack.c.bf16 %v3720_v28, %v3712_v16  ;;  %v3848_v16 = vld [vmem:[#allocation16 + $0x14f0] sm:$0xff]  ;;  %v3857_v28 = vld [vmem:[#allocation16 + $0x1538] sm:$0xff] }
 0x7c0   : > { %7190 = vmatprep.subr.bf16.mxu0 %v7189_v56  ;;  %v7285_v56 = vpack.c.bf16 %v3737_v24, %v3729_v29  ;;  %v3865_v29 = vld [vmem:[#allocation16 + $0x1578] sm:$0xff] }
 0x7c3   : > { %7192 = vmatpush1.bf16.msra.mxu0 %v7191_v62  ;;  %v7287_v62 = vpack.c.bf16 %v3736_v31, %v3728_v15  ;;  %v3864_v15 = vld [vmem:[#allocation16 + $0x1570] sm:$0xff]  ;;  %v3873_v31 = vld [vmem:[#allocation16 + $0x15b8] sm:$0xff] }
 0x7c4   : > { %7194 = vmatprep.subr.bf16.mxu0 %v7193_v34  ;;  %v7289_v34 = vpack.c.bf16 %v3753_v30, %v3745_v33  ;;  %v3881_v33 = vld [vmem:[#allocation16 + $0x15f8] sm:$0xff] }
 0x7c7   : > { %7196 = vmatpush1.bf16.msra.mxu0 %v7195_v14  ;;  %v7291_v14 = vpack.c.bf16 %v3752_v11, %v3744_v23  ;;  %v3880_v23 = vld [vmem:[#allocation16 + $0x15f0] sm:$0xff]  ;;  %v3889_v11 = vld [vmem:[#allocation16 + $0x1638] sm:$0xff] }
 0x7c8   : > { %7198 = vmatprep.subr.bf16.mxu0 %v7197_v42  ;;  %v7293_v42 = vpack.c.bf16 %v3769_v61, %v3761_v43  ;;  %v3897_v43 = vld [vmem:[#allocation16 + $0x1678] sm:$0xff] }
 0x7cb   : > { %7200 = vmatpush1.bf16.msra.mxu0 %v7199_v54  ;;  %v7295_v54 = vpack.c.bf16 %v3768_v36, %v3760_v8  ;;  %v3896_v8 = vld [vmem:[#allocation16 + $0x1670] sm:$0xff]  ;;  %v3905_v36 = vld [vmem:[#allocation16 + $0x16b8] sm:$0xff] }
 0x7cc   : > { %7202 = vmatprep.subr.bf16.mxu0 %v7201_v39  ;;  %v7297_v39 = vpack.c.bf16 %v3785_v50, %v3777_v37  ;;  %v3913_v37 = vld [vmem:[#allocation16 + $0x16f8] sm:$0xff] }
 0x7cf   : > { %7204 = vmatpush1.bf16.msra.mxu0 %v7203_v21  ;;  %v7301_v21 = vpack.c.bf16 %v3801_v41, %v3793_v63  ;;  %v3929_v63 = vld [vmem:[#allocation16 + $0x1778] sm:$0xff] }
 0x7d0   : > { %7206 = vmatprep.subr.bf16.mxu0 %v7205_v45  ;;  %v3792_v45 = vld [vmem:[#allocation16 + $0x1330] sm:$0xff] }
 0x7d1   : > { %v7303_v57 = vpack.c.bf16 %v3800_v6, %v3792_v45  ;;  %v3928_v45 = vld [vmem:[#allocation16 + $0x1770] sm:$0xff]  ;;  %v3937_v6 = vld [vmem:[#allocation16 + $0x17b8] sm:$0xff] }
 0x7d3   : > { %7208 = vmatpush1.bf16.msra.mxu0 %v7207_v58  ;;  %v7305_v58 = vpack.c.bf16 %v3817_v5, %v3809_v7  ;;  %v3945_v7 = vld [vmem:[#allocation16 + $0x17f8] sm:$0xff] }
 0x7d4   : > { %7210 = vmatprep.subr.bf16.mxu0 %v7209_v53  ;;  %v3808_v53 = vld [vmem:[#allocation16 + $0x13b0] sm:$0xff] }
 0x7d5   : > { %v7307_v44 = vpack.c.bf16 %v3816_v19, %v3808_v53  ;;  %v3944_v53 = vld [vmem:[#allocation16 + $0x17f0] sm:$0xff] }
 0x7d7   : > { %7212 = vmatpush1.bf16.msra.mxu0 %v7211_v32  ;;  %v7309_v32 = vpack.c.bf16 %v3833_v60, %v3825_v9  ;;  %v4309_v9 = vsub.s32 4, %v9173_v52  ;;  %v9492_v60 = vld [vmem:[#allocation17] sm:$0xff] }
 0x7d8   : > { %7278 = vmatprep.subr.bf16.mxu0 %v7277_v59  ;;  %v3824_v59 = vld [vmem:[#allocation16 + $0x1430] sm:$0xff] }
 0x7d9   : > { %v7311_v18 = vpack.c.bf16 %v3832_v22, %v3824_v59  ;;  %v9496_v59 = vld [vmem:[#allocation19] sm:$0xff] }
 0x7da   : > { %4107 = vmatmul.mubr.f32.vlgmr.msra.gmra.mrb[28].mxu0 %v9437_v12 }
 0x7db   : > { %4112 = vmatprep.mubr.f32.mxu0 %v9444_v51  ;;  %7280 = vmatpush1.bf16.msra.mxu0 %v7279_v26  ;;  %v7313_v26 = vpack.c.bf16 %v3849_v25, %v3841_v49 }
 0x7dc   : > { %7282 = vmatprep.subr.bf16.mxu0 %v7281_v27  ;;  %v3840_v27 = vld [vmem:[#allocation16 + $0x14b0] sm:$0xff] }
 0x7dd   : > { %v7315_v24 = vpack.c.bf16 %v3848_v16, %v3840_v27  ;;  %v4356_v16 = vrot.slane %v9496_v59, %v9203_v4 }
 0x7de   : > { %4113 = vmatmul.mubr.f32.gmra.mrb[30].mxu0 %v9449_v35 }
 0x7df   : > { %7284 = vmatpush1.bf16.msra.mxu0 %v7283_v3  ;;  %4260 = vmatprep.mubr.f32.mxu0 %v9429_v13  ;;  %v3776_v13 = vld [vmem:[#allocation16 + $0x12b0] sm:$0xff]  ;;  %v7317_v3 = vpack.c.bf16 %v3865_v29, %v3857_v28 }
 0x7e0   : > { %7286 = vmatprep.subr.bf16.mxu0 %v7285_v56  ;;  %v7299_v1 = vpack.c.bf16 %v3784_v40, %v3776_v13  ;;  %v3856_v56 = vld [vmem:[#allocation16 + $0x1530] sm:$0xff]  ;;  %v3921_v40 = vld [vmem:[#allocation16 + $0x1738] sm:$0xff] }
 0x7e1   : > { %v7319_v30 = vpack.c.bf16 %v3864_v15, %v3856_v56  ;;  %v3912_v13 = vld [vmem:[#allocation16 + $0x16f0] sm:$0xff] }
 0x7e3   : > { %7288 = vmatpush1.bf16.msra.mxu0 %v7287_v62  ;;  %v7321_v62 = vpack.c.bf16 %v3881_v33, %v3873_v31 }
 0x7e4   : > { %7290 = vmatprep.subr.bf16.mxu0 %v7289_v34  ;;  %v3872_v34 = vld [vmem:[#allocation16 + $0x15b0] sm:$0xff] }
 0x7e5   : > { %v7323_v61 = vpack.c.bf16 %v3880_v23, %v3872_v34 }
 0x7e7   : > { %7292 = vmatpush1.bf16.msra.mxu0 %v7291_v14  ;;  %v7325_v14 = vpack.c.bf16 %v3897_v43, %v3889_v11 }
 0x7e8   : > { %7294 = vmatprep.subr.bf16.mxu0 %v7293_v42  ;;  %v3888_v42 = vld [vmem:[#allocation16 + $0x1630] sm:$0xff] }
 0x7e9   : > { %v7327_v50 = vpack.c.bf16 %v3896_v8, %v3888_v42 }
 0x7eb   : > { %7296 = vmatpush1.bf16.msra.mxu0 %v7295_v54  ;;  %v7329_v54 = vpack.c.bf16 %v3913_v37, %v3905_v36 }
 0x7ec   : > { %7298 = vmatprep.subr.bf16.mxu0 %v7297_v39  ;;  %v3904_v39 = vld [vmem:[#allocation16 + $0x16b0] sm:$0xff] }
 0x7ed   : > { %v7331_v41 = vpack.c.bf16 %v3912_v13, %v3904_v39 }
 0x7ef   : > { %7300 = vmatpush1.bf16.msra.mxu0 %v7299_v1  ;;  %v7333_v1 = vpack.c.bf16 %v3929_v63, %v3921_v40  ;;  %v4726_v63 = vld [vmem:[#allocation20 + $0x28] sm:$0xff] }
 0x7f0   : > { %7302 = vmatprep.subr.bf16.mxu0 %v7301_v21  ;;  %v3920_v21 = vld [vmem:[#allocation16 + $0x1730] sm:$0xff] }
 0x7f1   : > { %v7335_v5 = vpack.c.bf16 %v3928_v45, %v3920_v21  ;;  %v4725_v21 = vld [vmem:[#allocation20 + $0x20] sm:$0xff] }
 0x7f2   : > { %v4733_v45 = vld [vmem:[#allocation20 + $0x60] sm:$0xff] }
 0x7f3   : > { %7304 = vmatpush1.bf16.msra.mxu0 %v7303_v57  ;;  %v7337_v57 = vpack.c.bf16 %v3945_v7, %v3937_v6  ;;  %v7615_v6 = vpack.c.bf16 %v4733_v45, %v4725_v21  ;;  %v4742_v7 = vld [vmem:[#allocation20 + $0xa8] sm:$0xff] }
 0x7f4   : > { %7306 = vmatprep.subr.bf16.mxu0 %v7305_v58  ;;  %v3936_v58 = vld [vmem:[#allocation16 + $0x17b0] sm:$0xff] }
 0x7f5   : > { %v7339_v19 = vpack.c.bf16 %v3944_v53, %v3936_v58  ;;  %v4741_v58 = vld [vmem:[#allocation20 + $0xa0] sm:$0xff] }
 0x7f6   : > { %v4749_v53 = vld [vmem:[#allocation20 + $0xe0] sm:$0xff] }
 0x7f7   : > { %7308 = vmatpush1.bf16.msra.mxu0 %v7307_v44  ;;  %v4313_v44 = vsub.s32 5, %v9173_v52 }
 0x7f8   : > { %7310 = vmatprep.subr.bf16.mxu0 %v7309_v32  ;;  %v4310_v32 = vrot.slane %v9492_v60, %v4309_v9 }
 0x7f9   : > { %v4314_v22 = vrot.slane %v9492_v60, %v4313_v44  ;;  %v4372_v25 = vrot.slane %v9496_v59, %v4313_v44  ;;  %v4766_v44 = vld [vmem:[#allocation20 + $0x168] sm:$0xff] }
 0x7fa   : > { %v4335_v49 = vmul.f32 %v4310_v32, %v9472_v47  ;;  %v4343_v28 = vmul.f32 %v4310_v32, %v9476_v20 }
 0x7fb   : > { %7312 = vmatpush1.bf16.msra.mxu0 %v7311_v18  ;;  %v4298_v18 = vrot.slane %v9492_v60, %v9203_v4 }
 0x7fc   : > { %7314 = vmatprep.subr.bf16.mxu0 %v7313_v26  ;;  %v4352_v26 = vrot.slane %v9496_v59, %v9200_v2 }
 0x7ff   : > { %7316 = vmatpush1.bf16.msra.mxu0 %v7315_v24 }
 0x800   : > { %7318 = vmatprep.subr.bf16.mxu0 %v7317_v3 }
 0x803   : > { %7320 = vmatpush1.bf16.msra.mxu0 %v7319_v30 }
 0x804   : > { %7322 = vmatprep.subr.bf16.mxu0 %v7321_v62 }
 0x807   : > { %7324 = vmatpush1.bf16.msra.mxu0 %v7323_v61 }
 0x808   : > { %7326 = vmatprep.subr.bf16.mxu0 %v7325_v14 }
 0x80b   : > { %7328 = vmatpush1.bf16.msra.mxu0 %v7327_v50 }
 0x80c   : > { %7330 = vmatprep.subr.bf16.mxu0 %v7329_v54 }
 0x80f   : > { %7332 = vmatpush1.bf16.msra.mxu0 %v7331_v41  ;;  %v4734_v41 = vld [vmem:[#allocation20 + $0x68] sm:$0xff] }
 0x810   : > { %7334 = vmatprep.subr.bf16.mxu0 %v7333_v1  ;;  %v7613_v1 = vpack.c.bf16 %v4734_v41, %v4726_v63  ;;  %v4870_v63 = vld [vmem:[#allocation20 + $0x4a8] sm:$0xff] }
 0x811   : > { %v4878_v41 = vld [vmem:[#allocation20 + $0x4e8] sm:$0xff] }
 0x813   : > { %7336 = vmatpush1.bf16.msra.mxu0 %v7335_v5  ;;  %v4750_v5 = vld [vmem:[#allocation20 + $0xe8] sm:$0xff] }
 0x814   : > { %7338 = vmatprep.subr.bf16.mxu0 %v7337_v57  ;;  %v7617_v57 = vpack.c.bf16 %v4750_v5, %v4742_v7  ;;  %v4877_v7 = vld [vmem:[#allocation20 + $0x4e0] sm:$0xff] }
 0x817   : > { %7340 = vmatpush1.bf16.msra.mxu0 %v7339_v19  ;;  %v7619_v19 = vpack.c.bf16 %v4749_v53, %v4741_v58  ;;  %v4894_v58 = vld [vmem:[#allocation20 + $0x568] sm:$0xff] }
 0x818   : > { %7614 = vmatprep.subr.bf16.mxu0 %v7613_v1  ;;  %v7649_v1 = vpack.c.bf16 %v4878_v41, %v4870_v63 }
 0x81a   : > { %4261 = vmatmul.mubr.f32.vlgmr.msra.gmra.mrb[32].mxu0 %v9437_v12  ;;  %v4368_v12 = vrot.slane %v9496_v59, %v4309_v9  ;;  %v4758_v9 = vld [vmem:[#allocation20 + $0x128] sm:$0xff] }
 0x81b   : > { %4266 = vmatprep.mubr.f32.mxu0 %v9444_v51  ;;  %v4294_v51 = vrot.slane %v9492_v60, %v9200_v2  ;;  %7616 = vmatpush1.bf16.msra.mxu0 %v7615_v6  ;;  %v7621_v32 = vpack.c.bf16 %v4766_v44, %v4758_v9  ;;  %v4869_v6 = vld [vmem:[#allocation20 + $0x4a0] sm:$0xff] }
 0x81c   : > { %v4393_v47 = vadd.f32 %v4368_v12, %v4335_v49  ;;  %v4401_v62 = vadd.f32 %v4368_v12, %v4343_v28  ;;  %7618 = vmatprep.subr.bf16.mxu0 %v7617_v57  ;;  %v4765_v49 = vld [vmem:[#allocation20 + $0x160] sm:$0xff]  ;;  %v7651_v5 = vpack.c.bf16 %v4877_v7, %v4869_v6  ;;  %v4886_v57 = vld [vmem:[#allocation20 + $0x528] sm:$0xff] }
 0x81d   : > { %v7653_v53 = vpack.c.bf16 %v4894_v58, %v4886_v57  ;;  %v4885_v44 = vld [vmem:[#allocation20 + $0x520] sm:$0xff] }
 0x81e   : > { %4267 = vmatmul.mubr.f32.gmra.mrb[34].mxu0 %v9449_v35  ;;  %v4336_v35 = vmul.f32 %v4314_v22, %v9474_v17  ;;  %v4344_v17 = vmul.f32 %v4314_v22, %v9478_v46  ;;  %v4409_v30 = vmax.f32 %v4393_v47, 0.0  ;;  %v4417_v36 = vmax.f32 %v4401_v62, 0.0  ;;  %v4757_v22 = vld [vmem:[#allocation20 + $0x120] sm:$0xff]  ;;  %v4798_v47 = vld [vmem:[#allocation20 + $0x268] sm:$0xff] }
 0x81f   : > { %7620 = vmatpush1.bf16.msra.mxu0 %v7619_v19  ;;  %v7623_v12 = vpack.c.bf16 %v4765_v49, %v4757_v22  ;;  %v4822_v62 = vld [vmem:[#allocation20 + $0x328] sm:$0xff] }
 0x820   : > { %v4394_v3 = vadd.f32 %v4372_v25, %v4336_v35  ;;  %v4402_v43 = vadd.f32 %v4372_v25, %v4344_v17  ;;  %7622 = vmatprep.subr.bf16.mxu0 %v7621_v32  ;;  %v4782_v35 = vld [vmem:[#allocation20 + $0x1e8] sm:$0xff]  ;;  %v4893_v32 = vld [vmem:[#allocation20 + $0x560] sm:$0xff] }
 0x821   : > { %v4806_v17 = vld [vmem:[#allocation20 + $0x2a8] sm:$0xff]  ;;  %v7655_v22 = vpack.c.bf16 %v4893_v32, %v4885_v44 }
 0x822   : > { %v4410_v11 = vmax.f32 %v4394_v3, 0.0  ;;  %v4418_v46 = vmax.f32 %v4402_v43, 0.0  ;;  %v4902_v49 = vld [vmem:[#allocation20 + $0x5a8] sm:$0xff] }
 0x823   : > { %7624 = vmatpush1.bf16.msra.mxu0 %v7623_v12  ;;  %v4910_v12 = vld [vmem:[#allocation20 + $0x5e8] sm:$0xff] }
 0x86d   : > { %v4031_v27 = vpop.f32.mrb[24].mxu0 }
 0x86e   : > { %v4331_v29 = vmul.f32 %v4294_v51, %v4031_v27  ;;  %v4033_v24 = vpop.f32.mrb[25].mxu0 }
 0x86f   : > { %v4332_v56 = vmul.f32 %v4298_v18, %v4033_v24  ;;  %v4797_v24 = vld [vmem:[#allocation20 + $0x260] sm:$0xff] }
 0x870   : > { %v4389_v15 = vadd.f32 %v4352_v26, %v4331_v29  ;;  %v4789_v29 = vld [vmem:[#allocation20 + $0x220] sm:$0xff] }
 0x871   : > { %v4390_v31 = vadd.f32 %v4356_v16, %v4332_v56  ;;  %v4037_v33 = vpop.f32.mrb[26].mxu0  ;;  %v7631_v3 = vpack.c.bf16 %v4797_v24, %v4789_v29  ;;  %v4814_v56 = vld [vmem:[#allocation20 + $0x2e8] sm:$0xff] }
 0x872   : > { %v4405_v34 = vmax.f32 %v4389_v15, 0.0  ;;  %v4339_v2 = vmul.f32 %v4294_v51, %v4037_v33  ;;  %v4039_v23 = vpop.f32.mrb[27].mxu0  ;;  %v4774_v51 = vld [vmem:[#allocation20 + $0x1a8] sm:$0xff]  ;;  %v7633_v15 = vpack.c.bf16 %v4814_v56, %v4806_v17  ;;  %v4813_v33 = vld [vmem:[#allocation20 + $0x2e0] sm:$0xff] }
 0x873   : > { %v4406_v4 = vmax.f32 %v4390_v31, 0.0  ;;  %v4340_v61 = vmul.f32 %v4298_v18, %v4039_v23  ;;  %v7625_v25 = vpack.c.bf16 %v4782_v35, %v4774_v51  ;;  %v4773_v18 = vld [vmem:[#allocation20 + $0x1a0] sm:$0xff]  ;;  %v7657_v51 = vpack.c.bf16 %v4910_v12, %v4902_v49  ;;  %v4934_v24 = vld [vmem:[#allocation20 + $0x6a8] sm:$0xff] }
 0x874   : > { %v4421_v14 = vmax.f32 %v4405_v34, %v4409_v30  ;;  %v4397_v20 = vadd.f32 %v4352_v26, %v4339_v2  ;;  %v4781_v26 = vld [vmem:[#allocation20 + $0x1e0] sm:$0xff]  ;;  %v4830_v34 = vld [vmem:[#allocation20 + $0x368] sm:$0xff] }
 0x875   : > { %v4422_v42 = vmax.f32 %v4406_v4, %v4410_v11  ;;  %v4398_v8 = vadd.f32 %v4356_v16, %v4340_v61  ;;  %7626 = vmatprep.subr.bf16.mxu0 %v7625_v25  ;;  %v7627_v27 = vpack.c.bf16 %v4781_v26, %v4773_v18  ;;  %v4790_v16 = vld [vmem:[#allocation20 + $0x228] sm:$0xff]  ;;  %v4805_v31 = vld [vmem:[#allocation20 + $0x2a0] sm:$0xff]  ;;  %v7637_v2 = vpack.c.bf16 %v4830_v34, %v4822_v62 }
 0x876   : > { %v4413_v37 = vmax.f32 %v4397_v20, 0.0  ;;  %v7629_v28 = vpack.c.bf16 %v4798_v47, %v4790_v16  ;;  %v7635_v30 = vpack.c.bf16 %v4813_v33, %v4805_v31  ;;  %v4821_v23 = vld [vmem:[#allocation20 + $0x320] sm:$0xff]  ;;  %v4838_v4 = vld [vmem:[#allocation20 + $0x3a8] sm:$0xff] }
 0x877   : > { %v4414_v50 = vmax.f32 %v4398_v8, 0.0  ;;  %7628 = vmatpush1.bf16.msra.mxu0 %v7627_v27  ;;  %v4829_v11 = vld [vmem:[#allocation20 + $0x360] sm:$0xff]  ;;  %v4846_v61 = vld [vmem:[#allocation20 + $0x3e8] sm:$0xff] }
 0x878   : > { %v4425_v54 = vmax.f32 %v4413_v37, %v4417_v36  ;;  %7630 = vmatprep.subr.bf16.mxu0 %v7629_v28  ;;  %v7639_v43 = vpack.c.bf16 %v4829_v11, %v4821_v23  ;;  %v4837_v20 = vld [vmem:[#allocation20 + $0x3a0] sm:$0xff]  ;;  %v4854_v36 = vld [vmem:[#allocation20 + $0x428] sm:$0xff]  ;;  %v4302_v11 = vrot.slane %v9492_v60, %v9361_v10 }
 0x879   : > { %v4426_v39 = vmax.f32 %v4414_v50, %v4418_v46  ;;  %v4862_v37 = vld [vmem:[#allocation20 + $0x468] sm:$0xff]  ;;  %v4853_v50 = vld [vmem:[#allocation20 + $0x420] sm:$0xff] }
 0x87a   : > { %v9513_v13 = vpack.c.bf16 %v4425_v54, %v4421_v14  ;;  %v7641_v14 = vpack.c.bf16 %v4846_v61, %v4838_v4  ;;  %v7645_v46 = vpack.c.bf16 %v4862_v37, %v4854_v36  ;;  %v4861_v54 = vld [vmem:[#allocation20 + $0x460] sm:$0xff]  ;;  %v4918_v26 = vld [vmem:[#allocation20 + $0x628] sm:$0xff]  ;;  %v4306_v4 = vrot.slane %v9492_v60, %v9365_v38 }
 0x87b   : > { %v9515_v40 = vpack.c.bf16 %v4426_v39, %v4422_v42  ;;  %7632 = vmatpush1.bf16.msra.mxu0 %v7631_v3  ;;  %v4845_v42 = vld [vmem:[#allocation20 + $0x3e0] sm:$0xff]  ;;  %v7647_v39 = vpack.c.bf16 %v4861_v54, %v4853_v50  ;;  %v4926_v27 = vld [vmem:[#allocation20 + $0x668] sm:$0xff]  ;;  %v4321_v61 = vsub.s32 7, %v9173_v52  ;;  %v4364_v36 = vrot.slane %v9496_v59, %v9365_v38 }
 0x87c   : > { %7634 = vmatprep.subr.bf16.mxu0 %v7633_v15  ;;  %v7643_v8 = vpack.c.bf16 %v4845_v42, %v4837_v20  ;;  %v4901_v35 = vld [vmem:[#allocation20 + $0x5a0] sm:$0xff]  ;;  %v7661_v16 = vpack.c.bf16 %v4926_v27, %v4918_v26  ;;  %v4942_v3 = vld [vmem:[#allocation20 + $0x6e8] sm:$0xff]  ;;  %v4360_v20 = vrot.slane %v9496_v59, %v9361_v10 }
 0x87d   : > { %7342 = vmatprep.subr.bf16.mxu1 %v9515_v40  ;;  %v4909_v25 = vld [vmem:[#allocation20 + $0x5e0] sm:$0xff]  ;;  %v7665_v17 = vpack.c.bf16 %v4942_v3, %v4934_v24  ;;  %v4950_v33 = vld [vmem:[#allocation20 + $0x728] sm:$0xff]  ;;  %v4322_v37 = vrot.slane %v9492_v60, %v4321_v61  ;;  %v4380_v54 = vrot.slane %v9496_v59, %v4321_v61 }
 0x87e   : > { %7344 = vmatpush1.bf16.msra.mxu1 %v9513_v13  ;;  %v7659_v18 = vpack.c.bf16 %v4909_v25, %v4901_v35  ;;  %v4917_v47 = vld [vmem:[#allocation20 + $0x620] sm:$0xff] }
 0x87f   : > { %7636 = vmatpush1.bf16.msra.mxu0 %v7635_v30  ;;  %v4925_v28 = vld [vmem:[#allocation20 + $0x660] sm:$0xff]  ;;  %v4958_v30 = vld [vmem:[#allocation20 + $0x768] sm:$0xff] }
 0x880   : > { %7638 = vmatprep.subr.bf16.mxu0 %v7637_v2  ;;  %v7663_v29 = vpack.c.bf16 %v4925_v28, %v4917_v47  ;;  %v4933_v56 = vld [vmem:[#allocation20 + $0x6a0] sm:$0xff]  ;;  %v7669_v62 = vpack.c.bf16 %v4958_v30, %v4950_v33  ;;  %v4722_v47 = vld [vmem:[#allocation20 + $0x8] sm:$0xff] }
 0x881   : > { %6193 = vmatmul.mubr.msk.f32.vlgmr.msra.gmra.mrb[36].mxu1 %vm674_vm1, %v9181_v55  ;;  %v4941_v15 = vld [vmem:[#allocation20 + $0x6e0] sm:$0xff]  ;;  %v4730_v28 = vld [vmem:[#allocation20 + $0x48] sm:$0xff] }
 0x882   : > { %4566 = vmatprep.mubr.f32.mxu1 %v8657_v0  ;;  %v7667_v31 = vpack.c.bf16 %v4941_v15, %v4933_v56  ;;  %v4949_v34 = vld [vmem:[#allocation20 + $0x720] sm:$0xff]  ;;  %v4746_v56 = vld [vmem:[#allocation20 + $0xc8] sm:$0xff] }
 0x883   : > { %7640 = vmatpush1.bf16.msra.mxu0 %v7639_v43  ;;  %v4957_v2 = vld [vmem:[#allocation20 + $0x760] sm:$0xff]  ;;  %v4317_v43 = vsub.s32 6, %v9173_v52  ;;  %v4762_v33 = vld [vmem:[#allocation20 + $0x148] sm:$0xff] }
 0x884   : > { %7642 = vmatprep.subr.bf16.mxu0 %v7641_v14  ;;  %v7671_v23 = vpack.c.bf16 %v4957_v2, %v4949_v34  ;;  %v4721_v24 = vld [vmem:[#allocation20] sm:$0xff] }
 0x885   : > { %v4318_v42 = vrot.slane %v9492_v60, %v4317_v43  ;;  %v4729_v3 = vld [vmem:[#allocation20 + $0x40] sm:$0xff] }
 0x886   : > { %v4753_v34 = vld [vmem:[#allocation20 + $0x100] sm:$0xff] }
 0x887   : > { %7644 = vmatpush1.bf16.msra.mxu0 %v7643_v8  ;;  %v4761_v2 = vld [vmem:[#allocation20 + $0x140] sm:$0xff] }
 0x888   : > { %7646 = vmatprep.subr.bf16.mxu0 %v7645_v46  ;;  %v4376_v46 = vrot.slane %v9496_v59, %v4317_v43  ;;  %v7367_v43 = vpack.c.bf16 %v4761_v2, %v4753_v34  ;;  %v4769_v61 = vld [vmem:[#allocation20 + $0x180] sm:$0xff]  ;;  %v4938_v34 = vld [vmem:[#allocation20 + $0x6c8] sm:$0xff] }
 0x88b   : > { %7648 = vmatpush1.bf16.msra.mxu0 %v7647_v39 }
 0x88c   : > { %7650 = vmatprep.subr.bf16.mxu0 %v7649_v1 }
 0x88f   : > { %7652 = vmatpush1.bf16.msra.mxu0 %v7651_v5 }
 0x890   : > { %7654 = vmatprep.subr.bf16.mxu0 %v7653_v53 }
 0x893   : > { %7656 = vmatpush1.bf16.msra.mxu0 %v7655_v22 }
 0x894   : > { %7658 = vmatprep.subr.bf16.mxu0 %v7657_v51 }
 0x897   : > { %7660 = vmatpush1.bf16.msra.mxu0 %v7659_v18 }
 0x898   : > { %7662 = vmatprep.subr.bf16.mxu0 %v7661_v16 }
 0x89b   : > { %7664 = vmatpush1.bf16.msra.mxu0 %v7663_v29  ;;  %v7357_v29 = vpack.c.bf16 %v4730_v28, %v4722_v47  ;;  %v4881_v47 = vld [vmem:[#allocation20 + $0x500] sm:$0xff] }
 0x89c   : > { %7666 = vmatprep.subr.bf16.mxu0 %v7665_v17  ;;  %v4738_v17 = vld [vmem:[#allocation20 + $0x88] sm:$0xff]  ;;  %v4889_v28 = vld [vmem:[#allocation20 + $0x540] sm:$0xff] }
 0x89d   : > { %v7361_v15 = vpack.c.bf16 %v4746_v56, %v4738_v17  ;;  %v4897_v56 = vld [vmem:[#allocation20 + $0x580] sm:$0xff] }
 0x89f   : > { %7668 = vmatpush1.bf16.msra.mxu0 %v7667_v31  ;;  %v4745_v31 = vld [vmem:[#allocation20 + $0xc0] sm:$0xff] }
 0x8a0   : > { %7670 = vmatprep.subr.bf16.mxu0 %v7669_v62 }
 0x8a3   : > { %7672 = vmatpush1.bf16.msra.mxu0 %v7671_v23  ;;  %v4770_v23 = vld [vmem:[#allocation20 + $0x188] sm:$0xff] }
 0x8ad   : > { %v4108_v21 = vpop.f32.mrb[28].mxu0 }
 0x8ae   : > { %v4110_v45 = vpop.f32.mrb[29].mxu0  ;;  %v4333_v14 = vmul.f32 %v4302_v11, %v4108_v21 }
 0x8af   : > { %v4334_v8 = vmul.f32 %v4306_v4, %v4110_v45 }
 0x8b0   : > { %v4391_v39 = vadd.f32 %v4360_v20, %v4333_v14  ;;  %v4777_v14 = vld [vmem:[#allocation20 + $0x1c0] sm:$0xff] }
 0x8b1   : > { %v4114_v19 = vpop.f32.mrb[30].mxu0  ;;  %v4392_v1 = vadd.f32 %v4364_v36, %v4334_v8  ;;  %v7371_v8 = vpack.c.bf16 %v4777_v14, %v4769_v61  ;;  %v4954_v61 = vld [vmem:[#allocation20 + $0x748] sm:$0xff] }
 0x8b2   : > { %v4116_v9 = vpop.f32.mrb[31].mxu0  ;;  %v4341_v63 = vmul.f32 %v4302_v11, %v4114_v19  ;;  %v4407_v5 = vmax.f32 %v4391_v39, 0.0  ;;  %v4778_v11 = vld [vmem:[#allocation20 + $0x1c8] sm:$0xff] }
 0x8b3   : > { %v4342_v21 = vmul.f32 %v4306_v4, %v4116_v9  ;;  %v4408_v53 = vmax.f32 %v4392_v1, 0.0  ;;  %v7369_v4 = vpack.c.bf16 %v4778_v11, %v4770_v23  ;;  %v4826_v1 = vld [vmem:[#allocation20 + $0x348] sm:$0xff]  ;;  %v4929_v11 = vld [vmem:[#allocation20 + $0x680] sm:$0xff] }
 0x8b4   : > { %v4399_v57 = vadd.f32 %v4360_v20, %v4341_v63  ;;  %v4786_v20 = vld [vmem:[#allocation20 + $0x208] sm:$0xff]  ;;  %v4801_v63 = vld [vmem:[#allocation20 + $0x280] sm:$0xff] }
 0x8b5   : > { %v4400_v44 = vadd.f32 %v4364_v36, %v4342_v21  ;;  %v4785_v36 = vld [vmem:[#allocation20 + $0x200] sm:$0xff] }
 0x8b6   : > { %v4415_v51 = vmax.f32 %v4399_v57, 0.0 }
 0x8b7   : > { %v4416_v9 = vmax.f32 %v4400_v44, 0.0  ;;  %v4858_v44 = vld [vmem:[#allocation20 + $0x448] sm:$0xff] }
 0x8ed   : > { %v4262_v50 = vpop.f32.mrb[32].mxu0 }
 0x8ee   : > { %v4337_v52 = vmul.f32 %v4318_v42, %v4262_v50  ;;  %v4264_v41 = vpop.f32.mrb[33].mxu0  ;;  %v4810_v50 = vld [vmem:[#allocation20 + $0x2c8] sm:$0xff] }
 0x8ef   : > { %v4338_v10 = vmul.f32 %v4322_v37, %v4264_v41  ;;  %v4818_v41 = vld [vmem:[#allocation20 + $0x308] sm:$0xff] }
 0x8f0   : > { %v4395_v6 = vadd.f32 %v4376_v46, %v4337_v52  ;;  %v4809_v52 = vld [vmem:[#allocation20 + $0x2c0] sm:$0xff] }
 0x8f1   : > { %v4396_v7 = vadd.f32 %v4380_v54, %v4338_v10  ;;  %v4268_v45 = vpop.f32.mrb[34].mxu0  ;;  %v7379_v21 = vpack.c.bf16 %v4809_v52, %v4801_v63  ;;  %v7381_v10 = vpack.c.bf16 %v4826_v1, %v4818_v41  ;;  %v4974_v63 = vld [vmem:[#allocation20 + $0x7e8] sm:$0xff]  ;;  %v4961_v52 = vld [vmem:[#allocation20 + $0x780] sm:$0xff] }
 0x8f2   : > { %v4411_v38 = vmax.f32 %v4395_v6, 0.0  ;;  %v4345_v58 = vmul.f32 %v4318_v42, %v4268_v45  ;;  %v4270_v60 = vpop.f32.mrb[35].mxu0  ;;  %v4794_v42 = vld [vmem:[#allocation20 + $0x248] sm:$0xff]  ;;  %v4817_v6 = vld [vmem:[#allocation20 + $0x300] sm:$0xff] }
 0x8f3   : > { %v4412_v32 = vmax.f32 %v4396_v7, 0.0  ;;  %v4346_v22 = vmul.f32 %v4322_v37, %v4270_v60  ;;  %v4793_v37 = vld [vmem:[#allocation20 + $0x240] sm:$0xff]  ;;  %v4834_v45 = vld [vmem:[#allocation20 + $0x388] sm:$0xff] }
 0x8f4   : > { %v4423_v59 = vmax.f32 %v4407_v5, %v4411_v38  ;;  %v4403_v49 = vadd.f32 %v4376_v46, %v4345_v58  ;;  %v4802_v46 = vld [vmem:[#allocation20 + $0x288] sm:$0xff]  ;;  %v4825_v7 = vld [vmem:[#allocation20 + $0x340] sm:$0xff] }
 0x8f5   : > { %v4424_v19 = vmax.f32 %v4408_v53, %v4412_v32  ;;  %v4404_v12 = vadd.f32 %v4380_v54, %v4346_v22  ;;  %v7375_v54 = vpack.c.bf16 %v4793_v37, %v4785_v36  ;;  %v7377_v39 = vpack.c.bf16 %v4810_v50, %v4802_v46  ;;  %v4842_v5 = vld [vmem:[#allocation20 + $0x3c8] sm:$0xff]  ;;  %v4833_v58 = vld [vmem:[#allocation20 + $0x380] sm:$0xff] }
 0x8f6   : > { %v4419_v35 = vmax.f32 %v4403_v49, 0.0  ;;  %v7383_v57 = vpack.c.bf16 %v4825_v7, %v4817_v6  ;;  %v7385_v38 = vpack.c.bf16 %v4842_v5, %v4834_v45  ;;  %v4841_v60 = vld [vmem:[#allocation20 + $0x3c0] sm:$0xff]  ;;  %v4850_v53 = vld [vmem:[#allocation20 + $0x408] sm:$0xff] }
 0x8f7   : > { %v4420_v25 = vmax.f32 %v4404_v12, 0.0  ;;  %v7387_v32 = vpack.c.bf16 %v4841_v60, %v4833_v58  ;;  %v7389_v22 = vpack.c.bf16 %v4858_v44, %v4850_v53  ;;  %v4857_v49 = vld [vmem:[#allocation20 + $0x440] sm:$0xff]  ;;  %v4874_v12 = vld [vmem:[#allocation20 + $0x4c8] sm:$0xff] }
 0x8f8   : > { %v4427_v18 = vmax.f32 %v4415_v51, %v4419_v35  ;;  %v4962_v46 = vld [vmem:[#allocation20 + $0x788] sm:$0xff]  ;;  %v4969_v41 = vld [vmem:[#allocation20 + $0x7c0] sm:$0xff] }
 0x8f9   : > { %v4428_v26 = vmax.f32 %v4416_v9, %v4420_v25  ;;  %v4865_v9 = vld [vmem:[#allocation20 + $0x480] sm:$0xff]  ;;  %v4970_v50 = vld [vmem:[#allocation20 + $0x7c8] sm:$0xff] }
 0x8fa   : > { %v7347_v27 = vpack.c.bf16 %v4427_v18, %v4423_v59  ;;  %v4849_v59 = vld [vmem:[#allocation20 + $0x400] sm:$0xff]  ;;  %v4882_v18 = vld [vmem:[#allocation20 + $0x508] sm:$0xff] }
 0x8fb   : > { %v7345_v16 = vpack.c.bf16 %v4428_v26, %v4424_v19  ;;  %v4866_v19 = vld [vmem:[#allocation20 + $0x488] sm:$0xff]  ;;  %v7391_v51 = vpack.c.bf16 %v4857_v49, %v4849_v59  ;;  %v4873_v25 = vld [vmem:[#allocation20 + $0x4c0] sm:$0xff] }
 0x8fc   : > { %v7393_v35 = vpack.c.bf16 %v4874_v12, %v4866_v19  ;;  %v4890_v26 = vld [vmem:[#allocation20 + $0x548] sm:$0xff]  ;;  %v4973_v6 = vld [vmem:[#allocation20 + $0x7e0] sm:$0xff] }
 0x8fd   : > { %7346 = vmatprep.subr.bf16.mxu1 %v7345_v16  ;;  %v4978_v45 = vld [vmem:[#allocation20 + $0x808] sm:$0xff]  ;;  %v4981_v59 = vld [vmem:[#allocation20 + $0x820] sm:$0xff] }
 0x8fe   : > { %7348 = vmatpush1.bf16.msra.mxu1 %v7347_v27  ;;  %v4986_v5 = vld [vmem:[#allocation20 + $0x848] sm:$0xff]  ;;  %v4989_v49 = vld [vmem:[#allocation20 + $0x860] sm:$0xff] }
 0x8ff   : > { %7350 = vmatprep.subr.bf16.mxu1 %v9515_v40  ;;  %v7359_v40 = vpack.c.bf16 %v4729_v3, %v4721_v24  ;;  %v4906_v24 = vld [vmem:[#allocation20 + $0x5c8] sm:$0xff]  ;;  %v7399_v3 = vpack.c.bf16 %v4889_v28, %v4881_v47  ;;  %v4993_v47 = vld [vmem:[#allocation20 + $0x880] sm:$0xff] }
 0x900   : > { %v4990_v58 = vld [vmem:[#allocation20 + $0x868] sm:$0xff]  ;;  %v5001_v28 = vld [vmem:[#allocation20 + $0x8c0] sm:$0xff] }
 0x901   : > { %6194 = vmatmul.mubr.msk.f32.vlgmr.msra.gmra.mrb[38].mxu1 %vm674_vm1, %v9181_v55  ;;  %v4737_v55 = vld [vmem:[#allocation20 + $0x80] sm:$0xff]  ;;  %v4994_v19 = vld [vmem:[#allocation20 + $0x888] sm:$0xff] }
 0x902   : > { %7352 = vmatpush1.bf16.msra.mxu1 %v9513_v13  ;;  %4639 = vmatprep.mubr.f32.mxu1 %v8657_v0  ;;  %v4754_v13 = vld [vmem:[#allocation20 + $0x108] sm:$0xff]  ;;  %v7363_v30 = vpack.c.bf16 %v4745_v31, %v4737_v55 }
 0x903   : > { %7354 = vmatprep.subr.bf16.mxu1 %v7345_v16  ;;  %v7365_v62 = vpack.c.bf16 %v4762_v33, %v4754_v13  ;;  %v7397_v16 = vpack.c.bf16 %v4890_v26, %v4882_v18  ;;  %v4922_v55 = vld [vmem:[#allocation20 + $0x648] sm:$0xff]  ;;  %v4913_v33 = vld [vmem:[#allocation20 + $0x600] sm:$0xff] }
 0x905   : > { %6195 = vmatmul.mubr.msk.f32.vlgmr.msra.gmra.mrb[40].mxu1 %vm674_vm1, %v9278_v48 }
 0x906   : > { %7356 = vmatpush1.bf16.msra.mxu1 %v7347_v27  ;;  %4710 = vmatprep.mubr.f32.mxu1 %v8657_v0  ;;  %v7395_v27 = vpack.c.bf16 %v4873_v25, %v4865_v9  ;;  %v5006_v9 = vld [vmem:[#allocation20 + $0x8e8] sm:$0xff] }
 0x907   : > { %7358 = vmatprep.subr.bf16.mxu1 %v7357_v29  ;;  %v4898_v29 = vld [vmem:[#allocation20 + $0x588] sm:$0xff] }
 0x908   : > { %v7401_v17 = vpack.c.bf16 %v4906_v24, %v4898_v29 }
 0x909   : > { %6196 = vmatmul.mubr.msk.f32.vlgmr.msra.gmra.mrb[42].mxu1 %vm674_vm1, %v9278_v48  ;;  %v7373_v48 = vpack.c.bf16 %v4794_v42, %v4786_v20  ;;  %v4945_v42 = vld [vmem:[#allocation20 + $0x700] sm:$0xff]  ;;  %vm5921_vm1 = vcmask 303104  }
 0x90a   : > { %7360 = vmatpush1.bf16.msra.mxu1 %v7359_v40  ;;  %v4905_v40 = vld [vmem:[#allocation20 + $0x5c0] sm:$0xff] }
 0x90b   : > { %7362 = vmatprep.subr.bf16.mxu1 %v7361_v15  ;;  %v4914_v15 = vld [vmem:[#allocation20 + $0x608] sm:$0xff]  ;;  %v7403_v31 = vpack.c.bf16 %v4905_v40, %v4897_v56 }
 0x90c   : > { %v7405_v13 = vpack.c.bf16 %v4922_v55, %v4914_v15  ;;  %v5010_v56 = vld [vmem:[#allocation20 + $0x908] sm:$0xff] }
 0x90d   : > { %v5018_v40 = vld [vmem:[#allocation20 + $0x948] sm:$0xff] }
 0x90e   : > { %7364 = vmatpush1.bf16.msra.mxu1 %v7363_v30  ;;  %v4921_v30 = vld [vmem:[#allocation20 + $0x640] sm:$0xff]  ;;  %v5014_v15 = vld [vmem:[#allocation20 + $0x928] sm:$0xff] }
 0x90f   : > { %7366 = vmatprep.subr.bf16.mxu1 %v7365_v62  ;;  %v4930_v62 = vld [vmem:[#allocation20 + $0x688] sm:$0xff]  ;;  %v7407_v2 = vpack.c.bf16 %v4921_v30, %v4913_v33  ;;  %v7427_v30 = vpack.c.bf16 %v5001_v28, %v4993_v47 }
 0x910   : > { %v7409_v23 = vpack.c.bf16 %v4938_v34, %v4930_v62  ;;  %v5022_v55 = vld [vmem:[#allocation20 + $0x968] sm:$0xff]  ;;  %v5009_v34 = vld [vmem:[#allocation20 + $0x900] sm:$0xff] }
 0x911   : > { %v5086_v47 = vld [vmem:[#allocation20 + $0xb68] sm:$0xff] }
 0x912   : > { %7368 = vmatpush1.bf16.msra.mxu1 %v7367_v43  ;;  %v4937_v43 = vld [vmem:[#allocation20 + $0x6c0] sm:$0xff] }
 0x913   : > { %7370 = vmatprep.subr.bf16.mxu1 %v7369_v4  ;;  %v4946_v4 = vld [vmem:[#allocation20 + $0x708] sm:$0xff]  ;;  %v7411_v14 = vpack.c.bf16 %v4937_v43, %v4929_v11  ;;  %v7429_v11 = vpack.c.bf16 %v5018_v40, %v5010_v56  ;;  %v7685_v43 = vpack.c.bf16 %v5022_v55, %v5014_v15  ;;  %v5077_v40 = vld [vmem:[#allocation20 + $0xb20] sm:$0xff] }
 0x914   : > { %v7413_v20 = vpack.c.bf16 %v4954_v61, %v4946_v4  ;;  %v5013_v4 = vld [vmem:[#allocation20 + $0x920] sm:$0xff]  ;;  %v5090_v55 = vld [vmem:[#allocation20 + $0xb88] sm:$0xff] }
 0x915   : > { %v5021_v61 = vld [vmem:[#allocation20 + $0x960] sm:$0xff] }
 0x916   : > { %7372 = vmatpush1.bf16.msra.mxu1 %v7371_v8  ;;  %v4953_v8 = vld [vmem:[#allocation20 + $0x740] sm:$0xff] }
 0x917   : > { %7374 = vmatprep.subr.bf16.mxu1 %v7373_v48  ;;  %v7415_v48 = vpack.c.bf16 %v4953_v8, %v4945_v42  ;;  %v5030_v42 = vld [vmem:[#allocation20 + $0x9a8] sm:$0xff]  ;;  %v5085_v15 = vld [vmem:[#allocation20 + $0xb60] sm:$0xff] }
 0x918   : > { %v5038_v8 = vld [vmem:[#allocation20 + $0x9e8] sm:$0xff] }
 0x91a   : > { %7376 = vmatpush1.bf16.msra.mxu1 %v7375_v54  ;;  %v4966_v54 = vld [vmem:[#allocation20 + $0x7a8] sm:$0xff] }
 0x91b   : > { %7378 = vmatprep.subr.bf16.mxu1 %v7377_v39  ;;  %v7417_v39 = vpack.c.bf16 %v4970_v50, %v4962_v46  ;;  %v7673_v1 = vpack.c.bf16 %v4974_v63, %v4966_v54  ;;  %v5033_v46 = vld [vmem:[#allocation20 + $0x9c0] sm:$0xff]  ;;  %v7689_v54 = vpack.c.bf16 %v5038_v8, %v5030_v42  ;;  %v5114_v42 = vld [vmem:[#allocation20 + $0xc48] sm:$0xff] }
 0x91c   : > { %v5037_v63 = vld [vmem:[#allocation20 + $0x9e0] sm:$0xff]  ;;  %v5110_v8 = vld [vmem:[#allocation20 + $0xc28] sm:$0xff] }
 0x91d   : > { %7674 = vmatprep.subr.bf16.mxu0 %v7673_v1  ;;  %v5046_v1 = vld [vmem:[#allocation20 + $0xa28] sm:$0xff] }
 0x91e   : > { %7380 = vmatpush1.bf16.msra.mxu1 %v7379_v21  ;;  %v7419_v21 = vpack.c.bf16 %v4969_v41, %v4961_v52  ;;  %v5042_v52 = vld [vmem:[#allocation20 + $0xa08] sm:$0xff] }
 0x91f   : > { %7382 = vmatprep.subr.bf16.mxu1 %v7381_v10  ;;  %v4965_v10 = vld [vmem:[#allocation20 + $0x7a0] sm:$0xff]  ;;  %v5050_v41 = vld [vmem:[#allocation20 + $0xa48] sm:$0xff] }
 0x920   : > { %v7675_v7 = vpack.c.bf16 %v4973_v6, %v4965_v10 }
 0x922   : > { %7384 = vmatpush1.bf16.msra.mxu1 %v7383_v57  ;;  %v4982_v57 = vld [vmem:[#allocation20 + $0x828] sm:$0xff]  ;;  %7676 = vmatpush1.bf16.msra.mxu0 %v7675_v7  ;;  %v5041_v7 = vld [vmem:[#allocation20 + $0xa00] sm:$0xff] }
 0x923   : > { %7386 = vmatprep.subr.bf16.mxu1 %v7385_v38  ;;  %v7421_v38 = vpack.c.bf16 %v4986_v5, %v4978_v45  ;;  %v7677_v60 = vpack.c.bf16 %v4990_v58, %v4982_v57  ;;  %v5049_v45 = vld [vmem:[#allocation20 + $0xa40] sm:$0xff]  ;;  %v7437_v5 = vpack.c.bf16 %v5050_v41, %v5042_v52  ;;  %v5122_v41 = vld [vmem:[#allocation20 + $0xc88] sm:$0xff] }
 0x924   : > { %v5053_v58 = vld [vmem:[#allocation20 + $0xa60] sm:$0xff] }
 0x925   : > { %7678 = vmatprep.subr.bf16.mxu0 %v7677_v60  ;;  %v5058_v60 = vld [vmem:[#allocation20 + $0xa88] sm:$0xff]  ;;  %v5117_v52 = vld [vmem:[#allocation20 + $0xc60] sm:$0xff] }
 0x926   : > { %7388 = vmatpush1.bf16.msra.mxu1 %v7387_v32  ;;  %v4977_v32 = vld [vmem:[#allocation20 + $0x800] sm:$0xff] }
 0x927   : > { %7390 = vmatprep.subr.bf16.mxu1 %v7389_v22  ;;  %v4985_v22 = vld [vmem:[#allocation20 + $0x840] sm:$0xff] }
 0x92a   : > { %7392 = vmatpush1.bf16.msra.mxu1 %v7391_v51  ;;  %v5002_v51 = vld [vmem:[#allocation20 + $0x8c8] sm:$0xff] }
 0x92b   : > { %7394 = vmatprep.subr.bf16.mxu1 %v7393_v35  ;;  %v4998_v35 = vld [vmem:[#allocation20 + $0x8a8] sm:$0xff]  ;;  %v7425_v29 = vpack.c.bf16 %v5002_v51, %v4994_v19  ;;  %v5065_v19 = vld [vmem:[#allocation20 + $0xac0] sm:$0xff] }
 0x92c   : > { %v7681_v24 = vpack.c.bf16 %v5006_v9, %v4998_v35  ;;  %v5061_v35 = vld [vmem:[#allocation20 + $0xaa0] sm:$0xff] }
 0x92d   : > { %v5069_v9 = vld [vmem:[#allocation20 + $0xae0] sm:$0xff] }
 0x92e   : > { %7396 = vmatpush1.bf16.msra.mxu1 %v7395_v27  ;;  %v7423_v27 = vpack.c.bf16 %v4985_v22, %v4977_v32  ;;  %v5070_v32 = vld [vmem:[#allocation20 + $0xae8] sm:$0xff]  ;;  %v7439_v22 = vpack.c.bf16 %v5049_v45, %v5041_v7  ;;  %v5121_v45 = vld [vmem:[#allocation20 + $0xc80] sm:$0xff] }
 0x92f   : > { %7398 = vmatprep.subr.bf16.mxu1 %v7397_v16  ;;  %v7679_v16 = vpack.c.bf16 %v4989_v49, %v4981_v59  ;;  %v5057_v49 = vld [vmem:[#allocation20 + $0xa80] sm:$0xff] }
 0x930   : > { %v7443_v28 = vpack.c.bf16 %v5065_v19, %v5057_v49  ;;  %v5137_v19 = vld [vmem:[#allocation20 + $0xd00] sm:$0xff] }
 0x932   : > { %7400 = vmatpush1.bf16.msra.mxu1 %v7399_v3  ;;  %v4997_v3 = vld [vmem:[#allocation20 + $0x8a0] sm:$0xff] }
 0x933   : > { %7402 = vmatprep.subr.bf16.mxu1 %v7401_v17  ;;  %v5005_v17 = vld [vmem:[#allocation20 + $0x8e0] sm:$0xff] }
 0x934   : > { %v7683_v62 = vpack.c.bf16 %v5005_v17, %v4997_v3  ;;  %v5081_v3 = vld [vmem:[#allocation20 + $0xb40] sm:$0xff] }
 0x936   : > { %7404 = vmatpush1.bf16.msra.mxu1 %v7403_v31 }
 0x937   : > { %7406 = vmatprep.subr.bf16.mxu1 %v7405_v13 }
 0x93a   : > { %7408 = vmatpush1.bf16.msra.mxu1 %v7407_v2  ;;  %v5017_v2 = vld [vmem:[#allocation20 + $0x940] sm:$0xff] }
 0x93b   : > { %7410 = vmatprep.subr.bf16.mxu1 %v7409_v23 }
 0x93e   : > { %7412 = vmatpush1.bf16.msra.mxu1 %v7411_v14  ;;  %v5026_v14 = vld [vmem:[#allocation20 + $0x988] sm:$0xff] }
 0x93f   : > { %7414 = vmatprep.subr.bf16.mxu1 %v7413_v20  ;;  %v5034_v20 = vld [vmem:[#allocation20 + $0x9c8] sm:$0xff] }
 0x940   : > { %v7433_v50 = vpack.c.bf16 %v5034_v20, %v5026_v14  ;;  %v5101_v14 = vld [vmem:[#allocation20 + $0xbe0] sm:$0xff]  ;;  %v5106_v20 = vld [vmem:[#allocation20 + $0xc08] sm:$0xff] }
 0x942   : > { %7416 = vmatpush1.bf16.msra.mxu1 %v7415_v48  ;;  %v7431_v48 = vpack.c.bf16 %v5017_v2, %v5009_v34  ;;  %v7703_v34 = vpack.c.bf16 %v5085_v15, %v5077_v40  ;;  %v5089_v2 = vld [vmem:[#allocation20 + $0xb80] sm:$0xff] }
 0x943   : > { %7418 = vmatprep.subr.bf16.mxu1 %v7417_v39  ;;  %v5029_v39 = vld [vmem:[#allocation20 + $0x9a0] sm:$0xff] }
 0x944   : > { %v7691_v6 = vpack.c.bf16 %v5037_v63, %v5029_v39  ;;  %v5109_v63 = vld [vmem:[#allocation20 + $0xc20] sm:$0xff] }
 0x945   : > { %v7711_v7 = vpack.c.bf16 %v5117_v52, %v5109_v63  ;;  %v5157_v15 = vld [vmem:[#allocation20 + $0xda0] sm:$0xff] }
 0x946   : > { %7420 = vmatpush1.bf16.msra.mxu1 %v7419_v21  ;;  %v5054_v21 = vld [vmem:[#allocation20 + $0xa68] sm:$0xff]  ;;  %v5189_v52 = vld [vmem:[#allocation20 + $0xea0] sm:$0xff] }
 0x947   : > { %7422 = vmatprep.subr.bf16.mxu1 %v7421_v38  ;;  %v7693_v57 = vpack.c.bf16 %v5054_v21, %v5046_v1  ;;  %v5045_v38 = vld [vmem:[#allocation20 + $0xa20] sm:$0xff]  ;;  %v5130_v1 = vld [vmem:[#allocation20 + $0xcc8] sm:$0xff] }
 0x948   : > { %v7695_v59 = vpack.c.bf16 %v5053_v58, %v5045_v38  ;;  %v5126_v21 = vld [vmem:[#allocation20 + $0xca8] sm:$0xff]  ;;  %v5125_v58 = vld [vmem:[#allocation20 + $0xca0] sm:$0xff] }
 0x954   : > { %v4497_v36 = vpop.f32.mrb[36].mxu1 }
 0x955   : > { %v4499_v37 = vpop.f32.mrb[37].mxu1 }
 0x9d4   : > { %v4568_v53 = vpop.f32.mrb[38].mxu1 }
 0x9d5   : > { %v4570_v44 = vpop.f32.mrb[39].mxu1 }
 0x9d8   : > { %v4641_v12 = vpop.f32.mrb[40].mxu1 }
 0x9d9   : > { %v9546_v25 = vmax.f32 %v4497_v36, %v4641_v12  ;;  %v4643_v18 = vpop.f32.mrb[41].mxu1  ;;  %v7687_v36 = vpack.c.bf16 %v5021_v61, %v5013_v4  ;;  %v5093_v61 = vld [vmem:[#allocation20 + $0xba0] sm:$0xff] }
 0x9da   : > { %v9548_v26 = vmax.f32 %v4499_v37, %v4643_v18  ;;  %v5025_v37 = vld [vmem:[#allocation20 + $0x980] sm:$0xff]  ;;  %v5074_v18 = vld [vmem:[#allocation20 + $0xb08] sm:$0xff] }
 0x9db   : > { %v7435_v10 = vpack.c.bf16 %v5033_v46, %v5025_v37  ;;  %v7707_v37 = vpack.c.bf16 %v5101_v14, %v5093_v61  ;;  %v5105_v46 = vld [vmem:[#allocation20 + $0xc00] sm:$0xff] }
 0x9dc   : > { %5297 = vmatprep.mubr.f32.mxu1 %v9548_v26  ;;  %5581 = vmatprep.mubr.f32.mxu0 %v9548_v26  ;;  %v4712_v31 = vpop.f32.mrb[42].mxu1  ;;  %v5173_v14 = vld [vmem:[#allocation20 + $0xe20] sm:$0xff] }
 0x9dd   : > { %5298 = vmatmul.mubr.f32.vlgmr.msra.gmra.mrb[44].mxu1 %v9546_v25  ;;  %5582 = vmatmul.mubr.f32.vlgmr.msra.gmra.mrb[36].mxu0 %v9546_v25  ;;  %v9554_v13 = vmax.f32 %v4568_v53, %v4712_v31  ;;  %v4714_v33 = vpop.f32.mrb[43].mxu1  ;;  %v5066_v53 = vld [vmem:[#allocation20 + $0xac8] sm:$0xff] }
 0x9de   : > { %7424 = vmatpush1.bf16.msra.mxu1 %v7423_v27  ;;  %7680 = vmatpush1.bf16.msra.mxu0 %v7679_v16  ;;  %v9556_v23 = vmax.f32 %v4570_v44, %v4714_v33  ;;  %v5062_v44 = vld [vmem:[#allocation20 + $0xaa8] sm:$0xff]  ;;  %v7441_v12 = vpack.c.bf16 %v5066_v53, %v5058_v60  ;;  %v5133_v60 = vld [vmem:[#allocation20 + $0xce0] sm:$0xff] }
 0x9df   : > { %7426 = vmatprep.subr.bf16.mxu1 %v7425_v29  ;;  %7682 = vmatprep.subr.bf16.mxu0 %v7681_v24  ;;  %v7697_v51 = vpack.c.bf16 %v5070_v32, %v5062_v44  ;;  %v5082_v27 = vld [vmem:[#allocation20 + $0xb48] sm:$0xff]  ;;  %v7699_v29 = vpack.c.bf16 %v5069_v9, %v5061_v35  ;;  %v5073_v24 = vld [vmem:[#allocation20 + $0xb00] sm:$0xff]  ;;  %v7715_v49 = vpack.c.bf16 %v5133_v60, %v5125_v58 }
 0x9e0   : > { %5368 = vmatprep.mubr.f32.mxu1 %v9556_v23  ;;  %5652 = vmatprep.mubr.f32.mxu0 %v9556_v23  ;;  %v5078_v16 = vld [vmem:[#allocation20 + $0xb28] sm:$0xff]  ;;  %v7445_v17 = vpack.c.bf16 %v5082_v27, %v5074_v18  ;;  %v5141_v9 = vld [vmem:[#allocation20 + $0xd20] sm:$0xff] }
 0x9e1   : > { %v7701_v56 = vpack.c.bf16 %v5086_v47, %v5078_v16  ;;  %v5098_v31 = vld [vmem:[#allocation20 + $0xbc8] sm:$0xff]  ;;  %v5149_v18 = vld [vmem:[#allocation20 + $0xd60] sm:$0xff] }
 0x9e2   : > { %7428 = vmatpush1.bf16.msra.mxu1 %v7427_v30  ;;  %7684 = vmatpush1.bf16.msra.mxu0 %v7683_v62  ;;  %v5094_v33 = vld [vmem:[#allocation20 + $0xba8] sm:$0xff]  ;;  %v7447_v62 = vpack.c.bf16 %v5081_v3, %v5073_v24  ;;  %v7719_v24 = vpack.c.bf16 %v5149_v18, %v5141_v9  ;;  %v5153_v3 = vld [vmem:[#allocation20 + $0xd80] sm:$0xff] }
 0x9e3   : > { %7430 = vmatprep.subr.bf16.mxu1 %v7429_v11  ;;  %7686 = vmatprep.subr.bf16.mxu0 %v7685_v43  ;;  %v5102_v30 = vld [vmem:[#allocation20 + $0xbe8] sm:$0xff]  ;;  %v5097_v11 = vld [vmem:[#allocation20 + $0xbc0] sm:$0xff]  ;;  %v7449_v43 = vpack.c.bf16 %v5098_v31, %v5090_v55 }
 0x9e4   : > { %v7705_v4 = vpack.c.bf16 %v5102_v30, %v5094_v33  ;;  %v5138_v53 = vld [vmem:[#allocation20 + $0xd08] sm:$0xff]  ;;  %v5165_v55 = vld [vmem:[#allocation20 + $0xde0] sm:$0xff] }
 0x9e5   : > { %v5146_v44 = vld [vmem:[#allocation20 + $0xd48] sm:$0xff]  ;;  %v5205_v60 = vld [vmem:[#allocation20 + $0xf20] sm:$0xff] }
 0x9e6   : > { %7432 = vmatpush1.bf16.msra.mxu1 %v7431_v48  ;;  %7688 = vmatpush1.bf16.msra.mxu0 %v7687_v36  ;;  %v5118_v48 = vld [vmem:[#allocation20 + $0xc68] sm:$0xff]  ;;  %v7451_v36 = vpack.c.bf16 %v5097_v11, %v5089_v2  ;;  %v7723_v2 = vpack.c.bf16 %v5165_v55, %v5157_v15  ;;  %v5169_v11 = vld [vmem:[#allocation20 + $0xe00] sm:$0xff] }
 0x9e7   : > { %7434 = vmatprep.subr.bf16.mxu1 %v7433_v50  ;;  %7690 = vmatprep.subr.bf16.mxu0 %v7689_v54  ;;  %v5113_v50 = vld [vmem:[#allocation20 + $0xc40] sm:$0xff]  ;;  %v7453_v54 = vpack.c.bf16 %v5114_v42, %v5106_v20  ;;  %v7709_v39 = vpack.c.bf16 %v5118_v48, %v5110_v8  ;;  %v5142_v32 = vld [vmem:[#allocation20 + $0xd28] sm:$0xff] }
 0x9e8   : > { %v5154_v27 = vld [vmem:[#allocation20 + $0xd88] sm:$0xff]  ;;  %v5181_v20 = vld [vmem:[#allocation20 + $0xe60] sm:$0xff] }
 0x9e9   : > { %v5162_v16 = vld [vmem:[#allocation20 + $0xdc8] sm:$0xff]  ;;  %v5225_v9 = vld [vmem:[#allocation20 + $0xfc0] sm:$0xff] }
 0x9ea   : > { %7436 = vmatpush1.bf16.msra.mxu1 %v7435_v10  ;;  %7692 = vmatpush1.bf16.msra.mxu0 %v7691_v6  ;;  %v5134_v10 = vld [vmem:[#allocation20 + $0xce8] sm:$0xff]  ;;  %v7455_v6 = vpack.c.bf16 %v5113_v50, %v5105_v46  ;;  %v7727_v46 = vpack.c.bf16 %v5181_v20, %v5173_v14  ;;  %v5185_v50 = vld [vmem:[#allocation20 + $0xe80] sm:$0xff] }
 0x9eb   : > { %7438 = vmatprep.subr.bf16.mxu1 %v7437_v5  ;;  %7694 = vmatprep.subr.bf16.mxu0 %v7693_v57  ;;  %v5129_v5 = vld [vmem:[#allocation20 + $0xcc0] sm:$0xff]  ;;  %v7457_v57 = vpack.c.bf16 %v5130_v1, %v5122_v41  ;;  %v7713_v38 = vpack.c.bf16 %v5134_v10, %v5126_v21  ;;  %v5158_v47 = vld [vmem:[#allocation20 + $0xda8] sm:$0xff] }
 0x9ec   : > { %v5170_v31 = vld [vmem:[#allocation20 + $0xe08] sm:$0xff]  ;;  %v5197_v41 = vld [vmem:[#allocation20 + $0xee0] sm:$0xff] }
 0x9ed   : > { %v5178_v33 = vld [vmem:[#allocation20 + $0xe48] sm:$0xff]  ;;  %v5221_v18 = vld [vmem:[#allocation20 + $0xfa0] sm:$0xff] }
 0x9ee   : > { %7440 = vmatpush1.bf16.msra.mxu1 %v7439_v22  ;;  %7696 = vmatpush1.bf16.msra.mxu0 %v7695_v59  ;;  %v5150_v22 = vld [vmem:[#allocation20 + $0xd68] sm:$0xff]  ;;  %v7459_v59 = vpack.c.bf16 %v5129_v5, %v5121_v45  ;;  %v7731_v45 = vpack.c.bf16 %v5197_v41, %v5189_v52  ;;  %v5201_v5 = vld [vmem:[#allocation20 + $0xf00] sm:$0xff] }
 0x9ef   : > { %7442 = vmatprep.subr.bf16.mxu1 %v7441_v12  ;;  %7698 = vmatprep.subr.bf16.mxu0 %v7697_v51  ;;  %v5145_v12 = vld [vmem:[#allocation20 + $0xd40] sm:$0xff]  ;;  %v7461_v51 = vpack.c.bf16 %v5146_v44, %v5138_v53  ;;  %v7717_v35 = vpack.c.bf16 %v5150_v22, %v5142_v32  ;;  %v5174_v30 = vld [vmem:[#allocation20 + $0xe28] sm:$0xff] }
 0x9f0   : > { %v5186_v42 = vld [vmem:[#allocation20 + $0xe88] sm:$0xff]  ;;  %v5213_v53 = vld [vmem:[#allocation20 + $0xf60] sm:$0xff] }
 0x9f1   : > { %v5194_v8 = vld [vmem:[#allocation20 + $0xec8] sm:$0xff] }
 0x9f2   : > { %7444 = vmatpush1.bf16.msra.mxu1 %v7443_v28  ;;  %7700 = vmatpush1.bf16.msra.mxu0 %v7699_v29  ;;  %v5166_v28 = vld [vmem:[#allocation20 + $0xde8] sm:$0xff]  ;;  %v7463_v29 = vpack.c.bf16 %v5145_v12, %v5137_v19  ;;  %v7735_v19 = vpack.c.bf16 %v5213_v53, %v5205_v60  ;;  %v5217_v12 = vld [vmem:[#allocation20 + $0xf80] sm:$0xff] }
 0x9f3   : > { %7446 = vmatprep.subr.bf16.mxu1 %v7445_v17  ;;  %7702 = vmatprep.subr.bf16.mxu0 %v7701_v56  ;;  %v5161_v17 = vld [vmem:[#allocation20 + $0xdc0] sm:$0xff]  ;;  %v7465_v56 = vpack.c.bf16 %v5162_v16, %v5154_v27  ;;  %v7721_v40 = vpack.c.bf16 %v5166_v28, %v5158_v47  ;;  %v5190_v48 = vld [vmem:[#allocation20 + $0xea8] sm:$0xff]  ;;  %v4724_v16 = vld [vmem:[#allocation20 + $0x18] sm:$0xff]  ;;  %v7483_v28 = vpack.c.bf16 %v5225_v9, %v5217_v12 }
 0x9f4   : > { %v5202_v1 = vld [vmem:[#allocation20 + $0xf08] sm:$0xff]  ;;  %v5229_v27 = vld [vmem:[#allocation20 + $0xfe0] sm:$0xff]  ;;  %v4732_v47 = vld [vmem:[#allocation20 + $0x58] sm:$0xff] }
 0x9f5   : > { %v5210_v21 = vld [vmem:[#allocation20 + $0xf48] sm:$0xff]  ;;  %v4851_v12 = vld [vmem:[#allocation20 + $0x410] sm:$0xff]  ;;  %v4876_v9 = vld [vmem:[#allocation20 + $0x4d8] sm:$0xff] }
 0x9f6   : > { %7448 = vmatpush1.bf16.msra.mxu1 %v7447_v62  ;;  %7704 = vmatpush1.bf16.msra.mxu0 %v7703_v34  ;;  %v5182_v62 = vld [vmem:[#allocation20 + $0xe68] sm:$0xff]  ;;  %v7467_v34 = vpack.c.bf16 %v5161_v17, %v5153_v3  ;;  %v4723_v3 = vld [vmem:[#allocation20 + $0x10] sm:$0xff] }
 0x9f7   : > { %7450 = vmatprep.subr.bf16.mxu1 %v7449_v43  ;;  %7706 = vmatprep.subr.bf16.mxu0 %v7705_v4  ;;  %v5177_v43 = vld [vmem:[#allocation20 + $0xe40] sm:$0xff]  ;;  %v7469_v4 = vpack.c.bf16 %v5178_v33, %v5170_v31  ;;  %v7725_v61 = vpack.c.bf16 %v5182_v62, %v5174_v30  ;;  %v5206_v10 = vld [vmem:[#allocation20 + $0xf28] sm:$0xff]  ;;  %v4731_v17 = vld [vmem:[#allocation20 + $0x50] sm:$0xff] }
 0x9f8   : > { %v5218_v44 = vld [vmem:[#allocation20 + $0xf88] sm:$0xff]  ;;  %v7487_v15 = vpack.c.bf16 %v4731_v17, %v4723_v3  ;;  %v4739_v31 = vld [vmem:[#allocation20 + $0x90] sm:$0xff]  ;;  %v4756_v30 = vld [vmem:[#allocation20 + $0x118] sm:$0xff] }
 0x9f9   : > { %v5226_v32 = vld [vmem:[#allocation20 + $0xfc8] sm:$0xff]  ;;  %v4747_v33 = vld [vmem:[#allocation20 + $0xd0] sm:$0xff]  ;;  %v4764_v62 = vld [vmem:[#allocation20 + $0x158] sm:$0xff] }
 0x9fa   : > { %7452 = vmatpush1.bf16.msra.mxu1 %v7451_v36  ;;  %7708 = vmatpush1.bf16.msra.mxu0 %v7707_v37  ;;  %v5198_v36 = vld [vmem:[#allocation20 + $0xee8] sm:$0xff]  ;;  %v7471_v37 = vpack.c.bf16 %v5177_v43, %v5169_v11  ;;  %v4755_v11 = vld [vmem:[#allocation20 + $0x110] sm:$0xff] }
 0x9fb   : > { %7454 = vmatprep.subr.bf16.mxu1 %v7453_v54  ;;  %7710 = vmatprep.subr.bf16.mxu0 %v7709_v39  ;;  %v5193_v54 = vld [vmem:[#allocation20 + $0xec0] sm:$0xff]  ;;  %v7473_v39 = vpack.c.bf16 %v5194_v8, %v5186_v42  ;;  %v7729_v63 = vpack.c.bf16 %v5198_v36, %v5190_v48  ;;  %v5222_v22 = vld [vmem:[#allocation20 + $0xfa8] sm:$0xff]  ;;  %v4763_v43 = vld [vmem:[#allocation20 + $0x150] sm:$0xff] }
 0x9fc   : > { %v7495_v14 = vpack.c.bf16 %v4763_v43, %v4755_v11  ;;  %v4771_v42 = vld [vmem:[#allocation20 + $0x190] sm:$0xff]  ;;  %v4788_v48 = vld [vmem:[#allocation20 + $0x218] sm:$0xff] }
 0x9fd   : > { %v4779_v8 = vld [vmem:[#allocation20 + $0x1d0] sm:$0xff]  ;;  %v4796_v36 = vld [vmem:[#allocation20 + $0x258] sm:$0xff] }
 0x9fe   : > { %7456 = vmatpush1.bf16.msra.mxu1 %v7455_v6  ;;  %7712 = vmatpush1.bf16.msra.mxu0 %v7711_v7  ;;  %v5214_v6 = vld [vmem:[#allocation20 + $0xf68] sm:$0xff]  ;;  %v7475_v7 = vpack.c.bf16 %v5193_v54, %v5185_v50  ;;  %v4787_v50 = vld [vmem:[#allocation20 + $0x210] sm:$0xff] }
 0x9ff   : > { %7458 = vmatprep.subr.bf16.mxu1 %v7457_v57  ;;  %7714 = vmatprep.subr.bf16.mxu0 %v7713_v38  ;;  %v5209_v57 = vld [vmem:[#allocation20 + $0xf40] sm:$0xff]  ;;  %v7477_v38 = vpack.c.bf16 %v5210_v21, %v5202_v1  ;;  %v7733_v58 = vpack.c.bf16 %v5214_v6, %v5206_v10  ;;  %v4795_v54 = vld [vmem:[#allocation20 + $0x250] sm:$0xff]  ;;  %v4820_v10 = vld [vmem:[#allocation20 + $0x318] sm:$0xff] }
 0xa00   : > { %v7503_v52 = vpack.c.bf16 %v4795_v54, %v4787_v50  ;;  %v4803_v1 = vld [vmem:[#allocation20 + $0x290] sm:$0xff]  ;;  %v4828_v6 = vld [vmem:[#allocation20 + $0x358] sm:$0xff] }
 0xa01   : > { %v4811_v21 = vld [vmem:[#allocation20 + $0x2d0] sm:$0xff] }
 0xa02   : > { %7460 = vmatpush1.bf16.msra.mxu1 %v7459_v59  ;;  %7716 = vmatpush1.bf16.msra.mxu0 %v7715_v49  ;;  %v5230_v59 = vld [vmem:[#allocation20 + $0xfe8] sm:$0xff]  ;;  %v7479_v49 = vpack.c.bf16 %v5209_v57, %v5201_v5  ;;  %v4819_v5 = vld [vmem:[#allocation20 + $0x310] sm:$0xff] }
 0xa03   : > { %7462 = vmatprep.subr.bf16.mxu1 %v7461_v51  ;;  %7718 = vmatprep.subr.bf16.mxu0 %v7717_v35  ;;  %v7481_v51 = vpack.c.bf16 %v5226_v32, %v5218_v44  ;;  %v7737_v35 = vpack.c.bf16 %v5230_v59, %v5222_v22  ;;  %v4827_v57 = vld [vmem:[#allocation20 + $0x350] sm:$0xff]  ;;  %v4852_v22 = vld [vmem:[#allocation20 + $0x418] sm:$0xff] }
 0xa04   : > { %v7511_v60 = vpack.c.bf16 %v4827_v57, %v4819_v5  ;;  %v4835_v44 = vld [vmem:[#allocation20 + $0x390] sm:$0xff]  ;;  %v4860_v59 = vld [vmem:[#allocation20 + $0x458] sm:$0xff] }
 0xa05   : > { %v4843_v32 = vld [vmem:[#allocation20 + $0x3d0] sm:$0xff] }
 0xa06   : > { %7464 = vmatpush1.bf16.msra.mxu1 %v7463_v29  ;;  %7720 = vmatpush1.bf16.msra.mxu0 %v7719_v24  ;;  %v7739_v29 = vpack.c.bf16 %v5229_v27, %v5221_v18  ;;  %v7485_v24 = vpack.c.bf16 %v4732_v47, %v4724_v16  ;;  %v4867_v16 = vld [vmem:[#allocation20 + $0x490] sm:$0xff] }
 0xa07   : > { %7466 = vmatprep.subr.bf16.mxu1 %v7465_v56  ;;  %7722 = vmatprep.subr.bf16.mxu0 %v7721_v40  ;;  %v4740_v56 = vld [vmem:[#allocation20 + $0x98] sm:$0xff]  ;;  %v4875_v47 = vld [vmem:[#allocation20 + $0x4d0] sm:$0xff] }
 0xa08   : > { %v4748_v40 = vld [vmem:[#allocation20 + $0xd8] sm:$0xff]  ;;  %v4883_v17 = vld [vmem:[#allocation20 + $0x510] sm:$0xff] }
 0xa09   : > { %v7489_v55 = vpack.c.bf16 %v4748_v40, %v4740_v56  ;;  %v4891_v56 = vld [vmem:[#allocation20 + $0x550] sm:$0xff]  ;;  %v4900_v40 = vld [vmem:[#allocation20 + $0x598] sm:$0xff] }
 0xa0a   : > { %7468 = vmatpush1.bf16.msra.mxu1 %v7467_v34  ;;  %7724 = vmatpush1.bf16.msra.mxu0 %v7723_v2  ;;  %v7491_v34 = vpack.c.bf16 %v4747_v33, %v4739_v31  ;;  %v7493_v2 = vpack.c.bf16 %v4764_v62, %v4756_v30  ;;  %v4899_v33 = vld [vmem:[#allocation20 + $0x590] sm:$0xff]  ;;  %v4916_v62 = vld [vmem:[#allocation20 + $0x618] sm:$0xff] }
 0xa0b   : > { %7470 = vmatprep.subr.bf16.mxu1 %v7469_v4  ;;  %7726 = vmatprep.subr.bf16.mxu0 %v7725_v61  ;;  %v4772_v4 = vld [vmem:[#allocation20 + $0x198] sm:$0xff]  ;;  %v4907_v30 = vld [vmem:[#allocation20 + $0x5d0] sm:$0xff] }
 0xa0c   : > { %v4780_v61 = vld [vmem:[#allocation20 + $0x1d8] sm:$0xff]  ;;  %v4915_v43 = vld [vmem:[#allocation20 + $0x610] sm:$0xff] }
 0xa0d   : > { %v7497_v20 = vpack.c.bf16 %v4780_v61, %v4772_v4  ;;  %v4923_v4 = vld [vmem:[#allocation20 + $0x650] sm:$0xff]  ;;  %v4932_v61 = vld [vmem:[#allocation20 + $0x698] sm:$0xff] }
 0xa0e   : > { %7472 = vmatpush1.bf16.msra.mxu1 %v7471_v37  ;;  %7728 = vmatpush1.bf16.msra.mxu0 %v7727_v46  ;;  %v7499_v37 = vpack.c.bf16 %v4779_v8, %v4771_v42  ;;  %v7501_v46 = vpack.c.bf16 %v4796_v36, %v4788_v48  ;;  %v4931_v8 = vld [vmem:[#allocation20 + $0x690] sm:$0xff]  ;;  %v4948_v36 = vld [vmem:[#allocation20 + $0x718] sm:$0xff] }
 0xa0f   : > { %7474 = vmatprep.subr.bf16.mxu1 %v7473_v39  ;;  %7730 = vmatprep.subr.bf16.mxu0 %v7729_v63  ;;  %v4804_v39 = vld [vmem:[#allocation20 + $0x298] sm:$0xff]  ;;  %v4939_v48 = vld [vmem:[#allocation20 + $0x6d0] sm:$0xff] }
 0xa10   : > { %v4812_v63 = vld [vmem:[#allocation20 + $0x2d8] sm:$0xff]  ;;  %v4947_v54 = vld [vmem:[#allocation20 + $0x710] sm:$0xff] }
 0xa11   : > { %v7505_v41 = vpack.c.bf16 %v4812_v63, %v4804_v39  ;;  %v4955_v39 = vld [vmem:[#allocation20 + $0x750] sm:$0xff]  ;;  %v4964_v63 = vld [vmem:[#allocation20 + $0x798] sm:$0xff] }
 0xa12   : > { %7476 = vmatpush1.bf16.msra.mxu1 %v7475_v7  ;;  %7732 = vmatpush1.bf16.msra.mxu0 %v7731_v45  ;;  %v7507_v7 = vpack.c.bf16 %v4811_v21, %v4803_v1  ;;  %v7509_v45 = vpack.c.bf16 %v4828_v6, %v4820_v10  ;;  %v4963_v21 = vld [vmem:[#allocation20 + $0x790] sm:$0xff]  ;;  %v4980_v6 = vld [vmem:[#allocation20 + $0x818] sm:$0xff] }
 0xa13   : > { %7478 = vmatprep.subr.bf16.mxu1 %v7477_v38  ;;  %7734 = vmatprep.subr.bf16.mxu0 %v7733_v58  ;;  %v4836_v38 = vld [vmem:[#allocation20 + $0x398] sm:$0xff]  ;;  %v4971_v10 = vld [vmem:[#allocation20 + $0x7d0] sm:$0xff] }
 0xa14   : > { %v4844_v58 = vld [vmem:[#allocation20 + $0x3d8] sm:$0xff]  ;;  %v4979_v57 = vld [vmem:[#allocation20 + $0x810] sm:$0xff] }
 0xa15   : > { %v7513_v53 = vpack.c.bf16 %v4844_v58, %v4836_v38  ;;  %v4987_v38 = vld [vmem:[#allocation20 + $0x850] sm:$0xff]  ;;  %v4996_v58 = vld [vmem:[#allocation20 + $0x898] sm:$0xff] }
 0xa16   : > { %7480 = vmatpush1.bf16.msra.mxu1 %v7479_v49  ;;  %7736 = vmatpush1.bf16.msra.mxu0 %v7735_v19  ;;  %v7515_v49 = vpack.c.bf16 %v4843_v32, %v4835_v44  ;;  %v7517_v19 = vpack.c.bf16 %v4860_v59, %v4852_v22  ;;  %v4995_v32 = vld [vmem:[#allocation20 + $0x890] sm:$0xff]  ;;  %v5012_v59 = vld [vmem:[#allocation20 + $0x918] sm:$0xff] }
 0xa17   : > { %7482 = vmatprep.subr.bf16.mxu1 %v7481_v51  ;;  %7738 = vmatprep.subr.bf16.mxu0 %v7737_v35  ;;  %v4859_v51 = vld [vmem:[#allocation20 + $0x450] sm:$0xff]  ;;  %v4868_v35 = vld [vmem:[#allocation20 + $0x498] sm:$0xff] }
 0xa18   : > { %v7519_v18 = vpack.c.bf16 %v4859_v51, %v4851_v12  ;;  %v7521_v27 = vpack.c.bf16 %v4876_v9, %v4868_v35  ;;  %v5003_v22 = vld [vmem:[#allocation20 + $0x8d0] sm:$0xff]  ;;  %v5028_v9 = vld [vmem:[#allocation20 + $0x998] sm:$0xff] }
 0xa19   : > { %v5011_v51 = vld [vmem:[#allocation20 + $0x910] sm:$0xff] }
 0xa1a   : > { %7484 = vmatpush1.bf16.msra.mxu1 %v7483_v28  ;;  %7740 = vmatpush1.bf16.msra.mxu0 %v7739_v29  ;;  %v4884_v28 = vld [vmem:[#allocation20 + $0x518] sm:$0xff]  ;;  %v5019_v35 = vld [vmem:[#allocation20 + $0x950] sm:$0xff] }
 0xa1b   : > { %7486 = vmatprep.subr.bf16.mxu1 %v7485_v24  ;;  %v4892_v29 = vld [vmem:[#allocation20 + $0x558] sm:$0xff]  ;;  %v7523_v24 = vpack.c.bf16 %v4875_v47, %v4867_v16  ;;  %v5027_v47 = vld [vmem:[#allocation20 + $0x990] sm:$0xff] }
 0xa1c   : > { %v7525_v3 = vpack.c.bf16 %v4892_v29, %v4884_v28  ;;  %v5035_v28 = vld [vmem:[#allocation20 + $0x9d0] sm:$0xff]  ;;  %v5044_v29 = vld [vmem:[#allocation20 + $0xa18] sm:$0xff] }
 0xa1d   : > { %5369 = vmatmul.mubr.f32.vlgmr.msra.gmra.mrb[44].mxu1 %v9554_v13  ;;  %5653 = vmatmul.mubr.f32.vlgmr.msra.gmra.mrb[36].mxu0 %v9554_v13 }
 0xa1e   : > { %7488 = vmatpush1.bf16.msra.mxu1 %v7487_v15  ;;  %5439 = vmatprep.mubr.f32.mxu1 %v9548_v26  ;;  %v4908_v15 = vld [vmem:[#allocation20 + $0x5d8] sm:$0xff] }
 0xa1f   : > { %7490 = vmatprep.subr.bf16.mxu1 %v7489_v55  ;;  %v7527_v55 = vpack.c.bf16 %v4891_v56, %v4883_v17  ;;  %v7529_v31 = vpack.c.bf16 %v4908_v15, %v4900_v40  ;;  %v5043_v56 = vld [vmem:[#allocation20 + $0xa10] sm:$0xff]  ;;  %v5060_v15 = vld [vmem:[#allocation20 + $0xa98] sm:$0xff]  ;;  %6318 = vmatprep.mubr.msk.f32.mxu0 %vm8659_vm0, %v8657_v0 }
 0xa20   : > { %v5051_v40 = vld [vmem:[#allocation20 + $0xa50] sm:$0xff] }
 0xa22   : > { %7492 = vmatpush1.bf16.msra.mxu1 %v7491_v34  ;;  %v4924_v34 = vld [vmem:[#allocation20 + $0x658] sm:$0xff] }
 0xa23   : > { %7494 = vmatprep.subr.bf16.mxu1 %v7493_v2  ;;  %v7531_v2 = vpack.c.bf16 %v4907_v30, %v4899_v33  ;;  %v7533_v11 = vpack.c.bf16 %v4924_v34, %v4916_v62  ;;  %v5059_v30 = vld [vmem:[#allocation20 + $0xa90] sm:$0xff]  ;;  %v5076_v34 = vld [vmem:[#allocation20 + $0xb18] sm:$0xff] }
 0xa24   : > { %v5067_v62 = vld [vmem:[#allocation20 + $0xad0] sm:$0xff] }
 0xa26   : > { %7496 = vmatpush1.bf16.msra.mxu1 %v7495_v14  ;;  %v4940_v14 = vld [vmem:[#allocation20 + $0x6d8] sm:$0xff] }
 0xa27   : > { %7498 = vmatprep.subr.bf16.mxu1 %v7497_v20  ;;  %v7535_v20 = vpack.c.bf16 %v4923_v4, %v4915_v43  ;;  %v7537_v42 = vpack.c.bf16 %v4940_v14, %v4932_v61  ;;  %v5075_v4 = vld [vmem:[#allocation20 + $0xb10] sm:$0xff]  ;;  %v5092_v14 = vld [vmem:[#allocation20 + $0xb98] sm:$0xff] }
 0xa28   : > { %v5083_v61 = vld [vmem:[#allocation20 + $0xb50] sm:$0xff] }
 0xa2a   : > { %7500 = vmatpush1.bf16.msra.mxu1 %v7499_v37  ;;  %v4956_v37 = vld [vmem:[#allocation20 + $0x758] sm:$0xff] }
 0xa2b   : > { %7502 = vmatprep.subr.bf16.mxu1 %v7501_v46  ;;  %v7539_v46 = vpack.c.bf16 %v4939_v48, %v4931_v8  ;;  %v7541_v50 = vpack.c.bf16 %v4956_v37, %v4948_v36  ;;  %v5091_v48 = vld [vmem:[#allocation20 + $0xb90] sm:$0xff]  ;;  %v5108_v37 = vld [vmem:[#allocation20 + $0xc18] sm:$0xff] }
 0xa2c   : > { %v5099_v36 = vld [vmem:[#allocation20 + $0xbd0] sm:$0xff] }
 0xa2e   : > { %7504 = vmatpush1.bf16.msra.mxu1 %v7503_v52  ;;  %v4972_v52 = vld [vmem:[#allocation20 + $0x7d8] sm:$0xff] }
 0xa2f   : > { %7506 = vmatprep.subr.bf16.mxu1 %v7505_v41  ;;  %v7543_v41 = vpack.c.bf16 %v4955_v39, %v4947_v54  ;;  %v7545_v1 = vpack.c.bf16 %v4972_v52, %v4964_v63  ;;  %v5107_v39 = vld [vmem:[#allocation20 + $0xc10] sm:$0xff]  ;;  %v5124_v52 = vld [vmem:[#allocation20 + $0xc98] sm:$0xff] }
 0xa30   : > { %v5115_v63 = vld [vmem:[#allocation20 + $0xc50] sm:$0xff] }
 0xa32   : > { %7508 = vmatpush1.bf16.msra.mxu1 %v7507_v7  ;;  %v4988_v7 = vld [vmem:[#allocation20 + $0x858] sm:$0xff] }
 0xa33   : > { %7510 = vmatprep.subr.bf16.mxu1 %v7509_v45  ;;  %v7547_v45 = vpack.c.bf16 %v4971_v10, %v4963_v21  ;;  %v7549_v5 = vpack.c.bf16 %v4988_v7, %v4980_v6  ;;  %v5123_v10 = vld [vmem:[#allocation20 + $0xc90] sm:$0xff]  ;;  %v5140_v7 = vld [vmem:[#allocation20 + $0xd18] sm:$0xff] }
 0xa34   : > { %v5131_v6 = vld [vmem:[#allocation20 + $0xcd0] sm:$0xff] }
 0xa36   : > { %7512 = vmatpush1.bf16.msra.mxu1 %v7511_v60  ;;  %v5004_v60 = vld [vmem:[#allocation20 + $0x8d8] sm:$0xff] }
 0xa37   : > { %7514 = vmatprep.subr.bf16.mxu1 %v7513_v53  ;;  %v7551_v53 = vpack.c.bf16 %v4987_v38, %v4979_v57  ;;  %v7553_v44 = vpack.c.bf16 %v5004_v60, %v4996_v58  ;;  %v5139_v38 = vld [vmem:[#allocation20 + $0xd10] sm:$0xff]  ;;  %v5156_v60 = vld [vmem:[#allocation20 + $0xd98] sm:$0xff] }
 0xa38   : > { %v5147_v58 = vld [vmem:[#allocation20 + $0xd50] sm:$0xff] }
 0xa3a   : > { %7516 = vmatpush1.bf16.msra.mxu1 %v7515_v49  ;;  %v5020_v49 = vld [vmem:[#allocation20 + $0x958] sm:$0xff] }
 0xa3b   : > { %7518 = vmatprep.subr.bf16.mxu1 %v7517_v19  ;;  %v7555_v19 = vpack.c.bf16 %v5003_v22, %v4995_v32  ;;  %v7557_v12 = vpack.c.bf16 %v5020_v49, %v5012_v59  ;;  %v5155_v22 = vld [vmem:[#allocation20 + $0xd90] sm:$0xff]  ;;  %v5172_v49 = vld [vmem:[#allocation20 + $0xe18] sm:$0xff] }
 0xa3c   : > { %v5163_v59 = vld [vmem:[#allocation20 + $0xdd0] sm:$0xff] }
 0xa3e   : > { %7520 = vmatpush1.bf16.msra.mxu1 %v7519_v18  ;;  %v5036_v18 = vld [vmem:[#allocation20 + $0x9d8] sm:$0xff] }
 0xa3f   : > { %7522 = vmatprep.subr.bf16.mxu1 %v7521_v27  ;;  %v7559_v27 = vpack.c.bf16 %v5019_v35, %v5011_v51  ;;  %v7561_v16 = vpack.c.bf16 %v5036_v18, %v5028_v9  ;;  %v5171_v35 = vld [vmem:[#allocation20 + $0xe10] sm:$0xff]  ;;  %v5188_v18 = vld [vmem:[#allocation20 + $0xe98] sm:$0xff] }
 0xa40   : > { %v5179_v9 = vld [vmem:[#allocation20 + $0xe50] sm:$0xff] }
 0xa42   : > { %7524 = vmatpush1.bf16.msra.mxu1 %v7523_v24  ;;  %v5052_v24 = vld [vmem:[#allocation20 + $0xa58] sm:$0xff] }
 0xa43   : > { %7526 = vmatprep.subr.bf16.mxu1 %v7525_v3  ;;  %v7563_v3 = vpack.c.bf16 %v5035_v28, %v5027_v47  ;;  %v7565_v17 = vpack.c.bf16 %v5052_v24, %v5044_v29  ;;  %v5187_v28 = vld [vmem:[#allocation20 + $0xe90] sm:$0xff]  ;;  %v5204_v24 = vld [vmem:[#allocation20 + $0xf18] sm:$0xff] }
 0xa44   : > { %v5195_v29 = vld [vmem:[#allocation20 + $0xed0] sm:$0xff] }
 0xa46   : > { %7528 = vmatpush1.bf16.msra.mxu1 %v7527_v55  ;;  %v5068_v55 = vld [vmem:[#allocation20 + $0xad8] sm:$0xff] }
 0xa47   : > { %7530 = vmatprep.subr.bf16.mxu1 %v7529_v31  ;;  %v7567_v31 = vpack.c.bf16 %v5051_v40, %v5043_v56  ;;  %v7569_v33 = vpack.c.bf16 %v5068_v55, %v5060_v15  ;;  %v5203_v40 = vld [vmem:[#allocation20 + $0xf10] sm:$0xff]  ;;  %v5220_v55 = vld [vmem:[#allocation20 + $0xf98] sm:$0xff] }
 0xa48   : > { %v5211_v15 = vld [vmem:[#allocation20 + $0xf50] sm:$0xff] }
 0xa4a   : > { %7532 = vmatpush1.bf16.msra.mxu1 %v7531_v2  ;;  %v5084_v2 = vld [vmem:[#allocation20 + $0xb58] sm:$0xff] }
 0xa4b   : > { %7534 = vmatprep.subr.bf16.mxu1 %v7533_v11  ;;  %v7571_v11 = vpack.c.bf16 %v5067_v62, %v5059_v30  ;;  %v7573_v43 = vpack.c.bf16 %v5084_v2, %v5076_v34  ;;  %v5219_v62 = vld [vmem:[#allocation20 + $0xf90] sm:$0xff]  ;;  %v4728_v2 = vld [vmem:[#allocation20 + $0x38] sm:$0xff] }
 0xa4c   : > { %v5227_v34 = vld [vmem:[#allocation20 + $0xfd0] sm:$0xff] }
 0xa4e   : > { %7536 = vmatpush1.bf16.msra.mxu1 %v7535_v20  ;;  %v5100_v20 = vld [vmem:[#allocation20 + $0xbd8] sm:$0xff] }
 0xa4f   : > { %7538 = vmatprep.subr.bf16.mxu1 %v7537_v42  ;;  %v7575_v42 = vpack.c.bf16 %v5083_v61, %v5075_v4  ;;  %v7577_v8 = vpack.c.bf16 %v5100_v20, %v5092_v14  ;;  %v4727_v61 = vld [vmem:[#allocation20 + $0x30] sm:$0xff]  ;;  %v4744_v20 = vld [vmem:[#allocation20 + $0xb8] sm:$0xff] }
 0xa50   : > { %v4735_v14 = vld [vmem:[#allocation20 + $0x70] sm:$0xff] }
 0xa52   : > { %7540 = vmatpush1.bf16.msra.mxu1 %v7539_v46  ;;  %v5116_v46 = vld [vmem:[#allocation20 + $0xc58] sm:$0xff] }
 0xa53   : > { %7542 = vmatprep.subr.bf16.mxu1 %v7541_v50  ;;  %v7579_v50 = vpack.c.bf16 %v5099_v36, %v5091_v48  ;;  %v7581_v54 = vpack.c.bf16 %v5116_v46, %v5108_v37  ;;  %v4743_v36 = vld [vmem:[#allocation20 + $0xb0] sm:$0xff]  ;;  %v4760_v46 = vld [vmem:[#allocation20 + $0x138] sm:$0xff] }
 0xa54   : > { %v4751_v37 = vld [vmem:[#allocation20 + $0xf0] sm:$0xff] }
 0xa56   : > { %7544 = vmatpush1.bf16.msra.mxu1 %v7543_v41  ;;  %v5132_v41 = vld [vmem:[#allocation20 + $0xcd8] sm:$0xff] }
 0xa57   : > { %7546 = vmatprep.subr.bf16.mxu1 %v7545_v1  ;;  %v7583_v1 = vpack.c.bf16 %v5115_v63, %v5107_v39  ;;  %v7585_v21 = vpack.c.bf16 %v5132_v41, %v5124_v52  ;;  %v4759_v63 = vld [vmem:[#allocation20 + $0x130] sm:$0xff]  ;;  %v4776_v41 = vld [vmem:[#allocation20 + $0x1b8] sm:$0xff] }
 0xa58   : > { %v4767_v52 = vld [vmem:[#allocation20 + $0x170] sm:$0xff] }
 0xa5a   : > { %7548 = vmatpush1.bf16.msra.mxu1 %v7547_v45  ;;  %v5148_v45 = vld [vmem:[#allocation20 + $0xd58] sm:$0xff] }
 0xa5b   : > { %7550 = vmatprep.subr.bf16.mxu1 %v7549_v5  ;;  %v7587_v5 = vpack.c.bf16 %v5131_v6, %v5123_v10  ;;  %v7589_v57 = vpack.c.bf16 %v5148_v45, %v5140_v7  ;;  %v4775_v6 = vld [vmem:[#allocation20 + $0x1b0] sm:$0xff]  ;;  %v4792_v45 = vld [vmem:[#allocation20 + $0x238] sm:$0xff] }
 0xa5c   : > { %v4783_v7 = vld [vmem:[#allocation20 + $0x1f0] sm:$0xff] }
 0xa5d   : > { %5440 = vmatmul.mubr.f32.vlgmr.msra.gmra.mrb[46].mxu1 %v9546_v25 }
 0xa5e   : > { %7552 = vmatpush1.bf16.msra.mxu1 %v7551_v53  ;;  %5510 = vmatprep.mubr.f32.mxu1 %v9556_v23  ;;  %v5164_v53 = vld [vmem:[#allocation20 + $0xdd8] sm:$0xff] }
 0xa5f   : > { %7554 = vmatprep.subr.bf16.mxu1 %v7553_v44  ;;  %v7591_v44 = vpack.c.bf16 %v5147_v58, %v5139_v38  ;;  %v7593_v32 = vpack.c.bf16 %v5164_v53, %v5156_v60  ;;  %v4799_v58 = vld [vmem:[#allocation20 + $0x270] sm:$0xff]  ;;  %v4808_v60 = vld [vmem:[#allocation20 + $0x2b8] sm:$0xff] }
 0xa60   : > { %v4816_v53 = vld [vmem:[#allocation20 + $0x2f8] sm:$0xff] }
 0xa62   : > { %7556 = vmatpush1.bf16.msra.mxu1 %v7555_v19  ;;  %v5180_v19 = vld [vmem:[#allocation20 + $0xe58] sm:$0xff] }
 0xa63   : > { %7558 = vmatprep.subr.bf16.mxu1 %v7557_v12  ;;  %v7595_v12 = vpack.c.bf16 %v5163_v59, %v5155_v22  ;;  %v7597_v51 = vpack.c.bf16 %v5180_v19, %v5172_v49  ;;  %v4807_v22 = vld [vmem:[#allocation20 + $0x2b0] sm:$0xff]  ;;  %v4824_v49 = vld [vmem:[#allocation20 + $0x338] sm:$0xff] }
 0xa64   : > { %v4815_v59 = vld [vmem:[#allocation20 + $0x2f0] sm:$0xff]  ;;  %v4832_v19 = vld [vmem:[#allocation20 + $0x378] sm:$0xff] }
 0xa66   : > { %7560 = vmatpush1.bf16.msra.mxu1 %v7559_v27  ;;  %v5196_v27 = vld [vmem:[#allocation20 + $0xed8] sm:$0xff] }
 0xa67   : > { %7562 = vmatprep.subr.bf16.mxu1 %v7561_v16  ;;  %v7599_v16 = vpack.c.bf16 %v5179_v9, %v5171_v35  ;;  %v7601_v47 = vpack.c.bf16 %v5196_v27, %v5188_v18  ;;  %v4823_v35 = vld [vmem:[#allocation20 + $0x330] sm:$0xff]  ;;  %v4840_v18 = vld [vmem:[#allocation20 + $0x3b8] sm:$0xff] }
 0xa68   : > { %v4831_v9 = vld [vmem:[#allocation20 + $0x370] sm:$0xff]  ;;  %v4848_v27 = vld [vmem:[#allocation20 + $0x3f8] sm:$0xff] }
 0xa6a   : > { %7564 = vmatpush1.bf16.msra.mxu1 %v7563_v3  ;;  %v5212_v3 = vld [vmem:[#allocation20 + $0xf58] sm:$0xff] }
 0xa6b   : > { %7566 = vmatprep.subr.bf16.mxu1 %v7565_v17  ;;  %v7603_v17 = vpack.c.bf16 %v5195_v29, %v5187_v28  ;;  %v7605_v56 = vpack.c.bf16 %v5212_v3, %v5204_v24  ;;  %v4839_v28 = vld [vmem:[#allocation20 + $0x3b0] sm:$0xff]  ;;  %v4856_v24 = vld [vmem:[#allocation20 + $0x438] sm:$0xff] }
 0xa6c   : > { %v4847_v29 = vld [vmem:[#allocation20 + $0x3f0] sm:$0xff]  ;;  %v4864_v3 = vld [vmem:[#allocation20 + $0x478] sm:$0xff] }
 0xa6e   : > { %7568 = vmatpush1.bf16.msra.mxu1 %v7567_v31  ;;  %v5228_v31 = vld [vmem:[#allocation20 + $0xfd8] sm:$0xff] }
 0xa6f   : > { %7570 = vmatprep.subr.bf16.mxu1 %v7569_v33  ;;  %v7607_v33 = vpack.c.bf16 %v5211_v15, %v5203_v40  ;;  %v7609_v30 = vpack.c.bf16 %v5228_v31, %v5220_v55  ;;  %v4855_v40 = vld [vmem:[#allocation20 + $0x430] sm:$0xff]  ;;  %v4872_v55 = vld [vmem:[#allocation20 + $0x4b8] sm:$0xff] }
 0xa70   : > { %v4863_v15 = vld [vmem:[#allocation20 + $0x470] sm:$0xff]  ;;  %v4880_v31 = vld [vmem:[#allocation20 + $0x4f8] sm:$0xff] }
 0xa72   : > { %7572 = vmatpush1.bf16.msra.mxu1 %v7571_v11  ;;  %v4736_v11 = vld [vmem:[#allocation20 + $0x78] sm:$0xff] }
 0xa73   : > { %7574 = vmatprep.subr.bf16.mxu1 %v7573_v43  ;;  %v7611_v43 = vpack.c.bf16 %v5227_v34, %v5219_v62  ;;  %v7741_v4 = vpack.c.bf16 %v4736_v11, %v4728_v2  ;;  %v4871_v62 = vld [vmem:[#allocation20 + $0x4b0] sm:$0xff]  ;;  %v4888_v2 = vld [vmem:[#allocation20 + $0x538] sm:$0xff] }
 0xa74   : > { %v4879_v34 = vld [vmem:[#allocation20 + $0x4f0] sm:$0xff]  ;;  %v4896_v11 = vld [vmem:[#allocation20 + $0x578] sm:$0xff] }
 0xa76   : > { %7576 = vmatpush1.bf16.msra.mxu1 %v7575_v42  ;;  %v4752_v42 = vld [vmem:[#allocation20 + $0xf8] sm:$0xff] }
 0xa77   : > { %7578 = vmatprep.subr.bf16.mxu1 %v7577_v8  ;;  %v7743_v8 = vpack.c.bf16 %v4735_v14, %v4727_v61  ;;  %v7745_v48 = vpack.c.bf16 %v4752_v42, %v4744_v20  ;;  %v4887_v61 = vld [vmem:[#allocation20 + $0x530] sm:$0xff]  ;;  %v4904_v20 = vld [vmem:[#allocation20 + $0x5b8] sm:$0xff] }
 0xa78   : > { %v4895_v14 = vld [vmem:[#allocation20 + $0x570] sm:$0xff]  ;;  %v4912_v42 = vld [vmem:[#allocation20 + $0x5f8] sm:$0xff] }
 0xa7a   : > { %7580 = vmatpush1.bf16.msra.mxu1 %v7579_v50  ;;  %v4768_v50 = vld [vmem:[#allocation20 + $0x178] sm:$0xff] }
 0xa7b   : > { %7582 = vmatprep.subr.bf16.mxu1 %v7581_v54  ;;  %v7747_v54 = vpack.c.bf16 %v4751_v37, %v4743_v36  ;;  %v7749_v39 = vpack.c.bf16 %v4768_v50, %v4760_v46  ;;  %v4903_v36 = vld [vmem:[#allocation20 + $0x5b0] sm:$0xff]  ;;  %v4920_v46 = vld [vmem:[#allocation20 + $0x638] sm:$0xff] }
 0xa7c   : > { %v4911_v37 = vld [vmem:[#allocation20 + $0x5f0] sm:$0xff]  ;;  %v4928_v50 = vld [vmem:[#allocation20 + $0x678] sm:$0xff] }
 0xa7e   : > { %7584 = vmatpush1.bf16.msra.mxu1 %v7583_v1  ;;  %v4784_v1 = vld [vmem:[#allocation20 + $0x1f8] sm:$0xff] }
 0xa7f   : > { %7586 = vmatprep.subr.bf16.mxu1 %v7585_v21  ;;  %v7751_v21 = vpack.c.bf16 %v4767_v52, %v4759_v63  ;;  %v7753_v10 = vpack.c.bf16 %v4784_v1, %v4776_v41  ;;  %v4919_v63 = vld [vmem:[#allocation20 + $0x630] sm:$0xff]  ;;  %v4936_v41 = vld [vmem:[#allocation20 + $0x6b8] sm:$0xff] }
 0xa80   : > { %v4927_v52 = vld [vmem:[#allocation20 + $0x670] sm:$0xff]  ;;  %v4944_v1 = vld [vmem:[#allocation20 + $0x6f8] sm:$0xff] }
 0xa82   : > { %7588 = vmatpush1.bf16.msra.mxu1 %v7587_v5  ;;  %v4800_v5 = vld [vmem:[#allocation20 + $0x278] sm:$0xff] }
 0xa83   : > { %7590 = vmatprep.subr.bf16.mxu1 %v7589_v57  ;;  %v7755_v57 = vpack.c.bf16 %v4783_v7, %v4775_v6  ;;  %v7757_v38 = vpack.c.bf16 %v4800_v5, %v4792_v45  ;;  %v4935_v6 = vld [vmem:[#allocation20 + $0x6b0] sm:$0xff]  ;;  %v4952_v45 = vld [vmem:[#allocation20 + $0x738] sm:$0xff] }
 0xa84   : > { %v4943_v7 = vld [vmem:[#allocation20 + $0x6f0] sm:$0xff]  ;;  %v4960_v5 = vld [vmem:[#allocation20 + $0x778] sm:$0xff] }
 0xa86   : > { %7592 = vmatpush1.bf16.msra.mxu1 %v7591_v44 }
 0xa87   : > { %7594 = vmatprep.subr.bf16.mxu1 %v7593_v32  ;;  %v7761_v32 = vpack.c.bf16 %v4816_v53, %v4808_v60  ;;  %v4968_v60 = vld [vmem:[#allocation20 + $0x7b8] sm:$0xff] }
 0xa88   : > { %v4976_v53 = vld [vmem:[#allocation20 + $0x7f8] sm:$0xff] }
 0xa8a   : > { %7596 = vmatpush1.bf16.msra.mxu1 %v7595_v12  ;;  %v7763_v12 = vpack.c.bf16 %v4815_v59, %v4807_v22  ;;  %v4967_v22 = vld [vmem:[#allocation20 + $0x7b0] sm:$0xff] }
 0xa8b   : > { %7598 = vmatprep.subr.bf16.mxu1 %v7597_v51  ;;  %v7765_v51 = vpack.c.bf16 %v4832_v19, %v4824_v49  ;;  %v4975_v59 = vld [vmem:[#allocation20 + $0x7f0] sm:$0xff]  ;;  %v4984_v49 = vld [vmem:[#allocation20 + $0x838] sm:$0xff] }
 0xa8c   : > { %v4992_v19 = vld [vmem:[#allocation20 + $0x878] sm:$0xff] }
 0xa8e   : > { %7600 = vmatpush1.bf16.msra.mxu1 %v7599_v16  ;;  %v7767_v16 = vpack.c.bf16 %v4831_v9, %v4823_v35  ;;  %v4983_v35 = vld [vmem:[#allocation20 + $0x830] sm:$0xff] }
 0xa8f   : > { %7602 = vmatprep.subr.bf16.mxu1 %v7601_v47  ;;  %v7769_v47 = vpack.c.bf16 %v4848_v27, %v4840_v18  ;;  %v4991_v9 = vld [vmem:[#allocation20 + $0x870] sm:$0xff]  ;;  %v5000_v18 = vld [vmem:[#allocation20 + $0x8b8] sm:$0xff] }
 0xa90   : > { %v5008_v27 = vld [vmem:[#allocation20 + $0x8f8] sm:$0xff] }
 0xa92   : > { %7604 = vmatpush1.bf16.msra.mxu1 %v7603_v17  ;;  %v7771_v17 = vpack.c.bf16 %v4847_v29, %v4839_v28  ;;  %v4999_v28 = vld [vmem:[#allocation20 + $0x8b0] sm:$0xff] }
 0xa93   : > { %7606 = vmatprep.subr.bf16.mxu1 %v7605_v56  ;;  %v7773_v56 = vpack.c.bf16 %v4864_v3, %v4856_v24  ;;  %v5007_v29 = vld [vmem:[#allocation20 + $0x8f0] sm:$0xff]  ;;  %v5016_v24 = vld [vmem:[#allocation20 + $0x938] sm:$0xff] }
 0xa94   : > { %v5024_v3 = vld [vmem:[#allocation20 + $0x978] sm:$0xff] }
 0xa96   : > { %7608 = vmatpush1.bf16.msra.mxu1 %v7607_v33  ;;  %v7775_v33 = vpack.c.bf16 %v4863_v15, %v4855_v40  ;;  %v5015_v40 = vld [vmem:[#allocation20 + $0x930] sm:$0xff] }
 0xa97   : > { %7610 = vmatprep.subr.bf16.mxu1 %v7609_v30  ;;  %v7777_v30 = vpack.c.bf16 %v4880_v31, %v4872_v55  ;;  %v5023_v15 = vld [vmem:[#allocation20 + $0x970] sm:$0xff]  ;;  %v5032_v55 = vld [vmem:[#allocation20 + $0x9b8] sm:$0xff] }
 0xa98   : > { %v5040_v31 = vld [vmem:[#allocation20 + $0x9f8] sm:$0xff] }
 0xa9a   : > { %7612 = vmatpush1.bf16.msra.mxu1 %v7611_v43  ;;  %v7779_v43 = vpack.c.bf16 %v4879_v34, %v4871_v62  ;;  %v5031_v62 = vld [vmem:[#allocation20 + $0x9b0] sm:$0xff] }
 0xa9b   : > { %7742 = vmatprep.subr.bf16.mxu1 %v7741_v4  ;;  %v7781_v4 = vpack.c.bf16 %v4896_v11, %v4888_v2  ;;  %v5039_v34 = vld [vmem:[#allocation20 + $0x9f0] sm:$0xff]  ;;  %v5048_v2 = vld [vmem:[#allocation20 + $0xa38] sm:$0xff] }
 0xa9c   : > { %v5056_v11 = vld [vmem:[#allocation20 + $0xa78] sm:$0xff] }
 0xa9d   : > { %5511 = vmatmul.mubr.f32.vlgmr.msra.gmra.mrb[46].mxu1 %v9554_v13 }
 0xa9e   : > { %7744 = vmatpush1.bf16.msra.mxu1 %v7743_v8  ;;  %5723 = vmatprep.mubr.f32.mxu1 %v9548_v26  ;;  %v4791_v26 = vld [vmem:[#allocation20 + $0x230] sm:$0xff]  ;;  %v7783_v8 = vpack.c.bf16 %v4895_v14, %v4887_v61  ;;  %v5064_v61 = vld [vmem:[#allocation20 + $0xab8] sm:$0xff] }
 0xa9f   : > { %7746 = vmatprep.subr.bf16.mxu1 %v7745_v48  ;;  %v7759_v44 = vpack.c.bf16 %v4799_v58, %v4791_v26  ;;  %v7785_v48 = vpack.c.bf16 %v4912_v42, %v4904_v20  ;;  %v4951_v26 = vld [vmem:[#allocation20 + $0x730] sm:$0xff]  ;;  %v5072_v14 = vld [vmem:[#allocation20 + $0xaf8] sm:$0xff] }
 0xaa0   : > { %v4959_v58 = vld [vmem:[#allocation20 + $0x770] sm:$0xff]  ;;  %v7825_v42 = vpack.c.bf16 %v5072_v14, %v5064_v61  ;;  %v5176_v14 = vld [vmem:[#allocation20 + $0xe38] sm:$0xff] }
 0xaa1   : > { %v5843_v61 = vld [vmem:[%s9696_s13 + $0x48] sm:$0xff] }
 0xaa2   : > { %7748 = vmatpush1.bf16.msra.mxu1 %v7747_v54  ;;  %v7787_v54 = vpack.c.bf16 %v4911_v37, %v4903_v36  ;;  %v5080_v36 = vld [vmem:[#allocation20 + $0xb38] sm:$0xff] }
 0xaa3   : > { %7750 = vmatprep.subr.bf16.mxu1 %v7749_v39  ;;  %v7789_v39 = vpack.c.bf16 %v4928_v50, %v4920_v46  ;;  %v5088_v37 = vld [vmem:[#allocation20 + $0xb78] sm:$0xff] }
 0xaa4   : > { %v7829_v50 = vpack.c.bf16 %v5088_v37, %v5080_v36  ;;  %v5175_v36 = vld [vmem:[#allocation20 + $0xe30] sm:$0xff] }
 0xaa5   : > { %v5183_v37 = vld [vmem:[#allocation20 + $0xe70] sm:$0xff] }
 0xaa6   : > { %7752 = vmatpush1.bf16.msra.mxu1 %v7751_v21  ;;  %v7791_v21 = vpack.c.bf16 %v4927_v52, %v4919_v63 }
 0xaa7   : > { %7754 = vmatprep.subr.bf16.mxu1 %v7753_v10  ;;  %v7793_v10 = vpack.c.bf16 %v4944_v1, %v4936_v41  ;;  %v5096_v41 = vld [vmem:[#allocation20 + $0xbb8] sm:$0xff] }
 0xaa8   : > { %v5104_v1 = vld [vmem:[#allocation20 + $0xbf8] sm:$0xff] }
 0xaaa   : > { %7756 = vmatpush1.bf16.msra.mxu1 %v7755_v57  ;;  %v7795_v57 = vpack.c.bf16 %v4943_v7, %v4935_v6 }
 0xaab   : > { %7758 = vmatprep.subr.bf16.mxu1 %v7757_v38  ;;  %v7797_v38 = vpack.c.bf16 %v4960_v5, %v4952_v45  ;;  %v7833_v45 = vpack.c.bf16 %v5104_v1, %v5096_v41  ;;  %v5095_v5 = vld [vmem:[#allocation20 + $0xbb0] sm:$0xff]  ;;  %v5208_v1 = vld [vmem:[#allocation20 + $0xf38] sm:$0xff] }
 0xaac   : > { %v5199_v41 = vld [vmem:[#allocation20 + $0xef0] sm:$0xff] }
 0xaae   : > { %7760 = vmatpush1.bf16.msra.mxu1 %v7759_v44  ;;  %v7799_v44 = vpack.c.bf16 %v4959_v58, %v4951_v26  ;;  %v5112_v26 = vld [vmem:[#allocation20 + $0xc38] sm:$0xff] }
 0xaaf   : > { %7762 = vmatprep.subr.bf16.mxu1 %v7761_v32  ;;  %v7801_v32 = vpack.c.bf16 %v4976_v53, %v4968_v60  ;;  %v5120_v58 = vld [vmem:[#allocation20 + $0xc78] sm:$0xff]  ;;  %v5111_v53 = vld [vmem:[#allocation20 + $0xc30] sm:$0xff] }
 0xab2   : > { %7764 = vmatpush1.bf16.msra.mxu1 %v7763_v12  ;;  %v7803_v12 = vpack.c.bf16 %v4975_v59, %v4967_v22  ;;  %v5834_v22 = vld [vmem:[%s9696_s13] sm:$0xff]  ;;  %v5835_v59 = vld [vmem:[%s9696_s13 + $0x8] sm:$0xff] }
 0xab3   : > { %7766 = vmatprep.subr.bf16.mxu1 %v7765_v51  ;;  %v7805_v51 = vpack.c.bf16 %v4992_v19, %v4984_v49  ;;  %v5836_v49 = vld [vmem:[%s9696_s13 + $0x10] sm:$0xff] }
 0xab4   : > { %v5128_v19 = vld [vmem:[#allocation20 + $0xcb8] sm:$0xff] }
 0xab6   : > { %7768 = vmatpush1.bf16.msra.mxu1 %v7767_v16  ;;  %v7807_v16 = vpack.c.bf16 %v4991_v9, %v4983_v35  ;;  %v7870_v35 = vpack.c.bf16 %v5835_v59, %v5834_v22  ;;  %v5837_v9 = vld [vmem:[%s9696_s13 + $0x18] sm:$0xff] }
 0xab7   : > { %7770 = vmatprep.subr.bf16.mxu1 %v7769_v47  ;;  %v7809_v47 = vpack.c.bf16 %v5008_v27, %v5000_v18  ;;  %v5127_v27 = vld [vmem:[#allocation20 + $0xcb0] sm:$0xff] }
 0xaba   : > { %7772 = vmatpush1.bf16.msra.mxu1 %v7771_v17  ;;  %v7811_v17 = vpack.c.bf16 %v5007_v29, %v4999_v28  ;;  %v5135_v28 = vld [vmem:[#allocation20 + $0xcf0] sm:$0xff]  ;;  %v5838_v29 = vld [vmem:[%s9696_s13 + $0x20] sm:$0xff] }
 0xabb   : > { %7774 = vmatprep.subr.bf16.mxu1 %v7773_v56  ;;  %v7813_v56 = vpack.c.bf16 %v5024_v3, %v5016_v24  ;;  %v5839_v24 = vld [vmem:[%s9696_s13 + $0x28] sm:$0xff]  ;;  %v5144_v3 = vld [vmem:[#allocation20 + $0xd38] sm:$0xff] }
 0xabe   : > { %7776 = vmatpush1.bf16.msra.mxu1 %v7775_v33  ;;  %v7815_v33 = vpack.c.bf16 %v5023_v15, %v5015_v40  ;;  %v5143_v40 = vld [vmem:[#allocation20 + $0xd30] sm:$0xff]  ;;  %v7876_v15 = vpack.c.bf16 %v5839_v24, %v5838_v29 }
 0xabf   : > { %7778 = vmatprep.subr.bf16.mxu1 %v7777_v30  ;;  %v7817_v30 = vpack.c.bf16 %v5040_v31, %v5032_v55  ;;  %v5151_v31 = vld [vmem:[#allocation20 + $0xd70] sm:$0xff] }
 0xac2   : > { %7780 = vmatpush1.bf16.msra.mxu1 %v7779_v43  ;;  %v7821_v43 = vpack.c.bf16 %v5056_v11, %v5048_v2  ;;  %v7847_v2 = vpack.c.bf16 %v5151_v31, %v5143_v40  ;;  %v5159_v11 = vld [vmem:[#allocation20 + $0xdb0] sm:$0xff] }
 0xac3   : > { %7782 = vmatprep.subr.bf16.mxu1 %v7781_v4  ;;  %v5055_v4 = vld [vmem:[#allocation20 + $0xa70] sm:$0xff] }
 0xac6   : > { %7784 = vmatpush1.bf16.msra.mxu1 %v7783_v8  ;;  %v5063_v8 = vld [vmem:[#allocation20 + $0xab0] sm:$0xff] }
 0xac7   : > { %7786 = vmatprep.subr.bf16.mxu1 %v7785_v48  ;;  %v5071_v48 = vld [vmem:[#allocation20 + $0xaf0] sm:$0xff] }
 0xac8   : > { %v7827_v46 = vpack.c.bf16 %v5071_v48, %v5063_v8 }
 0xaca   : > { %7788 = vmatpush1.bf16.msra.mxu1 %v7787_v54  ;;  %v5079_v54 = vld [vmem:[#allocation20 + $0xb30] sm:$0xff] }
 0xacb   : > { %7790 = vmatprep.subr.bf16.mxu1 %v7789_v39  ;;  %v5087_v39 = vld [vmem:[#allocation20 + $0xb70] sm:$0xff] }
 0xacc   : > { %v7831_v7 = vpack.c.bf16 %v5087_v39, %v5079_v54  ;;  %v7855_v54 = vpack.c.bf16 %v5183_v37, %v5175_v36 }
 0xace   : > { %7792 = vmatpush1.bf16.msra.mxu1 %v7791_v21 }
 0xacf   : > { %7794 = vmatprep.subr.bf16.mxu1 %v7793_v10 }
 0xad2   : > { %7796 = vmatpush1.bf16.msra.mxu1 %v7795_v57  ;;  %v5103_v57 = vld [vmem:[#allocation20 + $0xbf0] sm:$0xff] }
 0xad3   : > { %7798 = vmatprep.subr.bf16.mxu1 %v7797_v38  ;;  %v7835_v60 = vpack.c.bf16 %v5103_v57, %v5095_v5  ;;  %v5215_v5 = vld [vmem:[#allocation20 + $0xf70] sm:$0xff]  ;;  %v5224_v57 = vld [vmem:[#allocation20 + $0xfb8] sm:$0xff] }
 0xad6   : > { %7800 = vmatpush1.bf16.msra.mxu1 %v7799_v44  ;;  %v5119_v44 = vld [vmem:[#allocation20 + $0xc70] sm:$0xff] }
 0xad7   : > { %7802 = vmatprep.subr.bf16.mxu1 %v7801_v32  ;;  %v7837_v32 = vpack.c.bf16 %v5120_v58, %v5112_v26  ;;  %v7839_v18 = vpack.c.bf16 %v5119_v44, %v5111_v53  ;;  %v5232_v26 = vld [vmem:[#allocation20 + $0xff8] sm:$0xff]  ;;  %v5223_v53 = vld [vmem:[#allocation20 + $0xfb0] sm:$0xff] }
 0xad8   : > { %v5231_v44 = vld [vmem:[#allocation20 + $0xff0] sm:$0xff] }
 0xada   : > { %7804 = vmatpush1.bf16.msra.mxu1 %v7803_v12  ;;  %v5136_v12 = vld [vmem:[#allocation20 + $0xcf8] sm:$0xff] }
 0xadb   : > { %7806 = vmatprep.subr.bf16.mxu1 %v7805_v51  ;;  %v8658_v51 = vmov 0.0|0.0  }
 0xadc   : > { %7869 = vmatprep.subr.bf16.mxu0 %v8658_v51 }
 0xadd   : > { %5724 = vmatmul.mubr.f32.vlgmr.msra.gmra.mrb[48].mxu1 %v9546_v25  ;;  %v7819_v25 = vpack.c.bf16 %v5039_v34, %v5031_v62  ;;  %7871 = vmatpush3.bf16.msra.mxu0 %v7870_v35  ;;  %v5160_v62 = vld [vmem:[#allocation20 + $0xdb8] sm:$0xff] }
 0xade   : > { %7808 = vmatpush1.bf16.msra.mxu1 %v7807_v16  ;;  %5794 = vmatprep.mubr.f32.mxu1 %v9556_v23  ;;  %v5047_v23 = vld [vmem:[#allocation20 + $0xa30] sm:$0xff]  ;;  %v7873_v16 = vpack.c.bf16 %v5837_v9, %v5836_v49  ;;  %v5168_v34 = vld [vmem:[#allocation20 + $0xdf8] sm:$0xff] }
 0xadf   : > { %7810 = vmatprep.subr.bf16.mxu1 %v7809_v47  ;;  %v7823_v20 = vpack.c.bf16 %v5055_v4, %v5047_v23  ;;  %v7841_v47 = vpack.c.bf16 %v5136_v12, %v5128_v19  ;;  %7872 = vmatprep.subr.bf16.mxu0 %v8658_v51  ;;  %v5167_v23 = vld [vmem:[#allocation20 + $0xdf0] sm:$0xff]  ;;  %v5842_v4 = vld [vmem:[%s9696_s13 + $0x40] sm:$0xff]  ;;  %v5845_v12 = vld [vmem:[%s9696_s13 + $0x58] sm:$0xff] }
 0xae0   : > { %v7882_v8 = vpack.c.bf16 %v5843_v61, %v5842_v4  ;;  %v5844_v19 = vld [vmem:[%s9696_s13 + $0x50] sm:$0xff] }
 0xae1   : > { %7874 = vmatpush3.bf16.msra.mxu0 %v7873_v16  ;;  %v7885_v9 = vpack.c.bf16 %v5845_v12, %v5844_v19 }
 0xae2   : > { %7812 = vmatpush1.bf16.msra.mxu1 %v7811_v17  ;;  %v5152_v17 = vld [vmem:[#allocation20 + $0xd78] sm:$0xff]  ;;  %7875 = vmatprep.subr.bf16.mxu0 %v8658_v51 }
 0xae3   : > { %7814 = vmatprep.subr.bf16.mxu1 %v7813_v56  ;;  %v7843_v56 = vpack.c.bf16 %v5135_v28, %v5127_v27  ;;  %v7845_v55 = vpack.c.bf16 %v5152_v17, %v5144_v3  ;;  %v5849_v3 = vld [vmem:[%s9696_s13 + $0x78] sm:$0xff] }
 0xae5   : > { %7877 = vmatpush3.bf16.msra.mxu0 %v7876_v15 }
 0xae6   : > { %7816 = vmatpush1.bf16.msra.mxu1 %v7815_v33  ;;  %v5840_v33 = vld [vmem:[%s9696_s13 + $0x30] sm:$0xff]  ;;  %7878 = vmatprep.subr.bf16.mxu0 %v8658_v51 }
 0xae7   : > { %7818 = vmatprep.subr.bf16.mxu1 %v7817_v30  ;;  %v5841_v30 = vld [vmem:[%s9696_s13 + $0x38] sm:$0xff] }
 0xaea   : > { %7820 = vmatpush1.bf16.msra.mxu1 %v7819_v25  ;;  %v7879_v25 = vpack.c.bf16 %v5841_v30, %v5840_v33  ;;  %v5831_v33 = vld [vmem:[#allocation23] sm:$0x1] }
 0xaeb   : > { %7822 = vmatprep.subr.bf16.mxu1 %v7821_v43  ;;  %v7849_v43 = vpack.c.bf16 %v5168_v34, %v5160_v62 }
 0xaec   : > { %7880 = vmatpush3.bf16.msra.mxu0 %v7879_v25 }
 0xaed   : > { %7881 = vmatprep.subr.bf16.mxu0 %v8658_v51 }
 0xaee   : > { %7824 = vmatpush1.bf16.msra.mxu1 %v7823_v20  ;;  %v5184_v20 = vld [vmem:[#allocation20 + $0xe78] sm:$0xff] }
 0xaef   : > { %7826 = vmatprep.subr.bf16.mxu1 %v7825_v42  ;;  %v7851_v42 = vpack.c.bf16 %v5167_v23, %v5159_v11  ;;  %v7853_v48 = vpack.c.bf16 %v5184_v20, %v5176_v14 }
 0xaf0   : > { %v5370_v63 = vpop.f32.mrb[44].mxu1  ;;  %v9569_v52 = vpop.f32.mrb[36].mxu0  ;;  %7883 = vmatpush3.bf16.msra.mxu0 %v7882_v8 }
 0xaf1   : > { %v5372_v21 = vpop.f32.mrb[45].mxu1  ;;  %v9571_v10 = vpop.f32.mrb[37].mxu0  ;;  %7884 = vmatprep.subr.bf16.mxu0 %v8658_v51  ;;  %v5814_v27 = vrot.slane %v9569_v52, 4  ;;  %v5848_v52 = vld [vmem:[%s9696_s13 + $0x70] sm:$0xff] }
 0xaf2   : > { %v5802_v6 = vrot.slane %v5372_v21, 1  ;;  %7828 = vmatpush1.bf16.msra.mxu1 %v7827_v46  ;;  %v5192_v46 = vld [vmem:[#allocation20 + $0xeb8] sm:$0xff]  ;;  %v5818_v29 = vrot.slane %v9571_v10, 5  ;;  %v7891_v17 = vpack.c.bf16 %v5849_v3, %v5848_v52 }
 0xaf3   : > { %7830 = vmatprep.subr.bf16.mxu1 %v7829_v50  ;;  %v5200_v50 = vld [vmem:[#allocation20 + $0xef8] sm:$0xff] }
 0xaf4   : > { %v9573_v38 = vadd.f32 %v5802_v6, %v5370_v63  ;;  %v7857_v39 = vpack.c.bf16 %v5200_v50, %v5192_v46  ;;  %v5191_v63 = vld [vmem:[#allocation20 + $0xeb0] sm:$0xff]  ;;  %v5216_v21 = vld [vmem:[#allocation20 + $0xf78] sm:$0xff]  ;;  %7886 = vmatpush3.bf16.msra.mxu0 %v7885_v9 }
 0xaf5   : > { %v7859_v6 = vpack.c.bf16 %v5199_v41, %v5191_v63  ;;  %7887 = vmatprep.subr.bf16.mxu0 %v8658_v51 }
 0xaf6   : > { %7832 = vmatpush1.bf16.msra.mxu1 %v7831_v7  ;;  %v7861_v7 = vpack.c.bf16 %v5216_v21, %v5208_v1 }
 0xaf7   : > { %7834 = vmatprep.subr.bf16.mxu1 %v7833_v45  ;;  %v5207_v45 = vld [vmem:[#allocation20 + $0xf30] sm:$0xff] }
 0xaf8   : > { %v7863_v58 = vpack.c.bf16 %v5215_v5, %v5207_v45 }
 0xafa   : > { %7836 = vmatpush1.bf16.msra.mxu1 %v7835_v60  ;;  %v7865_v60 = vpack.c.bf16 %v5232_v26, %v5224_v57 }
 0xafb   : > { %7838 = vmatprep.subr.bf16.mxu1 %v7837_v32  ;;  %v7867_v32 = vpack.c.bf16 %v5231_v44, %v5223_v53 }
 0xafe   : > { %7840 = vmatpush1.bf16.msra.mxu1 %v7839_v18 }
 0xaff   : > { %7842 = vmatprep.subr.bf16.mxu1 %v7841_v47  ;;  %v5847_v47 = vld [vmem:[%s9696_s13 + $0x68] sm:$0xff] }
 0xb02   : > { %7844 = vmatpush1.bf16.msra.mxu1 %v7843_v56 }
 0xb03   : > { %7846 = vmatprep.subr.bf16.mxu1 %v7845_v55  ;;  %v5829_v55 = vld [vmem:[#allocation22] sm:$0x1] }
 0xb06   : > { %7848 = vmatpush1.bf16.msra.mxu1 %v7847_v2  ;;  %v5850_v2 = vld [vmem:[#allocation25] sm:$0x1] }
 0xb07   : > { %7850 = vmatprep.subr.bf16.mxu1 %v7849_v43 }
 0xb0a   : > { %7852 = vmatpush1.bf16.msra.mxu1 %v7851_v42 }
 0xb0b   : > { %7854 = vmatprep.subr.bf16.mxu1 %v7853_v48 }
 0xb0e   : > { %7856 = vmatpush1.bf16.msra.mxu1 %v7855_v54 }
 0xb0f   : > { %7858 = vmatprep.subr.bf16.mxu1 %v7857_v39 }
 0xb12   : > { %7860 = vmatpush1.bf16.msra.mxu1 %v7859_v6 }
 0xb13   : > { %7862 = vmatprep.subr.bf16.mxu1 %v7861_v7 }
 0xb16   : > { %7864 = vmatpush1.bf16.msra.mxu1 %v7863_v58 }
 0xb17   : > { %7866 = vmatprep.subr.bf16.mxu1 %v7865_v60 }
 0xb1a   : > { %7868 = vmatpush1.bf16.msra.mxu1 %v7867_v32 }
 0xb1d   : > { %5795 = vmatmul.mubr.f32.vlgmr.msra.gmra.mrb[48].mxu1 %v9554_v13  ;;  %v5846_v13 = vld [vmem:[%s9696_s13 + $0x60] sm:$0xff] }
 0xb1e   : > { %v7888_v28 = vpack.c.bf16 %v5847_v47, %v5846_v13 }
 0xb20   : > { %7889 = vmatpush3.bf16.msra.mxu0 %v7888_v28 }
 0xb21   : > { %7890 = vmatprep.subr.bf16.mxu0 %v8658_v51 }
 0xb24   : > { %7892 = vmatpush3.bf16.msra.mxu0 %v7891_v17 }
 0xb70   : > { %v5512_v22 = vpop.f32.mrb[46].mxu1 }
 0xb71   : > { %v5806_v59 = vrot.slane %v5512_v22, 2  ;;  %v5514_v49 = vpop.f32.mrb[47].mxu1 }
 0xb72   : > { %v5810_v35 = vrot.slane %v5514_v49, 3 }
 0xb73   : > { %v5808_v18 = vadd.f32 %v5806_v59, %v9573_v38 }
 0xb75   : > { %v5812_v16 = vadd.f32 %v5810_v35, %v5808_v18 }
 0xb77   : > { %v5816_v24 = vadd.f32 %v5814_v27, %v5812_v16 }
 0xb79   : > { %v5820_v38 = vadd.f32 %v5818_v29, %v5816_v24 }
 0xbf0   : > { %v5796_v10 = vpop.f32.mrb[48].mxu1 }
 0xbf1   : > { %v5822_v56 = vrot.slane %v5796_v10, 6  ;;  %v5798_v40 = vpop.f32.mrb[49].mxu1 }
 0xbf2   : > { %v5826_v15 = vrot.slane %v5798_v40, 7 }
 0xbf3   : > { %v5824_v51 = vadd.f32 %v5822_v56, %v5820_v38 }
 0xbf5   : > { %v5828_v31 = vadd.f32 %v5826_v15, %v5824_v51 }
 0xbf7   : > { %v5830_v30 = vmul.f32 %v5829_v55, %v5828_v31 }
 0xbf9   : > { %v5832_v62 = vadd.f32 %v5831_v33, %v5830_v30 }
 0xbfb   : > { %v5833_v34 = vmax.f32 %v5832_v62, 0.0 }
 0xbfd   : > { %6319 = vmatmul.mubr.f32.vlgmr.msra.gmra.mrb[38].mxu0 %v5833_v34 }
 0xcd0   : > { %v5917_v11 = vpop.f32.mrb[38].mxu0 }
 0xcd1   : > { %v5918_v0 = vadd.f32 %v5917_v11, %v5850_v2  ;;  %v6320_v25 = vpop.f32.mrb[39].mxu0 }
 0xcd3   : > { %5922 = vst.msk [vmem:[%s657_s20] sm:$0x1] %vm5921_vm1, %v5918_v0 }
 0xcd4   : > { %8559 = shalt.err (!%p8556_p3)
}
 0xcd5   : > { %s8560_s24 = scalar_lea.hbm %s9641_s27, 16  ;;  %s8564_s17 = scalar_lea.hbm %s9755_s15, 32 }
 0xcd6   : > { %p8561_p4 = scmp.ne.s32.totalorder %s9641_s27, %s8560_s24  ;;  %p8565_p11 = scmp.lt.u32.totalorder %s9641_s27, %s9755_s15 }
 0xcd7   : > { %p8566_p13 = scmp.lt.u32.totalorder %s8564_s17, %s8560_s24  ;;  %p8568_p0 = scmp.lt.u32.totalorder %s8560_s24, %s9641_s27 }
 0xcd8   : > { %p8562_p7 = pnand %p8561_p4, %p9756_p6 }
 0xcd9   : > { %p8567_p1 = por %p8566_p13, %p8565_p11 }
 0xcda   : > { %p8563_p8 = pneg %p8562_p7 }
 0xcdb   : > { %p8569_p5 = por %p8568_p0, %p8567_p1 }
 0xcdd   : > { %p8570_p9 = pnand %p8569_p5, %p8563_p8 }
 0xcdf   : > { %8573 = shalt.err (!%p8570_p9)
}
 0xce0   : > { %8051 = dma.vmem_to_hbm [thread:$0]  (%p9756_p6), %s9643_s4, 16, %s9641_s27, %s5924_s18  }
 0xce1 PF: > { %s9757_s26 = sld [smem:[#allocation38_spill]]  ;;  %s9758_s23 = sld [smem:[#allocation35_spill]] }
 0xce2   : > { %s9759_s20 = sld [smem:[#allocation42_spill]] }
 0xce7   : > { %p8123_p12 = scmp.ge.s32.totalorder %s9757_s26, 2  ;;  %s5948_s16 = sand.u32 1, %s9758_s23  }
 0xce8   : > { %p9760_p10 = scmp.ne.s32.totalorder %s9759_s20, 0  ;;  %s5949_s25 = scalar_lea.sflag [#allocation7], %s5948_s16 }
 0xcea   : > { %p8094_p2 = pnand %p8123_p12, %p9760_p10 }
 0xcec   : > { %8619 = dma.done.wait (!%p8094_p2), %s5949_s25, 16  }
 0xced   : > { %8621 = vsyncadd (!%p8094_p2), %s5949_s25, 4294967280  ;;  %s9761_s21 = sld [smem:[#allocation39_spill]]  ;;  %s9762_s18 = sld [smem:[#allocation36_spill]] }
 0xcee   : > { %s9763_s19 = sld [smem:[#allocation37_spill]]  ;;  %s9764_s20 = sld [smem:[#allocation40_spill]] }
 0xcf3   : > { %p32_p3 = scmp.ge.s32.totalorder %s9761_s21, 4  }
 0xcf5   :  { %34 = sbr.rel (!%p32_p3) target bundleno = 16 (0x10), region = 175 }
 0xcfc   :  { %5953 = vsyncpa [#allocation6], 1 }
 0xcfd   :  { %5955 = vsyncpa [#allocation6 + $0x1], 1 }
 0xcfe   :  { %5956 = vsyncpa [#allocation9], 1 }
 0xcff   :  { %5957 = vsyncpa [#allocation12], 1 }
 0xd00   :  { %5958 = vsyncpa [#allocation15], 1 }
 0xd01   :  { %5959 = vsyncpa [#allocation18], 1 }
 0xd02   :  { %5960 = vsyncpa [#allocation21], 1 }
 0xd03   :  { %5961 = vsyncpa [#allocation24], 1 }
 0xd04   :  { %5962 = vsyncpa [#allocation7], 1 }
 0xd05   :  { %5964 = vsyncpa [#allocation7 + $0x1], 1 }

</bundles_post_ra>
